<compile_context>
chip_gen: v5e
topology: v5e:2x2
jax: 0.10.0
libtpu: 0.0.40
codegen_flags: <defaults>
</compile_context>

<pallas_src>
import numpy as np
import jax
import jax.numpy as jnp
from jax.experimental import pallas as pl
from jax.experimental.pallas import tpu as pltpu

PAD = 8                                   # max dilation in SmoothDilatedResidualBlock
DILATIONS = (1, 2, 4, 8)
# tap 0 = fused center taps of all 4 branches; taps 1..8 = (-d, +d) per branch
TAP_OFFSETS = (0, -1, 1, -2, 2, -4, 4, -8, 8)


def _lrelu(x):
    return jnp.where(x >= 0, x, 0.2 * x)


# ----------------------------------------------------------------------------
# Host-side (numpy) weight folding — runs ONCE at param-prep time.
# ----------------------------------------------------------------------------
def _banded_np(w_hwio, width, dilation):
    """(3,3,Cin,Cout) -> (3, width*Cin, width*Cout) per-row-tap banded matrices.

    M[ki][src*Cin + c, dst*Cout + o] = w[ki, kj, c, o]  iff src == dst + (kj-1)*d
    (out-of-range sources get no weight -> implicit zero width-padding).
    """
    cin, cout = w_hwio.shape[2], w_hwio.shape[3]
    m = np.zeros((3, width * cin, width * cout), np.float32)
    for ki in range(3):
        for kj in range(3):
            for dst in range(width):
                src = dst + (kj - 1) * dilation
                if 0 <= src < width:
                    m[ki, src * cin:(src + 1) * cin,
                      dst * cout:(dst + 1) * cout] += w_hwio[ki, kj]
    return m


def _block_matrices_np(p, width):
    """Fold one SmoothDilatedResidualBlock's convs into (mb, mf).

    mb: (9, W*C, 4*W*Ch) — tap t uses input rows at offset TAP_OFFSETS[t];
        each branch only occupies its own Ch-wide lane block of the output.
    mf: (3, 4*W*Ch, W*C) — final 3x3 conv over the lane-concatenated branches.
    """
    feats = p['w1'].shape[2]
    ch = feats // 2
    wch = width * ch
    banded = {d: _banded_np(p['w%d' % d], width, d) for d in DILATIONS}

    mb = np.zeros((len(TAP_OFFSETS), width * feats, 4 * wch), np.float32)
    for b, d in enumerate(DILATIONS):
        col = slice(b * wch, (b + 1) * wch)
        mb[0, :, col] = banded[d][1]              # center taps, shared LHS -> fused
        mb[1 + 2 * b, :, col] = banded[d][0]      # row offset -d
        mb[2 + 2 * b, :, col] = banded[d][2]      # row offset +d

    mf = np.concatenate(
        [_banded_np(p['wf'][:, :, b * ch:(b + 1) * ch, :], width, 1)
         for b in range(4)], axis=1)              # (3, 4*W*Ch, W*C)
    return mb, mf


def _pool_matrix_np(w_oc, width):
    """2x2 avg pool (x0.25, column half) + 1x1 conv: (W*Cin, (W/2)*Cout)."""
    cout, cin = w_oc.shape
    w2 = width // 2
    m = np.zeros((width * cin, w2 * cout), np.float32)
    for src in range(width):
        dst = src // 2
        m[src * cin:(src + 1) * cin, dst * cout:(dst + 1) * cout] += 0.25 * w_oc.T
    return m


def _row_pair_matrix_np(hout, hin):
    """(H/2, H) 0/1 matrix summing vertical row pairs (avg factor lives in pool mat)."""
    a = np.zeros((hout, hin), np.float32)
    a[np.arange(hout), 2 * np.arange(hout)] = 1.0
    a[np.arange(hout), 2 * np.arange(hout) + 1] = 1.0
    return a


def prepare_kernel_params(params, height, width):
    """Build all bf16 MXU-ready matrices once (host numpy) from raw HWIO weights."""
    h2, w2 = height // 2, width // 2
    h3, w3 = h2 // 2, w2 // 2

    def level_mats(blocks, w):
        mbs, mfs = [], []
        for b in blocks:
            nb = {k: np.asarray(v, np.float32) for k, v in b.items()}
            mb, mf = _block_matrices_np(nb, w)
            mbs.append(mb)
            mfs.append(mf)
        return (jnp.asarray(np.stack(mbs), dtype=jnp.bfloat16),
                jnp.asarray(np.stack(mfs), dtype=jnp.bfloat16))

    mb1, mf1 = level_mats(params['level1'], width)
    mb2, mf2 = level_mats(params['level2'], w2)
    mb3, mf3 = level_mats(params['level3'], w3)

    d12 = jnp.asarray(_pool_matrix_np(np.asarray(params['down12'], np.float32), width),
                      dtype=jnp.bfloat16)
    d23 = jnp.asarray(_pool_matrix_np(np.asarray(params['down23'], np.float32), w2),
                      dtype=jnp.bfloat16)
    a12 = jnp.asarray(_row_pair_matrix_np(h2, height), dtype=jnp.bfloat16)
    a23 = jnp.asarray(_row_pair_matrix_np(h3, h2), dtype=jnp.bfloat16)

    return dict(mb1=mb1, mf1=mf1, mb2=mb2, mf2=mf2, mb3=mb3, mf3=mf3,
                a12=a12, d12=d12, a23=a23, d23=d23)


# ----------------------------------------------------------------------------
# Fused Encoder kernel (grid over batch, "parallel").
# ----------------------------------------------------------------------------
def _zero_halos(xpad, ybuf, h):
    z = jnp.zeros((PAD, xpad.shape[1]), jnp.bfloat16)
    xpad[0:PAD, :] = z
    xpad[PAD + h:2 * PAD + h, :] = z
    zrow = jnp.zeros((1, ybuf.shape[1]), jnp.bfloat16)
    ybuf[0:1, :] = zrow
    ybuf[h + 1:h + 2, :] = zrow


def _res_block(x, xpad, ybuf, mb_ref, mf_ref, blk, h):
    """One SmoothDilatedResidualBlock on a lane-dense (H, W*C) f32 image."""
    xb = x.astype(jnp.bfloat16)
    xpad[PAD:PAD + h, :] = xb

    # 9 row-shifted full-width matmuls (tap 0 = fused center taps of 4 branches)
    acc = jnp.dot(xb, mb_ref[blk, 0], preferred_element_type=jnp.float32)
    for t in range(1, len(TAP_OFFSETS)):
        off = TAP_OFFSETS[t]
        acc = acc + jnp.dot(xpad[PAD + off:PAD + off + h, :], mb_ref[blk, t],
                            preferred_element_type=jnp.float32)
    ybuf[1:1 + h, :] = _lrelu(acc).astype(jnp.bfloat16)   # lane-concatenated branches

    # final 3x3 conv over the concatenated branches + residual
    out = x
    for ki in range(3):
        out = out + jnp.dot(ybuf[ki:ki + h, :], mf_ref[blk, ki],
                            preferred_element_type=jnp.float32)
    return _lrelu(out)


def _encoder_kernel(x_ref,
                    mb1_ref, mf1_ref, mb2_ref, mf2_ref, mb3_ref, mf3_ref,
                    a12_ref, d12_ref, a23_ref, d23_ref,
                    enc1_ref, enc2_ref, enc3_ref,
                    xpad1, ybuf1, xpad2, ybuf2, xpad3, ybuf3):
    h1 = enc1_ref.shape[0]
    h2 = enc2_ref.shape[0]
    h3 = enc3_ref.shape[0]

    # zero halo rows once per grid step (interior rows are overwritten per block)
    _zero_halos(xpad1, ybuf1, h1)
    _zero_halos(xpad2, ybuf2, h2)
    _zero_halos(xpad3, ybuf3, h3)

    # ---------- level 1
    h = x_ref[...]
    for blk in range(2):
        h = _res_block(h, xpad1, ybuf1, mb1_ref, mf1_ref, blk, h1)
    enc1_ref[...] = h

    # ---------- DownSample 1->2: row-pair sum (tiny matmul) + folded pool/1x1 conv
    pooled = jnp.dot(a12_ref[...], h.astype(jnp.bfloat16),
                     preferred_element_type=jnp.float32)
    h = jnp.dot(pooled.astype(jnp.bfloat16), d12_ref[...],
                preferred_element_type=jnp.float32)

    # ---------- level 2
    for blk in range(2):
        h = _res_block(h, xpad2, ybuf2, mb2_ref, mf2_ref, blk, h2)
    enc2_ref[...] = h

    # ---------- DownSample 2->3
    pooled = jnp.dot(a23_ref[...], h.astype(jnp.bfloat16),
                     preferred_element_type=jnp.float32)
    h = jnp.dot(pooled.astype(jnp.bfloat16), d23_ref[...],
                preferred_element_type=jnp.float32)

    # ---------- level 3
    for blk in range(2):
        h = _res_block(h, xpad3, ybuf3, mb3_ref, mf3_ref, blk, h3)
    enc3_ref[...] = h


def encoder_forward(x_nchw, kparams):
    """x_nchw: (N, f1, H, W) -> [enc1 NCHW, enc2 NCHW, enc3 NCHW]."""
    N, f1, H, W = x_nchw.shape
    H2, W2, H3, W3 = H // 2, W // 2, H // 4, W // 4
    f2 = kparams['d12'].shape[1] // W2
    f3 = kparams['d23'].shape[1] // W3

    # lane-dense layout: (N, H, W*C)
    x = jnp.transpose(x_nchw.astype(jnp.float32), (0, 2, 3, 1)).reshape(N, H, W * f1)

    enc1, enc2, enc3 = pl.pallas_call(
        _encoder_kernel,
        out_shape=(
            jax.ShapeDtypeStruct((N, H, W * f1), jnp.float32),
            jax.ShapeDtypeStruct((N, H2, W2 * f2), jnp.float32),
            jax.ShapeDtypeStruct((N, H3, W3 * f3), jnp.float32),
        ),
        grid=(N,),
        in_specs=[
            pl.BlockSpec((None, H, W * f1), lambda n: (n, 0, 0)),
            pl.BlockSpec(kparams['mb1'].shape, lambda n: (0, 0, 0, 0)),
            pl.BlockSpec(kparams['mf1'].shape, lambda n: (0, 0, 0, 0)),
            pl.BlockSpec(kparams['mb2'].shape, lambda n: (0, 0, 0, 0)),
            pl.BlockSpec(kparams['mf2'].shape, lambda n: (0, 0, 0, 0)),
            pl.BlockSpec(kparams['mb3'].shape, lambda n: (0, 0, 0, 0)),
            pl.BlockSpec(kparams['mf3'].shape, lambda n: (0, 0, 0, 0)),
            pl.BlockSpec(kparams['a12'].shape, lambda n: (0, 0)),
            pl.BlockSpec(kparams['d12'].shape, lambda n: (0, 0)),
            pl.BlockSpec(kparams['a23'].shape, lambda n: (0, 0)),
            pl.BlockSpec(kparams['d23'].shape, lambda n: (0, 0)),
        ],
        out_specs=(
            pl.BlockSpec((None, H, W * f1), lambda n: (n, 0, 0)),
            pl.BlockSpec((None, H2, W2 * f2), lambda n: (n, 0, 0)),
            pl.BlockSpec((None, H3, W3 * f3), lambda n: (n, 0, 0)),
        ),
        scratch_shapes=[
            pltpu.VMEM((H + 2 * PAD, W * f1), jnp.bfloat16),          # xpad level 1
            pltpu.VMEM((H + 2, 4 * W * (f1 // 2)), jnp.bfloat16),     # ybuf level 1
            pltpu.VMEM((H2 + 2 * PAD, W2 * f2), jnp.bfloat16),        # xpad level 2
            pltpu.VMEM((H2 + 2, 4 * W2 * (f2 // 2)), jnp.bfloat16),   # ybuf level 2
            pltpu.VMEM((H3 + 2 * PAD, W3 * f3), jnp.bfloat16),        # xpad level 3
            pltpu.VMEM((H3 + 2, 4 * W3 * (f3 // 2)), jnp.bfloat16),   # ybuf level 3
        ],
        compiler_params=pltpu.CompilerParams(dimension_semantics=("parallel",)),
    )(x, kparams['mb1'], kparams['mf1'], kparams['mb2'], kparams['mf2'],
      kparams['mb3'], kparams['mf3'],
      kparams['a12'], kparams['d12'], kparams['a23'], kparams['d23'])

    def from_flat(t, h, w, c):
        return jnp.transpose(t.reshape(-1, h, w, c), (0, 3, 1, 2))

    return [from_flat(enc1, H, W, f1),
            from_flat(enc2, H2, W2, f2),
            from_flat(enc3, H3, W3, f3)]


encoder_forward = jax.jit(encoder_forward)


# ----------------------------------------------------------------------------
# Parameter init (deterministic, synthetic) — raw HWIO weights for the reference.
# ----------------------------------------------------------------------------
def init_encoder_params(key, n_feat, scale_unetfeats):
    def wn_conv(k, cout, cin):
        # weight_norm'd 3x3 conv: effective w = g * v / ||v||  (norm per out-channel)
        k1, k2 = jax.random.split(k)
        v = jax.random.normal(k1, (cout, cin, 3, 3), jnp.float32) * 0.1
        g = jax.random.uniform(k2, (cout,), jnp.float32, minval=0.5, maxval=1.5)
        norm = jnp.sqrt(jnp.sum(v * v, axis=(1, 2, 3), keepdims=True))
        w = v / norm * g[:, None, None, None]
        return jnp.transpose(w, (2, 3, 1, 0))          # OIHW -> HWIO

    def plain_conv(k, cout, cin):
        v = jax.random.normal(k, (cout, cin, 3, 3), jnp.float32) * 0.05
        return jnp.transpose(v, (2, 3, 1, 0))          # OIHW -> HWIO

    def block_params(k, feats):
        ks = jax.random.split(k, 5)
        half = feats // 2
        return dict(
            w1=wn_conv(ks[0], half, feats), w2=wn_conv(ks[1], half, feats),
            w4=wn_conv(ks[2], half, feats), w8=wn_conv(ks[3], half, feats),
            wf=plain_conv(ks[4], feats, 2 * feats))

    keys = jax.random.split(key, 8)
    f1 = n_feat
    f2 = n_feat + scale_unetfeats
    f3 = n_feat + 2 * scale_unetfeats
    return dict(
        level1=[block_params(keys[0], f1), block_params(keys[1], f1)],
        level2=[block_params(keys[2], f2), block_params(keys[3], f2)],
        level3=[block_params(keys[4], f3), block_params(keys[5], f3)],
        down12=jax.random.normal(keys[6], (f2, f1), jnp.float32) * 0.1,
        down23=jax.random.normal(keys[7], (f3, f2), jnp.float32) * 0.1,
    )


# ----------------------------------------------------------------------------
# Pure-JAX reference (no Pallas) for numerical validation.
# ----------------------------------------------------------------------------
def _conv_ref(x_nhwc, w_hwio, d):
    return jax.lax.conv_general_dilated(
        x_nhwc, w_hwio, window_strides=(1, 1), padding=((d, d), (d, d)),
        rhs_dilation=(d, d), dimension_numbers=('NHWC', 'HWIO', 'NHWC'),
        precision=jax.lax.Precision.HIGHEST)


def _residual_block_ref(x, p):
    ys = [_lrelu(_conv_ref(x, p[k], d))
          for k, d in (('w1', 1), ('w2', 2), ('w4', 4), ('w8', 8))]
    y = jnp.concatenate(ys, axis=-1)
    y = _conv_ref(y, p['wf'], 1) + x
    return _lrelu(y)


def _downsample_ref(x, w_oc):
    n, h, w, c = x.shape
    pooled = x.reshape(n, h // 2, 2, w // 2, 2, c).mean(axis=(2, 4))
    return jnp.einsum('nhwc,oc->nhwo', pooled, w_oc,
                      precision=jax.lax.Precision.HIGHEST)


def encoder_forward_ref(x_nchw, params):
    x = jnp.transpose(x_nchw, (0, 2, 3, 1)).astype(jnp.float32)
    h = x
    for p in params['level1']:
        h = _residual_block_ref(h, p)
    enc1 = h
    h = _downsample_ref(enc1, params['down12'])
    for p in params['level2']:
        h = _residual_block_ref(h, p)
    enc2 = h
    h = _downsample_ref(enc2, params['down23'])
    for p in params['level3']:
        h = _residual_block_ref(h, p)
    enc3 = h
    return [jnp.transpose(e, (0, 3, 1, 2)) for e in (enc1, enc2, enc3)]


if __name__ == "__main__":
    n_feat, scale_unetfeats = 8, 4
    N, H, W = 2, 16, 16

    key = jax.random.PRNGKey(0)
    k_x, k_p = jax.random.split(key)
    x = jax.random.normal(k_x, (N, n_feat, H, W), jnp.float32)      # NCHW input
    params = init_encoder_params(k_p, n_feat, scale_unetfeats)      # raw conv weights
    kparams = prepare_kernel_params(params, H, W)                   # folded once, host-side

    outs = jax.block_until_ready(encoder_forward(x, kparams))

    expected = [
        (N, n_feat, H, W),
        (N, n_feat + scale_unetfeats, H // 2, W // 2),
        (N, n_feat + 2 * scale_unetfeats, H // 4, W // 4),
    ]
    assert [tuple(o.shape) for o in outs] == expected
    assert all(bool(jnp.all(jnp.isfinite(o))) for o in outs)

    # Numerical check against a pure-JAX f32 reference of the same math
    # (bf16 MXU inputs with f32 accumulation stay well inside this tolerance).
    refs = jax.block_until_ready(encoder_forward_ref(x, params))
    for o, r in zip(outs, refs):
        err = float(jnp.max(jnp.abs(o - r)))
        scale = float(jnp.max(jnp.abs(r)))
        assert err <= 5e-2 * (1.0 + scale), (err, scale)

    print("KERNEL_OK")
</pallas_src>

<mosaic_0001>
module attributes {stable_mosaic.version = 11 : i64} {
  func.func @_encoder_kernel(%arg0: i32, %arg1: memref<1x16x128xf32, #tpu.memory_space<vmem>>, %arg2: memref<2x9x128x256xbf16, #tpu.memory_space<vmem>>, %arg3: memref<2x3x256x128xbf16, #tpu.memory_space<vmem>>, %arg4: memref<2x9x96x192xbf16, #tpu.memory_space<vmem>>, %arg5: memref<2x3x192x96xbf16, #tpu.memory_space<vmem>>, %arg6: memref<2x9x64x128xbf16, #tpu.memory_space<vmem>>, %arg7: memref<2x3x128x64xbf16, #tpu.memory_space<vmem>>, %arg8: memref<8x16xbf16, #tpu.memory_space<vmem>>, %arg9: memref<128x96xbf16, #tpu.memory_space<vmem>>, %arg10: memref<4x8xbf16, #tpu.memory_space<vmem>>, %arg11: memref<96x64xbf16, #tpu.memory_space<vmem>>, %arg12: memref<1x16x128xf32, #tpu.memory_space<vmem>>, %arg13: memref<1x8x96xf32, #tpu.memory_space<vmem>>, %arg14: memref<1x4x64xf32, #tpu.memory_space<vmem>>, %arg15: memref<32x128xbf16, #tpu.memory_space<vmem>>, %arg16: memref<18x256xbf16, #tpu.memory_space<vmem>>, %arg17: memref<24x96xbf16, #tpu.memory_space<vmem>>, %arg18: memref<10x192xbf16, #tpu.memory_space<vmem>>, %arg19: memref<20x64xbf16, #tpu.memory_space<vmem>>, %arg20: memref<6x128xbf16, #tpu.memory_space<vmem>>) attributes {dimension_semantics = [#tpu.dimension_semantics<parallel>], iteration_bounds = array<i64: 2>, scalar_prefetch = 0 : i64, scratch_operands = 6 : i64, tpu.core_type = #tpu.core_type<tc>, window_params = [{transform_indices = @transform_0, window_bounds = array<i64: 1, 16, 128>}, {pipeline_mode = #tpu.pipeline_mode<synchronous>, transform_indices = @transform_1, window_bounds = array<i64: 2, 9, 128, 256>}, {pipeline_mode = #tpu.pipeline_mode<synchronous>, transform_indices = @transform_2, window_bounds = array<i64: 2, 3, 256, 128>}, {pipeline_mode = #tpu.pipeline_mode<synchronous>, transform_indices = @transform_3, window_bounds = array<i64: 2, 9, 96, 192>}, {pipeline_mode = #tpu.pipeline_mode<synchronous>, transform_indices = @transform_4, window_bounds = array<i64: 2, 3, 192, 96>}, {pipeline_mode = #tpu.pipeline_mode<synchronous>, transform_indices = @transform_5, window_bounds = array<i64: 2, 9, 64, 128>}, {pipeline_mode = #tpu.pipeline_mode<synchronous>, transform_indices = @transform_6, window_bounds = array<i64: 2, 3, 128, 64>}, {pipeline_mode = #tpu.pipeline_mode<synchronous>, transform_indices = @transform_7, window_bounds = array<i64: 8, 16>}, {pipeline_mode = #tpu.pipeline_mode<synchronous>, transform_indices = @transform_8, window_bounds = array<i64: 128, 96>}, {pipeline_mode = #tpu.pipeline_mode<synchronous>, transform_indices = @transform_9, window_bounds = array<i64: 4, 8>}, {pipeline_mode = #tpu.pipeline_mode<synchronous>, transform_indices = @transform_10, window_bounds = array<i64: 96, 64>}, {transform_indices = @transform_11, window_bounds = array<i64: 1, 16, 128>}, {transform_indices = @transform_12, window_bounds = array<i64: 1, 8, 96>}, {transform_indices = @transform_13, window_bounds = array<i64: 1, 4, 64>}]} {
    %cst = arith.constant 0.000000e+00 : bf16
    %0 = vector.broadcast %cst : bf16 to vector<8x128xbf16>
    %c0 = arith.constant 0 : index
    %c0_0 = arith.constant 0 : index
    %1 = vector.load %arg15[%c0, %c0_0] : memref<32x128xbf16, #tpu.memory_space<vmem>>, vector<8x128xbf16>
    tpu.vector_store %arg15[%c0, %c0_0], %0 {strides = array<i32>} : memref<32x128xbf16, #tpu.memory_space<vmem>>, vector<8x128xbf16>,
    %c24 = arith.constant 24 : index
    %c0_1 = arith.constant 0 : index
    %2 = vector.load %arg15[%c24, %c0_1] : memref<32x128xbf16, #tpu.memory_space<vmem>>, vector<8x128xbf16>
    tpu.vector_store %arg15[%c24, %c0_1], %0 {strides = array<i32>} : memref<32x128xbf16, #tpu.memory_space<vmem>>, vector<8x128xbf16>,
    %cst_2 = arith.constant 0.000000e+00 : bf16
    %3 = vector.broadcast %cst_2 : bf16 to vector<1x256xbf16>
    %c0_3 = arith.constant 0 : index
    %c0_4 = arith.constant 0 : index
    %4 = vector.load %arg16[%c0_3, %c0_4] : memref<18x256xbf16, #tpu.memory_space<vmem>>, vector<1x256xbf16>
    tpu.vector_store %arg16[%c0_3, %c0_4], %3 {strides = array<i32>} : memref<18x256xbf16, #tpu.memory_space<vmem>>, vector<1x256xbf16>,
    %c17 = arith.constant 17 : index
    %c0_5 = arith.constant 0 : index
    %5 = vector.load %arg16[%c17, %c0_5] : memref<18x256xbf16, #tpu.memory_space<vmem>>, vector<1x256xbf16>
    tpu.vector_store %arg16[%c17, %c0_5], %3 {strides = array<i32>} : memref<18x256xbf16, #tpu.memory_space<vmem>>, vector<1x256xbf16>,
    %cst_6 = arith.constant 0.000000e+00 : bf16
    %6 = vector.broadcast %cst_6 : bf16 to vector<8x96xbf16>
    %c0_7 = arith.constant 0 : index
    %c0_8 = arith.constant 0 : index
    %7 = vector.load %arg17[%c0_7, %c0_8] : memref<24x96xbf16, #tpu.memory_space<vmem>>, vector<8x96xbf16>
    tpu.vector_store %arg17[%c0_7, %c0_8], %6 {strides = array<i32>} : memref<24x96xbf16, #tpu.memory_space<vmem>>, vector<8x96xbf16>,
    %c16 = arith.constant 16 : index
    %c0_9 = arith.constant 0 : index
    %8 = vector.load %arg17[%c16, %c0_9] : memref<24x96xbf16, #tpu.memory_space<vmem>>, vector<8x96xbf16>
    tpu.vector_store %arg17[%c16, %c0_9], %6 {strides = array<i32>} : memref<24x96xbf16, #tpu.memory_space<vmem>>, vector<8x96xbf16>,
    %cst_10 = arith.constant 0.000000e+00 : bf16
    %9 = vector.broadcast %cst_10 : bf16 to vector<1x192xbf16>
    %c0_11 = arith.constant 0 : index
    %c0_12 = arith.constant 0 : index
    %10 = vector.load %arg18[%c0_11, %c0_12] : memref<10x192xbf16, #tpu.memory_space<vmem>>, vector<1x192xbf16>
    tpu.vector_store %arg18[%c0_11, %c0_12], %9 {strides = array<i32>} : memref<10x192xbf16, #tpu.memory_space<vmem>>, vector<1x192xbf16>,
    %c9 = arith.constant 9 : index
    %c0_13 = arith.constant 0 : index
    %11 = vector.load %arg18[%c9, %c0_13] : memref<10x192xbf16, #tpu.memory_space<vmem>>, vector<1x192xbf16>
    tpu.vector_store %arg18[%c9, %c0_13], %9 {strides = array<i32>} : memref<10x192xbf16, #tpu.memory_space<vmem>>, vector<1x192xbf16>,
    %cst_14 = arith.constant 0.000000e+00 : bf16
    %12 = vector.broadcast %cst_14 : bf16 to vector<8x64xbf16>
    %c0_15 = arith.constant 0 : index
    %c0_16 = arith.constant 0 : index
    %13 = vector.load %arg19[%c0_15, %c0_16] : memref<20x64xbf16, #tpu.memory_space<vmem>>, vector<8x64xbf16>
    tpu.vector_store %arg19[%c0_15, %c0_16], %12 {strides = array<i32>} : memref<20x64xbf16, #tpu.memory_space<vmem>>, vector<8x64xbf16>,
    %c12 = arith.constant 12 : index
    %c0_17 = arith.constant 0 : index
    %14 = vector.load %arg19[%c12, %c0_17] : memref<20x64xbf16, #tpu.memory_space<vmem>>, vector<8x64xbf16>
    tpu.vector_store %arg19[%c12, %c0_17], %12 {strides = array<i32>} : memref<20x64xbf16, #tpu.memory_space<vmem>>, vector<8x64xbf16>,
    %cst_18 = arith.constant 0.000000e+00 : bf16
    %15 = vector.broadcast %cst_18 : bf16 to vector<1x128xbf16>
    %c0_19 = arith.constant 0 : index
    %c0_20 = arith.constant 0 : index
    %16 = vector.load %arg20[%c0_19, %c0_20] : memref<6x128xbf16, #tpu.memory_space<vmem>>, vector<1x128xbf16>
    tpu.vector_store %arg20[%c0_19, %c0_20], %15 {strides = array<i32>} : memref<6x128xbf16, #tpu.memory_space<vmem>>, vector<1x128xbf16>,
    %c5 = arith.constant 5 : index
    %c0_21 = arith.constant 0 : index
    %17 = vector.load %arg20[%c5, %c0_21] : memref<6x128xbf16, #tpu.memory_space<vmem>>, vector<1x128xbf16>
    tpu.vector_store %arg20[%c5, %c0_21], %15 {strides = array<i32>} : memref<6x128xbf16, #tpu.memory_space<vmem>>, vector<1x128xbf16>,
    %c0_22 = arith.constant 0 : index
    %c0_23 = arith.constant 0 : index
    %c0_24 = arith.constant 0 : index
    %18 = vector.load %arg1[%c0_22, %c0_23, %c0_24] : memref<1x16x128xf32, #tpu.memory_space<vmem>>, vector<1x16x128xf32>
    %19 = vector.shape_cast %18 : vector<1x16x128xf32> to vector<16x128xf32>
    %20 = arith.truncf %19 : vector<16x128xf32> to vector<16x128xbf16>
    %c8 = arith.constant 8 : index
    %c0_25 = arith.constant 0 : index
    %21 = vector.load %arg15[%c8, %c0_25] : memref<32x128xbf16, #tpu.memory_space<vmem>>, vector<16x128xbf16>
    tpu.vector_store %arg15[%c8, %c0_25], %20 {strides = array<i32>} : memref<32x128xbf16, #tpu.memory_space<vmem>>, vector<16x128xbf16>,
    %c0_26 = arith.constant 0 : index
    %c0_27 = arith.constant 0 : index
    %c0_28 = arith.constant 0 : index
    %c0_29 = arith.constant 0 : index
    %22 = vector.load %arg2[%c0_26, %c0_27, %c0_28, %c0_29] : memref<2x9x128x256xbf16, #tpu.memory_space<vmem>>, vector<1x1x128x256xbf16>
    %23 = vector.shape_cast %22 : vector<1x1x128x256xbf16> to vector<128x256xbf16>
    %cst_30 = arith.constant dense<0.000000e+00> : vector<16x256xf32>
    %24 = tpu.matmul %20, %23, %cst_30 {dimension_numbers = #tpu.dot_dimension_numbers<[1], [0], [0], [1], [0, 0, 1, 1], [], []>} : vector<16x128xbf16>, vector<128x256xbf16>, vector<16x256xf32> -> vector<16x256xf32>
    %c7 = arith.constant 7 : index
    %c0_31 = arith.constant 0 : index
    %25 = vector.load %arg15[%c7, %c0_31] : memref<32x128xbf16, #tpu.memory_space<vmem>>, vector<16x128xbf16>
    %c0_32 = arith.constant 0 : index
    %c1 = arith.constant 1 : index
    %c0_33 = arith.constant 0 : index
    %c0_34 = arith.constant 0 : index
    %26 = vector.load %arg2[%c0_32, %c1, %c0_33, %c0_34] : memref<2x9x128x256xbf16, #tpu.memory_space<vmem>>, vector<1x1x128x256xbf16>
    %27 = vector.shape_cast %26 : vector<1x1x128x256xbf16> to vector<128x256xbf16>
    %cst_35 = arith.constant dense<0.000000e+00> : vector<16x256xf32>
    %28 = tpu.matmul %25, %27, %cst_35 {dimension_numbers = #tpu.dot_dimension_numbers<[1], [0], [0], [1], [0, 0, 1, 1], [], []>} : vector<16x128xbf16>, vector<128x256xbf16>, vector<16x256xf32> -> vector<16x256xf32>
    %29 = arith.addf %24, %28 : vector<16x256xf32>
    %c9_36 = arith.constant 9 : index
    %c0_37 = arith.constant 0 : index
    %30 = vector.load %arg15[%c9_36, %c0_37] : memref<32x128xbf16, #tpu.memory_space<vmem>>, vector<16x128xbf16>
    %c0_38 = arith.constant 0 : index
    %c2 = arith.constant 2 : index
    %c0_39 = arith.constant 0 : index
    %c0_40 = arith.constant 0 : index
    %31 = vector.load %arg2[%c0_38, %c2, %c0_39, %c0_40] : memref<2x9x128x256xbf16, #tpu.memory_space<vmem>>, vector<1x1x128x256xbf16>
    %32 = vector.shape_cast %31 : vector<1x1x128x256xbf16> to vector<128x256xbf16>
    %cst_41 = arith.constant dense<0.000000e+00> : vector<16x256xf32>
    %33 = tpu.matmul %30, %32, %cst_41 {dimension_numbers = #tpu.dot_dimension_numbers<[1], [0], [0], [1], [0, 0, 1, 1], [], []>} : vector<16x128xbf16>, vector<128x256xbf16>, vector<16x256xf32> -> vector<16x256xf32>
    %34 = arith.addf %29, %33 : vector<16x256xf32>
    %c6 = arith.constant 6 : index
    %c0_42 = arith.constant 0 : index
    %35 = vector.load %arg15[%c6, %c0_42] : memref<32x128xbf16, #tpu.memory_space<vmem>>, vector<16x128xbf16>
    %c0_43 = arith.constant 0 : index
    %c3 = arith.constant 3 : index
    %c0_44 = arith.constant 0 : index
    %c0_45 = arith.constant 0 : index
    %36 = vector.load %arg2[%c0_43, %c3, %c0_44, %c0_45] : memref<2x9x128x256xbf16, #tpu.memory_space<vmem>>, vector<1x1x128x256xbf16>
    %37 = vector.shape_cast %36 : vector<1x1x128x256xbf16> to vector<128x256xbf16>
    %cst_46 = arith.constant dense<0.000000e+00> : vector<16x256xf32>
    %38 = tpu.matmul %35, %37, %cst_46 {dimension_numbers = #tpu.dot_dimension_numbers<[1], [0], [0], [1], [0, 0, 1, 1], [], []>} : vector<16x128xbf16>, vector<128x256xbf16>, vector<16x256xf32> -> vector<16x256xf32>
    %39 = arith.addf %34, %38 : vector<16x256xf32>
    %c10 = arith.constant 10 : index
    %c0_47 = arith.constant 0 : index
    %40 = vector.load %arg15[%c10, %c0_47] : memref<32x128xbf16, #tpu.memory_space<vmem>>, vector<16x128xbf16>
    %c0_48 = arith.constant 0 : index
    %c4 = arith.constant 4 : index
    %c0_49 = arith.constant 0 : index
    %c0_50 = arith.constant 0 : index
    %41 = vector.load %arg2[%c0_48, %c4, %c0_49, %c0_50] : memref<2x9x128x256xbf16, #tpu.memory_space<vmem>>, vector<1x1x128x256xbf16>
    %42 = vector.shape_cast %41 : vector<1x1x128x256xbf16> to vector<128x256xbf16>
    %cst_51 = arith.constant dense<0.000000e+00> : vector<16x256xf32>
    %43 = tpu.matmul %40, %42, %cst_51 {dimension_numbers = #tpu.dot_dimension_numbers<[1], [0], [0], [1], [0, 0, 1, 1], [], []>} : vector<16x128xbf16>, vector<128x256xbf16>, vector<16x256xf32> -> vector<16x256xf32>
    %44 = arith.addf %39, %43 : vector<16x256xf32>
    %c4_52 = arith.constant 4 : index
    %c0_53 = arith.constant 0 : index
    %45 = vector.load %arg15[%c4_52, %c0_53] : memref<32x128xbf16, #tpu.memory_space<vmem>>, vector<16x128xbf16>
    %c0_54 = arith.constant 0 : index
    %c5_55 = arith.constant 5 : index
    %c0_56 = arith.constant 0 : index
    %c0_57 = arith.constant 0 : index
    %46 = vector.load %arg2[%c0_54, %c5_55, %c0_56, %c0_57] : memref<2x9x128x256xbf16, #tpu.memory_space<vmem>>, vector<1x1x128x256xbf16>
    %47 = vector.shape_cast %46 : vector<1x1x128x256xbf16> to vector<128x256xbf16>
    %cst_58 = arith.constant dense<0.000000e+00> : vector<16x256xf32>
    %48 = tpu.matmul %45, %47, %cst_58 {dimension_numbers = #tpu.dot_dimension_numbers<[1], [0], [0], [1], [0, 0, 1, 1], [], []>} : vector<16x128xbf16>, vector<128x256xbf16>, vector<16x256xf32> -> vector<16x256xf32>
    %49 = arith.addf %44, %48 : vector<16x256xf32>
    %c12_59 = arith.constant 12 : index
    %c0_60 = arith.constant 0 : index
    %50 = vector.load %arg15[%c12_59, %c0_60] : memref<32x128xbf16, #tpu.memory_space<vmem>>, vector<16x128xbf16>
    %c0_61 = arith.constant 0 : index
    %c6_62 = arith.constant 6 : index
    %c0_63 = arith.constant 0 : index
    %c0_64 = arith.constant 0 : index
    %51 = vector.load %arg2[%c0_61, %c6_62, %c0_63, %c0_64] : memref<2x9x128x256xbf16, #tpu.memory_space<vmem>>, vector<1x1x128x256xbf16>
    %52 = vector.shape_cast %51 : vector<1x1x128x256xbf16> to vector<128x256xbf16>
    %cst_65 = arith.constant dense<0.000000e+00> : vector<16x256xf32>
    %53 = tpu.matmul %50, %52, %cst_65 {dimension_numbers = #tpu.dot_dimension_numbers<[1], [0], [0], [1], [0, 0, 1, 1], [], []>} : vector<16x128xbf16>, vector<128x256xbf16>, vector<16x256xf32> -> vector<16x256xf32>
    %54 = arith.addf %49, %53 : vector<16x256xf32>
    %c0_66 = arith.constant 0 : index
    %c0_67 = arith.constant 0 : index
    %55 = vector.load %arg15[%c0_66, %c0_67] : memref<32x128xbf16, #tpu.memory_space<vmem>>, vector<16x128xbf16>
    %c0_68 = arith.constant 0 : index
    %c7_69 = arith.constant 7 : index
    %c0_70 = arith.constant 0 : index
    %c0_71 = arith.constant 0 : index
    %56 = vector.load %arg2[%c0_68, %c7_69, %c0_70, %c0_71] : memref<2x9x128x256xbf16, #tpu.memory_space<vmem>>, vector<1x1x128x256xbf16>
    %57 = vector.shape_cast %56 : vector<1x1x128x256xbf16> to vector<128x256xbf16>
    %cst_72 = arith.constant dense<0.000000e+00> : vector<16x256xf32>
    %58 = tpu.matmul %55, %57, %cst_72 {dimension_numbers = #tpu.dot_dimension_numbers<[1], [0], [0], [1], [0, 0, 1, 1], [], []>} : vector<16x128xbf16>, vector<128x256xbf16>, vector<16x256xf32> -> vector<16x256xf32>
    %59 = arith.addf %54, %58 : vector<16x256xf32>
    %c16_73 = arith.constant 16 : index
    %c0_74 = arith.constant 0 : index
    %60 = vector.load %arg15[%c16_73, %c0_74] : memref<32x128xbf16, #tpu.memory_space<vmem>>, vector<16x128xbf16>
    %c0_75 = arith.constant 0 : index
    %c8_76 = arith.constant 8 : index
    %c0_77 = arith.constant 0 : index
    %c0_78 = arith.constant 0 : index
    %61 = vector.load %arg2[%c0_75, %c8_76, %c0_77, %c0_78] : memref<2x9x128x256xbf16, #tpu.memory_space<vmem>>, vector<1x1x128x256xbf16>
    %62 = vector.shape_cast %61 : vector<1x1x128x256xbf16> to vector<128x256xbf16>
    %cst_79 = arith.constant dense<0.000000e+00> : vector<16x256xf32>
    %63 = tpu.matmul %60, %62, %cst_79 {dimension_numbers = #tpu.dot_dimension_numbers<[1], [0], [0], [1], [0, 0, 1, 1], [], []>} : vector<16x128xbf16>, vector<128x256xbf16>, vector<16x256xf32> -> vector<16x256xf32>
    %64 = arith.addf %59, %63 : vector<16x256xf32>
    %cst_80 = arith.constant 0.000000e+00 : f32
    %65 = vector.broadcast %cst_80 : f32 to vector<16x256xf32>
    %66 = arith.cmpf oge, %64, %65 : vector<16x256xf32>
    %cst_81 = arith.constant 2.000000e-01 : f32
    %67 = vector.broadcast %cst_81 : f32 to vector<16x256xf32>
    %68 = arith.mulf %67, %64 : vector<16x256xf32>
    %69 = arith.select %66, %64, %68 : vector<16x256xi1>, vector<16x256xf32>
    %70 = arith.truncf %69 : vector<16x256xf32> to vector<16x256xbf16>
    %c1_82 = arith.constant 1 : index
    %c0_83 = arith.constant 0 : index
    %71 = vector.load %arg16[%c1_82, %c0_83] : memref<18x256xbf16, #tpu.memory_space<vmem>>, vector<16x256xbf16>
    tpu.vector_store %arg16[%c1_82, %c0_83], %70 {strides = array<i32>} : memref<18x256xbf16, #tpu.memory_space<vmem>>, vector<16x256xbf16>,
    %c0_84 = arith.constant 0 : index
    %c0_85 = arith.constant 0 : index
    %72 = vector.load %arg16[%c0_84, %c0_85] : memref<18x256xbf16, #tpu.memory_space<vmem>>, vector<16x256xbf16>
    %c0_86 = arith.constant 0 : index
    %c0_87 = arith.constant 0 : index
    %c0_88 = arith.constant 0 : index
    %c0_89 = arith.constant 0 : index
    %73 = vector.load %arg3[%c0_86, %c0_87, %c0_88, %c0_89] : memref<2x3x256x128xbf16, #tpu.memory_space<vmem>>, vector<1x1x256x128xbf16>
    %74 = vector.shape_cast %73 : vector<1x1x256x128xbf16> to vector<256x128xbf16>
    %cst_90 = arith.constant dense<0.000000e+00> : vector<16x128xf32>
    %75 = tpu.matmul %72, %74, %cst_90 {dimension_numbers = #tpu.dot_dimension_numbers<[1], [0], [0], [1], [0, 0, 1, 1], [], []>} : vector<16x256xbf16>, vector<256x128xbf16>, vector<16x128xf32> -> vector<16x128xf32>
    %76 = arith.addf %19, %75 : vector<16x128xf32>
    %c1_91 = arith.constant 1 : index
    %c0_92 = arith.constant 0 : index
    %77 = vector.load %arg16[%c1_91, %c0_92] : memref<18x256xbf16, #tpu.memory_space<vmem>>, vector<16x256xbf16>
    %c0_93 = arith.constant 0 : index
    %c1_94 = arith.constant 1 : index
    %c0_95 = arith.constant 0 : index
    %c0_96 = arith.constant 0 : index
    %78 = vector.load %arg3[%c0_93, %c1_94, %c0_95, %c0_96] : memref<2x3x256x128xbf16, #tpu.memory_space<vmem>>, vector<1x1x256x128xbf16>
    %79 = vector.shape_cast %78 : vector<1x1x256x128xbf16> to vector<256x128xbf16>
    %cst_97 = arith.constant dense<0.000000e+00> : vector<16x128xf32>
    %80 = tpu.matmul %77, %79, %cst_97 {dimension_numbers = #tpu.dot_dimension_numbers<[1], [0], [0], [1], [0, 0, 1, 1], [], []>} : vector<16x256xbf16>, vector<256x128xbf16>, vector<16x128xf32> -> vector<16x128xf32>
    %81 = arith.addf %76, %80 : vector<16x128xf32>
    %c2_98 = arith.constant 2 : index
    %c0_99 = arith.constant 0 : index
    %82 = vector.load %arg16[%c2_98, %c0_99] : memref<18x256xbf16, #tpu.memory_space<vmem>>, vector<16x256xbf16>
    %c0_100 = arith.constant 0 : index
    %c2_101 = arith.constant 2 : index
    %c0_102 = arith.constant 0 : index
    %c0_103 = arith.constant 0 : index
    %83 = vector.load %arg3[%c0_100, %c2_101, %c0_102, %c0_103] : memref<2x3x256x128xbf16, #tpu.memory_space<vmem>>, vector<1x1x256x128xbf16>
    %84 = vector.shape_cast %83 : vector<1x1x256x128xbf16> to vector<256x128xbf16>
    %cst_104 = arith.constant dense<0.000000e+00> : vector<16x128xf32>
    %85 = tpu.matmul %82, %84, %cst_104 {dimension_numbers = #tpu.dot_dimension_numbers<[1], [0], [0], [1], [0, 0, 1, 1], [], []>} : vector<16x256xbf16>, vector<256x128xbf16>, vector<16x128xf32> -> vector<16x128xf32>
    %86 = arith.addf %81, %85 : vector<16x128xf32>
    %cst_105 = arith.constant 0.000000e+00 : f32
    %87 = vector.broadcast %cst_105 : f32 to vector<16x128xf32>
    %88 = arith.cmpf oge, %86, %87 : vector<16x128xf32>
    %cst_106 = arith.constant 2.000000e-01 : f32
    %89 = vector.broadcast %cst_106 : f32 to vector<16x128xf32>
    %90 = arith.mulf %89, %86 : vector<16x128xf32>
    %91 = arith.select %88, %86, %90 : vector<16x128xi1>, vector<16x128xf32>
    %92 = arith.truncf %91 : vector<16x128xf32> to vector<16x128xbf16>
    %c8_107 = arith.constant 8 : index
    %c0_108 = arith.constant 0 : index
    %93 = vector.load %arg15[%c8_107, %c0_108] : memref<32x128xbf16, #tpu.memory_space<vmem>>, vector<16x128xbf16>
    tpu.vector_store %arg15[%c8_107, %c0_108], %92 {strides = array<i32>} : memref<32x128xbf16, #tpu.memory_space<vmem>>, vector<16x128xbf16>,
    %c1_109 = arith.constant 1 : index
    %c0_110 = arith.constant 0 : index
    %c0_111 = arith.constant 0 : index
    %c0_112 = arith.constant 0 : index
    %94 = vector.load %arg2[%c1_109, %c0_110, %c0_111, %c0_112] : memref<2x9x128x256xbf16, #tpu.memory_space<vmem>>, vector<1x1x128x256xbf16>
    %95 = vector.shape_cast %94 : vector<1x1x128x256xbf16> to vector<128x256xbf16>
    %cst_113 = arith.constant dense<0.000000e+00> : vector<16x256xf32>
    %96 = tpu.matmul %92, %95, %cst_113 {dimension_numbers = #tpu.dot_dimension_numbers<[1], [0], [0], [1], [0, 0, 1, 1], [], []>} : vector<16x128xbf16>, vector<128x256xbf16>, vector<16x256xf32> -> vector<16x256xf32>
    %c7_114 = arith.constant 7 : index
    %c0_115 = arith.constant 0 : index
    %97 = vector.load %arg15[%c7_114, %c0_115] : memref<32x128xbf16, #tpu.memory_space<vmem>>, vector<16x128xbf16>
    %c1_116 = arith.constant 1 : index
    %c1_117 = arith.constant 1 : index
    %c0_118 = arith.constant 0 : index
    %c0_119 = arith.constant 0 : index
    %98 = vector.load %arg2[%c1_116, %c1_117, %c0_118, %c0_119] : memref<2x9x128x256xbf16, #tpu.memory_space<vmem>>, vector<1x1x128x256xbf16>
    %99 = vector.shape_cast %98 : vector<1x1x128x256xbf16> to vector<128x256xbf16>
    %cst_120 = arith.constant dense<0.000000e+00> : vector<16x256xf32>
    %100 = tpu.matmul %97, %99, %cst_120 {dimension_numbers = #tpu.dot_dimension_numbers<[1], [0], [0], [1], [0, 0, 1, 1], [], []>} : vector<16x128xbf16>, vector<128x256xbf16>, vector<16x256xf32> -> vector<16x256xf32>
    %101 = arith.addf %96, %100 : vector<16x256xf32>
    %c9_121 = arith.constant 9 : index
    %c0_122 = arith.constant 0 : index
    %102 = vector.load %arg15[%c9_121, %c0_122] : memref<32x128xbf16, #tpu.memory_space<vmem>>, vector<16x128xbf16>
    %c1_123 = arith.constant 1 : index
    %c2_124 = arith.constant 2 : index
    %c0_125 = arith.constant 0 : index
    %c0_126 = arith.constant 0 : index
    %103 = vector.load %arg2[%c1_123, %c2_124, %c0_125, %c0_126] : memref<2x9x128x256xbf16, #tpu.memory_space<vmem>>, vector<1x1x128x256xbf16>
    %104 = vector.shape_cast %103 : vector<1x1x128x256xbf16> to vector<128x256xbf16>
    %cst_127 = arith.constant dense<0.000000e+00> : vector<16x256xf32>
    %105 = tpu.matmul %102, %104, %cst_127 {dimension_numbers = #tpu.dot_dimension_numbers<[1], [0], [0], [1], [0, 0, 1, 1], [], []>} : vector<16x128xbf16>, vector<128x256xbf16>, vector<16x256xf32> -> vector<16x256xf32>
    %106 = arith.addf %101, %105 : vector<16x256xf32>
    %c6_128 = arith.constant 6 : index
    %c0_129 = arith.constant 0 : index
    %107 = vector.load %arg15[%c6_128, %c0_129] : memref<32x128xbf16, #tpu.memory_space<vmem>>, vector<16x128xbf16>
    %c1_130 = arith.constant 1 : index
    %c3_131 = arith.constant 3 : index
    %c0_132 = arith.constant 0 : index
    %c0_133 = arith.constant 0 : index
    %108 = vector.load %arg2[%c1_130, %c3_131, %c0_132, %c0_133] : memref<2x9x128x256xbf16, #tpu.memory_space<vmem>>, vector<1x1x128x256xbf16>
    %109 = vector.shape_cast %108 : vector<1x1x128x256xbf16> to vector<128x256xbf16>
    %cst_134 = arith.constant dense<0.000000e+00> : vector<16x256xf32>
    %110 = tpu.matmul %107, %109, %cst_134 {dimension_numbers = #tpu.dot_dimension_numbers<[1], [0], [0], [1], [0, 0, 1, 1], [], []>} : vector<16x128xbf16>, vector<128x256xbf16>, vector<16x256xf32> -> vector<16x256xf32>
    %111 = arith.addf %106, %110 : vector<16x256xf32>
    %c10_135 = arith.constant 10 : index
    %c0_136 = arith.constant 0 : index
    %112 = vector.load %arg15[%c10_135, %c0_136] : memref<32x128xbf16, #tpu.memory_space<vmem>>, vector<16x128xbf16>
    %c1_137 = arith.constant 1 : index
    %c4_138 = arith.constant 4 : index
    %c0_139 = arith.constant 0 : index
    %c0_140 = arith.constant 0 : index
    %113 = vector.load %arg2[%c1_137, %c4_138, %c0_139, %c0_140] : memref<2x9x128x256xbf16, #tpu.memory_space<vmem>>, vector<1x1x128x256xbf16>
    %114 = vector.shape_cast %113 : vector<1x1x128x256xbf16> to vector<128x256xbf16>
    %cst_141 = arith.constant dense<0.000000e+00> : vector<16x256xf32>
    %115 = tpu.matmul %112, %114, %cst_141 {dimension_numbers = #tpu.dot_dimension_numbers<[1], [0], [0], [1], [0, 0, 1, 1], [], []>} : vector<16x128xbf16>, vector<128x256xbf16>, vector<16x256xf32> -> vector<16x256xf32>
    %116 = arith.addf %111, %115 : vector<16x256xf32>
    %c4_142 = arith.constant 4 : index
    %c0_143 = arith.constant 0 : index
    %117 = vector.load %arg15[%c4_142, %c0_143] : memref<32x128xbf16, #tpu.memory_space<vmem>>, vector<16x128xbf16>
    %c1_144 = arith.constant 1 : index
    %c5_145 = arith.constant 5 : index
    %c0_146 = arith.constant 0 : index
    %c0_147 = arith.constant 0 : index
    %118 = vector.load %arg2[%c1_144, %c5_145, %c0_146, %c0_147] : memref<2x9x128x256xbf16, #tpu.memory_space<vmem>>, vector<1x1x128x256xbf16>
    %119 = vector.shape_cast %118 : vector<1x1x128x256xbf16> to vector<128x256xbf16>
    %cst_148 = arith.constant dense<0.000000e+00> : vector<16x256xf32>
    %120 = tpu.matmul %117, %119, %cst_148 {dimension_numbers = #tpu.dot_dimension_numbers<[1], [0], [0], [1], [0, 0, 1, 1], [], []>} : vector<16x128xbf16>, vector<128x256xbf16>, vector<16x256xf32> -> vector<16x256xf32>
    %121 = arith.addf %116, %120 : vector<16x256xf32>
    %c12_149 = arith.constant 12 : index
    %c0_150 = arith.constant 0 : index
    %122 = vector.load %arg15[%c12_149, %c0_150] : memref<32x128xbf16, #tpu.memory_space<vmem>>, vector<16x128xbf16>
    %c1_151 = arith.constant 1 : index
    %c6_152 = arith.constant 6 : index
    %c0_153 = arith.constant 0 : index
    %c0_154 = arith.constant 0 : index
    %123 = vector.load %arg2[%c1_151, %c6_152, %c0_153, %c0_154] : memref<2x9x128x256xbf16, #tpu.memory_space<vmem>>, vector<1x1x128x256xbf16>
    %124 = vector.shape_cast %123 : vector<1x1x128x256xbf16> to vector<128x256xbf16>
    %cst_155 = arith.constant dense<0.000000e+00> : vector<16x256xf32>
    %125 = tpu.matmul %122, %124, %cst_155 {dimension_numbers = #tpu.dot_dimension_numbers<[1], [0], [0], [1], [0, 0, 1, 1], [], []>} : vector<16x128xbf16>, vector<128x256xbf16>, vector<16x256xf32> -> vector<16x256xf32>
    %126 = arith.addf %121, %125 : vector<16x256xf32>
    %c0_156 = arith.constant 0 : index
    %c0_157 = arith.constant 0 : index
    %127 = vector.load %arg15[%c0_156, %c0_157] : memref<32x128xbf16, #tpu.memory_space<vmem>>, vector<16x128xbf16>
    %c1_158 = arith.constant 1 : index
    %c7_159 = arith.constant 7 : index
    %c0_160 = arith.constant 0 : index
    %c0_161 = arith.constant 0 : index
    %128 = vector.load %arg2[%c1_158, %c7_159, %c0_160, %c0_161] : memref<2x9x128x256xbf16, #tpu.memory_space<vmem>>, vector<1x1x128x256xbf16>
    %129 = vector.shape_cast %128 : vector<1x1x128x256xbf16> to vector<128x256xbf16>
    %cst_162 = arith.constant dense<0.000000e+00> : vector<16x256xf32>
    %130 = tpu.matmul %127, %129, %cst_162 {dimension_numbers = #tpu.dot_dimension_numbers<[1], [0], [0], [1], [0, 0, 1, 1], [], []>} : vector<16x128xbf16>, vector<128x256xbf16>, vector<16x256xf32> -> vector<16x256xf32>
    %131 = arith.addf %126, %130 : vector<16x256xf32>
    %c16_163 = arith.constant 16 : index
    %c0_164 = arith.constant 0 : index
    %132 = vector.load %arg15[%c16_163, %c0_164] : memref<32x128xbf16, #tpu.memory_space<vmem>>, vector<16x128xbf16>
    %c1_165 = arith.constant 1 : index
    %c8_166 = arith.constant 8 : index
    %c0_167 = arith.constant 0 : index
    %c0_168 = arith.constant 0 : index
    %133 = vector.load %arg2[%c1_165, %c8_166, %c0_167, %c0_168] : memref<2x9x128x256xbf16, #tpu.memory_space<vmem>>, vector<1x1x128x256xbf16>
    %134 = vector.shape_cast %133 : vector<1x1x128x256xbf16> to vector<128x256xbf16>
    %cst_169 = arith.constant dense<0.000000e+00> : vector<16x256xf32>
    %135 = tpu.matmul %132, %134, %cst_169 {dimension_numbers = #tpu.dot_dimension_numbers<[1], [0], [0], [1], [0, 0, 1, 1], [], []>} : vector<16x128xbf16>, vector<128x256xbf16>, vector<16x256xf32> -> vector<16x256xf32>
    %136 = arith.addf %131, %135 : vector<16x256xf32>
    %cst_170 = arith.constant 0.000000e+00 : f32
    %137 = vector.broadcast %cst_170 : f32 to vector<16x256xf32>
    %138 = arith.cmpf oge, %136, %137 : vector<16x256xf32>
    %cst_171 = arith.constant 2.000000e-01 : f32
    %139 = vector.broadcast %cst_171 : f32 to vector<16x256xf32>
    %140 = arith.mulf %139, %136 : vector<16x256xf32>
    %141 = arith.select %138, %136, %140 : vector<16x256xi1>, vector<16x256xf32>
    %142 = arith.truncf %141 : vector<16x256xf32> to vector<16x256xbf16>
    %c1_172 = arith.constant 1 : index
    %c0_173 = arith.constant 0 : index
    %143 = vector.load %arg16[%c1_172, %c0_173] : memref<18x256xbf16, #tpu.memory_space<vmem>>, vector<16x256xbf16>
    tpu.vector_store %arg16[%c1_172, %c0_173], %142 {strides = array<i32>} : memref<18x256xbf16, #tpu.memory_space<vmem>>, vector<16x256xbf16>,
    %c0_174 = arith.constant 0 : index
    %c0_175 = arith.constant 0 : index
    %144 = vector.load %arg16[%c0_174, %c0_175] : memref<18x256xbf16, #tpu.memory_space<vmem>>, vector<16x256xbf16>
    %c1_176 = arith.constant 1 : index
    %c0_177 = arith.constant 0 : index
    %c0_178 = arith.constant 0 : index
    %c0_179 = arith.constant 0 : index
    %145 = vector.load %arg3[%c1_176, %c0_177, %c0_178, %c0_179] : memref<2x3x256x128xbf16, #tpu.memory_space<vmem>>, vector<1x1x256x128xbf16>
    %146 = vector.shape_cast %145 : vector<1x1x256x128xbf16> to vector<256x128xbf16>
    %cst_180 = arith.constant dense<0.000000e+00> : vector<16x128xf32>
    %147 = tpu.matmul %144, %146, %cst_180 {dimension_numbers = #tpu.dot_dimension_numbers<[1], [0], [0], [1], [0, 0, 1, 1], [], []>} : vector<16x256xbf16>, vector<256x128xbf16>, vector<16x128xf32> -> vector<16x128xf32>
    %148 = arith.addf %91, %147 : vector<16x128xf32>
    %c1_181 = arith.constant 1 : index
    %c0_182 = arith.constant 0 : index
    %149 = vector.load %arg16[%c1_181, %c0_182] : memref<18x256xbf16, #tpu.memory_space<vmem>>, vector<16x256xbf16>
    %c1_183 = arith.constant 1 : index
    %c1_184 = arith.constant 1 : index
    %c0_185 = arith.constant 0 : index
    %c0_186 = arith.constant 0 : index
    %150 = vector.load %arg3[%c1_183, %c1_184, %c0_185, %c0_186] : memref<2x3x256x128xbf16, #tpu.memory_space<vmem>>, vector<1x1x256x128xbf16>
    %151 = vector.shape_cast %150 : vector<1x1x256x128xbf16> to vector<256x128xbf16>
    %cst_187 = arith.constant dense<0.000000e+00> : vector<16x128xf32>
    %152 = tpu.matmul %149, %151, %cst_187 {dimension_numbers = #tpu.dot_dimension_numbers<[1], [0], [0], [1], [0, 0, 1, 1], [], []>} : vector<16x256xbf16>, vector<256x128xbf16>, vector<16x128xf32> -> vector<16x128xf32>
    %153 = arith.addf %148, %152 : vector<16x128xf32>
    %c2_188 = arith.constant 2 : index
    %c0_189 = arith.constant 0 : index
    %154 = vector.load %arg16[%c2_188, %c0_189] : memref<18x256xbf16, #tpu.memory_space<vmem>>, vector<16x256xbf16>
    %c1_190 = arith.constant 1 : index
    %c2_191 = arith.constant 2 : index
    %c0_192 = arith.constant 0 : index
    %c0_193 = arith.constant 0 : index
    %155 = vector.load %arg3[%c1_190, %c2_191, %c0_192, %c0_193] : memref<2x3x256x128xbf16, #tpu.memory_space<vmem>>, vector<1x1x256x128xbf16>
    %156 = vector.shape_cast %155 : vector<1x1x256x128xbf16> to vector<256x128xbf16>
    %cst_194 = arith.constant dense<0.000000e+00> : vector<16x128xf32>
    %157 = tpu.matmul %154, %156, %cst_194 {dimension_numbers = #tpu.dot_dimension_numbers<[1], [0], [0], [1], [0, 0, 1, 1], [], []>} : vector<16x256xbf16>, vector<256x128xbf16>, vector<16x128xf32> -> vector<16x128xf32>
    %158 = arith.addf %153, %157 : vector<16x128xf32>
    %cst_195 = arith.constant 0.000000e+00 : f32
    %159 = vector.broadcast %cst_195 : f32 to vector<16x128xf32>
    %160 = arith.cmpf oge, %158, %159 : vector<16x128xf32>
    %cst_196 = arith.constant 2.000000e-01 : f32
    %161 = vector.broadcast %cst_196 : f32 to vector<16x128xf32>
    %162 = arith.mulf %161, %158 : vector<16x128xf32>
    %163 = arith.select %160, %158, %162 : vector<16x128xi1>, vector<16x128xf32>
    %c0_197 = arith.constant 0 : index
    %c0_198 = arith.constant 0 : index
    %c0_199 = arith.constant 0 : index
    %164 = vector.load %arg12[%c0_197, %c0_198, %c0_199] : memref<1x16x128xf32, #tpu.memory_space<vmem>>, vector<1x16x128xf32>
    %165 = vector.shape_cast %164 : vector<1x16x128xf32> to vector<16x128xf32>
    %166 = vector.shape_cast %163 : vector<16x128xf32> to vector<1x16x128xf32>
    tpu.vector_store %arg12[%c0_197, %c0_198, %c0_199], %166 {strides = array<i32>} : memref<1x16x128xf32, #tpu.memory_space<vmem>>, vector<1x16x128xf32>,
    %c0_200 = arith.constant 0 : index
    %c0_201 = arith.constant 0 : index
    %167 = vector.load %arg8[%c0_200, %c0_201] : memref<8x16xbf16, #tpu.memory_space<vmem>>, vector<8x16xbf16>
    %168 = arith.truncf %163 : vector<16x128xf32> to vector<16x128xbf16>
    %cst_202 = arith.constant dense<0.000000e+00> : vector<8x128xf32>
    %169 = tpu.matmul %167, %168, %cst_202 {dimension_numbers = #tpu.dot_dimension_numbers<[1], [0], [0], [1], [0, 0, 1, 1], [], []>} : vector<8x16xbf16>, vector<16x128xbf16>, vector<8x128xf32> -> vector<8x128xf32>
    %170 = arith.truncf %169 : vector<8x128xf32> to vector<8x128xbf16>
    %c0_203 = arith.constant 0 : index
    %c0_204 = arith.constant 0 : index
    %171 = vector.load %arg9[%c0_203, %c0_204] : memref<128x96xbf16, #tpu.memory_space<vmem>>, vector<128x96xbf16>
    %cst_205 = arith.constant dense<0.000000e+00> : vector<8x96xf32>
    %172 = tpu.matmul %170, %171, %cst_205 {dimension_numbers = #tpu.dot_dimension_numbers<[1], [0], [0], [1], [0, 0, 1, 1], [], []>} : vector<8x128xbf16>, vector<128x96xbf16>, vector<8x96xf32> -> vector<8x96xf32>
    %173 = arith.truncf %172 : vector<8x96xf32> to vector<8x96xbf16>
    %c8_206 = arith.constant 8 : index
    %c0_207 = arith.constant 0 : index
    %174 = vector.load %arg17[%c8_206, %c0_207] : memref<24x96xbf16, #tpu.memory_space<vmem>>, vector<8x96xbf16>
    tpu.vector_store %arg17[%c8_206, %c0_207], %173 {strides = array<i32>} : memref<24x96xbf16, #tpu.memory_space<vmem>>, vector<8x96xbf16>,
    %c0_208 = arith.constant 0 : index
    %c0_209 = arith.constant 0 : index
    %c0_210 = arith.constant 0 : index
    %c0_211 = arith.constant 0 : index
    %175 = vector.load %arg4[%c0_208, %c0_209, %c0_210, %c0_211] : memref<2x9x96x192xbf16, #tpu.memory_space<vmem>>, vector<1x1x96x192xbf16>
    %176 = vector.shape_cast %175 : vector<1x1x96x192xbf16> to vector<96x192xbf16>
    %cst_212 = arith.constant dense<0.000000e+00> : vector<8x192xf32>
    %177 = tpu.matmul %173, %176, %cst_212 {dimension_numbers = #tpu.dot_dimension_numbers<[1], [0], [0], [1], [0, 0, 1, 1], [], []>} : vector<8x96xbf16>, vector<96x192xbf16>, vector<8x192xf32> -> vector<8x192xf32>
    %c7_213 = arith.constant 7 : index
    %c0_214 = arith.constant 0 : index
    %178 = vector.load %arg17[%c7_213, %c0_214] : memref<24x96xbf16, #tpu.memory_space<vmem>>, vector<8x96xbf16>
    %c0_215 = arith.constant 0 : index
    %c1_216 = arith.constant 1 : index
    %c0_217 = arith.constant 0 : index
    %c0_218 = arith.constant 0 : index
    %179 = vector.load %arg4[%c0_215, %c1_216, %c0_217, %c0_218] : memref<2x9x96x192xbf16, #tpu.memory_space<vmem>>, vector<1x1x96x192xbf16>
    %180 = vector.shape_cast %179 : vector<1x1x96x192xbf16> to vector<96x192xbf16>
    %cst_219 = arith.constant dense<0.000000e+00> : vector<8x192xf32>
    %181 = tpu.matmul %178, %180, %cst_219 {dimension_numbers = #tpu.dot_dimension_numbers<[1], [0], [0], [1], [0, 0, 1, 1], [], []>} : vector<8x96xbf16>, vector<96x192xbf16>, vector<8x192xf32> -> vector<8x192xf32>
    %182 = arith.addf %177, %181 : vector<8x192xf32>
    %c9_220 = arith.constant 9 : index
    %c0_221 = arith.constant 0 : index
    %183 = vector.load %arg17[%c9_220, %c0_221] : memref<24x96xbf16, #tpu.memory_space<vmem>>, vector<8x96xbf16>
    %c0_222 = arith.constant 0 : index
    %c2_223 = arith.constant 2 : index
    %c0_224 = arith.constant 0 : index
    %c0_225 = arith.constant 0 : index
    %184 = vector.load %arg4[%c0_222, %c2_223, %c0_224, %c0_225] : memref<2x9x96x192xbf16, #tpu.memory_space<vmem>>, vector<1x1x96x192xbf16>
    %185 = vector.shape_cast %184 : vector<1x1x96x192xbf16> to vector<96x192xbf16>
    %cst_226 = arith.constant dense<0.000000e+00> : vector<8x192xf32>
    %186 = tpu.matmul %183, %185, %cst_226 {dimension_numbers = #tpu.dot_dimension_numbers<[1], [0], [0], [1], [0, 0, 1, 1], [], []>} : vector<8x96xbf16>, vector<96x192xbf16>, vector<8x192xf32> -> vector<8x192xf32>
    %187 = arith.addf %182, %186 : vector<8x192xf32>
    %c6_227 = arith.constant 6 : index
    %c0_228 = arith.constant 0 : index
    %188 = vector.load %arg17[%c6_227, %c0_228] : memref<24x96xbf16, #tpu.memory_space<vmem>>, vector<8x96xbf16>
    %c0_229 = arith.constant 0 : index
    %c3_230 = arith.constant 3 : index
    %c0_231 = arith.constant 0 : index
    %c0_232 = arith.constant 0 : index
    %189 = vector.load %arg4[%c0_229, %c3_230, %c0_231, %c0_232] : memref<2x9x96x192xbf16, #tpu.memory_space<vmem>>, vector<1x1x96x192xbf16>
    %190 = vector.shape_cast %189 : vector<1x1x96x192xbf16> to vector<96x192xbf16>
    %cst_233 = arith.constant dense<0.000000e+00> : vector<8x192xf32>
    %191 = tpu.matmul %188, %190, %cst_233 {dimension_numbers = #tpu.dot_dimension_numbers<[1], [0], [0], [1], [0, 0, 1, 1], [], []>} : vector<8x96xbf16>, vector<96x192xbf16>, vector<8x192xf32> -> vector<8x192xf32>
    %192 = arith.addf %187, %191 : vector<8x192xf32>
    %c10_234 = arith.constant 10 : index
    %c0_235 = arith.constant 0 : index
    %193 = vector.load %arg17[%c10_234, %c0_235] : memref<24x96xbf16, #tpu.memory_space<vmem>>, vector<8x96xbf16>
    %c0_236 = arith.constant 0 : index
    %c4_237 = arith.constant 4 : index
    %c0_238 = arith.constant 0 : index
    %c0_239 = arith.constant 0 : index
    %194 = vector.load %arg4[%c0_236, %c4_237, %c0_238, %c0_239] : memref<2x9x96x192xbf16, #tpu.memory_space<vmem>>, vector<1x1x96x192xbf16>
    %195 = vector.shape_cast %194 : vector<1x1x96x192xbf16> to vector<96x192xbf16>
    %cst_240 = arith.constant dense<0.000000e+00> : vector<8x192xf32>
    %196 = tpu.matmul %193, %195, %cst_240 {dimension_numbers = #tpu.dot_dimension_numbers<[1], [0], [0], [1], [0, 0, 1, 1], [], []>} : vector<8x96xbf16>, vector<96x192xbf16>, vector<8x192xf32> -> vector<8x192xf32>
    %197 = arith.addf %192, %196 : vector<8x192xf32>
    %c4_241 = arith.constant 4 : index
    %c0_242 = arith.constant 0 : index
    %198 = vector.load %arg17[%c4_241, %c0_242] : memref<24x96xbf16, #tpu.memory_space<vmem>>, vector<8x96xbf16>
    %c0_243 = arith.constant 0 : index
    %c5_244 = arith.constant 5 : index
    %c0_245 = arith.constant 0 : index
    %c0_246 = arith.constant 0 : index
    %199 = vector.load %arg4[%c0_243, %c5_244, %c0_245, %c0_246] : memref<2x9x96x192xbf16, #tpu.memory_space<vmem>>, vector<1x1x96x192xbf16>
    %200 = vector.shape_cast %199 : vector<1x1x96x192xbf16> to vector<96x192xbf16>
    %cst_247 = arith.constant dense<0.000000e+00> : vector<8x192xf32>
    %201 = tpu.matmul %198, %200, %cst_247 {dimension_numbers = #tpu.dot_dimension_numbers<[1], [0], [0], [1], [0, 0, 1, 1], [], []>} : vector<8x96xbf16>, vector<96x192xbf16>, vector<8x192xf32> -> vector<8x192xf32>
    %202 = arith.addf %197, %201 : vector<8x192xf32>
    %c12_248 = arith.constant 12 : index
    %c0_249 = arith.constant 0 : index
    %203 = vector.load %arg17[%c12_248, %c0_249] : memref<24x96xbf16, #tpu.memory_space<vmem>>, vector<8x96xbf16>
    %c0_250 = arith.constant 0 : index
    %c6_251 = arith.constant 6 : index
    %c0_252 = arith.constant 0 : index
    %c0_253 = arith.constant 0 : index
    %204 = vector.load %arg4[%c0_250, %c6_251, %c0_252, %c0_253] : memref<2x9x96x192xbf16, #tpu.memory_space<vmem>>, vector<1x1x96x192xbf16>
    %205 = vector.shape_cast %204 : vector<1x1x96x192xbf16> to vector<96x192xbf16>
    %cst_254 = arith.constant dense<0.000000e+00> : vector<8x192xf32>
    %206 = tpu.matmul %203, %205, %cst_254 {dimension_numbers = #tpu.dot_dimension_numbers<[1], [0], [0], [1], [0, 0, 1, 1], [], []>} : vector<8x96xbf16>, vector<96x192xbf16>, vector<8x192xf32> -> vector<8x192xf32>
    %207 = arith.addf %202, %206 : vector<8x192xf32>
    %c0_255 = arith.constant 0 : index
    %c0_256 = arith.constant 0 : index
    %208 = vector.load %arg17[%c0_255, %c0_256] : memref<24x96xbf16, #tpu.memory_space<vmem>>, vector<8x96xbf16>
    %c0_257 = arith.constant 0 : index
    %c7_258 = arith.constant 7 : index
    %c0_259 = arith.constant 0 : index
    %c0_260 = arith.constant 0 : index
    %209 = vector.load %arg4[%c0_257, %c7_258, %c0_259, %c0_260] : memref<2x9x96x192xbf16, #tpu.memory_space<vmem>>, vector<1x1x96x192xbf16>
    %210 = vector.shape_cast %209 : vector<1x1x96x192xbf16> to vector<96x192xbf16>
    %cst_261 = arith.constant dense<0.000000e+00> : vector<8x192xf32>
    %211 = tpu.matmul %208, %210, %cst_261 {dimension_numbers = #tpu.dot_dimension_numbers<[1], [0], [0], [1], [0, 0, 1, 1], [], []>} : vector<8x96xbf16>, vector<96x192xbf16>, vector<8x192xf32> -> vector<8x192xf32>
    %212 = arith.addf %207, %211 : vector<8x192xf32>
    %c16_262 = arith.constant 16 : index
    %c0_263 = arith.constant 0 : index
    %213 = vector.load %arg17[%c16_262, %c0_263] : memref<24x96xbf16, #tpu.memory_space<vmem>>, vector<8x96xbf16>
    %c0_264 = arith.constant 0 : index
    %c8_265 = arith.constant 8 : index
    %c0_266 = arith.constant 0 : index
    %c0_267 = arith.constant 0 : index
    %214 = vector.load %arg4[%c0_264, %c8_265, %c0_266, %c0_267] : memref<2x9x96x192xbf16, #tpu.memory_space<vmem>>, vector<1x1x96x192xbf16>
    %215 = vector.shape_cast %214 : vector<1x1x96x192xbf16> to vector<96x192xbf16>
    %cst_268 = arith.constant dense<0.000000e+00> : vector<8x192xf32>
    %216 = tpu.matmul %213, %215, %cst_268 {dimension_numbers = #tpu.dot_dimension_numbers<[1], [0], [0], [1], [0, 0, 1, 1], [], []>} : vector<8x96xbf16>, vector<96x192xbf16>, vector<8x192xf32> -> vector<8x192xf32>
    %217 = arith.addf %212, %216 : vector<8x192xf32>
    %cst_269 = arith.constant 0.000000e+00 : f32
    %218 = vector.broadcast %cst_269 : f32 to vector<8x192xf32>
    %219 = arith.cmpf oge, %217, %218 : vector<8x192xf32>
    %cst_270 = arith.constant 2.000000e-01 : f32
    %220 = vector.broadcast %cst_270 : f32 to vector<8x192xf32>
    %221 = arith.mulf %220, %217 : vector<8x192xf32>
    %222 = arith.select %219, %217, %221 : vector<8x192xi1>, vector<8x192xf32>
    %223 = arith.truncf %222 : vector<8x192xf32> to vector<8x192xbf16>
    %c1_271 = arith.constant 1 : index
    %c0_272 = arith.constant 0 : index
    %224 = vector.load %arg18[%c1_271, %c0_272] : memref<10x192xbf16, #tpu.memory_space<vmem>>, vector<8x192xbf16>
    tpu.vector_store %arg18[%c1_271, %c0_272], %223 {strides = array<i32>} : memref<10x192xbf16, #tpu.memory_space<vmem>>, vector<8x192xbf16>,
    %c0_273 = arith.constant 0 : index
    %c0_274 = arith.constant 0 : index
    %225 = vector.load %arg18[%c0_273, %c0_274] : memref<10x192xbf16, #tpu.memory_space<vmem>>, vector<8x192xbf16>
    %c0_275 = arith.constant 0 : index
    %c0_276 = arith.constant 0 : index
    %c0_277 = arith.constant 0 : index
    %c0_278 = arith.constant 0 : index
    %226 = vector.load %arg5[%c0_275, %c0_276, %c0_277, %c0_278] : memref<2x3x192x96xbf16, #tpu.memory_space<vmem>>, vector<1x1x192x96xbf16>
    %227 = vector.shape_cast %226 : vector<1x1x192x96xbf16> to vector<192x96xbf16>
    %cst_279 = arith.constant dense<0.000000e+00> : vector<8x96xf32>
    %228 = tpu.matmul %225, %227, %cst_279 {dimension_numbers = #tpu.dot_dimension_numbers<[1], [0], [0], [1], [0, 0, 1, 1], [], []>} : vector<8x192xbf16>, vector<192x96xbf16>, vector<8x96xf32> -> vector<8x96xf32>
    %229 = arith.addf %172, %228 : vector<8x96xf32>
    %c1_280 = arith.constant 1 : index
    %c0_281 = arith.constant 0 : index
    %230 = vector.load %arg18[%c1_280, %c0_281] : memref<10x192xbf16, #tpu.memory_space<vmem>>, vector<8x192xbf16>
    %c0_282 = arith.constant 0 : index
    %c1_283 = arith.constant 1 : index
    %c0_284 = arith.constant 0 : index
    %c0_285 = arith.constant 0 : index
    %231 = vector.load %arg5[%c0_282, %c1_283, %c0_284, %c0_285] : memref<2x3x192x96xbf16, #tpu.memory_space<vmem>>, vector<1x1x192x96xbf16>
    %232 = vector.shape_cast %231 : vector<1x1x192x96xbf16> to vector<192x96xbf16>
    %cst_286 = arith.constant dense<0.000000e+00> : vector<8x96xf32>
    %233 = tpu.matmul %230, %232, %cst_286 {dimension_numbers = #tpu.dot_dimension_numbers<[1], [0], [0], [1], [0, 0, 1, 1], [], []>} : vector<8x192xbf16>, vector<192x96xbf16>, vector<8x96xf32> -> vector<8x96xf32>
    %234 = arith.addf %229, %233 : vector<8x96xf32>
    %c2_287 = arith.constant 2 : index
    %c0_288 = arith.constant 0 : index
    %235 = vector.load %arg18[%c2_287, %c0_288] : memref<10x192xbf16, #tpu.memory_space<vmem>>, vector<8x192xbf16>
    %c0_289 = arith.constant 0 : index
    %c2_290 = arith.constant 2 : index
    %c0_291 = arith.constant 0 : index
    %c0_292 = arith.constant 0 : index
    %236 = vector.load %arg5[%c0_289, %c2_290, %c0_291, %c0_292] : memref<2x3x192x96xbf16, #tpu.memory_space<vmem>>, vector<1x1x192x96xbf16>
    %237 = vector.shape_cast %236 : vector<1x1x192x96xbf16> to vector<192x96xbf16>
    %cst_293 = arith.constant dense<0.000000e+00> : vector<8x96xf32>
    %238 = tpu.matmul %235, %237, %cst_293 {dimension_numbers = #tpu.dot_dimension_numbers<[1], [0], [0], [1], [0, 0, 1, 1], [], []>} : vector<8x192xbf16>, vector<192x96xbf16>, vector<8x96xf32> -> vector<8x96xf32>
    %239 = arith.addf %234, %238 : vector<8x96xf32>
    %cst_294 = arith.constant 0.000000e+00 : f32
    %240 = vector.broadcast %cst_294 : f32 to vector<8x96xf32>
    %241 = arith.cmpf oge, %239, %240 : vector<8x96xf32>
    %cst_295 = arith.constant 2.000000e-01 : f32
    %242 = vector.broadcast %cst_295 : f32 to vector<8x96xf32>
    %243 = arith.mulf %242, %239 : vector<8x96xf32>
    %244 = arith.select %241, %239, %243 : vector<8x96xi1>, vector<8x96xf32>
    %245 = arith.truncf %244 : vector<8x96xf32> to vector<8x96xbf16>
    %c8_296 = arith.constant 8 : index
    %c0_297 = arith.constant 0 : index
    %246 = vector.load %arg17[%c8_296, %c0_297] : memref<24x96xbf16, #tpu.memory_space<vmem>>, vector<8x96xbf16>
    tpu.vector_store %arg17[%c8_296, %c0_297], %245 {strides = array<i32>} : memref<24x96xbf16, #tpu.memory_space<vmem>>, vector<8x96xbf16>,
    %c1_298 = arith.constant 1 : index
    %c0_299 = arith.constant 0 : index
    %c0_300 = arith.constant 0 : index
    %c0_301 = arith.constant 0 : index
    %247 = vector.load %arg4[%c1_298, %c0_299, %c0_300, %c0_301] : memref<2x9x96x192xbf16, #tpu.memory_space<vmem>>, vector<1x1x96x192xbf16>
    %248 = vector.shape_cast %247 : vector<1x1x96x192xbf16> to vector<96x192xbf16>
    %cst_302 = arith.constant dense<0.000000e+00> : vector<8x192xf32>
    %249 = tpu.matmul %245, %248, %cst_302 {dimension_numbers = #tpu.dot_dimension_numbers<[1], [0], [0], [1], [0, 0, 1, 1], [], []>} : vector<8x96xbf16>, vector<96x192xbf16>, vector<8x192xf32> -> vector<8x192xf32>
    %c7_303 = arith.constant 7 : index
    %c0_304 = arith.constant 0 : index
    %250 = vector.load %arg17[%c7_303, %c0_304] : memref<24x96xbf16, #tpu.memory_space<vmem>>, vector<8x96xbf16>
    %c1_305 = arith.constant 1 : index
    %c1_306 = arith.constant 1 : index
    %c0_307 = arith.constant 0 : index
    %c0_308 = arith.constant 0 : index
    %251 = vector.load %arg4[%c1_305, %c1_306, %c0_307, %c0_308] : memref<2x9x96x192xbf16, #tpu.memory_space<vmem>>, vector<1x1x96x192xbf16>
    %252 = vector.shape_cast %251 : vector<1x1x96x192xbf16> to vector<96x192xbf16>
    %cst_309 = arith.constant dense<0.000000e+00> : vector<8x192xf32>
    %253 = tpu.matmul %250, %252, %cst_309 {dimension_numbers = #tpu.dot_dimension_numbers<[1], [0], [0], [1], [0, 0, 1, 1], [], []>} : vector<8x96xbf16>, vector<96x192xbf16>, vector<8x192xf32> -> vector<8x192xf32>
    %254 = arith.addf %249, %253 : vector<8x192xf32>
    %c9_310 = arith.constant 9 : index
    %c0_311 = arith.constant 0 : index
    %255 = vector.load %arg17[%c9_310, %c0_311] : memref<24x96xbf16, #tpu.memory_space<vmem>>, vector<8x96xbf16>
    %c1_312 = arith.constant 1 : index
    %c2_313 = arith.constant 2 : index
    %c0_314 = arith.constant 0 : index
    %c0_315 = arith.constant 0 : index
    %256 = vector.load %arg4[%c1_312, %c2_313, %c0_314, %c0_315] : memref<2x9x96x192xbf16, #tpu.memory_space<vmem>>, vector<1x1x96x192xbf16>
    %257 = vector.shape_cast %256 : vector<1x1x96x192xbf16> to vector<96x192xbf16>
    %cst_316 = arith.constant dense<0.000000e+00> : vector<8x192xf32>
    %258 = tpu.matmul %255, %257, %cst_316 {dimension_numbers = #tpu.dot_dimension_numbers<[1], [0], [0], [1], [0, 0, 1, 1], [], []>} : vector<8x96xbf16>, vector<96x192xbf16>, vector<8x192xf32> -> vector<8x192xf32>
    %259 = arith.addf %254, %258 : vector<8x192xf32>
    %c6_317 = arith.constant 6 : index
    %c0_318 = arith.constant 0 : index
    %260 = vector.load %arg17[%c6_317, %c0_318] : memref<24x96xbf16, #tpu.memory_space<vmem>>, vector<8x96xbf16>
    %c1_319 = arith.constant 1 : index
    %c3_320 = arith.constant 3 : index
    %c0_321 = arith.constant 0 : index
    %c0_322 = arith.constant 0 : index
    %261 = vector.load %arg4[%c1_319, %c3_320, %c0_321, %c0_322] : memref<2x9x96x192xbf16, #tpu.memory_space<vmem>>, vector<1x1x96x192xbf16>
    %262 = vector.shape_cast %261 : vector<1x1x96x192xbf16> to vector<96x192xbf16>
    %cst_323 = arith.constant dense<0.000000e+00> : vector<8x192xf32>
    %263 = tpu.matmul %260, %262, %cst_323 {dimension_numbers = #tpu.dot_dimension_numbers<[1], [0], [0], [1], [0, 0, 1, 1], [], []>} : vector<8x96xbf16>, vector<96x192xbf16>, vector<8x192xf32> -> vector<8x192xf32>
    %264 = arith.addf %259, %263 : vector<8x192xf32>
    %c10_324 = arith.constant 10 : index
    %c0_325 = arith.constant 0 : index
    %265 = vector.load %arg17[%c10_324, %c0_325] : memref<24x96xbf16, #tpu.memory_space<vmem>>, vector<8x96xbf16>
    %c1_326 = arith.constant 1 : index
    %c4_327 = arith.constant 4 : index
    %c0_328 = arith.constant 0 : index
    %c0_329 = arith.constant 0 : index
    %266 = vector.load %arg4[%c1_326, %c4_327, %c0_328, %c0_329] : memref<2x9x96x192xbf16, #tpu.memory_space<vmem>>, vector<1x1x96x192xbf16>
    %267 = vector.shape_cast %266 : vector<1x1x96x192xbf16> to vector<96x192xbf16>
    %cst_330 = arith.constant dense<0.000000e+00> : vector<8x192xf32>
    %268 = tpu.matmul %265, %267, %cst_330 {dimension_numbers = #tpu.dot_dimension_numbers<[1], [0], [0], [1], [0, 0, 1, 1], [], []>} : vector<8x96xbf16>, vector<96x192xbf16>, vector<8x192xf32> -> vector<8x192xf32>
    %269 = arith.addf %264, %268 : vector<8x192xf32>
    %c4_331 = arith.constant 4 : index
    %c0_332 = arith.constant 0 : index
    %270 = vector.load %arg17[%c4_331, %c0_332] : memref<24x96xbf16, #tpu.memory_space<vmem>>, vector<8x96xbf16>
    %c1_333 = arith.constant 1 : index
    %c5_334 = arith.constant 5 : index
    %c0_335 = arith.constant 0 : index
    %c0_336 = arith.constant 0 : index
    %271 = vector.load %arg4[%c1_333, %c5_334, %c0_335, %c0_336] : memref<2x9x96x192xbf16, #tpu.memory_space<vmem>>, vector<1x1x96x192xbf16>
    %272 = vector.shape_cast %271 : vector<1x1x96x192xbf16> to vector<96x192xbf16>
    %cst_337 = arith.constant dense<0.000000e+00> : vector<8x192xf32>
    %273 = tpu.matmul %270, %272, %cst_337 {dimension_numbers = #tpu.dot_dimension_numbers<[1], [0], [0], [1], [0, 0, 1, 1], [], []>} : vector<8x96xbf16>, vector<96x192xbf16>, vector<8x192xf32> -> vector<8x192xf32>
    %274 = arith.addf %269, %273 : vector<8x192xf32>
    %c12_338 = arith.constant 12 : index
    %c0_339 = arith.constant 0 : index
    %275 = vector.load %arg17[%c12_338, %c0_339] : memref<24x96xbf16, #tpu.memory_space<vmem>>, vector<8x96xbf16>
    %c1_340 = arith.constant 1 : index
    %c6_341 = arith.constant 6 : index
    %c0_342 = arith.constant 0 : index
    %c0_343 = arith.constant 0 : index
    %276 = vector.load %arg4[%c1_340, %c6_341, %c0_342, %c0_343] : memref<2x9x96x192xbf16, #tpu.memory_space<vmem>>, vector<1x1x96x192xbf16>
    %277 = vector.shape_cast %276 : vector<1x1x96x192xbf16> to vector<96x192xbf16>
    %cst_344 = arith.constant dense<0.000000e+00> : vector<8x192xf32>
    %278 = tpu.matmul %275, %277, %cst_344 {dimension_numbers = #tpu.dot_dimension_numbers<[1], [0], [0], [1], [0, 0, 1, 1], [], []>} : vector<8x96xbf16>, vector<96x192xbf16>, vector<8x192xf32> -> vector<8x192xf32>
    %279 = arith.addf %274, %278 : vector<8x192xf32>
    %c0_345 = arith.constant 0 : index
    %c0_346 = arith.constant 0 : index
    %280 = vector.load %arg17[%c0_345, %c0_346] : memref<24x96xbf16, #tpu.memory_space<vmem>>, vector<8x96xbf16>
    %c1_347 = arith.constant 1 : index
    %c7_348 = arith.constant 7 : index
    %c0_349 = arith.constant 0 : index
    %c0_350 = arith.constant 0 : index
    %281 = vector.load %arg4[%c1_347, %c7_348, %c0_349, %c0_350] : memref<2x9x96x192xbf16, #tpu.memory_space<vmem>>, vector<1x1x96x192xbf16>
    %282 = vector.shape_cast %281 : vector<1x1x96x192xbf16> to vector<96x192xbf16>
    %cst_351 = arith.constant dense<0.000000e+00> : vector<8x192xf32>
    %283 = tpu.matmul %280, %282, %cst_351 {dimension_numbers = #tpu.dot_dimension_numbers<[1], [0], [0], [1], [0, 0, 1, 1], [], []>} : vector<8x96xbf16>, vector<96x192xbf16>, vector<8x192xf32> -> vector<8x192xf32>
    %284 = arith.addf %279, %283 : vector<8x192xf32>
    %c16_352 = arith.constant 16 : index
    %c0_353 = arith.constant 0 : index
    %285 = vector.load %arg17[%c16_352, %c0_353] : memref<24x96xbf16, #tpu.memory_space<vmem>>, vector<8x96xbf16>
    %c1_354 = arith.constant 1 : index
    %c8_355 = arith.constant 8 : index
    %c0_356 = arith.constant 0 : index
    %c0_357 = arith.constant 0 : index
    %286 = vector.load %arg4[%c1_354, %c8_355, %c0_356, %c0_357] : memref<2x9x96x192xbf16, #tpu.memory_space<vmem>>, vector<1x1x96x192xbf16>
    %287 = vector.shape_cast %286 : vector<1x1x96x192xbf16> to vector<96x192xbf16>
    %cst_358 = arith.constant dense<0.000000e+00> : vector<8x192xf32>
    %288 = tpu.matmul %285, %287, %cst_358 {dimension_numbers = #tpu.dot_dimension_numbers<[1], [0], [0], [1], [0, 0, 1, 1], [], []>} : vector<8x96xbf16>, vector<96x192xbf16>, vector<8x192xf32> -> vector<8x192xf32>
    %289 = arith.addf %284, %288 : vector<8x192xf32>
    %cst_359 = arith.constant 0.000000e+00 : f32
    %290 = vector.broadcast %cst_359 : f32 to vector<8x192xf32>
    %291 = arith.cmpf oge, %289, %290 : vector<8x192xf32>
    %cst_360 = arith.constant 2.000000e-01 : f32
    %292 = vector.broadcast %cst_360 : f32 to vector<8x192xf32>
    %293 = arith.mulf %292, %289 : vector<8x192xf32>
    %294 = arith.select %291, %289, %293 : vector<8x192xi1>, vector<8x192xf32>
    %295 = arith.truncf %294 : vector<8x192xf32> to vector<8x192xbf16>
    %c1_361 = arith.constant 1 : index
    %c0_362 = arith.constant 0 : index
    %296 = vector.load %arg18[%c1_361, %c0_362] : memref<10x192xbf16, #tpu.memory_space<vmem>>, vector<8x192xbf16>
    tpu.vector_store %arg18[%c1_361, %c0_362], %295 {strides = array<i32>} : memref<10x192xbf16, #tpu.memory_space<vmem>>, vector<8x192xbf16>,
    %c0_363 = arith.constant 0 : index
    %c0_364 = arith.constant 0 : index
    %297 = vector.load %arg18[%c0_363, %c0_364] : memref<10x192xbf16, #tpu.memory_space<vmem>>, vector<8x192xbf16>
    %c1_365 = arith.constant 1 : index
    %c0_366 = arith.constant 0 : index
    %c0_367 = arith.constant 0 : index
    %c0_368 = arith.constant 0 : index
    %298 = vector.load %arg5[%c1_365, %c0_366, %c0_367, %c0_368] : memref<2x3x192x96xbf16, #tpu.memory_space<vmem>>, vector<1x1x192x96xbf16>
    %299 = vector.shape_cast %298 : vector<1x1x192x96xbf16> to vector<192x96xbf16>
    %cst_369 = arith.constant dense<0.000000e+00> : vector<8x96xf32>
    %300 = tpu.matmul %297, %299, %cst_369 {dimension_numbers = #tpu.dot_dimension_numbers<[1], [0], [0], [1], [0, 0, 1, 1], [], []>} : vector<8x192xbf16>, vector<192x96xbf16>, vector<8x96xf32> -> vector<8x96xf32>
    %301 = arith.addf %244, %300 : vector<8x96xf32>
    %c1_370 = arith.constant 1 : index
    %c0_371 = arith.constant 0 : index
    %302 = vector.load %arg18[%c1_370, %c0_371] : memref<10x192xbf16, #tpu.memory_space<vmem>>, vector<8x192xbf16>
    %c1_372 = arith.constant 1 : index
    %c1_373 = arith.constant 1 : index
    %c0_374 = arith.constant 0 : index
    %c0_375 = arith.constant 0 : index
    %303 = vector.load %arg5[%c1_372, %c1_373, %c0_374, %c0_375] : memref<2x3x192x96xbf16, #tpu.memory_space<vmem>>, vector<1x1x192x96xbf16>
    %304 = vector.shape_cast %303 : vector<1x1x192x96xbf16> to vector<192x96xbf16>
    %cst_376 = arith.constant dense<0.000000e+00> : vector<8x96xf32>
    %305 = tpu.matmul %302, %304, %cst_376 {dimension_numbers = #tpu.dot_dimension_numbers<[1], [0], [0], [1], [0, 0, 1, 1], [], []>} : vector<8x192xbf16>, vector<192x96xbf16>, vector<8x96xf32> -> vector<8x96xf32>
    %306 = arith.addf %301, %305 : vector<8x96xf32>
    %c2_377 = arith.constant 2 : index
    %c0_378 = arith.constant 0 : index
    %307 = vector.load %arg18[%c2_377, %c0_378] : memref<10x192xbf16, #tpu.memory_space<vmem>>, vector<8x192xbf16>
    %c1_379 = arith.constant 1 : index
    %c2_380 = arith.constant 2 : index
    %c0_381 = arith.constant 0 : index
    %c0_382 = arith.constant 0 : index
    %308 = vector.load %arg5[%c1_379, %c2_380, %c0_381, %c0_382] : memref<2x3x192x96xbf16, #tpu.memory_space<vmem>>, vector<1x1x192x96xbf16>
    %309 = vector.shape_cast %308 : vector<1x1x192x96xbf16> to vector<192x96xbf16>
    %cst_383 = arith.constant dense<0.000000e+00> : vector<8x96xf32>
    %310 = tpu.matmul %307, %309, %cst_383 {dimension_numbers = #tpu.dot_dimension_numbers<[1], [0], [0], [1], [0, 0, 1, 1], [], []>} : vector<8x192xbf16>, vector<192x96xbf16>, vector<8x96xf32> -> vector<8x96xf32>
    %311 = arith.addf %306, %310 : vector<8x96xf32>
    %cst_384 = arith.constant 0.000000e+00 : f32
    %312 = vector.broadcast %cst_384 : f32 to vector<8x96xf32>
    %313 = arith.cmpf oge, %311, %312 : vector<8x96xf32>
    %cst_385 = arith.constant 2.000000e-01 : f32
    %314 = vector.broadcast %cst_385 : f32 to vector<8x96xf32>
    %315 = arith.mulf %314, %311 : vector<8x96xf32>
    %316 = arith.select %313, %311, %315 : vector<8x96xi1>, vector<8x96xf32>
    %c0_386 = arith.constant 0 : index
    %c0_387 = arith.constant 0 : index
    %c0_388 = arith.constant 0 : index
    %317 = vector.load %arg13[%c0_386, %c0_387, %c0_388] : memref<1x8x96xf32, #tpu.memory_space<vmem>>, vector<1x8x96xf32>
    %318 = vector.shape_cast %317 : vector<1x8x96xf32> to vector<8x96xf32>
    %319 = vector.shape_cast %316 : vector<8x96xf32> to vector<1x8x96xf32>
    tpu.vector_store %arg13[%c0_386, %c0_387, %c0_388], %319 {strides = array<i32>} : memref<1x8x96xf32, #tpu.memory_space<vmem>>, vector<1x8x96xf32>,
    %c0_389 = arith.constant 0 : index
    %c0_390 = arith.constant 0 : index
    %320 = vector.load %arg10[%c0_389, %c0_390] : memref<4x8xbf16, #tpu.memory_space<vmem>>, vector<4x8xbf16>
    %321 = arith.truncf %316 : vector<8x96xf32> to vector<8x96xbf16>
    %cst_391 = arith.constant dense<0.000000e+00> : vector<4x96xf32>
    %322 = tpu.matmul %320, %321, %cst_391 {dimension_numbers = #tpu.dot_dimension_numbers<[1], [0], [0], [1], [0, 0, 1, 1], [], []>} : vector<4x8xbf16>, vector<8x96xbf16>, vector<4x96xf32> -> vector<4x96xf32>
    %323 = arith.truncf %322 : vector<4x96xf32> to vector<4x96xbf16>
    %c0_392 = arith.constant 0 : index
    %c0_393 = arith.constant 0 : index
    %324 = vector.load %arg11[%c0_392, %c0_393] : memref<96x64xbf16, #tpu.memory_space<vmem>>, vector<96x64xbf16>
    %cst_394 = arith.constant dense<0.000000e+00> : vector<4x64xf32>
    %325 = tpu.matmul %323, %324, %cst_394 {dimension_numbers = #tpu.dot_dimension_numbers<[1], [0], [0], [1], [0, 0, 1, 1], [], []>} : vector<4x96xbf16>, vector<96x64xbf16>, vector<4x64xf32> -> vector<4x64xf32>
    %326 = arith.truncf %325 : vector<4x64xf32> to vector<4x64xbf16>
    %c8_395 = arith.constant 8 : index
    %c0_396 = arith.constant 0 : index
    %327 = vector.load %arg19[%c8_395, %c0_396] : memref<20x64xbf16, #tpu.memory_space<vmem>>, vector<4x64xbf16>
    tpu.vector_store %arg19[%c8_395, %c0_396], %326 {strides = array<i32>} : memref<20x64xbf16, #tpu.memory_space<vmem>>, vector<4x64xbf16>,
    %c0_397 = arith.constant 0 : index
    %c0_398 = arith.constant 0 : index
    %c0_399 = arith.constant 0 : index
    %c0_400 = arith.constant 0 : index
    %328 = vector.load %arg6[%c0_397, %c0_398, %c0_399, %c0_400] : memref<2x9x64x128xbf16, #tpu.memory_space<vmem>>, vector<1x1x64x128xbf16>
    %329 = vector.shape_cast %328 : vector<1x1x64x128xbf16> to vector<64x128xbf16>
    %cst_401 = arith.constant dense<0.000000e+00> : vector<4x128xf32>
    %330 = tpu.matmul %326, %329, %cst_401 {dimension_numbers = #tpu.dot_dimension_numbers<[1], [0], [0], [1], [0, 0, 1, 1], [], []>} : vector<4x64xbf16>, vector<64x128xbf16>, vector<4x128xf32> -> vector<4x128xf32>
    %c7_402 = arith.constant 7 : index
    %c0_403 = arith.constant 0 : index
    %331 = vector.load %arg19[%c7_402, %c0_403] : memref<20x64xbf16, #tpu.memory_space<vmem>>, vector<4x64xbf16>
    %c0_404 = arith.constant 0 : index
    %c1_405 = arith.constant 1 : index
    %c0_406 = arith.constant 0 : index
    %c0_407 = arith.constant 0 : index
    %332 = vector.load %arg6[%c0_404, %c1_405, %c0_406, %c0_407] : memref<2x9x64x128xbf16, #tpu.memory_space<vmem>>, vector<1x1x64x128xbf16>
    %333 = vector.shape_cast %332 : vector<1x1x64x128xbf16> to vector<64x128xbf16>
    %cst_408 = arith.constant dense<0.000000e+00> : vector<4x128xf32>
    %334 = tpu.matmul %331, %333, %cst_408 {dimension_numbers = #tpu.dot_dimension_numbers<[1], [0], [0], [1], [0, 0, 1, 1], [], []>} : vector<4x64xbf16>, vector<64x128xbf16>, vector<4x128xf32> -> vector<4x128xf32>
    %335 = arith.addf %330, %334 : vector<4x128xf32>
    %c9_409 = arith.constant 9 : index
    %c0_410 = arith.constant 0 : index
    %336 = vector.load %arg19[%c9_409, %c0_410] : memref<20x64xbf16, #tpu.memory_space<vmem>>, vector<4x64xbf16>
    %c0_411 = arith.constant 0 : index
    %c2_412 = arith.constant 2 : index
    %c0_413 = arith.constant 0 : index
    %c0_414 = arith.constant 0 : index
    %337 = vector.load %arg6[%c0_411, %c2_412, %c0_413, %c0_414] : memref<2x9x64x128xbf16, #tpu.memory_space<vmem>>, vector<1x1x64x128xbf16>
    %338 = vector.shape_cast %337 : vector<1x1x64x128xbf16> to vector<64x128xbf16>
    %cst_415 = arith.constant dense<0.000000e+00> : vector<4x128xf32>
    %339 = tpu.matmul %336, %338, %cst_415 {dimension_numbers = #tpu.dot_dimension_numbers<[1], [0], [0], [1], [0, 0, 1, 1], [], []>} : vector<4x64xbf16>, vector<64x128xbf16>, vector<4x128xf32> -> vector<4x128xf32>
    %340 = arith.addf %335, %339 : vector<4x128xf32>
    %c6_416 = arith.constant 6 : index
    %c0_417 = arith.constant 0 : index
    %341 = vector.load %arg19[%c6_416, %c0_417] : memref<20x64xbf16, #tpu.memory_space<vmem>>, vector<4x64xbf16>
    %c0_418 = arith.constant 0 : index
    %c3_419 = arith.constant 3 : index
    %c0_420 = arith.constant 0 : index
    %c0_421 = arith.constant 0 : index
    %342 = vector.load %arg6[%c0_418, %c3_419, %c0_420, %c0_421] : memref<2x9x64x128xbf16, #tpu.memory_space<vmem>>, vector<1x1x64x128xbf16>
    %343 = vector.shape_cast %342 : vector<1x1x64x128xbf16> to vector<64x128xbf16>
    %cst_422 = arith.constant dense<0.000000e+00> : vector<4x128xf32>
    %344 = tpu.matmul %341, %343, %cst_422 {dimension_numbers = #tpu.dot_dimension_numbers<[1], [0], [0], [1], [0, 0, 1, 1], [], []>} : vector<4x64xbf16>, vector<64x128xbf16>, vector<4x128xf32> -> vector<4x128xf32>
    %345 = arith.addf %340, %344 : vector<4x128xf32>
    %c10_423 = arith.constant 10 : index
    %c0_424 = arith.constant 0 : index
    %346 = vector.load %arg19[%c10_423, %c0_424] : memref<20x64xbf16, #tpu.memory_space<vmem>>, vector<4x64xbf16>
    %c0_425 = arith.constant 0 : index
    %c4_426 = arith.constant 4 : index
    %c0_427 = arith.constant 0 : index
    %c0_428 = arith.constant 0 : index
    %347 = vector.load %arg6[%c0_425, %c4_426, %c0_427, %c0_428] : memref<2x9x64x128xbf16, #tpu.memory_space<vmem>>, vector<1x1x64x128xbf16>
    %348 = vector.shape_cast %347 : vector<1x1x64x128xbf16> to vector<64x128xbf16>
    %cst_429 = arith.constant dense<0.000000e+00> : vector<4x128xf32>
    %349 = tpu.matmul %346, %348, %cst_429 {dimension_numbers = #tpu.dot_dimension_numbers<[1], [0], [0], [1], [0, 0, 1, 1], [], []>} : vector<4x64xbf16>, vector<64x128xbf16>, vector<4x128xf32> -> vector<4x128xf32>
    %350 = arith.addf %345, %349 : vector<4x128xf32>
    %c4_430 = arith.constant 4 : index
    %c0_431 = arith.constant 0 : index
    %351 = vector.load %arg19[%c4_430, %c0_431] : memref<20x64xbf16, #tpu.memory_space<vmem>>, vector<4x64xbf16>
    %c0_432 = arith.constant 0 : index
    %c5_433 = arith.constant 5 : index
    %c0_434 = arith.constant 0 : index
    %c0_435 = arith.constant 0 : index
    %352 = vector.load %arg6[%c0_432, %c5_433, %c0_434, %c0_435] : memref<2x9x64x128xbf16, #tpu.memory_space<vmem>>, vector<1x1x64x128xbf16>
    %353 = vector.shape_cast %352 : vector<1x1x64x128xbf16> to vector<64x128xbf16>
    %cst_436 = arith.constant dense<0.000000e+00> : vector<4x128xf32>
    %354 = tpu.matmul %351, %353, %cst_436 {dimension_numbers = #tpu.dot_dimension_numbers<[1], [0], [0], [1], [0, 0, 1, 1], [], []>} : vector<4x64xbf16>, vector<64x128xbf16>, vector<4x128xf32> -> vector<4x128xf32>
    %355 = arith.addf %350, %354 : vector<4x128xf32>
    %c12_437 = arith.constant 12 : index
    %c0_438 = arith.constant 0 : index
    %356 = vector.load %arg19[%c12_437, %c0_438] : memref<20x64xbf16, #tpu.memory_space<vmem>>, vector<4x64xbf16>
    %c0_439 = arith.constant 0 : index
    %c6_440 = arith.constant 6 : index
    %c0_441 = arith.constant 0 : index
    %c0_442 = arith.constant 0 : index
    %357 = vector.load %arg6[%c0_439, %c6_440, %c0_441, %c0_442] : memref<2x9x64x128xbf16, #tpu.memory_space<vmem>>, vector<1x1x64x128xbf16>
    %358 = vector.shape_cast %357 : vector<1x1x64x128xbf16> to vector<64x128xbf16>
    %cst_443 = arith.constant dense<0.000000e+00> : vector<4x128xf32>
    %359 = tpu.matmul %356, %358, %cst_443 {dimension_numbers = #tpu.dot_dimension_numbers<[1], [0], [0], [1], [0, 0, 1, 1], [], []>} : vector<4x64xbf16>, vector<64x128xbf16>, vector<4x128xf32> -> vector<4x128xf32>
    %360 = arith.addf %355, %359 : vector<4x128xf32>
    %c0_444 = arith.constant 0 : index
    %c0_445 = arith.constant 0 : index
    %361 = vector.load %arg19[%c0_444, %c0_445] : memref<20x64xbf16, #tpu.memory_space<vmem>>, vector<4x64xbf16>
    %c0_446 = arith.constant 0 : index
    %c7_447 = arith.constant 7 : index
    %c0_448 = arith.constant 0 : index
    %c0_449 = arith.constant 0 : index
    %362 = vector.load %arg6[%c0_446, %c7_447, %c0_448, %c0_449] : memref<2x9x64x128xbf16, #tpu.memory_space<vmem>>, vector<1x1x64x128xbf16>
    %363 = vector.shape_cast %362 : vector<1x1x64x128xbf16> to vector<64x128xbf16>
    %cst_450 = arith.constant dense<0.000000e+00> : vector<4x128xf32>
    %364 = tpu.matmul %361, %363, %cst_450 {dimension_numbers = #tpu.dot_dimension_numbers<[1], [0], [0], [1], [0, 0, 1, 1], [], []>} : vector<4x64xbf16>, vector<64x128xbf16>, vector<4x128xf32> -> vector<4x128xf32>
    %365 = arith.addf %360, %364 : vector<4x128xf32>
    %c16_451 = arith.constant 16 : index
    %c0_452 = arith.constant 0 : index
    %366 = vector.load %arg19[%c16_451, %c0_452] : memref<20x64xbf16, #tpu.memory_space<vmem>>, vector<4x64xbf16>
    %c0_453 = arith.constant 0 : index
    %c8_454 = arith.constant 8 : index
    %c0_455 = arith.constant 0 : index
    %c0_456 = arith.constant 0 : index
    %367 = vector.load %arg6[%c0_453, %c8_454, %c0_455, %c0_456] : memref<2x9x64x128xbf16, #tpu.memory_space<vmem>>, vector<1x1x64x128xbf16>
    %368 = vector.shape_cast %367 : vector<1x1x64x128xbf16> to vector<64x128xbf16>
    %cst_457 = arith.constant dense<0.000000e+00> : vector<4x128xf32>
    %369 = tpu.matmul %366, %368, %cst_457 {dimension_numbers = #tpu.dot_dimension_numbers<[1], [0], [0], [1], [0, 0, 1, 1], [], []>} : vector<4x64xbf16>, vector<64x128xbf16>, vector<4x128xf32> -> vector<4x128xf32>
    %370 = arith.addf %365, %369 : vector<4x128xf32>
    %cst_458 = arith.constant 0.000000e+00 : f32
    %371 = vector.broadcast %cst_458 : f32 to vector<4x128xf32>
    %372 = arith.cmpf oge, %370, %371 : vector<4x128xf32>
    %cst_459 = arith.constant 2.000000e-01 : f32
    %373 = vector.broadcast %cst_459 : f32 to vector<4x128xf32>
    %374 = arith.mulf %373, %370 : vector<4x128xf32>
    %375 = arith.select %372, %370, %374 : vector<4x128xi1>, vector<4x128xf32>
    %376 = arith.truncf %375 : vector<4x128xf32> to vector<4x128xbf16>
    %c1_460 = arith.constant 1 : index
    %c0_461 = arith.constant 0 : index
    %377 = vector.load %arg20[%c1_460, %c0_461] : memref<6x128xbf16, #tpu.memory_space<vmem>>, vector<4x128xbf16>
    tpu.vector_store %arg20[%c1_460, %c0_461], %376 {strides = array<i32>} : memref<6x128xbf16, #tpu.memory_space<vmem>>, vector<4x128xbf16>,
    %c0_462 = arith.constant 0 : index
    %c0_463 = arith.constant 0 : index
    %378 = vector.load %arg20[%c0_462, %c0_463] : memref<6x128xbf16, #tpu.memory_space<vmem>>, vector<4x128xbf16>
    %c0_464 = arith.constant 0 : index
    %c0_465 = arith.constant 0 : index
    %c0_466 = arith.constant 0 : index
    %c0_467 = arith.constant 0 : index
    %379 = vector.load %arg7[%c0_464, %c0_465, %c0_466, %c0_467] : memref<2x3x128x64xbf16, #tpu.memory_space<vmem>>, vector<1x1x128x64xbf16>
    %380 = vector.shape_cast %379 : vector<1x1x128x64xbf16> to vector<128x64xbf16>
    %cst_468 = arith.constant dense<0.000000e+00> : vector<4x64xf32>
    %381 = tpu.matmul %378, %380, %cst_468 {dimension_numbers = #tpu.dot_dimension_numbers<[1], [0], [0], [1], [0, 0, 1, 1], [], []>} : vector<4x128xbf16>, vector<128x64xbf16>, vector<4x64xf32> -> vector<4x64xf32>
    %382 = arith.addf %325, %381 : vector<4x64xf32>
    %c1_469 = arith.constant 1 : index
    %c0_470 = arith.constant 0 : index
    %383 = vector.load %arg20[%c1_469, %c0_470] : memref<6x128xbf16, #tpu.memory_space<vmem>>, vector<4x128xbf16>
    %c0_471 = arith.constant 0 : index
    %c1_472 = arith.constant 1 : index
    %c0_473 = arith.constant 0 : index
    %c0_474 = arith.constant 0 : index
    %384 = vector.load %arg7[%c0_471, %c1_472, %c0_473, %c0_474] : memref<2x3x128x64xbf16, #tpu.memory_space<vmem>>, vector<1x1x128x64xbf16>
    %385 = vector.shape_cast %384 : vector<1x1x128x64xbf16> to vector<128x64xbf16>
    %cst_475 = arith.constant dense<0.000000e+00> : vector<4x64xf32>
    %386 = tpu.matmul %383, %385, %cst_475 {dimension_numbers = #tpu.dot_dimension_numbers<[1], [0], [0], [1], [0, 0, 1, 1], [], []>} : vector<4x128xbf16>, vector<128x64xbf16>, vector<4x64xf32> -> vector<4x64xf32>
    %387 = arith.addf %382, %386 : vector<4x64xf32>
    %c2_476 = arith.constant 2 : index
    %c0_477 = arith.constant 0 : index
    %388 = vector.load %arg20[%c2_476, %c0_477] : memref<6x128xbf16, #tpu.memory_space<vmem>>, vector<4x128xbf16>
    %c0_478 = arith.constant 0 : index
    %c2_479 = arith.constant 2 : index
    %c0_480 = arith.constant 0 : index
    %c0_481 = arith.constant 0 : index
    %389 = vector.load %arg7[%c0_478, %c2_479, %c0_480, %c0_481] : memref<2x3x128x64xbf16, #tpu.memory_space<vmem>>, vector<1x1x128x64xbf16>
    %390 = vector.shape_cast %389 : vector<1x1x128x64xbf16> to vector<128x64xbf16>
    %cst_482 = arith.constant dense<0.000000e+00> : vector<4x64xf32>
    %391 = tpu.matmul %388, %390, %cst_482 {dimension_numbers = #tpu.dot_dimension_numbers<[1], [0], [0], [1], [0, 0, 1, 1], [], []>} : vector<4x128xbf16>, vector<128x64xbf16>, vector<4x64xf32> -> vector<4x64xf32>
    %392 = arith.addf %387, %391 : vector<4x64xf32>
    %cst_483 = arith.constant 0.000000e+00 : f32
    %393 = vector.broadcast %cst_483 : f32 to vector<4x64xf32>
    %394 = arith.cmpf oge, %392, %393 : vector<4x64xf32>
    %cst_484 = arith.constant 2.000000e-01 : f32
    %395 = vector.broadcast %cst_484 : f32 to vector<4x64xf32>
    %396 = arith.mulf %395, %392 : vector<4x64xf32>
    %397 = arith.select %394, %392, %396 : vector<4x64xi1>, vector<4x64xf32>
    %398 = arith.truncf %397 : vector<4x64xf32> to vector<4x64xbf16>
    %c8_485 = arith.constant 8 : index
    %c0_486 = arith.constant 0 : index
    %399 = vector.load %arg19[%c8_485, %c0_486] : memref<20x64xbf16, #tpu.memory_space<vmem>>, vector<4x64xbf16>
    tpu.vector_store %arg19[%c8_485, %c0_486], %398 {strides = array<i32>} : memref<20x64xbf16, #tpu.memory_space<vmem>>, vector<4x64xbf16>,
    %c1_487 = arith.constant 1 : index
    %c0_488 = arith.constant 0 : index
    %c0_489 = arith.constant 0 : index
    %c0_490 = arith.constant 0 : index
    %400 = vector.load %arg6[%c1_487, %c0_488, %c0_489, %c0_490] : memref<2x9x64x128xbf16, #tpu.memory_space<vmem>>, vector<1x1x64x128xbf16>
    %401 = vector.shape_cast %400 : vector<1x1x64x128xbf16> to vector<64x128xbf16>
    %cst_491 = arith.constant dense<0.000000e+00> : vector<4x128xf32>
    %402 = tpu.matmul %398, %401, %cst_491 {dimension_numbers = #tpu.dot_dimension_numbers<[1], [0], [0], [1], [0, 0, 1, 1], [], []>} : vector<4x64xbf16>, vector<64x128xbf16>, vector<4x128xf32> -> vector<4x128xf32>
    %c7_492 = arith.constant 7 : index
    %c0_493 = arith.constant 0 : index
    %403 = vector.load %arg19[%c7_492, %c0_493] : memref<20x64xbf16, #tpu.memory_space<vmem>>, vector<4x64xbf16>
    %c1_494 = arith.constant 1 : index
    %c1_495 = arith.constant 1 : index
    %c0_496 = arith.constant 0 : index
    %c0_497 = arith.constant 0 : index
    %404 = vector.load %arg6[%c1_494, %c1_495, %c0_496, %c0_497] : memref<2x9x64x128xbf16, #tpu.memory_space<vmem>>, vector<1x1x64x128xbf16>
    %405 = vector.shape_cast %404 : vector<1x1x64x128xbf16> to vector<64x128xbf16>
    %cst_498 = arith.constant dense<0.000000e+00> : vector<4x128xf32>
    %406 = tpu.matmul %403, %405, %cst_498 {dimension_numbers = #tpu.dot_dimension_numbers<[1], [0], [0], [1], [0, 0, 1, 1], [], []>} : vector<4x64xbf16>, vector<64x128xbf16>, vector<4x128xf32> -> vector<4x128xf32>
    %407 = arith.addf %402, %406 : vector<4x128xf32>
    %c9_499 = arith.constant 9 : index
    %c0_500 = arith.constant 0 : index
    %408 = vector.load %arg19[%c9_499, %c0_500] : memref<20x64xbf16, #tpu.memory_space<vmem>>, vector<4x64xbf16>
    %c1_501 = arith.constant 1 : index
    %c2_502 = arith.constant 2 : index
    %c0_503 = arith.constant 0 : index
    %c0_504 = arith.constant 0 : index
    %409 = vector.load %arg6[%c1_501, %c2_502, %c0_503, %c0_504] : memref<2x9x64x128xbf16, #tpu.memory_space<vmem>>, vector<1x1x64x128xbf16>
    %410 = vector.shape_cast %409 : vector<1x1x64x128xbf16> to vector<64x128xbf16>
    %cst_505 = arith.constant dense<0.000000e+00> : vector<4x128xf32>
    %411 = tpu.matmul %408, %410, %cst_505 {dimension_numbers = #tpu.dot_dimension_numbers<[1], [0], [0], [1], [0, 0, 1, 1], [], []>} : vector<4x64xbf16>, vector<64x128xbf16>, vector<4x128xf32> -> vector<4x128xf32>
    %412 = arith.addf %407, %411 : vector<4x128xf32>
    %c6_506 = arith.constant 6 : index
    %c0_507 = arith.constant 0 : index
    %413 = vector.load %arg19[%c6_506, %c0_507] : memref<20x64xbf16, #tpu.memory_space<vmem>>, vector<4x64xbf16>
    %c1_508 = arith.constant 1 : index
    %c3_509 = arith.constant 3 : index
    %c0_510 = arith.constant 0 : index
    %c0_511 = arith.constant 0 : index
    %414 = vector.load %arg6[%c1_508, %c3_509, %c0_510, %c0_511] : memref<2x9x64x128xbf16, #tpu.memory_space<vmem>>, vector<1x1x64x128xbf16>
    %415 = vector.shape_cast %414 : vector<1x1x64x128xbf16> to vector<64x128xbf16>
    %cst_512 = arith.constant dense<0.000000e+00> : vector<4x128xf32>
    %416 = tpu.matmul %413, %415, %cst_512 {dimension_numbers = #tpu.dot_dimension_numbers<[1], [0], [0], [1], [0, 0, 1, 1], [], []>} : vector<4x64xbf16>, vector<64x128xbf16>, vector<4x128xf32> -> vector<4x128xf32>
    %417 = arith.addf %412, %416 : vector<4x128xf32>
    %c10_513 = arith.constant 10 : index
    %c0_514 = arith.constant 0 : index
    %418 = vector.load %arg19[%c10_513, %c0_514] : memref<20x64xbf16, #tpu.memory_space<vmem>>, vector<4x64xbf16>
    %c1_515 = arith.constant 1 : index
    %c4_516 = arith.constant 4 : index
    %c0_517 = arith.constant 0 : index
    %c0_518 = arith.constant 0 : index
    %419 = vector.load %arg6[%c1_515, %c4_516, %c0_517, %c0_518] : memref<2x9x64x128xbf16, #tpu.memory_space<vmem>>, vector<1x1x64x128xbf16>
    %420 = vector.shape_cast %419 : vector<1x1x64x128xbf16> to vector<64x128xbf16>
    %cst_519 = arith.constant dense<0.000000e+00> : vector<4x128xf32>
    %421 = tpu.matmul %418, %420, %cst_519 {dimension_numbers = #tpu.dot_dimension_numbers<[1], [0], [0], [1], [0, 0, 1, 1], [], []>} : vector<4x64xbf16>, vector<64x128xbf16>, vector<4x128xf32> -> vector<4x128xf32>
    %422 = arith.addf %417, %421 : vector<4x128xf32>
    %c4_520 = arith.constant 4 : index
    %c0_521 = arith.constant 0 : index
    %423 = vector.load %arg19[%c4_520, %c0_521] : memref<20x64xbf16, #tpu.memory_space<vmem>>, vector<4x64xbf16>
    %c1_522 = arith.constant 1 : index
    %c5_523 = arith.constant 5 : index
    %c0_524 = arith.constant 0 : index
    %c0_525 = arith.constant 0 : index
    %424 = vector.load %arg6[%c1_522, %c5_523, %c0_524, %c0_525] : memref<2x9x64x128xbf16, #tpu.memory_space<vmem>>, vector<1x1x64x128xbf16>
    %425 = vector.shape_cast %424 : vector<1x1x64x128xbf16> to vector<64x128xbf16>
    %cst_526 = arith.constant dense<0.000000e+00> : vector<4x128xf32>
    %426 = tpu.matmul %423, %425, %cst_526 {dimension_numbers = #tpu.dot_dimension_numbers<[1], [0], [0], [1], [0, 0, 1, 1], [], []>} : vector<4x64xbf16>, vector<64x128xbf16>, vector<4x128xf32> -> vector<4x128xf32>
    %427 = arith.addf %422, %426 : vector<4x128xf32>
    %c12_527 = arith.constant 12 : index
    %c0_528 = arith.constant 0 : index
    %428 = vector.load %arg19[%c12_527, %c0_528] : memref<20x64xbf16, #tpu.memory_space<vmem>>, vector<4x64xbf16>
    %c1_529 = arith.constant 1 : index
    %c6_530 = arith.constant 6 : index
    %c0_531 = arith.constant 0 : index
    %c0_532 = arith.constant 0 : index
    %429 = vector.load %arg6[%c1_529, %c6_530, %c0_531, %c0_532] : memref<2x9x64x128xbf16, #tpu.memory_space<vmem>>, vector<1x1x64x128xbf16>
    %430 = vector.shape_cast %429 : vector<1x1x64x128xbf16> to vector<64x128xbf16>
    %cst_533 = arith.constant dense<0.000000e+00> : vector<4x128xf32>
    %431 = tpu.matmul %428, %430, %cst_533 {dimension_numbers = #tpu.dot_dimension_numbers<[1], [0], [0], [1], [0, 0, 1, 1], [], []>} : vector<4x64xbf16>, vector<64x128xbf16>, vector<4x128xf32> -> vector<4x128xf32>
    %432 = arith.addf %427, %431 : vector<4x128xf32>
    %c0_534 = arith.constant 0 : index
    %c0_535 = arith.constant 0 : index
    %433 = vector.load %arg19[%c0_534, %c0_535] : memref<20x64xbf16, #tpu.memory_space<vmem>>, vector<4x64xbf16>
    %c1_536 = arith.constant 1 : index
    %c7_537 = arith.constant 7 : index
    %c0_538 = arith.constant 0 : index
    %c0_539 = arith.constant 0 : index
    %434 = vector.load %arg6[%c1_536, %c7_537, %c0_538, %c0_539] : memref<2x9x64x128xbf16, #tpu.memory_space<vmem>>, vector<1x1x64x128xbf16>
    %435 = vector.shape_cast %434 : vector<1x1x64x128xbf16> to vector<64x128xbf16>
    %cst_540 = arith.constant dense<0.000000e+00> : vector<4x128xf32>
    %436 = tpu.matmul %433, %435, %cst_540 {dimension_numbers = #tpu.dot_dimension_numbers<[1], [0], [0], [1], [0, 0, 1, 1], [], []>} : vector<4x64xbf16>, vector<64x128xbf16>, vector<4x128xf32> -> vector<4x128xf32>
    %437 = arith.addf %432, %436 : vector<4x128xf32>
    %c16_541 = arith.constant 16 : index
    %c0_542 = arith.constant 0 : index
    %438 = vector.load %arg19[%c16_541, %c0_542] : memref<20x64xbf16, #tpu.memory_space<vmem>>, vector<4x64xbf16>
    %c1_543 = arith.constant 1 : index
    %c8_544 = arith.constant 8 : index
    %c0_545 = arith.constant 0 : index
    %c0_546 = arith.constant 0 : index
    %439 = vector.load %arg6[%c1_543, %c8_544, %c0_545, %c0_546] : memref<2x9x64x128xbf16, #tpu.memory_space<vmem>>, vector<1x1x64x128xbf16>
    %440 = vector.shape_cast %439 : vector<1x1x64x128xbf16> to vector<64x128xbf16>
    %cst_547 = arith.constant dense<0.000000e+00> : vector<4x128xf32>
    %441 = tpu.matmul %438, %440, %cst_547 {dimension_numbers = #tpu.dot_dimension_numbers<[1], [0], [0], [1], [0, 0, 1, 1], [], []>} : vector<4x64xbf16>, vector<64x128xbf16>, vector<4x128xf32> -> vector<4x128xf32>
    %442 = arith.addf %437, %441 : vector<4x128xf32>
    %cst_548 = arith.constant 0.000000e+00 : f32
    %443 = vector.broadcast %cst_548 : f32 to vector<4x128xf32>
    %444 = arith.cmpf oge, %442, %443 : vector<4x128xf32>
    %cst_549 = arith.constant 2.000000e-01 : f32
    %445 = vector.broadcast %cst_549 : f32 to vector<4x128xf32>
    %446 = arith.mulf %445, %442 : vector<4x128xf32>
    %447 = arith.select %444, %442, %446 : vector<4x128xi1>, vector<4x128xf32>
    %448 = arith.truncf %447 : vector<4x128xf32> to vector<4x128xbf16>
    %c1_550 = arith.constant 1 : index
    %c0_551 = arith.constant 0 : index
    %449 = vector.load %arg20[%c1_550, %c0_551] : memref<6x128xbf16, #tpu.memory_space<vmem>>, vector<4x128xbf16>
    tpu.vector_store %arg20[%c1_550, %c0_551], %448 {strides = array<i32>} : memref<6x128xbf16, #tpu.memory_space<vmem>>, vector<4x128xbf16>,
    %c0_552 = arith.constant 0 : index
    %c0_553 = arith.constant 0 : index
    %450 = vector.load %arg20[%c0_552, %c0_553] : memref<6x128xbf16, #tpu.memory_space<vmem>>, vector<4x128xbf16>
    %c1_554 = arith.constant 1 : index
    %c0_555 = arith.constant 0 : index
    %c0_556 = arith.constant 0 : index
    %c0_557 = arith.constant 0 : index
    %451 = vector.load %arg7[%c1_554, %c0_555, %c0_556, %c0_557] : memref<2x3x128x64xbf16, #tpu.memory_space<vmem>>, vector<1x1x128x64xbf16>
    %452 = vector.shape_cast %451 : vector<1x1x128x64xbf16> to vector<128x64xbf16>
    %cst_558 = arith.constant dense<0.000000e+00> : vector<4x64xf32>
    %453 = tpu.matmul %450, %452, %cst_558 {dimension_numbers = #tpu.dot_dimension_numbers<[1], [0], [0], [1], [0, 0, 1, 1], [], []>} : vector<4x128xbf16>, vector<128x64xbf16>, vector<4x64xf32> -> vector<4x64xf32>
    %454 = arith.addf %397, %453 : vector<4x64xf32>
    %c1_559 = arith.constant 1 : index
    %c0_560 = arith.constant 0 : index
    %455 = vector.load %arg20[%c1_559, %c0_560] : memref<6x128xbf16, #tpu.memory_space<vmem>>, vector<4x128xbf16>
    %c1_561 = arith.constant 1 : index
    %c1_562 = arith.constant 1 : index
    %c0_563 = arith.constant 0 : index
    %c0_564 = arith.constant 0 : index
    %456 = vector.load %arg7[%c1_561, %c1_562, %c0_563, %c0_564] : memref<2x3x128x64xbf16, #tpu.memory_space<vmem>>, vector<1x1x128x64xbf16>
    %457 = vector.shape_cast %456 : vector<1x1x128x64xbf16> to vector<128x64xbf16>
    %cst_565 = arith.constant dense<0.000000e+00> : vector<4x64xf32>
    %458 = tpu.matmul %455, %457, %cst_565 {dimension_numbers = #tpu.dot_dimension_numbers<[1], [0], [0], [1], [0, 0, 1, 1], [], []>} : vector<4x128xbf16>, vector<128x64xbf16>, vector<4x64xf32> -> vector<4x64xf32>
    %459 = arith.addf %454, %458 : vector<4x64xf32>
    %c2_566 = arith.constant 2 : index
    %c0_567 = arith.constant 0 : index
    %460 = vector.load %arg20[%c2_566, %c0_567] : memref<6x128xbf16, #tpu.memory_space<vmem>>, vector<4x128xbf16>
    %c1_568 = arith.constant 1 : index
    %c2_569 = arith.constant 2 : index
    %c0_570 = arith.constant 0 : index
    %c0_571 = arith.constant 0 : index
    %461 = vector.load %arg7[%c1_568, %c2_569, %c0_570, %c0_571] : memref<2x3x128x64xbf16, #tpu.memory_space<vmem>>, vector<1x1x128x64xbf16>
    %462 = vector.shape_cast %461 : vector<1x1x128x64xbf16> to vector<128x64xbf16>
    %cst_572 = arith.constant dense<0.000000e+00> : vector<4x64xf32>
    %463 = tpu.matmul %460, %462, %cst_572 {dimension_numbers = #tpu.dot_dimension_numbers<[1], [0], [0], [1], [0, 0, 1, 1], [], []>} : vector<4x128xbf16>, vector<128x64xbf16>, vector<4x64xf32> -> vector<4x64xf32>
    %464 = arith.addf %459, %463 : vector<4x64xf32>
    %cst_573 = arith.constant 0.000000e+00 : f32
    %465 = vector.broadcast %cst_573 : f32 to vector<4x64xf32>
    %466 = arith.cmpf oge, %464, %465 : vector<4x64xf32>
    %cst_574 = arith.constant 2.000000e-01 : f32
    %467 = vector.broadcast %cst_574 : f32 to vector<4x64xf32>
    %468 = arith.mulf %467, %464 : vector<4x64xf32>
    %469 = arith.select %466, %464, %468 : vector<4x64xi1>, vector<4x64xf32>
    %c0_575 = arith.constant 0 : index
    %c0_576 = arith.constant 0 : index
    %c0_577 = arith.constant 0 : index
    %470 = vector.load %arg14[%c0_575, %c0_576, %c0_577] : memref<1x4x64xf32, #tpu.memory_space<vmem>>, vector<1x4x64xf32>
    %471 = vector.shape_cast %470 : vector<1x4x64xf32> to vector<4x64xf32>
    %472 = vector.shape_cast %469 : vector<4x64xf32> to vector<1x4x64xf32>
    tpu.vector_store %arg14[%c0_575, %c0_576, %c0_577], %472 {strides = array<i32>} : memref<1x4x64xf32, #tpu.memory_space<vmem>>, vector<1x4x64xf32>,
    return
  }
  func.func @transform_0(%arg0: i32) -> (i32, i32, i32) {
    %c0_i32 = arith.constant 0 : i32
    %c0_i32_0 = arith.constant 0 : i32
    %c0_i32_1 = arith.constant 0 : i32
    return %arg0, %c0_i32, %c0_i32_0 : i32, i32, i32
  }
  func.func @transform_1(%arg0: i32) -> (i32, i32, i32, i32) {
    %c0_i32 = arith.constant 0 : i32
    %c0_i32_0 = arith.constant 0 : i32
    %c0_i32_1 = arith.constant 0 : i32
    %c0_i32_2 = arith.constant 0 : i32
    %c0_i32_3 = arith.constant 0 : i32
    return %c0_i32, %c0_i32_0, %c0_i32_1, %c0_i32_2 : i32, i32, i32, i32
  }
  func.func @transform_2(%arg0: i32) -> (i32, i32, i32, i32) {
    %c0_i32 = arith.constant 0 : i32
    %c0_i32_0 = arith.constant 0 : i32
    %c0_i32_1 = arith.constant 0 : i32
    %c0_i32_2 = arith.constant 0 : i32
    %c0_i32_3 = arith.constant 0 : i32
    return %c0_i32, %c0_i32_0, %c0_i32_1, %c0_i32_2 : i32, i32, i32, i32
  }
  func.func @transform_3(%arg0: i32) -> (i32, i32, i32, i32) {
    %c0_i32 = arith.constant 0 : i32
    %c0_i32_0 = arith.constant 0 : i32
    %c0_i32_1 = arith.constant 0 : i32
    %c0_i32_2 = arith.constant 0 : i32
    %c0_i32_3 = arith.constant 0 : i32
    return %c0_i32, %c0_i32_0, %c0_i32_1, %c0_i32_2 : i32, i32, i32, i32
  }
  func.func @transform_4(%arg0: i32) -> (i32, i32, i32, i32) {
    %c0_i32 = arith.constant 0 : i32
    %c0_i32_0 = arith.constant 0 : i32
    %c0_i32_1 = arith.constant 0 : i32
    %c0_i32_2 = arith.constant 0 : i32
    %c0_i32_3 = arith.constant 0 : i32
    return %c0_i32, %c0_i32_0, %c0_i32_1, %c0_i32_2 : i32, i32, i32, i32
  }
  func.func @transform_5(%arg0: i32) -> (i32, i32, i32, i32) {
    %c0_i32 = arith.constant 0 : i32
    %c0_i32_0 = arith.constant 0 : i32
    %c0_i32_1 = arith.constant 0 : i32
    %c0_i32_2 = arith.constant 0 : i32
    %c0_i32_3 = arith.constant 0 : i32
    return %c0_i32, %c0_i32_0, %c0_i32_1, %c0_i32_2 : i32, i32, i32, i32
  }
  func.func @transform_6(%arg0: i32) -> (i32, i32, i32, i32) {
    %c0_i32 = arith.constant 0 : i32
    %c0_i32_0 = arith.constant 0 : i32
    %c0_i32_1 = arith.constant 0 : i32
    %c0_i32_2 = arith.constant 0 : i32
    %c0_i32_3 = arith.constant 0 : i32
    return %c0_i32, %c0_i32_0, %c0_i32_1, %c0_i32_2 : i32, i32, i32, i32
  }
  func.func @transform_7(%arg0: i32) -> (i32, i32) {
    %c0_i32 = arith.constant 0 : i32
    %c0_i32_0 = arith.constant 0 : i32
    %c0_i32_1 = arith.constant 0 : i32
    return %c0_i32, %c0_i32_0 : i32, i32
  }
  func.func @transform_8(%arg0: i32) -> (i32, i32) {
    %c0_i32 = arith.constant 0 : i32
    %c0_i32_0 = arith.constant 0 : i32
    %c0_i32_1 = arith.constant 0 : i32
    return %c0_i32, %c0_i32_0 : i32, i32
  }
  func.func @transform_9(%arg0: i32) -> (i32, i32) {
    %c0_i32 = arith.constant 0 : i32
    %c0_i32_0 = arith.constant 0 : i32
    %c0_i32_1 = arith.constant 0 : i32
    return %c0_i32, %c0_i32_0 : i32, i32
  }
  func.func @transform_10(%arg0: i32) -> (i32, i32) {
    %c0_i32 = arith.constant 0 : i32
    %c0_i32_0 = arith.constant 0 : i32
    %c0_i32_1 = arith.constant 0 : i32
    return %c0_i32, %c0_i32_0 : i32, i32
  }
  func.func @transform_11(%arg0: i32) -> (i32, i32, i32) {
    %c0_i32 = arith.constant 0 : i32
    %c0_i32_0 = arith.constant 0 : i32
    %c0_i32_1 = arith.constant 0 : i32
    return %arg0, %c0_i32, %c0_i32_0 : i32, i32, i32
  }
  func.func @transform_12(%arg0: i32) -> (i32, i32, i32) {
    %c0_i32 = arith.constant 0 : i32
    %c0_i32_0 = arith.constant 0 : i32
    %c0_i32_1 = arith.constant 0 : i32
    return %arg0, %c0_i32, %c0_i32_0 : i32, i32, i32
  }
  func.func @transform_13(%arg0: i32) -> (i32, i32, i32) {
    %c0_i32 = arith.constant 0 : i32
    %c0_i32_0 = arith.constant 0 : i32
    %c0_i32_1 = arith.constant 0 : i32
    return %arg0, %c0_i32, %c0_i32_0 : i32, i32, i32
  }
}

</mosaic_0001>

<bundles_post_ra>
// kernel: encoder_forward.1
= control target key start
LH: loop header
LB: loop body
LE: loop exit
PB: predicated region body
PF: predicated region fallthrough
CT: control target
= control target key end

     0   :  { %s14612_s0 = inlined_call_operand.vmem [shape: f32[2,16,128], index: 0, kind: input, shape index: {}]   ;;  %s14613_s1 = inlined_call_operand.hbm [shape: bf16[2,9,128,256], index: 1, kind: input, shape index: {}]   ;;  %s14614_s2 = inlined_call_operand.hbm [shape: bf16[2,3,256,128], index: 2, kind: input, shape index: {}]   ;;  %s14615_s3 = inlined_call_operand.hbm [shape: bf16[2,9,96,192], index: 3, kind: input, shape index: {}]   ;;  %s14616_s4 = inlined_call_operand.hbm [shape: bf16[2,3,192,96], index: 4, kind: input, shape index: {}]   ;;  %s14617_s5 = inlined_call_operand.hbm [shape: bf16[2,9,64,128], index: 5, kind: input, shape index: {}]   ;;  %s14618_s6 = inlined_call_operand.vmem [shape: bf16[2,3,128,64], index: 6, kind: input, shape index: {}]   ;;  %s14619_s7 = inlined_call_operand.hbm [shape: bf16[8,16], index: 7, kind: input, shape index: {}]   ;;  %s14620_s8 = inlined_call_operand.vmem [shape: bf16[128,96], index: 8, kind: input, shape index: {}]   ;;  %s14621_s9 = inlined_call_operand.hbm [shape: bf16[4,8], index: 9, kind: input, shape index: {}]   ;;  %s14622_s10 = inlined_call_operand.vmem [shape: bf16[96,64], index: 10, kind: input, shape index: {}]   ;;  %s14623_s11 = inlined_call_operand.vmem [shape: f32[2,16,128], index: 11, kind: output, shape index: {0}]   ;;  %s14624_s12 = inlined_call_operand.vmem [shape: f32[2,8,96], index: 12, kind: output, shape index: {1}]   ;;  %s14625_s13 = inlined_call_operand.vmem [shape: f32[2,4,64], index: 13, kind: output, shape index: {2}]  }
   0x1   :  { %14629 = sst [smem:[#allocation23_spill]] %s14614_s2 }
   0x2   :  { %14630 = sst [smem:[#allocation24_spill]] %s14616_s4 }
   0x3   :  { %19 = vsyncpa [#allocation9], 0 }
   0x4   :  { %20 = vsyncpa [#allocation11], 0 }
   0x5   :  { %21 = vsyncpa [#allocation14], 0 }
   0x6   :  { %22 = vsyncpa [#allocation17], 0  ;;  %s13812_s25 = smov 0  }
   0x7 LB: > { %s14631_s2 = sld [smem:[#allocation23_spill]]  ;;  %s13821_s29 = sadd.s32 4294967295, %s13728_s25   ;;  %s13728_s25 = sphi %s13812_s25, %s28_s25  }
   0x8   : > { %p9160_p0 = scmp.ge.s32.totalorder %s13728_s25, 1  ;;  %p347_p1 = scmp.lt.s32.totalorder %s13728_s25, 3 }
   0x9   : > { %p13460_p2 = scmp.eq.s32.totalorder %s13821_s29, 0  ;;  %s13730_s14 = smov [#allocation10]  }
   0xa   : > { %p13826_p3 = pnand %p9160_p0, %p347_p1  ;;  %s374_s15 = sshll.u32 %s13730_s14, 4  ;;  %s375_s15 = int_to_ptr.vmem [resolvable:$true] %s374_s15 }
   0xb   : > { %s14633_s4 = sld [smem:[#allocation24_spill]]  ;;  %s13731_s20 = smov [#allocation13]  }
   0xc   : > { %p13438_p4 = pneg %p13826_p3  ;;  %s402_s21 = sshll.u32 %s13731_s20, 4  ;;  %s403_s21 = int_to_ptr.vmem [resolvable:$true] %s402_s21 }
   0xd   : > { %s372_s28 = sshll.u32 %s14631_s2, 4  ;;  %s432_s24 = sshll.u32 %s14619_s7, 4  ;;  %s373_s28 = int_to_ptr.hbm [resolvable:$true] %s372_s28  ;;  %s433_s24 = int_to_ptr.hbm [resolvable:$true] %s432_s24 }
   0xe   : > { %p13837_p5 = pnand %p13460_p2, %p13438_p4  ;;  %s14626_s26 = smov 64  }
   0xf   : > { %s14627_s27 = smov 4   ;;  %s13734_s14 = smov [#allocation16]  }
  0x10   : > { %13444 = dma.hbm_to_vmem [thread:$0]  (!%p13837_p5), %s373_s28, 12288, %s375_s15, [#allocation11], %s14626_s26, %s14626_s26, %s14627_s27  }
  0x11   : > { %s400_s18 = sshll.u32 %s14633_s4, 4  ;;  %s434_s16 = sshll.u32 %s13734_s14, 4  ;;  %s401_s18 = int_to_ptr.hbm [resolvable:$true] %s400_s18  ;;  %s435_s16 = int_to_ptr.vmem [resolvable:$true] %s434_s16 }
  0x12   : > { %13450 = dma.hbm_to_vmem [thread:$0]  (!%p13837_p5), %s401_s18, 9216, %s403_s21, [#allocation14], %s14626_s26, %s14626_s26, %s14627_s27  }
  0x13   : > { %s358_s22 = sshll.u32 %s14613_s1, 4  ;;  %s13735_s23 = smov [#allocation8]   ;;  %s359_s22 = int_to_ptr.hbm [resolvable:$true] %s358_s22 }
  0x14   : > { %13456 = dma.hbm_to_vmem [thread:$0]  (!%p13837_p5), %s433_s24, 64, %s435_s16, [#allocation17]  }
  0x15   : > { %s360_s2 = sshll.u32 %s13735_s23, 4  ;;  %s386_s4 = sshll.u32 %s14615_s3, 4  ;;  %s361_s2 = int_to_ptr.vmem [resolvable:$true] %s360_s2  ;;  %s387_s4 = int_to_ptr.hbm [resolvable:$true] %s386_s4 }
  0x16   : > { %s13736_s18 = smov 128   ;;  %s13737_s21 = smov 8  }
  0x17   : > { %13441 = dma.hbm_to_vmem [thread:$0]  (!%p13837_p5), %s359_s22, 36864, %s361_s2, [#allocation9], %s13736_s18, %s13736_s18, %s13737_s21  }
  0x18   : > { %s13738_s14 = smov [#allocation12]   ;;  %s414_s24 = sshll.u32 %s14617_s5, 4  ;;  %s415_s24 = int_to_ptr.hbm [resolvable:$true] %s414_s24 }
  0x19   : > { %s388_s17 = sshll.u32 %s13738_s14, 4  ;;  %s447_s28 = sshll.u32 %s14621_s9, 4  ;;  %s389_s17 = int_to_ptr.vmem [resolvable:$true] %s388_s17  ;;  %s448_s28 = int_to_ptr.hbm [resolvable:$true] %s447_s28 }
  0x1a   : > { %13447 = dma.hbm_to_vmem [thread:$0]  (!%p13837_p5), %s387_s4, 27648, %s389_s17, [#allocation11], %s13736_s18, %s13736_s18, %s13737_s21  }
  0x1b   : > { %s13739_s15 = smov [#allocation15]   ;;  %s14635_s2 = smov 4  }
  0x1c   : > { %s416_s27 = sshll.u32 %s13739_s15, 4  ;;  %s14636_s22 = smov 64   ;;  %s417_s27 = int_to_ptr.vmem [resolvable:$true] %s416_s27 }
  0x1d   : > { %13453 = dma.hbm_to_vmem [thread:$0]  (!%p13837_p5), %s415_s24, 9216, %s417_s27, [#allocation14], %s14636_s22, %s14636_s22, %s14635_s2  }
  0x1e   : > { %s13740_s14 = smov [#allocation18]   ;;  %473 = sbr.rel (%p13826_p3) target bundleno = 3018 (0xbca), region = 64 }
  0x1f   : > { %s449_s26 = sshll.u32 %s13740_s14, 4  ;;  %s450_s26 = int_to_ptr.vmem [resolvable:$true] %s449_s26 }
  0x20   : > { %13459 = dma.hbm_to_vmem [thread:$0]  (!%p13837_p5), %s448_s28, 32, %s450_s26, [#allocation17]  }
  0x23   : > { %13711 = dma.done.wait (%p13460_p2), [#allocation9], 36864  }
  0x24   : > { %13713 = vsyncadd (%p13460_p2), [#allocation9], 4294930432 }
  0x25   : > { %13715 = dma.done.wait (%p13460_p2), [#allocation11], 39936  }
  0x26   : > { %13717 = vsyncadd (%p13460_p2), [#allocation11], 4294927360 }
  0x27   : > { %13719 = dma.done.wait (%p13460_p2), [#allocation14], 18432  }
  0x28   : > { %13721 = vsyncadd (%p13460_p2), [#allocation14], 4294948864 }
  0x29   : > { %13723 = dma.done.wait (%p13460_p2), [#allocation17], 96  }
  0x2a   : > { %13725 = vsyncadd (%p13460_p2), [#allocation17], 4294967200  ;;  %v13741_v0 = vmov 0   ;;  %v9241_v1 = vld [vmem:[#allocation8 + $0xf0] sm:$0xf]  ;;  %p556_p6 = scmp.lt.s32.totalorder %s13821_s29, 1 }
  0x2b   : > { %575 = vst [vmem:[#allocation2] sm:$0xf] %v13741_v0  ;;  %v12625_v2 = vld [vmem:[#allocation8 + $0xf4] sm:$0xf0]  ;;  %v12624_v3 = vld [vmem:[#allocation8 + $0xf4] sm:$0xf] }
  0x2c   : > { %v9242_v4 = vor.u32 %v12625_v2, %v9241_v1  ;;  %v9243_v5 = vld [vmem:[#allocation8 + $0xf8] sm:$0xf0]  ;;  %v9305_v6 = vld [vmem:[#allocation8 + $0x70] sm:$0xf]  ;;  %v12609_v7 = vld [vmem:[#allocation8 + $0x74] sm:$0xf0] }
  0x2d   : > { %v9246_v8 = vor.u32 %v12624_v3, %v9243_v5  ;;  %v9306_v9 = vor.u32 %v12609_v7, %v9305_v6  ;;  %v12608_v10 = vld [vmem:[#allocation8 + $0x74] sm:$0xf]  ;;  %v9307_v11 = vld [vmem:[#allocation8 + $0x78] sm:$0xf0]  ;;  %v9233_v12 = vld [vmem:[#allocation8 + $0xe0] sm:$0xf] }
  0x2e   : > { %772 = vmatpush.bf16.msra.mxu0 %v9242_v4  ;;  %v9310_v13 = vor.u32 %v12608_v10, %v9307_v11  ;;  %v12623_v14 = vld [vmem:[#allocation8 + $0xe4] sm:$0xf0]  ;;  %v12622_v15 = vld [vmem:[#allocation8 + $0xe4] sm:$0xf]  ;;  %v9235_v16 = vld [vmem:[#allocation8 + $0xe8] sm:$0xf0] }
  0x2f   : > { %786 = vmatpush.bf16.msra.mxu1 %v9246_v8  ;;  %886 = vmatpush.bf16.msra.mxu2 %v9306_v9  ;;  %v9234_v17 = vor.u32 %v12623_v14, %v9233_v12  ;;  %v9238_v18 = vor.u32 %v12622_v15, %v9235_v16  ;;  %v9297_v19 = vld [vmem:[#allocation8 + $0x60] sm:$0xf]  ;;  %v12607_v20 = vld [vmem:[#allocation8 + $0x64] sm:$0xf0]  ;;  %v12606_v21 = vld [vmem:[#allocation8 + $0x64] sm:$0xf] }
  0x30   : > { %900 = vmatpush.bf16.msra.mxu3 %v9310_v13  ;;  %v9298_v22 = vor.u32 %v12607_v20, %v9297_v19  ;;  %v9299_v23 = vld [vmem:[#allocation8 + $0x68] sm:$0xf0]  ;;  %v9225_v24 = vld [vmem:[#allocation8 + $0xd0] sm:$0xf]  ;;  %v12621_v25 = vld [vmem:[#allocation8 + $0xd4] sm:$0xf0] }
  0x31   : > { %v9302_v26 = vor.u32 %v12606_v21, %v9299_v23  ;;  %v12620_v27 = vld [vmem:[#allocation8 + $0xd4] sm:$0xf]  ;;  %v9227_v28 = vld [vmem:[#allocation8 + $0xd8] sm:$0xf0]  ;;  %v9289_v29 = vld [vmem:[#allocation8 + $0x50] sm:$0xf]  ;;  %v9226_v30 = vor.u32 %v12621_v25, %v9225_v24 }
  0x32   : > { %773 = vmatpush.bf16.msra.mxu0 %v9234_v17  ;;  %v12605_v31 = vld [vmem:[#allocation8 + $0x54] sm:$0xf0]  ;;  %v12604_v32 = vld [vmem:[#allocation8 + $0x54] sm:$0xf]  ;;  %v9291_v33 = vld [vmem:[#allocation8 + $0x58] sm:$0xf0]  ;;  %v9230_v34 = vor.u32 %v12620_v27, %v9227_v28 }
  0x33   : > { %787 = vmatpush.bf16.msra.mxu1 %v9238_v18  ;;  %887 = vmatpush.bf16.msra.mxu2 %v9298_v22  ;;  %v9290_v35 = vor.u32 %v12605_v31, %v9289_v29  ;;  %v9217_v36 = vld [vmem:[#allocation8 + $0xc0] sm:$0xf]  ;;  %v12619_v37 = vld [vmem:[#allocation8 + $0xc4] sm:$0xf0]  ;;  %v12618_v38 = vld [vmem:[#allocation8 + $0xc4] sm:$0xf]  ;;  %v9294_v39 = vor.u32 %v12604_v32, %v9291_v33 }
  0x34   : > { %901 = vmatpush.bf16.msra.mxu3 %v9302_v26  ;;  %v9219_v40 = vld [vmem:[#allocation8 + $0xc8] sm:$0xf0]  ;;  %v9281_v41 = vld [vmem:[#allocation8 + $0x40] sm:$0xf]  ;;  %v12603_v42 = vld [vmem:[#allocation8 + $0x44] sm:$0xf0]  ;;  %v9218_v45 = vor.u32 %v12619_v37, %v9217_v36 }
  0x35   : > { %v12602_v43 = vld [vmem:[#allocation8 + $0x44] sm:$0xf]  ;;  %v9283_v44 = vld [vmem:[#allocation8 + $0x48] sm:$0xf0]  ;;  %v9222_v46 = vor.u32 %v12618_v38, %v9219_v40  ;;  %v9282_v47 = vor.u32 %v12603_v42, %v9281_v41  ;;  %v9209_v48 = vld [vmem:[#allocation8 + $0xb0] sm:$0xf] }
  0x36   : > { %774 = vmatpush.bf16.msra.mxu0 %v9226_v30  ;;  %v12617_v49 = vld [vmem:[#allocation8 + $0xb4] sm:$0xf0]  ;;  %v12616_v50 = vld [vmem:[#allocation8 + $0xb4] sm:$0xf]  ;;  %v9286_v51 = vor.u32 %v12602_v43, %v9283_v44  ;;  %v9211_v52 = vld [vmem:[#allocation8 + $0xb8] sm:$0xf0] }
  0x37   : > { %788 = vmatpush.bf16.msra.mxu1 %v9230_v34  ;;  %888 = vmatpush.bf16.msra.mxu2 %v9290_v35  ;;  %v9273_v53 = vld [vmem:[#allocation8 + $0x30] sm:$0xf]  ;;  %v12601_v54 = vld [vmem:[#allocation8 + $0x34] sm:$0xf0]  ;;  %v12600_v55 = vld [vmem:[#allocation8 + $0x34] sm:$0xf]  ;;  %v9210_v57 = vor.u32 %v12617_v49, %v9209_v48  ;;  %v9214_v58 = vor.u32 %v12616_v50, %v9211_v52 }
  0x38   : > { %902 = vmatpush.bf16.msra.mxu3 %v9294_v39  ;;  %v9275_v56 = vld [vmem:[#allocation8 + $0x38] sm:$0xf0]  ;;  %v9274_v59 = vor.u32 %v12601_v54, %v9273_v53  ;;  %v9201_v60 = vld [vmem:[#allocation8 + $0xa0] sm:$0xf]  ;;  %v12615_v61 = vld [vmem:[#allocation8 + $0xa4] sm:$0xf0] }
  0x39   : > { %v12614_v62 = vld [vmem:[#allocation8 + $0xa4] sm:$0xf]  ;;  %v9278_v63 = vor.u32 %v12600_v55, %v9275_v56  ;;  %v9203_v1 = vld [vmem:[#allocation8 + $0xa8] sm:$0xf0]  ;;  %v9265_v2 = vld [vmem:[#allocation8 + $0x20] sm:$0xf]  ;;  %v9202_v6 = vor.u32 %v12615_v61, %v9201_v60 }
  0x3a   : > { %775 = vmatpush.bf16.msra.mxu0 %v9218_v45  ;;  %v12599_v3 = vld [vmem:[#allocation8 + $0x24] sm:$0xf0]  ;;  %v12598_v4 = vld [vmem:[#allocation8 + $0x24] sm:$0xf]  ;;  %v9267_v5 = vld [vmem:[#allocation8 + $0x28] sm:$0xf0]  ;;  %v9206_v7 = vor.u32 %v12614_v62, %v9203_v1 }
  0x3b   : > { %789 = vmatpush.bf16.msra.mxu1 %v9222_v46  ;;  %889 = vmatpush.bf16.msra.mxu2 %v9282_v47  ;;  %s14659_s29 = smov (!%p556_p6, %s13821_s29), 1  ;;  %v9266_v8 = vor.u32 %v12599_v3, %v9265_v2  ;;  %v9193_v9 = vld [vmem:[#allocation8 + $0x90] sm:$0xf]  ;;  %v12613_v10 = vld [vmem:[#allocation8 + $0x94] sm:$0xf0]  ;;  %v9270_v12 = vor.u32 %v12598_v4, %v9267_v5  ;;  %vm577_vm0 = vcmask 1040384  }
  0x3c   : > { %903 = vmatpush.bf16.msra.mxu3 %v9286_v51  ;;  %v12612_v11 = vld [vmem:[#allocation8 + $0x94] sm:$0xf]  ;;  %v9195_v13 = vld [vmem:[#allocation8 + $0x98] sm:$0xf0]  ;;  %v9257_v14 = vld [vmem:[#allocation8 + $0x10] sm:$0xf]  ;;  %v9194_v18 = vor.u32 %v12613_v10, %v9193_v9 }
  0x3d   : > { %v12597_v15 = vld [vmem:[#allocation8 + $0x14] sm:$0xf0]  ;;  %v12596_v16 = vld [vmem:[#allocation8 + $0x14] sm:$0xf]  ;;  %v9259_v17 = vld [vmem:[#allocation8 + $0x18] sm:$0xf0]  ;;  %v9198_v21 = vor.u32 %v12612_v11, %v9195_v13 }
  0x3e   : > { %776 = vmatpush.bf16.msra.mxu0 %v9210_v57  ;;  %v9185_v19 = vld [vmem:[#allocation8 + $0x80] sm:$0xf]  ;;  %v12611_v20 = vld [vmem:[#allocation8 + $0x84] sm:$0xf0]  ;;  %s12592_s4 = sshll.u32 %s14659_s29, 4  ;;  %v9258_v22 = vor.u32 %v12597_v15, %v9257_v14  ;;  %v9262_v26 = vor.u32 %v12596_v16, %v9259_v17  ;;  %vm580_vm3 = vcmask 1044484  }
  0x3f   : > { %790 = vmatpush.bf16.msra.mxu1 %v9214_v58  ;;  %890 = vmatpush.bf16.msra.mxu2 %v9274_v59  ;;  %v12610_v23 = vld [vmem:[#allocation8 + $0x84] sm:$0xf]  ;;  %v9187_v24 = vld [vmem:[#allocation8 + $0x88] sm:$0xf0]  ;;  %v9249_v25 = vld [vmem:[#allocation8] sm:$0xf]  ;;  %v9186_v33 = vor.u32 %v12611_v20, %v9185_v19  ;;  %s13910_s27 = scalar_lea.vmem %s14612_s0, %s12592_s4  ;;  %s565_s26 = scalar_lea.vmem %s14623_s11, %s12592_s4 }
  0x40   : > { %904 = vmatpush.bf16.msra.mxu3 %v9278_v63  ;;  %v12595_v27 = vld [vmem:[#allocation8 + $0x4] sm:$0xf0]  ;;  %v12594_v28 = vld [vmem:[#allocation8 + $0x4] sm:$0xf]  ;;  %v9251_v29 = vld [vmem:[#allocation8 + $0x8] sm:$0xf0]  ;;  %v9190_v37 = vor.u32 %v12610_v23, %v9187_v24 }
  0x41   : > { %v9369_v30 = vld [vmem:[#allocation8 + $0x170] sm:$0xf]  ;;  %v12641_v31 = vld [vmem:[#allocation8 + $0x174] sm:$0xf0]  ;;  %v12640_v32 = vld [vmem:[#allocation8 + $0x174] sm:$0xf]  ;;  %v9250_v38 = vor.u32 %v12595_v27, %v9249_v25  ;;  %v9254_v41 = vor.u32 %v12594_v28, %v9251_v29 }
  0x42   : > { %777 = vmatpush.bf16.msra.mxu0 %v9202_v6  ;;  %v9371_v34 = vld [vmem:[#allocation8 + $0x178] sm:$0xf0]  ;;  %v9433_v35 = vld [vmem:[#allocation8 + $0x1f0] sm:$0xf]  ;;  %v12657_v36 = vld [vmem:[#allocation8 + $0x1f4] sm:$0xf0]  ;;  %v9370_v42 = vor.u32 %v12641_v31, %v9369_v30 }
  0x43   : > { %791 = vmatpush.bf16.msra.mxu1 %v9206_v7  ;;  %891 = vmatpush.bf16.msra.mxu2 %v9266_v8  ;;  %v12656_v39 = vld [vmem:[#allocation8 + $0x1f4] sm:$0xf]  ;;  %v9435_v40 = vld [vmem:[#allocation8 + $0x1f8] sm:$0xf0]  ;;  %v9361_v43 = vld [vmem:[#allocation8 + $0x160] sm:$0xf]  ;;  %v9374_v45 = vor.u32 %v12640_v32, %v9371_v34  ;;  %v9434_v46 = vor.u32 %v12657_v36, %v9433_v35 }
  0x44   : > { %905 = vmatpush.bf16.msra.mxu3 %v9270_v12  ;;  %v12639_v44 = vld [vmem:[#allocation8 + $0x164] sm:$0xf0]  ;;  %v12638_v47 = vld [vmem:[#allocation8 + $0x164] sm:$0xf]  ;;  %v9363_v48 = vld [vmem:[#allocation8 + $0x168] sm:$0xf0]  ;;  %v9438_v50 = vor.u32 %v12656_v39, %v9435_v40 }
  0x45   : > { %v9425_v49 = vld [vmem:[#allocation8 + $0x1e0] sm:$0xf]  ;;  %v12655_v51 = vld [vmem:[#allocation8 + $0x1e4] sm:$0xf0]  ;;  %v12654_v52 = vld [vmem:[#allocation8 + $0x1e4] sm:$0xf]  ;;  %v9362_v58 = vor.u32 %v12639_v44, %v9361_v43  ;;  %v9366_v1 = vor.u32 %v12638_v47, %v9363_v48 }
  0x46   : > { %778 = vmatpush.bf16.msra.mxu0 %v9194_v18  ;;  %v9427_v53 = vld [vmem:[#allocation8 + $0x1e8] sm:$0xf0]  ;;  %v13912_v54 = vld [vmem:[#allocation8 + $0x150] sm:$0xf]  ;;  %v13914_v55 = vld [vmem:[#allocation8 + $0x154] sm:$0xf0]  ;;  %v9426_v2 = vor.u32 %v12655_v51, %v9425_v49 }
  0x47   : > { %792 = vmatpush.bf16.msra.mxu1 %v9198_v21  ;;  %892 = vmatpush.bf16.msra.mxu2 %v9258_v22  ;;  %vm578_vm1 = vsmask.f32 256  ;;  %v584_v56 = vld [vmem:[#allocation3] sm:$0x11]  ;;  %v624_v57 = vld [vmem:[%s13910_s27] sm:$0xff]  ;;  %v9430_v6 = vor.u32 %v12654_v52, %v9427_v53  ;;  %vm598_vm10 = vcmask 520196   ;;  %v9354_v16 = vor.u32 %v13914_v55, %v13912_v54 }
  0x48   : > { %906 = vmatpush.bf16.msra.mxu3 %v9262_v26  ;;  %v13917_v59 = vld [vmem:[#allocation8 + $0x154] sm:$0xf]  ;;  %v13919_v60 = vld [vmem:[#allocation8 + $0x158] sm:$0xf0]  ;;  %v13921_v61 = vld [vmem:[#allocation8 + $0x1d0] sm:$0xf]  ;;  %v626_v5 = vpack.c.bf16 %v624_v57, %v624_v57 }
  0x49   : > { %v13923_v62 = vld [vmem:[#allocation8 + $0x1d4] sm:$0xf0]  ;;  %vm13927_vm2 = vmand %vm577_vm0, %vm578_vm1  ;;  %vm581_vm4 = vsmask.f32 4352  ;;  %vm587_vm5 = vsmask.f32 7938  ;;  %v9358_v23 = vor.u32 %v13917_v59, %v13919_v60 }
  0x4a   : > { %779 = vmatpush.bf16.msra.mxu0 %v9186_v33  ;;  %v13931_v3 = vld [vmem:[#allocation8 + $0x1d4] sm:$0xf]  ;;  %v13933_v4 = vld [vmem:[#allocation8 + $0x1d8] sm:$0xf0]  ;;  %vm582_vm6 = vmand %vm580_vm3, %vm581_vm4  ;;  %vm589_vm7 = vsmask.f32 7954  ;;  %v802_v22 = vunpack.c.l.b16 %v626_v5  ;;  %v9418_v24 = vor.u32 %v13923_v62, %v13921_v61 }
  0x4b   : > { %793 = vmatpush.bf16.msra.mxu1 %v9190_v37  ;;  %893 = vmatpush.bf16.msra.mxu2 %v9250_v38  ;;  %vm13939_vm8 = vmor %vm582_vm6, %vm13927_vm2  ;;  %v592_v8 = vld [vmem:[#allocation3 + $0x10] sm:$0x11]  ;;  %v615_v9 = vld [vmem:[#allocation7] sm:$0x1]  ;;  %628 = vst [vmem:[#allocation2 + $0x4] sm:$0xf] %v626_v5  ;;  %v9422_v28 = vor.u32 %v13931_v3, %v13933_v4 }
  0x4c   : > { %907 = vmatpush.bf16.msra.mxu3 %v9254_v41  ;;  %v13943_v10 = vld [vmem:[#allocation8 + $0x140] sm:$0xf]  ;;  %v13945_v11 = vld [vmem:[#allocation8 + $0x144] sm:$0xf0]  ;;  %v585_v12 = vsel %vm13939_vm8, 0, %v584_v56  ;;  %vm13951_vm9 = vmand %vm577_vm0, %vm587_vm5  ;;  %v616_v14 = vsel %vm13927_vm2, 0, %v615_v9 }
  0x4d   : > { %v625_v15 = vld [vmem:[%s13910_s27 + $0x8] sm:$0xff]  ;;  %v13960_v17 = vld [vmem:[#allocation8 + $0x144] sm:$0xf]  ;;  %v13962_v18 = vld [vmem:[#allocation8 + $0x148] sm:$0xf0]  ;;  %vm14628_vm14 = vcmask 1043456   ;;  %v9346_v36 = vor.u32 %v13945_v11, %v13943_v10 }
  0x4e   : > { %1036 = vmatpush.bf16.msrb.mxu0 %v9370_v42  ;;  %v13964_v19 = vld [vmem:[#allocation8 + $0x1c0] sm:$0xf]  ;;  %v13966_v20 = vld [vmem:[#allocation8 + $0x1c4] sm:$0xf0]  ;;  %586 = vst [vmem:[#allocation3] sm:$0x11] %v585_v12  ;;  %vm590_vm11 = vmand %vm580_vm3, %vm589_vm7  ;;  %v627_v21 = vpack.c.bf16 %v625_v15, %v625_v15  ;;  %v9350_v42 = vor.u32 %v13960_v17, %v13962_v18 }
  0x4f   : > { %1050 = vmatpush.bf16.msrb.mxu1 %v9374_v45  ;;  %1174 = vmatpush.bf16.msrb.mxu2 %v9434_v46  ;;  %v12650_v25 = vld [vmem:[#allocation8 + $0x1c4] sm:$0xf]  ;;  %v9411_v26 = vld [vmem:[#allocation8 + $0x1c8] sm:$0xf0]  ;;  %vm591_vm12 = vmor %vm590_vm11, %vm13951_vm9  ;;  %617 = vst [vmem:[#allocation7] sm:$0x1] %v616_v14  ;;  %v9410_v43 = vor.u32 %v13966_v20, %v13964_v19 }
  0x50   : > { %1188 = vmatpush.bf16.msrb.mxu3 %v9438_v50  ;;  %v601_v27 = vld [vmem:[#allocation5] sm:$0x11]  ;;  %v593_v29 = vsel %vm591_vm12, 0, %v592_v8  ;;  %vm599_vm13 = vmand %vm598_vm10, %vm581_vm4  ;;  %v606_v30 = vld [vmem:[#allocation5 + $0x8] sm:$0x11]  ;;  %v803_v31 = vunpack.c.l.b16 %v627_v21  ;;  %v9414_v46 = vor.u32 %v12650_v25, %v9411_v26  ;;  %vm5464_vm6 = vcmask 523268  }
  0x51   : > { %629 = vst [vmem:[#allocation2 + $0x8] sm:$0xf] %v627_v21  ;;  %vm13982_vm15 = vmor %vm599_vm13, %vm13927_vm2  ;;  %v646_v33 = vld [vmem:[#allocation2] sm:$0x8]  ;;  %v9337_v34 = vld [vmem:[#allocation8 + $0x130] sm:$0xf] }
  0x52   : > { %1037 = vmatpush.bf16.msrb.mxu0 %v9362_v58  ;;  %594 = vst [vmem:[#allocation3 + $0x10] sm:$0x11] %v593_v29  ;;  %v12633_v35 = vld [vmem:[#allocation8 + $0x134] sm:$0xf0]  ;;  %v602_v37 = vsel %vm13982_vm15, 0, %v601_v27  ;;  %vm13992_vm0 = vmand %vm598_vm10, %vm589_vm7  ;;  %vm1936_vm2 = vcmask 1047556   ;;  %v804_v39 = vpack.c.b16 %v803_v31, %v802_v22  ;;  %v669_v53 = vunpack.c.l.b16 %v646_v33 }
  0x53   : > { %1051 = vmatpush.bf16.msrb.mxu1 %v9366_v1  ;;  %1175 = vmatpush.bf16.msrb.mxu2 %v9426_v2  ;;  %576 = vst [vmem:[#allocation2 + $0xc] sm:$0xf] %v13741_v0  ;;  %v12632_v40 = vld [vmem:[#allocation8 + $0x134] sm:$0xf]  ;;  %v9339_v41 = vld [vmem:[#allocation8 + $0x138] sm:$0xf0]  ;;  %vm605_vm3 = vmor %vm13992_vm0, %vm13951_vm9  ;;  %v9338_v55 = vor.u32 %v12633_v35, %v9337_v34 }
  0x54   : > { %1189 = vmatpush.bf16.msrb.mxu3 %v9430_v6  ;;  %603 = vst [vmem:[#allocation5] sm:$0x11] %v602_v37  ;;  %v9401_v44 = vld [vmem:[#allocation8 + $0x1b0] sm:$0xf]  ;;  %v12649_v45 = vld [vmem:[#allocation8 + $0x1b4] sm:$0xf0]  ;;  %894 = vmatmul.bf16.vlgmr.msra.gmra.mxu2 %v804_v39  ;;  %vm14007_vm10 = vmand %vm14628_vm14, %vm587_vm5  ;;  %v9342_v60 = vor.u32 %v12632_v40, %v9339_v41 }
  0x55   : > { %v607_v47 = vsel %vm605_vm3, 0, %v606_v30  ;;  %v12648_v48 = vld [vmem:[#allocation8 + $0x1b4] sm:$0xf]  ;;  %v9403_v49 = vld [vmem:[#allocation8 + $0x1b8] sm:$0xf0]  ;;  %908 = vmatmul.bf16.vlgmr.msra.gmra.mxu3 %v804_v39  ;;  %vm14013_vm9 = vmand %vm1936_vm2, %vm589_vm7  ;;  %v9402_v61 = vor.u32 %v12649_v45, %v9401_v44  ;;  %vm1227_vm0 = vcmask 1046528  }
  0x56   : > { %1038 = vmatpush.bf16.msrb.mxu0 %v9354_v16  ;;  %608 = vst [vmem:[#allocation5 + $0x8] sm:$0x11] %v607_v47  ;;  %v9329_v51 = vld [vmem:[#allocation8 + $0x120] sm:$0xf]  ;;  %v12631_v52 = vld [vmem:[#allocation8 + $0x124] sm:$0xf0]  ;;  %vm1938_vm5 = vmor %vm14013_vm9, %vm14007_vm10  ;;  %v9406_v3 = vor.u32 %v12648_v48, %v9403_v49 }
  0x57   : > { %1052 = vmatpush.bf16.msrb.mxu1 %v9358_v23  ;;  %1176 = vmatpush.bf16.msrb.mxu2 %v9418_v24  ;;  %v12630_v56 = vld [vmem:[#allocation8 + $0x124] sm:$0xf]  ;;  %v9331_v57 = vld [vmem:[#allocation8 + $0x128] sm:$0xf0]  ;;  %v9393_v58 = vld [vmem:[#allocation8 + $0x1a0] sm:$0xf]  ;;  %v9330_v9 = vor.u32 %v12631_v52, %v9329_v51 }
  0x58   : > { %1190 = vmatpush.bf16.msrb.mxu3 %v9422_v28  ;;  %v14017_v59 = vld [vmem:[#allocation2 + $0x4] sm:$0xff]   ;;  %v12647_v62 = vld [vmem:[#allocation8 + $0x1a4] sm:$0xf0]  ;;  %vm14027_vm11 = vmand %vm5464_vm6, %vm589_vm7  ;;  %v9334_v12 = vor.u32 %v12630_v56, %v9331_v57  ;;  %vm1089_vm7 = vcmask 1044480   ;;  %vm942_vm13 = vsmask.f32 7424 }
  0x59   : > { %v670_v63 = vunpack.c.l.b16 %v14017_v59  ;;  %v671_v1 = vunpack.c.h.b16 %v14017_v59  ;;  %v12646_v4 = vld [vmem:[#allocation8 + $0x1a4] sm:$0xf]  ;;  %v9395_v5 = vld [vmem:[#allocation8 + $0x1a8] sm:$0xf0]  ;;  %vm5466_vm12 = vmor %vm14027_vm11, %vm14007_vm10  ;;  %v9394_v13 = vor.u32 %v12647_v62, %v9393_v58  ;;  %vm1369_vm2 = vcmask 1045504  }
  0x5a   : > { %1039 = vmatpush.bf16.msrb.mxu0 %v9346_v36  ;;  %v9321_v10 = vld [vmem:[#allocation8 + $0x110] sm:$0xf]  ;;  %v12629_v11 = vld [vmem:[#allocation8 + $0x114] sm:$0xf0]  ;;  %v9398_v14 = vor.u32 %v12646_v4, %v9395_v5  ;;  %v12628_v15 = vld [vmem:[#allocation8 + $0x114] sm:$0xf] }
  0x5b   : > { %1053 = vmatpush.bf16.msrb.mxu1 %v9350_v42  ;;  %1177 = vmatpush.bf16.msrb.mxu2 %v9410_v43  ;;  %v14037_v6 = vpack.c.b16 %v670_v63, %v669_v53  ;;  %v673_v8 = vpack.c.b16 %v671_v1, %v671_v1  ;;  %v9323_v16 = vld [vmem:[#allocation8 + $0x118] sm:$0xf0]  ;;  %v9385_v17 = vld [vmem:[#allocation8 + $0x190] sm:$0xf]  ;;  %v12645_v22 = vld [vmem:[#allocation8 + $0x194] sm:$0xf0]  ;;  %v9322_v23 = vor.u32 %v12629_v11, %v9321_v10 }
  0x5c   : > { %1191 = vmatpush.bf16.msrb.mxu3 %v9414_v46  ;;  %v12644_v24 = vld [vmem:[#allocation8 + $0x194] sm:$0xf]  ;;  %v9387_v25 = vld [vmem:[#allocation8 + $0x198] sm:$0xf0]  ;;  %v9313_v26 = vld [vmem:[#allocation8 + $0x100] sm:$0xf]  ;;  %v9326_v40 = vor.u32 %v12628_v15, %v9323_v16  ;;  %v9386_v41 = vor.u32 %v12645_v22, %v9385_v17 }
  0x5d   : > { %v675_v18 = vshrl.u32 %v14037_v6, 16  ;;  %v678_v19 = vshll.u32 %v14037_v6, 16  ;;  %v683_v20 = vshrl.u32 %v673_v8, 16  ;;  %v686_v21 = vshll.u32 %v673_v8, 16  ;;  %v12627_v31 = vld [vmem:[#allocation8 + $0x104] sm:$0xf0] }
  0x5e   : > { %1040 = vmatpush.bf16.msrb.mxu0 %v9338_v55  ;;  %v12626_v33 = vld [vmem:[#allocation8 + $0x104] sm:$0xf]  ;;  %v9315_v34 = vld [vmem:[#allocation8 + $0x108] sm:$0xf0]  ;;  %v9377_v35 = vld [vmem:[#allocation8 + $0x180] sm:$0xf]  ;;  %v9390_v45 = vor.u32 %v12644_v24, %v9387_v25  ;;  %v9314_v51 = vor.u32 %v12627_v31, %v9313_v26 }
  0x5f   : > { %1054 = vmatpush.bf16.msrb.mxu1 %v9342_v60  ;;  %1178 = vmatpush.bf16.msrb.mxu2 %v9402_v61  ;;  %v677_v27 = vrot.slane %v675_v18, 3  ;;  %v680_v28 = vrot.slane %v678_v19, 4  ;;  %v685_v29 = vrot.slane %v683_v20, 3  ;;  %v688_v30 = vrot.slane %v686_v21, 4  ;;  %v12643_v36 = vld [vmem:[#allocation8 + $0x184] sm:$0xf0] }
  0x60   : > { %1192 = vmatpush.bf16.msrb.mxu3 %v9406_v3  ;;  %v12642_v37 = vld [vmem:[#allocation8 + $0x184] sm:$0xf]  ;;  %v9379_v42 = vld [vmem:[#allocation8 + $0x188] sm:$0xf0]  ;;  %v9497_v43 = vld [vmem:[#allocation8 + $0x270] sm:$0xf]  ;;  %v9318_v1 = vor.u32 %v12626_v33, %v9315_v34  ;;  %v9378_v3 = vor.u32 %v12643_v36, %v9377_v35 }
  0x61   : > { %v681_v38 = vor.u32 %v680_v28, %v677_v27  ;;  %v689_v39 = vor.u32 %v688_v30, %v685_v29  ;;  %v12673_v44 = vld [vmem:[#allocation8 + $0x274] sm:$0xf0]  ;;  %v12672_v46 = vld [vmem:[#allocation8 + $0x274] sm:$0xf]  ;;  %v9499_v47 = vld [vmem:[#allocation8 + $0x278] sm:$0xf0]  ;;  %v9382_v4 = vor.u32 %v12642_v37, %v9379_v42 }
  0x62   : > { %1041 = vmatpush.bf16.msrb.mxu0 %v9330_v9  ;;  %v9561_v48 = vld [vmem:[#allocation8 + $0x2f0] sm:$0xf]  ;;  %v12689_v52 = vld [vmem:[#allocation8 + $0x2f4] sm:$0xf0]  ;;  %v9498_v56 = vor.u32 %v12673_v44, %v9497_v43  ;;  %v12688_v57 = vld [vmem:[#allocation8 + $0x2f4] sm:$0xf]  ;;  %v9502_v10 = vor.u32 %v12672_v46, %v9499_v47 }
  0x63   : > { %1055 = vmatpush.bf16.msrb.mxu1 %v9334_v12  ;;  %1179 = vmatpush.bf16.msrb.mxu2 %v9394_v13  ;;  %v690_v49 = vsel %vm581_vm4, %v681_v38, %v689_v39  ;;  %v914_v53 = vld [vmem:[#allocation2 + $0x4] sm:$0xff]   ;;  %v916_v55 = vld [vmem:[#allocation2 + $0xc] sm:$0x1]  ;;  %v9563_v58 = vld [vmem:[#allocation8 + $0x2f8] sm:$0xf0]  ;;  %v1090_v12 = vrot.slane %v14037_v6, 3  ;;  %v9562_v15 = vor.u32 %v12689_v52, %v9561_v48 }
  0x64   : > { %1193 = vmatpush.bf16.msrb.mxu3 %v9398_v14  ;;  %780 = vmatmul.bf16.vlgmr.msra.gmra.mxu0 %v690_v49  ;;  %v14042_v60 = vunpack.c.h.b16 %v914_v53  ;;  %v939_v61 = vunpack.c.l.b16 %v916_v55  ;;  %v1068_v62 = vld [vmem:[#allocation2 + $0x8] sm:$0x7]  ;;  %v9489_v8 = vld [vmem:[#allocation8 + $0x260] sm:$0xf]  ;;  %v12671_v9 = vld [vmem:[#allocation8 + $0x264] sm:$0xf0]  ;;  %v9566_v16 = vor.u32 %v12688_v57, %v9563_v58 }
  0x65   : > { %794 = vmatmul.bf16.vlgmr.msra.gmra.mxu1 %v690_v49  ;;  %v1087_v5 = vunpack.c.l.b16 %v1068_v62  ;;  %v12670_v13 = vld [vmem:[#allocation8 + $0x264] sm:$0xf]  ;;  %v9491_v14 = vld [vmem:[#allocation8 + $0x268] sm:$0xf0]  ;;  %v9553_v18 = vld [vmem:[#allocation8 + $0x2e0] sm:$0xf]  ;;  %v9490_v22 = vor.u32 %v12671_v9, %v9489_v8 }
  0x66   : > { %1042 = vmatpush.bf16.msrb.mxu0 %v9322_v23  ;;  %v14044_v11 = vpack.c.b16 %v939_v61, %v939_v61  ;;  %v12687_v19 = vld [vmem:[#allocation8 + $0x2e4] sm:$0xf0]  ;;  %v12686_v20 = vld [vmem:[#allocation8 + $0x2e4] sm:$0xf]  ;;  %v946_v21 = vshll.u32 %v914_v53, 16  ;;  %v944_v25 = vshrl.u32 %v914_v53, 16  ;;  %v9494_v29 = vor.u32 %v12670_v13, %v9491_v14 }
  0x67   : > { %1056 = vmatpush.bf16.msrb.mxu1 %v9326_v40  ;;  %1180 = vmatpush.bf16.msrb.mxu2 %v9386_v41  ;;  %v1088_v17 = vpack.c.b16 %v1087_v5, %v1087_v5  ;;  %v9555_v23 = vld [vmem:[#allocation8 + $0x2e8] sm:$0xf0]  ;;  %v9481_v24 = vld [vmem:[#allocation8 + $0x250] sm:$0xf]  ;;  %v12669_v27 = vld [vmem:[#allocation8 + $0x254] sm:$0xf0]  ;;  %v9554_v31 = vor.u32 %v12687_v19, %v9553_v18 }
  0x68   : > { %1194 = vmatpush.bf16.msrb.mxu3 %v9390_v45  ;;  %v951_v6 = vshll.u32 %v14044_v11, 16  ;;  %v948_v28 = vrot.slane %v946_v21, 1  ;;  %v9558_v33 = vor.u32 %v12686_v20, %v9555_v23  ;;  %v12668_v34 = vld [vmem:[#allocation8 + $0x254] sm:$0xf]  ;;  %v9483_v35 = vld [vmem:[#allocation8 + $0x258] sm:$0xf0]  ;;  %v9482_v37 = vor.u32 %v12669_v27, %v9481_v24 }
  0x69   : > { %v1091_v26 = vrot.slane %v1088_v17, 3  ;;  %v9545_v36 = vld [vmem:[#allocation8 + $0x2d0] sm:$0xf]  ;;  %v12685_v38 = vld [vmem:[#allocation8 + $0x2d4] sm:$0xf0]  ;;  %v9486_v43 = vor.u32 %v12668_v34, %v9483_v35  ;;  %vm14655_vm10 = vcmask 1043456  }
  0x6a   : > { %1043 = vmatpush.bf16.msrb.mxu0 %v9314_v51  ;;  %v12684_v39 = vld [vmem:[#allocation8 + $0x2d4] sm:$0xf]  ;;  %v9547_v40 = vld [vmem:[#allocation8 + $0x2d8] sm:$0xf0]  ;;  %v949_v41 = vor.u32 %v948_v28, %v944_v25  ;;  %v953_v42 = vrot.slane %v951_v6, 1  ;;  %v9546_v46 = vor.u32 %v12685_v38, %v9545_v36  ;;  %vm7340_vm11 = vcmask 64512  }
  0x6b   : > { %1057 = vmatpush.bf16.msrb.mxu1 %v9318_v1  ;;  %1181 = vmatpush.bf16.msrb.mxu2 %v9378_v3  ;;  %v1092_v30 = vsel %vm1089_vm7, %v1090_v12, %v1091_v26  ;;  %v9473_v44 = vld [vmem:[#allocation8 + $0x240] sm:$0xf]  ;;  %v12667_v45 = vld [vmem:[#allocation8 + $0x244] sm:$0xf0]  ;;  %v9550_v47 = vor.u32 %v12684_v39, %v9547_v40  ;;  %v12666_v48 = vld [vmem:[#allocation8 + $0x244] sm:$0xf] }
  0x6c   : > { %1195 = vmatpush.bf16.msrb.mxu3 %v9382_v4  ;;  %v9475_v49 = vld [vmem:[#allocation8 + $0x248] sm:$0xf0]  ;;  %v9537_v51 = vld [vmem:[#allocation8 + $0x2c0] sm:$0xf]  ;;  %v12683_v52 = vld [vmem:[#allocation8 + $0x2c4] sm:$0xf0]  ;;  %v9474_v57 = vor.u32 %v12667_v45, %v9473_v44 }
  0x6d   : > { %v12682_v53 = vld [vmem:[#allocation8 + $0x2c4] sm:$0xf]  ;;  %v9539_v55 = vld [vmem:[#allocation8 + $0x2c8] sm:$0xf0]  ;;  %v9478_v58 = vor.u32 %v12666_v48, %v9475_v49  ;;  %v9465_v61 = vld [vmem:[#allocation8 + $0x230] sm:$0xf]  ;;  %v9538_v1 = vor.u32 %v12683_v52, %v9537_v51 }
  0x6e   : > { %1312 = vmatpush.bf16.msra.mxu0 %v9498_v56  ;;  %1182 = vmatmul.bf16.vlgmr.msrb.gmra.mxu2 %v1092_v30  ;;  %v954_v56 = vsel %vm942_vm13, %v949_v41, %v953_v42  ;;  %v12665_v62 = vld [vmem:[#allocation8 + $0x234] sm:$0xf0]  ;;  %v9542_v3 = vor.u32 %v12682_v53, %v9539_v55  ;;  %v12664_v4 = vld [vmem:[#allocation8 + $0x234] sm:$0xf]  ;;  %v9467_v5 = vld [vmem:[#allocation8 + $0x238] sm:$0xf0] }
  0x6f   : > { %1326 = vmatpush.bf16.msra.mxu1 %v9502_v10  ;;  %1454 = vmatpush.bf16.msra.mxu2 %v9562_v15  ;;  %v9529_v8 = vld [vmem:[#allocation8 + $0x2b0] sm:$0xf]  ;;  %v12681_v9 = vld [vmem:[#allocation8 + $0x2b4] sm:$0xf0]  ;;  %v12680_v10 = vld [vmem:[#allocation8 + $0x2b4] sm:$0xf]  ;;  %v9466_v13 = vor.u32 %v12665_v62, %v9465_v61  ;;  %v9470_v14 = vor.u32 %v12664_v4, %v9467_v5 }
  0x70   : > { %1468 = vmatpush.bf16.msra.mxu3 %v9566_v16  ;;  %v9531_v12 = vld [vmem:[#allocation8 + $0x2b8] sm:$0xf0]  ;;  %v9457_v15 = vld [vmem:[#allocation8 + $0x220] sm:$0xf]  ;;  %v12663_v16 = vld [vmem:[#allocation8 + $0x224] sm:$0xf0]  ;;  %v9530_v17 = vor.u32 %v12681_v9, %v9529_v8 }
  0x71   : > { %1196 = vmatmul.bf16.vlgmr.msrb.gmra.mxu3 %v1092_v30  ;;  %v9534_v18 = vor.u32 %v12680_v10, %v9531_v12  ;;  %v12662_v19 = vld [vmem:[#allocation8 + $0x224] sm:$0xf]  ;;  %v9459_v20 = vld [vmem:[#allocation8 + $0x228] sm:$0xf0]  ;;  %v9521_v21 = vld [vmem:[#allocation8 + $0x2a0] sm:$0xf]  ;;  %v9458_v25 = vor.u32 %v12663_v16, %v9457_v15 }
  0x72   : > { %1313 = vmatpush.bf16.msra.mxu0 %v9490_v22  ;;  %v12679_v22 = vld [vmem:[#allocation8 + $0x2a4] sm:$0xf0]  ;;  %v12678_v23 = vld [vmem:[#allocation8 + $0x2a4] sm:$0xf]  ;;  %v9523_v24 = vld [vmem:[#allocation8 + $0x2a8] sm:$0xf0]  ;;  %v9462_v27 = vor.u32 %v12662_v19, %v9459_v20 }
  0x73   : > { %1327 = vmatpush.bf16.msra.mxu1 %v9494_v29  ;;  %1455 = vmatpush.bf16.msra.mxu2 %v9554_v31  ;;  %v9449_v6 = vld [vmem:[#allocation8 + $0x210] sm:$0xf]  ;;  %v12661_v26 = vld [vmem:[#allocation8 + $0x214] sm:$0xf0]  ;;  %v12660_v28 = vld [vmem:[#allocation8 + $0x214] sm:$0xf]  ;;  %v9522_v31 = vor.u32 %v12679_v22, %v9521_v21 }
  0x74   : > { %1469 = vmatpush.bf16.msra.mxu3 %v9558_v33  ;;  %1044 = vmatmul.bf16.vlgmr.msrb.gmra.mxu0 %v954_v56  ;;  %v9451_v29 = vld [vmem:[#allocation8 + $0x218] sm:$0xf0]  ;;  %v9513_v30 = vld [vmem:[#allocation8 + $0x290] sm:$0xf]  ;;  %v9526_v33 = vor.u32 %v12678_v23, %v9523_v24  ;;  %v12677_v34 = vld [vmem:[#allocation8 + $0x294] sm:$0xf0]  ;;  %v9450_v42 = vor.u32 %v12661_v26, %v9449_v6 }
  0x75   : > { %1058 = vmatmul.bf16.vlgmr.msrb.gmra.mxu1 %v954_v56  ;;  %v1206_v35 = vld [vmem:[#allocation2 + $0x4] sm:$0xe]  ;;  %v1344_v36 = vld [vmem:[#allocation2] sm:$0xc]  ;;  %v9515_v38 = vld [vmem:[#allocation8 + $0x298] sm:$0xf0] }
  0x76   : > { %1314 = vmatpush.bf16.msra.mxu0 %v9482_v37  ;;  %v12676_v37 = vld [vmem:[#allocation8 + $0x294] sm:$0xf]  ;;  %v1225_v39 = vunpack.c.l.b16 %v1206_v35  ;;  %v1365_v41 = vunpack.c.l.b16 %v1344_v36  ;;  %v12659_v44 = vld [vmem:[#allocation8 + $0x204] sm:$0xf0]  ;;  %v12658_v48 = vld [vmem:[#allocation8 + $0x204] sm:$0xf] }
  0x77   : > { %1328 = vmatpush.bf16.msra.mxu1 %v9486_v43  ;;  %1456 = vmatpush.bf16.msra.mxu2 %v9546_v46  ;;  %v1345_v40 = vld [vmem:[#allocation2 + $0x8] sm:$0x3]  ;;  %v9441_v43 = vld [vmem:[#allocation8 + $0x200] sm:$0xf]  ;;  %v9454_v46 = vor.u32 %v12660_v28, %v9451_v29  ;;  %v9443_v49 = vld [vmem:[#allocation8 + $0x208] sm:$0xf0]  ;;  %v9518_v53 = vor.u32 %v12676_v37, %v9515_v38 }
  0x78   : > { %1470 = vmatpush.bf16.msra.mxu3 %v9550_v47  ;;  %v1366_v45 = vunpack.c.l.b16 %v1345_v40  ;;  %v9514_v47 = vor.u32 %v12677_v34, %v9513_v30  ;;  %v9505_v51 = vld [vmem:[#allocation8 + $0x280] sm:$0xf]  ;;  %v1226_v52 = vpack.c.b16 %v14042_v60, %v1225_v39  ;;  %v12675_v55 = vld [vmem:[#allocation8 + $0x284] sm:$0xf0]  ;;  %v9625_v56 = vld [vmem:[#allocation8 + $0x370] sm:$0xf]  ;;  %v9442_v4 = vor.u32 %v12659_v44, %v9441_v43 }
  0x79   : > { %v12674_v62 = vld [vmem:[#allocation8 + $0x284] sm:$0xf]  ;;  %v9446_v5 = vor.u32 %v12658_v48, %v9443_v49  ;;  %v9627_v8 = vld [vmem:[#allocation8 + $0x378] sm:$0xf0]  ;;  %v9693_v9 = vld [vmem:[#allocation8 + $0x3f0] sm:$0xf]  ;;  %v9506_v12 = vor.u32 %v12675_v55, %v9505_v51 }
  0x7a   : > { %1315 = vmatpush.bf16.msra.mxu0 %v9474_v57  ;;  %v12705_v57 = vld [vmem:[#allocation8 + $0x374] sm:$0xf0]  ;;  %v1368_v61 = vpack.c.b16 %v1366_v45, %v1366_v45  ;;  %v9695_v15 = vld [vmem:[#allocation8 + $0x3f8] sm:$0xf0]  ;;  %v1228_v16 = vrot.slane %v1226_v52, 1 }
  0x7b   : > { %1329 = vmatpush.bf16.msra.mxu1 %v9478_v58  ;;  %1457 = vmatpush.bf16.msra.mxu2 %v9538_v1  ;;  %v1367_v58 = vpack.c.b16 %v670_v63, %v1365_v41  ;;  %v9507_v1 = vld [vmem:[#allocation8 + $0x288] sm:$0xf0]  ;;  %v12722_v10 = vld [vmem:[#allocation8 + $0x3f4] sm:$0xf0]  ;;  %v9617_v21 = vld [vmem:[#allocation8 + $0x360] sm:$0xf] }
  0x7c   : > { %1471 = vmatpush.bf16.msra.mxu3 %v9542_v3  ;;  %v12704_v3 = vld [vmem:[#allocation8 + $0x374] sm:$0xf]  ;;  %v9510_v59 = vor.u32 %v12674_v62, %v9507_v1  ;;  %v9694_v20 = vor.u32 %v12722_v10, %v9693_v9  ;;  %v12703_v22 = vld [vmem:[#allocation8 + $0x364] sm:$0xf0]  ;;  %v12702_v23 = vld [vmem:[#allocation8 + $0x364] sm:$0xf] }
  0x7d   : > { %v1370_v63 = vrot.slane %v1367_v58, 2  ;;  %v9630_v19 = vor.u32 %v12704_v3, %v9627_v8  ;;  %v9685_v6 = vld [vmem:[#allocation8 + $0x3e0] sm:$0xf]  ;;  %v12720_v26 = vld [vmem:[#allocation8 + $0x3e4] sm:$0xf0]  ;;  %v9618_v30 = vor.u32 %v12703_v22, %v9617_v21 }
  0x7e   : > { %1316 = vmatpush.bf16.msra.mxu0 %v9466_v13  ;;  %v9626_v13 = vor.u32 %v12705_v57, %v9625_v56  ;;  %v9687_v28 = vld [vmem:[#allocation8 + $0x3e8] sm:$0xf0]  ;;  %v9609_v34 = vld [vmem:[#allocation8 + $0x350] sm:$0xf]  ;;  %v12701_v35 = vld [vmem:[#allocation8 + $0x354] sm:$0xf0] }
  0x7f   : > { %1330 = vmatpush.bf16.msra.mxu1 %v9470_v14  ;;  %1458 = vmatpush.bf16.msra.mxu2 %v9530_v17  ;;  %v12721_v14 = vld [vmem:[#allocation8 + $0x3f4] sm:$0xf]  ;;  %v1229_v17 = vrot.slane %v14044_v11, 1  ;;  %v9611_v38 = vld [vmem:[#allocation8 + $0x358] sm:$0xf0]  ;;  %v9610_v43 = vor.u32 %v12701_v35, %v9609_v34 }
  0x80   : > { %1472 = vmatpush.bf16.msra.mxu3 %v9534_v18  ;;  %v1371_v18 = vrot.slane %v1368_v61, 2  ;;  %v9698_v24 = vor.u32 %v12721_v14, %v9695_v15  ;;  %v12700_v36 = vld [vmem:[#allocation8 + $0x354] sm:$0xf]  ;;  %v9677_v39 = vld [vmem:[#allocation8 + $0x3d0] sm:$0xf] }
  0x81   : > { %v1230_v11 = vsel %vm1227_vm0, %v1228_v16, %v1229_v17  ;;  %v12718_v40 = vld [vmem:[#allocation8 + $0x3d4] sm:$0xf0]  ;;  %v12717_v41 = vld [vmem:[#allocation8 + $0x3d4] sm:$0xf]  ;;  %v9614_v44 = vor.u32 %v12700_v36, %v9611_v38  ;;  %v12698_v48 = vld [vmem:[#allocation8 + $0x344] sm:$0xf] }
  0x82   : > { %1317 = vmatpush.bf16.msra.mxu0 %v9458_v25  ;;  %v9619_v25 = vld [vmem:[#allocation8 + $0x368] sm:$0xf0]  ;;  %v1372_v29 = vsel %vm1369_vm2, %v1370_v63, %v1371_v18  ;;  %v9678_v45 = vor.u32 %v12718_v40, %v9677_v39  ;;  %v9669_v52 = vld [vmem:[#allocation8 + $0x3c0] sm:$0xf]  ;;  %v12715_v55 = vld [vmem:[#allocation8 + $0x3c4] sm:$0xf] }
  0x83   : > { %1331 = vmatpush.bf16.msra.mxu1 %v9462_v27  ;;  %1459 = vmatpush.bf16.msra.mxu2 %v9522_v31  ;;  %v12719_v27 = vld [vmem:[#allocation8 + $0x3e4] sm:$0xf]  ;;  %v9622_v31 = vor.u32 %v12702_v23, %v9619_v25  ;;  %v9603_v51 = vld [vmem:[#allocation8 + $0x348] sm:$0xf0]  ;;  %v9593_v62 = vld [vmem:[#allocation8 + $0x330] sm:$0xf] }
  0x84   : > { %1473 = vmatpush.bf16.msra.mxu3 %v9526_v33  ;;  %v9686_v33 = vor.u32 %v12720_v26, %v9685_v6  ;;  %v9690_v37 = vor.u32 %v12719_v27, %v9687_v28  ;;  %v9671_v56 = vld [vmem:[#allocation8 + $0x3c8] sm:$0xf0]  ;;  %v9606_v58 = vor.u32 %v12698_v48, %v9603_v51  ;;  %v12697_v1 = vld [vmem:[#allocation8 + $0x334] sm:$0xf0]  ;;  %v12696_v3 = vld [vmem:[#allocation8 + $0x334] sm:$0xf] }
  0x85   : > { %v9661_v8 = vld [vmem:[#allocation8 + $0x3b0] sm:$0xf]  ;;  %v12714_v9 = vld [vmem:[#allocation8 + $0x3b4] sm:$0xf0]  ;;  %v12713_v10 = vld [vmem:[#allocation8 + $0x3b4] sm:$0xf] }
  0x86   : > { %1318 = vmatpush.bf16.msra.mxu0 %v9450_v42  ;;  %v9679_v42 = vld [vmem:[#allocation8 + $0x3d8] sm:$0xf0]  ;;  %v9585_v14 = vld [vmem:[#allocation8 + $0x320] sm:$0xf]  ;;  %v12695_v15 = vld [vmem:[#allocation8 + $0x324] sm:$0xf0]  ;;  %v9662_v17 = vor.u32 %v12714_v9, %v9661_v8 }
  0x87   : > { %1332 = vmatpush.bf16.msra.mxu1 %v9454_v46  ;;  %1460 = vmatpush.bf16.msra.mxu2 %v9514_v47  ;;  %v9601_v46 = vld [vmem:[#allocation8 + $0x340] sm:$0xf]  ;;  %v12699_v47 = vld [vmem:[#allocation8 + $0x344] sm:$0xf0]  ;;  %v9682_v49 = vor.u32 %v12717_v41, %v9679_v42  ;;  %v1486_v63 = vld [vmem:[#allocation2 + $0x4] sm:$0xc]  ;;  %v9586_v25 = vor.u32 %v12695_v15, %v9585_v14 }
  0x88   : > { %1474 = vmatpush.bf16.msra.mxu3 %v9518_v53  ;;  %v12716_v53 = vld [vmem:[#allocation8 + $0x3c4] sm:$0xf0]  ;;  %v9602_v57 = vor.u32 %v12699_v47, %v9601_v46  ;;  %v1487_v18 = vld [vmem:[#allocation2 + $0xc] sm:$0x3]  ;;  %v9653_v21 = vld [vmem:[#allocation8 + $0x3a0] sm:$0xf]  ;;  %v1507_v6 = vunpack.c.l.b16 %v1486_v63 }
  0x89   : > { %v9670_v61 = vor.u32 %v12716_v53, %v9669_v52  ;;  %v12712_v22 = vld [vmem:[#allocation8 + $0x3a4] sm:$0xf0]  ;;  %v12711_v23 = vld [vmem:[#allocation8 + $0x3a4] sm:$0xf]  ;;  %v1508_v26 = vunpack.c.l.b16 %v1487_v18  ;;  %v9577_v28 = vld [vmem:[#allocation8 + $0x310] sm:$0xf] }
  0x8a   : > { %1319 = vmatpush.bf16.msra.mxu0 %v9442_v4  ;;  %v9674_v4 = vor.u32 %v12715_v55, %v9671_v56  ;;  %v9654_v27 = vor.u32 %v12712_v22, %v9653_v21  ;;  %v9645_v34 = vld [vmem:[#allocation8 + $0x390] sm:$0xf]  ;;  %v12710_v35 = vld [vmem:[#allocation8 + $0x394] sm:$0xf0]  ;;  %v12709_v36 = vld [vmem:[#allocation8 + $0x394] sm:$0xf]  ;;  %v1509_v40 = vpack.c.b16 %v14042_v60, %v1507_v6 }
  0x8b   : > { %1333 = vmatpush.bf16.msra.mxu1 %v9446_v5  ;;  %1461 = vmatpush.bf16.msra.mxu2 %v9506_v12  ;;  %v9595_v5 = vld [vmem:[#allocation8 + $0x338] sm:$0xf0]  ;;  %v9569_v39 = vld [vmem:[#allocation8 + $0x300] sm:$0xf]  ;;  %v1510_v41 = vpack.c.b16 %v1508_v26, %v1508_v26  ;;  %v9571_v46 = vld [vmem:[#allocation8 + $0x308] sm:$0xf0] }
  0x8c   : > { %1475 = vmatpush.bf16.msra.mxu3 %v9510_v59  ;;  %v9663_v12 = vld [vmem:[#allocation8 + $0x3b8] sm:$0xf0]  ;;  %v9598_v16 = vor.u32 %v12696_v3, %v9595_v5  ;;  %v12694_v59 = vld [vmem:[#allocation8 + $0x324] sm:$0xf]  ;;  %v9637_v48 = vld [vmem:[#allocation8 + $0x380] sm:$0xf] }
  0x8d   : > { %1320 = vmatmul.bf16.vlgmr.msra.gmra.mxu0 %v1230_v11  ;;  %v12707_v51 = vld [vmem:[#allocation8 + $0x384] sm:$0xf]  ;;  %v9639_v52 = vld [vmem:[#allocation8 + $0x388] sm:$0xf0]  ;;  %v9757_v53 = vld [vmem:[#allocation8 + $0x470] sm:$0xf] }
  0x8e   : > { %1595 = vmatpush.bf16.msrb.mxu0 %v9626_v13  ;;  %1334 = vmatmul.bf16.vlgmr.msra.gmra.mxu1 %v1230_v11  ;;  %v9594_v13 = vor.u32 %v12697_v1, %v9593_v62  ;;  %v12738_v55 = vld [vmem:[#allocation8 + $0x474] sm:$0xf0]  ;;  %v1512_v62 = vrot.slane %v1510_v41, 2  ;;  %v9749_v9 = vld [vmem:[#allocation8 + $0x460] sm:$0xf] }
  0x8f   : > { %1609 = vmatpush.bf16.msrb.mxu1 %v9630_v19  ;;  %1732 = vmatpush.bf16.msrb.mxu2 %v9694_v20  ;;  %v9666_v19 = vor.u32 %v12713_v10, %v9663_v12  ;;  %v9587_v20 = vld [vmem:[#allocation8 + $0x328] sm:$0xf0]  ;;  %v9758_v5 = vor.u32 %v12738_v55, %v9757_v53  ;;  %v12736_v10 = vld [vmem:[#allocation8 + $0x464] sm:$0xf0]  ;;  %v12735_v14 = vld [vmem:[#allocation8 + $0x464] sm:$0xf] }
  0x90   : > { %1746 = vmatpush.bf16.msrb.mxu3 %v9698_v24  ;;  %1462 = vmatmul.bf16.vlgmr.msra.gmra.mxu2 %v1372_v29  ;;  %v9655_v24 = vld [vmem:[#allocation8 + $0x3a8] sm:$0xf0]  ;;  %v9590_v11 = vor.u32 %v12694_v59, %v9587_v20  ;;  %v9741_v59 = vld [vmem:[#allocation8 + $0x450] sm:$0xf]  ;;  %v12734_v63 = vld [vmem:[#allocation8 + $0x454] sm:$0xf0] }
  0x91   : > { %1476 = vmatmul.bf16.vlgmr.msra.gmra.mxu3 %v1372_v29  ;;  %v12693_v29 = vld [vmem:[#allocation8 + $0x314] sm:$0xf0]  ;;  %v9751_v15 = vld [vmem:[#allocation8 + $0x468] sm:$0xf0]  ;;  %v12733_v18 = vld [vmem:[#allocation8 + $0x454] sm:$0xf]  ;;  %v9742_v20 = vor.u32 %v12734_v63, %v9741_v59 }
  0x92   : > { %1596 = vmatpush.bf16.msrb.mxu0 %v9618_v30  ;;  %v12692_v30 = vld [vmem:[#allocation8 + $0x314] sm:$0xf]  ;;  %v9578_v38 = vor.u32 %v12693_v29, %v9577_v28  ;;  %v9733_v22 = vld [vmem:[#allocation8 + $0x440] sm:$0xf]  ;;  %v9727_v29 = vld [vmem:[#allocation8 + $0x438] sm:$0xf0] }
  0x93   : > { %1610 = vmatpush.bf16.msrb.mxu1 %v9622_v31  ;;  %1733 = vmatpush.bf16.msrb.mxu2 %v9686_v33  ;;  %v9658_v31 = vor.u32 %v12711_v23, %v9655_v24  ;;  %v9579_v33 = vld [vmem:[#allocation8 + $0x318] sm:$0xf0]  ;;  %v12732_v23 = vld [vmem:[#allocation8 + $0x444] sm:$0xf0]  ;;  %v12731_v24 = vld [vmem:[#allocation8 + $0x444] sm:$0xf] }
  0x94   : > { %1747 = vmatpush.bf16.msrb.mxu3 %v9690_v37  ;;  %v9647_v37 = vld [vmem:[#allocation8 + $0x398] sm:$0xf0]  ;;  %v9582_v42 = vor.u32 %v12692_v30, %v9579_v33  ;;  %v9734_v6 = vor.u32 %v12732_v23, %v9733_v22  ;;  %v12729_v28 = vld [vmem:[#allocation8 + $0x434] sm:$0xf]  ;;  %v9717_v33 = vld [vmem:[#allocation8 + $0x420] sm:$0xf] }
  0x95   : > { %v9650_v47 = vor.u32 %v12709_v36, %v9647_v37  ;;  %v9719_v36 = vld [vmem:[#allocation8 + $0x428] sm:$0xf0]  ;;  %v12725_v41 = vld [vmem:[#allocation8 + $0x414] sm:$0xf]  ;;  %v12745_v22 = vld [vmem:[#allocation10 + $0x20] sm:$0xff] }
  0x96   : > { %1597 = vmatpush.bf16.msrb.mxu0 %v9610_v43  ;;  %v9646_v43 = vor.u32 %v12710_v35, %v9645_v34  ;;  %v12728_v34 = vld [vmem:[#allocation8 + $0x424] sm:$0xf0]  ;;  %v12727_v35 = vld [vmem:[#allocation8 + $0x424] sm:$0xf]  ;;  %vm1912_vm14 = vsmask.f32 4368 }
  0x97   : > { %1611 = vmatpush.bf16.msrb.mxu1 %v9614_v44  ;;  %1734 = vmatpush.bf16.msrb.mxu2 %v9678_v45  ;;  %v12691_v44 = vld [vmem:[#allocation8 + $0x304] sm:$0xf0]  ;;  %v12690_v45 = vld [vmem:[#allocation8 + $0x304] sm:$0xf]  ;;  %v9718_v37 = vor.u32 %v12728_v34, %v9717_v33  ;;  %v12772_v33 = vld [vmem:[#allocation10 + $0xf8] sm:$0xff] }
  0x98   : > { %1748 = vmatpush.bf16.msrb.mxu3 %v9682_v49  ;;  %v12708_v49 = vld [vmem:[#allocation8 + $0x384] sm:$0xf0]  ;;  %v9570_v56 = vor.u32 %v12691_v44, %v9569_v39  ;;  %v9574_v1 = vor.u32 %v12690_v45, %v9571_v46  ;;  %v9709_v39 = vld [vmem:[#allocation8 + $0x410] sm:$0xf]  ;;  %v1764_v44 = vld [vmem:[#allocation2 + $0xc] sm:$0xf] }
  0x99   : > { %v9638_v3 = vor.u32 %v12708_v49, %v9637_v48  ;;  %v9701_v46 = vld [vmem:[#allocation8 + $0x400] sm:$0xf]  ;;  %v12723_v48 = vld [vmem:[#allocation8 + $0x404] sm:$0xf]  ;;  %v9703_v49 = vld [vmem:[#allocation8 + $0x408] sm:$0xf0] }
  0x9a   : > { %1598 = vmatpush.bf16.msrb.mxu0 %v9602_v57  ;;  %v12737_v57 = vld [vmem:[#allocation8 + $0x474] sm:$0xf]  ;;  %v9706_v53 = vor.u32 %v12723_v48, %v9703_v49  ;;  %v12754_v59 = vld [vmem:[#allocation10 + $0x68] sm:$0xff]  ;;  %v12753_v23 = vld [vmem:[#allocation10 + $0x60] sm:$0xff] }
  0x9b   : > { %1612 = vmatpush.bf16.msrb.mxu1 %v9606_v58  ;;  %1735 = vmatpush.bf16.msrb.mxu2 %v9670_v61  ;;  %v9759_v58 = vld [vmem:[#allocation8 + $0x478] sm:$0xf0]  ;;  %v1511_v61 = vrot.slane %v1509_v40, 2  ;;  %v12726_v40 = vld [vmem:[#allocation8 + $0x414] sm:$0xf0] }
  0x9c   : > { %1749 = vmatpush.bf16.msrb.mxu3 %v9674_v4  ;;  %v9642_v4 = vor.u32 %v12707_v51, %v9639_v52  ;;  %v9762_v8 = vor.u32 %v12737_v57, %v9759_v58  ;;  %v1783_v51 = vunpack.c.l.b16 %v1764_v44  ;;  %v12741_v44 = vld [vmem:[#allocation10] sm:$0xff]  ;;  %v12780_v48 = vld [vmem:[#allocation10 + $0x138] sm:$0xff] }
  0x9d   : > { %v1513_v12 = vsel %vm1369_vm2, %v1511_v61, %v1512_v62  ;;  %v12788_v49 = vld [vmem:[#allocation10 + $0x178] sm:$0xff] }
  0x9e   : > { %1599 = vmatpush.bf16.msrb.mxu0 %v9594_v13  ;;  %v12706_v13 = vld [vmem:[#allocation2] sm:$0xff]  ;;  %v1784_v55 = vpack.c.b16 %v1783_v51, %v14042_v60  ;;  %v12756_v60 = vld [vmem:[#allocation10 + $0x78] sm:$0xff] }
  0x9f   : > { %1613 = vmatpush.bf16.msrb.mxu1 %v9598_v16  ;;  %1736 = vmatpush.bf16.msrb.mxu2 %v9662_v17  ;;  %v9750_v16 = vor.u32 %v12736_v10, %v9749_v9  ;;  %v9754_v17 = vor.u32 %v12735_v14, %v9751_v15  ;;  %v12748_v9 = vld [vmem:[#allocation10 + $0x38] sm:$0xff]  ;;  %v12755_v14 = vld [vmem:[#allocation10 + $0x70] sm:$0xff]  ;;  %v12770_v51 = vld [vmem:[#allocation10 + $0xe8] sm:$0xff] }
  0xa0   : > { %1750 = vmatpush.bf16.msrb.mxu3 %v9666_v19  ;;  %v9743_v19 = vld [vmem:[#allocation8 + $0x458] sm:$0xf0] }
  0xa1   : > { %v9746_v21 = vor.u32 %v12733_v18, %v9743_v19 }
  0xa2   : > { %1600 = vmatpush.bf16.msrb.mxu0 %v9586_v25  ;;  %v9735_v25 = vld [vmem:[#allocation8 + $0x448] sm:$0xf0] }
  0xa3   : > { %1614 = vmatpush.bf16.msrb.mxu1 %v9590_v11  ;;  %1737 = vmatpush.bf16.msrb.mxu2 %v9654_v27  ;;  %v9738_v26 = vor.u32 %v12731_v24, %v9735_v25  ;;  %v9725_v11 = vld [vmem:[#allocation8 + $0x430] sm:$0xf]  ;;  %v12730_v27 = vld [vmem:[#allocation8 + $0x434] sm:$0xf0] }
  0xa4   : > { %1751 = vmatpush.bf16.msrb.mxu3 %v9658_v31  ;;  %v9726_v30 = vor.u32 %v12730_v27, %v9725_v11  ;;  %v9730_v31 = vor.u32 %v12729_v28, %v9727_v29  ;;  %v12752_v11 = vld [vmem:[#allocation10 + $0x58] sm:$0xff]  ;;  %v12743_v28 = vld [vmem:[#allocation10 + $0x10] sm:$0xff] }
  0xa5   : > { %v12751_v29 = vld [vmem:[#allocation10 + $0x50] sm:$0xff] }
  0xa6   : > { %1601 = vmatpush.bf16.msrb.mxu0 %v9578_v38  ;;  %v9722_v38 = vor.u32 %v12727_v35, %v9719_v36 }
  0xa7   : > { %1615 = vmatpush.bf16.msrb.mxu1 %v9582_v42  ;;  %1738 = vmatpush.bf16.msrb.mxu2 %v9646_v43  ;;  %v9711_v42 = vld [vmem:[#allocation8 + $0x418] sm:$0xf0]  ;;  %v9710_v43 = vor.u32 %v12726_v40, %v9709_v39  ;;  %v12763_v39 = vld [vmem:[#allocation10 + $0xb0] sm:$0xff] }
  0xa8   : > { %1752 = vmatpush.bf16.msrb.mxu3 %v9650_v47  ;;  %v9714_v45 = vor.u32 %v12725_v41, %v9711_v42  ;;  %v12724_v47 = vld [vmem:[#allocation8 + $0x404] sm:$0xf0]  ;;  %v12771_v41 = vld [vmem:[#allocation10 + $0xf0] sm:$0xff] }
  0xa9   : > { %v9702_v52 = vor.u32 %v12724_v47, %v9701_v46  ;;  %v12762_v46 = vld [vmem:[#allocation10 + $0xa8] sm:$0xff] }
  0xaa   : > { %1602 = vmatpush.bf16.msrb.mxu0 %v9570_v56 }
  0xab   : > { %1616 = vmatpush.bf16.msrb.mxu1 %v9574_v1  ;;  %1739 = vmatpush.bf16.msrb.mxu2 %v9638_v3 }
  0xac   : > { %1753 = vmatpush.bf16.msrb.mxu3 %v9642_v4 }
  0xad   : > { %1603 = vmatmul.bf16.vlgmr.msrb.gmra.mxu0 %v1513_v12 }
  0xae   : > { %1866 = vmatpush.bf16.msra.mxu0 %v9758_v5  ;;  %1617 = vmatmul.bf16.vlgmr.msrb.gmra.mxu1 %v1513_v12 }
  0xaf   : > { %1880 = vmatpush.bf16.msra.mxu1 %v9762_v8  ;;  %1740 = vmatmul.bf16.vlgmr.msrb.gmra.mxu2 %v12706_v13 }
  0xb0   : > { %1754 = vmatmul.bf16.vlgmr.msrb.gmra.mxu3 %v12706_v13  ;;  %2086 = vmatpush.bf16.msra.mxu2 %v12748_v9  ;;  %v12747_v13 = vld [vmem:[#allocation10 + $0x30] sm:$0xff]  ;;  %v12769_v9 = vld [vmem:[#allocation10 + $0xe0] sm:$0xff] }
  0xb1   : > { %2100 = vmatpush.bf16.msra.mxu3 %v12756_v60 }
  0xb2   : > { %1867 = vmatpush.bf16.msra.mxu0 %v9750_v16 }
  0xb3   : > { %1881 = vmatpush.bf16.msra.mxu1 %v9754_v17  ;;  %v12746_v17 = vld [vmem:[#allocation10 + $0x28] sm:$0xff] }
  0xb4   : > { %2087 = vmatpush.bf16.msra.mxu2 %v12747_v13 }
  0xb5   : > { %2101 = vmatpush.bf16.msra.mxu3 %v12755_v14 }
  0xb6   : > { %1868 = vmatpush.bf16.msra.mxu0 %v9742_v20 }
  0xb7   : > { %1882 = vmatpush.bf16.msra.mxu1 %v9746_v21 }
  0xb8   : > { %2088 = vmatpush.bf16.msra.mxu2 %v12746_v17 }
  0xb9   : > { %2102 = vmatpush.bf16.msra.mxu3 %v12754_v59 }
  0xba   : > { %1869 = vmatpush.bf16.msra.mxu0 %v9734_v6 }
  0xbb   : > { %1883 = vmatpush.bf16.msra.mxu1 %v9738_v26  ;;  %v12744_v26 = vld [vmem:[#allocation10 + $0x18] sm:$0xff] }
  0xbc   : > { %2089 = vmatpush.bf16.msra.mxu2 %v12745_v22 }
  0xbd   : > { %2103 = vmatpush.bf16.msra.mxu3 %v12753_v23 }
  0xbe   : > { %1870 = vmatpush.bf16.msra.mxu0 %v9726_v30  ;;  %v12764_v30 = vld [vmem:[#allocation10 + $0xb8] sm:$0xff] }
  0xbf   : > { %1884 = vmatpush.bf16.msra.mxu1 %v9730_v31 }
  0xc0   : > { %2090 = vmatpush.bf16.msra.mxu2 %v12744_v26  ;;  %v12760_v26 = vld [vmem:[#allocation10 + $0x98] sm:$0xff] }
  0xc1   : > { %2104 = vmatpush.bf16.msra.mxu3 %v12752_v11 }
  0xc2   : > { %1871 = vmatpush.bf16.msra.mxu0 %v9718_v37  ;;  %v12742_v37 = vld [vmem:[#allocation10 + $0x8] sm:$0xff] }
  0xc3   : > { %1885 = vmatpush.bf16.msra.mxu1 %v9722_v38  ;;  %v12750_v38 = vld [vmem:[#allocation10 + $0x48] sm:$0xff] }
  0xc4   : > { %2091 = vmatpush.bf16.msra.mxu2 %v12743_v28  ;;  %v12777_v28 = vld [vmem:[#allocation10 + $0x120] sm:$0xff] }
  0xc5   : > { %2105 = vmatpush.bf16.msra.mxu3 %v12751_v29 }
  0xc6   : > { %1872 = vmatpush.bf16.msra.mxu0 %v9710_v43 }
  0xc7   : > { %1886 = vmatpush.bf16.msra.mxu1 %v9714_v45  ;;  %v12749_v45 = vld [vmem:[#allocation10 + $0x40] sm:$0xff] }
  0xc8   : > { %2092 = vmatpush.bf16.msra.mxu2 %v12742_v37 }
  0xc9   : > { %2106 = vmatpush.bf16.msra.mxu3 %v12750_v38 }
  0xca   : > { %1873 = vmatpush.bf16.msra.mxu0 %v9702_v52 }
  0xcb   : > { %1887 = vmatpush.bf16.msra.mxu1 %v9706_v53 }
  0xcc   : > { %2093 = vmatpush.bf16.msra.mxu2 %v12741_v44  ;;  %v12758_v44 = vld [vmem:[#allocation10 + $0x88] sm:$0xff] }
  0xcd   : > { %1874 = vmatmul.bf16.vlgmr.msra.gmra.mxu0 %v1784_v55  ;;  %2107 = vmatpush.bf16.msra.mxu3 %v12749_v45 }
  0xce   : > { %1888 = vmatmul.bf16.vlgmr.msra.gmra.mxu1 %v1784_v55  ;;  %2287 = vmatpush.bf16.msrb.mxu0 %v12764_v30 }
  0xcf   : > { %2301 = vmatpush.bf16.msrb.mxu1 %v12772_v33 }
  0xd0   : > { %2460 = vmatpush.bf16.msrb.mxu2 %v12780_v48 }
  0xd1   : > { %2474 = vmatpush.bf16.msrb.mxu3 %v12788_v49 }
  0xd2   : > { %2288 = vmatpush.bf16.msrb.mxu0 %v12763_v39 }
  0xd3   : > { %2302 = vmatpush.bf16.msrb.mxu1 %v12771_v41  ;;  %v12784_v41 = vld [vmem:[#allocation10 + $0x158] sm:$0xff] }
  0xd6   : > { %2289 = vmatpush.bf16.msrb.mxu0 %v12762_v46 }
  0xd7   : > { %v895_v62 = vpop.f32.mrf.mxu2  ;;  %2303 = vmatpush.bf16.msrb.mxu1 %v12770_v51 }
  0xd8   : > { %v909_v1 = vpop.f32.mrf.mxu3 }
  0xdb   : > { %2304 = vmatpush.bf16.msrb.mxu1 %v12769_v9 }
  0xdf   : > { %v14063_v5 = vpop.f32.mrf.mxu2 }
  0xe0   : > { %v14065_v8 = vpop.f32.mrf.mxu3 }
  0xe1   : > { %v781_v56 = vpop.f32.mrf.mxu0 }
  0xe2   : > { %v795_v57 = vpop.f32.mrf.mxu1  ;;  %v896_v34 = vadd.f32 %v895_v62, %v781_v56  ;;  %v12787_v62 = vld [vmem:[#allocation10 + $0x170] sm:$0xff] }
  0xe3   : > { %v910_v35 = vadd.f32 %v909_v1, %v795_v57  ;;  %v12779_v57 = vld [vmem:[#allocation10 + $0x130] sm:$0xff]  ;;  %2475 = vmatpush.bf16.msrb.mxu3 %v12787_v62 }
  0xe4   : > { %2461 = vmatpush.bf16.msrb.mxu2 %v12779_v57  ;;  %v12765_v57 = vld [vmem:[#allocation10 + $0xc0] sm:$0xff] }
  0xe9   : > { %v14059_v58 = vpop.f32.mrf.mxu0 }
  0xea   : > { %v14061_v61 = vpop.f32.mrf.mxu1  ;;  %v898_v60 = vadd.f32 %v14063_v5, %v14059_v58  ;;  %v12768_v58 = vld [vmem:[#allocation10 + $0xd8] sm:$0xff] }
  0xeb   : > { %2305 = vmatpush.bf16.msrb.mxu1 %v12768_v58 }
  0xf1   : > { %v1045_v3 = vpop.f32.mrf.mxu0  ;;  %v1183_v15 = vpop.f32.mrf.mxu2 }
  0xf2   : > { %v1059_v4 = vpop.f32.mrf.mxu1  ;;  %v1064_v42 = vadd.f32 %v1045_v3, %v896_v34 }
  0xf3   : > { %v1065_v43 = vadd.f32 %v1059_v4, %v910_v35  ;;  %v12761_v4 = vld [vmem:[#allocation10 + $0xa0] sm:$0xff] }
  0xf4   : > { %v1197_v16 = vpop.f32.mrf.mxu3  ;;  %v1202_v47 = vadd.f32 %v1183_v15, %v1064_v42  ;;  %v912_v15 = vadd.f32 %v14065_v8, %v14061_v61  ;;  %2290 = vmatpush.bf16.msrb.mxu0 %v12761_v4  ;;  %v1939_v4 = vld [vmem:[#allocation3] sm:$0xff] }
  0xf5   : > { %v1203_v52 = vadd.f32 %v1197_v16, %v1065_v43 }
  0xf8   : > { %2291 = vmatpush.bf16.msrb.mxu0 %v12760_v26 }
  0xf9   : > { %v14067_v10 = vpop.f32.mrf.mxu0  ;;  %v14071_v19 = vpop.f32.mrf.mxu2 }
  0xfa   : > { %v14069_v12 = vpop.f32.mrf.mxu1  ;;  %v1066_v17 = vadd.f32 %v14067_v10, %v898_v60 }
  0xfb   : > { %v1067_v22 = vadd.f32 %v14069_v12, %v912_v15  ;;  %v12785_v12 = vld [vmem:[#allocation10 + $0x160] sm:$0xff]  ;;  %v12782_v15 = vld [vmem:[#allocation10 + $0x148] sm:$0xff] }
  0xfc   : > { %v14073_v20 = vpop.f32.mrf.mxu3  ;;  %v1204_v5 = vadd.f32 %v14071_v19, %v1066_v17  ;;  %v12767_v19 = vld [vmem:[#allocation10 + $0xd0] sm:$0xff] }
  0xfd   : > { %v1205_v61 = vadd.f32 %v14073_v20, %v1067_v22  ;;  %2306 = vmatpush.bf16.msrb.mxu1 %v12767_v19  ;;  %v12781_v22 = vld [vmem:[#allocation10 + $0x140] sm:$0xff]  ;;  %v10023_v19 = vld [vmem:[#allocation8 + $0x578] sm:$0xf0] }
 0x10a   : > { %v1321_v63 = vpop.f32.mrf.mxu0 }
 0x10b   : > { %v1335_v18 = vpop.f32.mrf.mxu1  ;;  %v1340_v55 = vadd.f32 %v1321_v63, %v1202_v47  ;;  %v12778_v63 = vld [vmem:[#allocation10 + $0x128] sm:$0xff] }
 0x10c   : > { %v1341_v1 = vadd.f32 %v1335_v18, %v1203_v52  ;;  %v12786_v18 = vld [vmem:[#allocation10 + $0x168] sm:$0xff]  ;;  %2462 = vmatpush.bf16.msrb.mxu2 %v12778_v63  ;;  %v12775_v52 = vld [vmem:[#allocation10 + $0x110] sm:$0xff] }
 0x10d   : > { %2476 = vmatpush.bf16.msrb.mxu3 %v12786_v18  ;;  %v12773_v18 = vld [vmem:[#allocation10 + $0x100] sm:$0xff] }
 0x110   : > { %2463 = vmatpush.bf16.msrb.mxu2 %v12777_v28 }
 0x111   : > { %2477 = vmatpush.bf16.msrb.mxu3 %v12785_v12 }
 0x112   : > { %v14075_v21 = vpop.f32.mrf.mxu0 }
 0x113   : > { %v14077_v24 = vpop.f32.mrf.mxu1  ;;  %v1463_v25 = vpop.f32.mrf.mxu2  ;;  %v1342_v10 = vadd.f32 %v14075_v21, %v1204_v5  ;;  %v1943_v5 = vld [vmem:[#allocation3 + $0x10] sm:$0x11] }
 0x114   : > { %v1477_v6 = vpop.f32.mrf.mxu3  ;;  %v1482_v13 = vadd.f32 %v1463_v25, %v1340_v55  ;;  %v1343_v29 = vadd.f32 %v14077_v24, %v1205_v61  ;;  %v12776_v24 = vld [vmem:[#allocation10 + $0x118] sm:$0xff] }
 0x115   : > { %v1483_v16 = vadd.f32 %v1477_v6, %v1341_v1  ;;  %2464 = vmatpush.bf16.msrb.mxu2 %v12776_v24  ;;  %2478 = vmatpush.bf16.msrb.mxu3 %v12784_v41  ;;  %v10077_v41 = vld [vmem:[#allocation8 + $0x4e0] sm:$0xf] }
 0x119   : > { %2465 = vmatpush.bf16.msrb.mxu2 %v12775_v52 }
 0x11b   : > { %v14079_v36 = vpop.f32.mrf.mxu2 }
 0x11c   : > { %v14081_v40 = vpop.f32.mrf.mxu3  ;;  %v1484_v33 = vadd.f32 %v14079_v36, %v1342_v10  ;;  %v12766_v36 = vld [vmem:[#allocation10 + $0xc8] sm:$0xff] }
 0x11d   : > { %v1485_v34 = vadd.f32 %v14081_v40, %v1343_v29  ;;  %2307 = vmatpush.bf16.msrb.mxu1 %v12766_v36  ;;  %v10021_v29 = vld [vmem:[#allocation8 + $0x570] sm:$0xf]  ;;  %v10013_v36 = vld [vmem:[#allocation8 + $0x560] sm:$0xf] }
 0x121   : > { %2308 = vmatpush.bf16.msrb.mxu1 %v12765_v57 }
 0x12a   : > { %v1604_v27 = vpop.f32.mrf.mxu0 }
 0x12b   : > { %v1618_v31 = vpop.f32.mrf.mxu1  ;;  %v1623_v59 = vadd.f32 %v1604_v27, %v1482_v13 }
 0x12c   : > { %v1624_v23 = vadd.f32 %v1618_v31, %v1483_v16  ;;  %v12759_v31 = vld [vmem:[#allocation10 + $0x90] sm:$0xff] }
 0x12d   : > { %2292 = vmatpush.bf16.msrb.mxu0 %v12759_v31  ;;  %v12819_v31 = vld [vmem:[#allocation8 + $0x574] sm:$0xf] }
 0x131   : > { %2293 = vmatpush.bf16.msrb.mxu0 %v12758_v44  ;;  %v10079_v44 = vld [vmem:[#allocation8 + $0x4e8] sm:$0xf0] }
 0x132   : > { %v1606_v53 = vpop.f32.mrf.mxu0  ;;  %v1741_v3 = vpop.f32.mrf.mxu2 }
 0x133   : > { %v1620_v56 = vpop.f32.mrf.mxu1  ;;  %v1755_v14 = vpop.f32.mrf.mxu3  ;;  %v1760_v25 = vadd.f32 %v1741_v3, %v1623_v59  ;;  %v1625_v37 = vadd.f32 %v1606_v53, %v1484_v33  ;;  %v12783_v53 = vld [vmem:[#allocation10 + $0x150] sm:$0xff] }
 0x134   : > { %v1761_v8 = vadd.f32 %v1755_v14, %v1624_v23  ;;  %v1626_v42 = vadd.f32 %v1620_v56, %v1485_v34  ;;  %v12757_v56 = vld [vmem:[#allocation10 + $0x80] sm:$0xff]  ;;  %2479 = vmatpush.bf16.msrb.mxu3 %v12783_v53  ;;  %v12774_v14 = vld [vmem:[#allocation10 + $0x108] sm:$0xff]  ;;  %v10085_v34 = vld [vmem:[#allocation8 + $0x4f0] sm:$0xf] }
 0x135   : > { %2294 = vmatpush.bf16.msrb.mxu0 %v12757_v56  ;;  %2466 = vmatpush.bf16.msrb.mxu2 %v12774_v14  ;;  %v10069_v14 = vld [vmem:[#allocation8 + $0x4d0] sm:$0xf] }
 0x138   : > { %2480 = vmatpush.bf16.msrb.mxu3 %v12782_v15  ;;  %v12800_v15 = vld [vmem:[#allocation8 + $0x4d4] sm:$0xf0] }
 0x139   : > { %2467 = vmatpush.bf16.msrb.mxu2 %v12773_v18 }
 0x13a   : > { %v1743_v21 = vpop.f32.mrf.mxu2 }
 0x13b   : > { %v1757_v38 = vpop.f32.mrf.mxu3  ;;  %v1762_v45 = vadd.f32 %v1743_v21, %v1625_v37  ;;  %v12804_v21 = vld [vmem:[#allocation8 + $0x4f4] sm:$0xf0]  ;;  %v10026_v37 = vor.u32 %v12819_v31, %v10023_v19 }
 0x13c   : > { %v1763_v47 = vadd.f32 %v1757_v38, %v1626_v42  ;;  %2481 = vmatpush.bf16.msrb.mxu3 %v12781_v22  ;;  %v12803_v38 = vld [vmem:[#allocation8 + $0x4f4] sm:$0xf]  ;;  %v12802_v42 = vld [vmem:[#allocation8 + $0x4e4] sm:$0xf0] }
 0x13d   : > { %2657 = vmatpush.bf16.msra.mxu1 %v10026_v37  ;;  %v10063_v37 = vld [vmem:[#allocation8 + $0x4c8] sm:$0xf0] }
 0x14a   : > { %v1875_v6 = vpop.f32.mrf.mxu0 }
 0x14b   : > { %v1894_v11 = vadd.f32 %v1875_v6, %v1760_v25  ;;  %v1889_v27 = vpop.f32.mrf.mxu1 }
 0x14c   : > { %v1895_v30 = vadd.f32 %v1889_v27, %v1761_v8 }
 0x14d   : > { %vm1898_vm3 = vcmp.ge.f32.partialorder %v1894_v11, 0.0  ;;  %v1902_v20 = vmul.f32 0.2, %v1894_v11 }
 0x14e   : > { %vm1899_vm6 = vcmp.ge.f32.partialorder %v1895_v30, 0.0  ;;  %v1903_v35 = vmul.f32 0.2, %v1895_v30 }
 0x14f   : > { %v1906_v39 = vsel %vm1898_vm3, %v1894_v11, %v1902_v20 }
 0x150   : > { %v1907_v43 = vsel %vm1899_vm6, %v1895_v30, %v1903_v35  ;;  %v12820_v30 = vld [vmem:[#allocation8 + $0x574] sm:$0xf0] }
 0x151   : > { %v1910_v46 = vpack.c.bf16 %v1907_v43, %v1906_v39  ;;  %v10022_v35 = vor.u32 %v12820_v30, %v10021_v29  ;;  %v10087_v39 = vld [vmem:[#allocation8 + $0x4f8] sm:$0xf0]  ;;  %v12801_v43 = vld [vmem:[#allocation8 + $0x4e4] sm:$0xf] }
 0x152   : > { %v1877_v40 = vpop.f32.mrf.mxu0  ;;  %v10090_v56 = vor.u32 %v12803_v38, %v10087_v39 }
 0x153   : > { %v1915_v48 = vshrl.u32 %v1910_v46, 16  ;;  %v1896_v49 = vadd.f32 %v1877_v40, %v1762_v45  ;;  %v1891_v51 = vpop.f32.mrf.mxu1  ;;  %v1918_v1 = vshll.u32 %v1910_v46, 16  ;;  %2643 = vmatpush.bf16.msra.mxu0 %v10022_v35  ;;  %v12818_v45 = vld [vmem:[#allocation8 + $0x564] sm:$0xf0]  ;;  %v12797_v35 = vld [vmem:[#allocation8 + $0x4c4] sm:$0xf] }
 0x154   : > { %v1897_v55 = vadd.f32 %v1891_v51, %v1763_v47  ;;  %v10086_v47 = vor.u32 %v12804_v21, %v10085_v34  ;;  %v10014_v40 = vor.u32 %v12818_v45, %v10013_v36  ;;  %v10061_v34 = vld [vmem:[#allocation8 + $0x4c0] sm:$0xf]  ;;  %v12798_v21 = vld [vmem:[#allocation8 + $0x4c4] sm:$0xf0]  ;;  %v10055_v36 = vld [vmem:[#allocation8 + $0x4b8] sm:$0xf0] }
 0x155   : > { %v1917_v62 = vrot.slane %v1915_v48, 7  ;;  %vm1900_vm3 = vcmp.ge.f32.partialorder %v1896_v49, 0.0  ;;  %v1904_v3 = vmul.f32 0.2, %v1896_v49  ;;  %v12817_v48 = vld [vmem:[#allocation8 + $0x564] sm:$0xf] }
 0x156   : > { %vm1901_vm6 = vcmp.ge.f32.partialorder %v1897_v55, 0.0  ;;  %v1905_v9 = vmul.f32 0.2, %v1897_v55 }
 0x157   : > { %v1920_v60 = vor.u32 %v1918_v1, %v1917_v62  ;;  %v1908_v13 = vsel %vm1900_vm3, %v1896_v49, %v1904_v3  ;;  %vm14101_vm3 = vmor %vm578_vm1, %vm1912_vm14  ;;  %v1921_v25 = vrot.slane %v1917_v62, 4  ;;  %v10015_v49 = vld [vmem:[#allocation8 + $0x568] sm:$0xf0]  ;;  %2644 = vmatpush.bf16.msra.mxu0 %v10014_v40 }
 0x158   : > { %v1909_v16 = vsel %vm1901_vm6, %v1897_v55, %v1905_v9  ;;  %v10018_v57 = vor.u32 %v12817_v48, %v10015_v49 }
 0x159   : > { %v1940_v17 = vsel %vm1938_vm5, %v1920_v60, %v1939_v4  ;;  %v1911_v59 = vpack.c.bf16 %v1909_v16, %v1908_v13  ;;  %v10078_v60 = vor.u32 %v12802_v42, %v10077_v41  ;;  %v10082_v13 = vor.u32 %v12801_v43, %v10079_v44  ;;  %v12799_v16 = vld [vmem:[#allocation8 + $0x4d4] sm:$0xf]  ;;  %v10053_v42 = vld [vmem:[#allocation8 + $0x4b0] sm:$0xf]  ;;  %v12796_v43 = vld [vmem:[#allocation8 + $0x4b4] sm:$0xf0] }
 0x15a   : > { %1941 = vst [vmem:[#allocation3] sm:$0xff] %v1940_v17  ;;  %v2155_v28 = vunpack.c.l.b16 %v1940_v17  ;;  %v2156_v12 = vunpack.c.h.b16 %v1940_v17  ;;  %2658 = vmatpush.bf16.msra.mxu1 %v10018_v57  ;;  %v10066_v41 = vor.u32 %v12797_v35, %v10063_v37  ;;  %v12795_v44 = vld [vmem:[#allocation8 + $0x4b4] sm:$0xf]  ;;  %v10054_v48 = vor.u32 %v12796_v43, %v10053_v42  ;;  %v10005_v57 = vld [vmem:[#allocation8 + $0x550] sm:$0xf] }
 0x15b   : > { %v1923_v63 = vshrl.u32 %v1911_v59, 16  ;;  %v1926_v26 = vshll.u32 %v1911_v59, 16  ;;  %v10058_v49 = vor.u32 %v12795_v44, %v10055_v36  ;;  %v12812_v35 = vld [vmem:[#allocation8 + $0x534] sm:$0xf0]  ;;  %v12811_v37 = vld [vmem:[#allocation8 + $0x534] sm:$0xf] }
 0x15c   : > { %v10207_v43 = vld [vmem:[#allocation8 + $0x668] sm:$0xf0]  ;;  %v9981_v44 = vld [vmem:[#allocation8 + $0x520] sm:$0xf]  ;;  %v12810_v36 = vld [vmem:[#allocation8 + $0x524] sm:$0xf0] }
 0x15d   : > { %v1925_v23 = vrot.slane %v1923_v63, 7 }
 0x15f   : > { %v1928_v61 = vor.u32 %v1926_v26, %v1925_v23  ;;  %v1930_v8 = vrot.slane %v1925_v23, 4  ;;  %v10071_v23 = vld [vmem:[#allocation8 + $0x4d8] sm:$0xf0] }
 0x161   : > { %v14107_v6 = vsel %vm14101_vm3, %v1921_v25, %v1928_v61  ;;  %v1944_v10 = vsel %vm13939_vm8, %v1930_v8, %v1943_v5  ;;  %v9765_v24 = vld [vmem:[#allocation3] sm:$0xf]  ;;  %v12739_v46 = vld [vmem:[#allocation3 + $0x4] sm:$0xf] }
 0x162   : > { %1942 = vst [vmem:[#allocation3 + $0x8] sm:$0xff] %v14107_v6  ;;  %v2157_v11 = vunpack.c.l.b16 %v14107_v6  ;;  %v2158_v27 = vunpack.c.h.b16 %v14107_v6  ;;  %v2317_v22 = vld [vmem:[#allocation3] sm:$0xee] }
 0x163   : > { %1945 = vst [vmem:[#allocation3 + $0x10] sm:$0x11] %v1944_v10  ;;  %v2352_v8 = vunpack.c.l.b16 %v2317_v22  ;;  %v2353_v10 = vunpack.c.h.b16 %v2317_v22  ;;  %v9999_v22 = vld [vmem:[#allocation8 + $0x548] sm:$0xf0] }
 0x164   : > { %v2161_v33 = vpack.c.b16 %v2157_v11, %v2155_v28  ;;  %v2162_v20 = vpack.c.b16 %v2158_v27, %v2156_v12  ;;  %v10070_v28 = vor.u32 %v12800_v15, %v10069_v14  ;;  %v10074_v12 = vor.u32 %v12799_v16, %v10071_v23  ;;  %v12791_v15 = vld [vmem:[#allocation8 + $0x494] sm:$0xf]  ;;  %v10039_v16 = vld [vmem:[#allocation8 + $0x498] sm:$0xf0] }
 0x165   : > { %v2354_v39 = vpack.c.b16 %v2157_v11, %v2352_v8 }
 0x166   : > { %v2168_v53 = vshll.u32 %v2161_v33, 16  ;;  %v2180_v55 = vshll.u32 %v2162_v20, 16  ;;  %v2166_v26 = vshrl.u32 %v2161_v33, 16  ;;  %v2178_v25 = vshrl.u32 %v2162_v20, 16 }
 0x167   : > { %v10062_v20 = vor.u32 %v12798_v21, %v10061_v34  ;;  %v9989_v34 = vld [vmem:[#allocation8 + $0x530] sm:$0xf] }
 0x168   : > { %v2170_v59 = vrot.slane %v2168_v53, 1  ;;  %v2182_v18 = vrot.slane %v2180_v55, 1  ;;  %v10047_v55 = vld [vmem:[#allocation8 + $0x4a8] sm:$0xf0] }
 0x169   : > { %v12740_v51 = vld [vmem:[#allocation3 + $0x4] sm:$0xf0]  ;;  %v9767_v52 = vld [vmem:[#allocation3 + $0x8] sm:$0xf0] }
 0x16a   : > { %v9766_v62 = vor.u32 %v12740_v51, %v9765_v24  ;;  %v9770_v1 = vor.u32 %v12739_v46, %v9767_v52  ;;  %v2118_v3 = vld [vmem:[#allocation3 + $0x10] sm:$0x11]  ;;  %v2171_v29 = vor.u32 %v2170_v59, %v2166_v26  ;;  %v2183_v31 = vor.u32 %v2182_v18, %v2178_v25  ;;  %v12794_v51 = vld [vmem:[#allocation8 + $0x4a4] sm:$0xf0]  ;;  %v12793_v52 = vld [vmem:[#allocation8 + $0x4a4] sm:$0xf] }
 0x16b   : > { %v2159_v4 = vunpack.c.l.b16 %v2118_v3  ;;  %v2160_v9 = vunpack.c.h.b16 %v2118_v3  ;;  %v2355_v24 = vpack.c.b16 %v2158_v27, %v2353_v10  ;;  %v10045_v27 = vld [vmem:[#allocation8 + $0x4a0] sm:$0xf]  ;;  %v10042_v59 = vor.u32 %v12791_v15, %v10039_v16  ;;  %v12813_v18 = vld [vmem:[#allocation8 + $0x544] sm:$0xf]  ;;  %v12790_v25 = vld [vmem:[#allocation8 + $0x484] sm:$0xf0] }
 0x16c   : > { %2094 = vmatmul.bf16.vlgmr.msra.gmra.mxu2 %v9766_v62  ;;  %2108 = vmatmul.bf16.vlgmr.msra.gmra.mxu3 %v9770_v1  ;;  %v10046_v53 = vor.u32 %v12794_v51, %v10045_v27  ;;  %v12816_v62 = vld [vmem:[#allocation8 + $0x554] sm:$0xf0]  ;;  %v12815_v1 = vld [vmem:[#allocation8 + $0x554] sm:$0xf]  ;;  %v10002_v26 = vor.u32 %v12813_v18, %v9999_v22  ;;  %v10031_v10 = vld [vmem:[#allocation8 + $0x488] sm:$0xf0] }
 0x16d   : > { %v2163_v17 = vpack.c.b16 %v2159_v4, %v2159_v4  ;;  %v2164_v63 = vpack.c.b16 %v2160_v9, %v2160_v9  ;;  %2757 = vmatpush.bf16.msra.mxu2 %v10086_v47  ;;  %2771 = vmatpush.bf16.msra.mxu3 %v10090_v56  ;;  %v2356_v47 = vrot.slane %v2354_v39, 1  ;;  %v2359_v40 = vrot.slane %v2355_v24, 1  ;;  %v10007_v4 = vld [vmem:[#allocation8 + $0x558] sm:$0xf0]  ;;  %v10037_v9 = vld [vmem:[#allocation8 + $0x490] sm:$0xf] }
 0x16e   : > { %v10050_v56 = vor.u32 %v12793_v52, %v10047_v55  ;;  %v10006_v3 = vor.u32 %v12816_v62, %v10005_v57  ;;  %v10205_v39 = vld [vmem:[#allocation8 + $0x660] sm:$0xf]  ;;  %v12850_v24 = vld [vmem:[#allocation8 + $0x664] sm:$0xf0]  ;;  %v10199_v51 = vld [vmem:[#allocation8 + $0x658] sm:$0xf0] }
 0x16f   : > { %v2173_v5 = vshll.u32 %v2163_v17, 16  ;;  %v2185_v61 = vshll.u32 %v2164_v63, 16  ;;  %v2357_v45 = vrot.slane %v2163_v17, 1  ;;  %v2360_v46 = vrot.slane %v2164_v63, 1  ;;  %v9997_v17 = vld [vmem:[#allocation8 + $0x540] sm:$0xf] }
 0x170   : > { %2645 = vmatpush.bf16.msra.mxu0 %v10006_v3  ;;  %v12814_v63 = vld [vmem:[#allocation8 + $0x544] sm:$0xf0]  ;;  %v10206_v42 = vor.u32 %v12850_v24, %v10205_v39  ;;  %v12808_v55 = vld [vmem:[#allocation8 + $0x514] sm:$0xf0]  ;;  %v9975_v62 = vld [vmem:[#allocation8 + $0x518] sm:$0xf0] }
 0x171   : > { %v2175_v30 = vrot.slane %v2173_v5, 1  ;;  %v2187_v19 = vrot.slane %v2185_v61, 1  ;;  %2758 = vmatpush.bf16.msra.mxu2 %v10078_v60  ;;  %2772 = vmatpush.bf16.msra.mxu3 %v10082_v13  ;;  %v2358_v11 = vsel %vm1227_vm0, %v2356_v47, %v2357_v45  ;;  %v2361_v6 = vsel %vm1227_vm0, %v2359_v40, %v2360_v46  ;;  %v12792_v60 = vld [vmem:[#allocation8 + $0x494] sm:$0xf0]  ;;  %v10029_v5 = vld [vmem:[#allocation8 + $0x480] sm:$0xf] }
 0x172   : > { %v10010_v13 = vor.u32 %v12815_v1, %v10007_v4  ;;  %v10038_v14 = vor.u32 %v12792_v60, %v10037_v9  ;;  %v9998_v23 = vor.u32 %v12814_v63, %v9997_v17  ;;  %v12789_v61 = vld [vmem:[#allocation8 + $0x484] sm:$0xf]  ;;  %v10030_v8 = vor.u32 %v12790_v25, %v10029_v5  ;;  %v9983_v40 = vld [vmem:[#allocation8 + $0x528] sm:$0xf0]  ;;  %v10189_v3 = vld [vmem:[#allocation8 + $0x640] sm:$0xf] }
 0x173   : > { %v2176_v38 = vsel %vm942_vm13, %v2171_v29, %v2175_v30  ;;  %v2188_v33 = vsel %vm942_vm13, %v2183_v31, %v2187_v19  ;;  %v10034_v29 = vor.u32 %v12789_v61, %v10031_v10  ;;  %v12851_v31 = vld [vmem:[#allocation8 + $0x674] sm:$0xf]  ;;  %v10215_v19 = vld [vmem:[#allocation8 + $0x678] sm:$0xf0]  ;;  %v9982_v46 = vor.u32 %v12810_v36, %v9981_v44  ;;  %v12809_v47 = vld [vmem:[#allocation8 + $0x524] sm:$0xf] }
 0x174   : > { %2295 = vmatmul.bf16.vlgmr.msrb.gmra.mxu0 %v2176_v38  ;;  %2309 = vmatmul.bf16.vlgmr.msrb.gmra.mxu1 %v2188_v33  ;;  %v10218_v21 = vor.u32 %v12851_v31, %v10215_v19  ;;  %v9991_v38 = vld [vmem:[#allocation8 + $0x538] sm:$0xf0]  ;;  %v9990_v33 = vor.u32 %v12812_v35, %v9989_v34  ;;  %v12846_v4 = vld [vmem:[#allocation8 + $0x644] sm:$0xf0]  ;;  %v12845_v9 = vld [vmem:[#allocation8 + $0x644] sm:$0xf] }
 0x175   : > { %2759 = vmatpush.bf16.msra.mxu2 %v10070_v28  ;;  %2773 = vmatpush.bf16.msra.mxu3 %v10074_v12  ;;  %v10213_v28 = vld [vmem:[#allocation8 + $0x670] sm:$0xf]  ;;  %v12852_v12 = vld [vmem:[#allocation8 + $0x674] sm:$0xf0]  ;;  %v10190_v60 = vor.u32 %v12846_v4, %v10189_v3  ;;  %v9965_v15 = vld [vmem:[#allocation8 + $0x500] sm:$0xf] }
 0x176   : > { %2659 = vmatpush.bf16.msra.mxu1 %v10010_v13  ;;  %2646 = vmatpush.bf16.msra.mxu0 %v9998_v23  ;;  %v10214_v30 = vor.u32 %v12852_v12, %v10213_v28  ;;  %v10191_v13 = vld [vmem:[#allocation8 + $0x648] sm:$0xf0]  ;;  %v12806_v16 = vld [vmem:[#allocation8 + $0x504] sm:$0xf0]  ;;  %v12805_v17 = vld [vmem:[#allocation8 + $0x504] sm:$0xf] }
 0x177   : > { %v9967_v63 = vld [vmem:[#allocation8 + $0x508] sm:$0xf0]  ;;  %v10149_v18 = vld [vmem:[#allocation8 + $0x5f0] sm:$0xf]  ;;  %v12836_v22 = vld [vmem:[#allocation8 + $0x5f4] sm:$0xf0] }
 0x178   : > { %v9970_v23 = vor.u32 %v12805_v17, %v9967_v63  ;;  %v12835_v5 = vld [vmem:[#allocation8 + $0x5f4] sm:$0xf]  ;;  %v10151_v25 = vld [vmem:[#allocation8 + $0x5f8] sm:$0xf0]  ;;  %v10181_v61 = vld [vmem:[#allocation8 + $0x630] sm:$0xf] }
 0x179   : > { %2760 = vmatpush.bf16.msra.mxu2 %v10062_v20  ;;  %2774 = vmatpush.bf16.msra.mxu3 %v10066_v41  ;;  %v9994_v20 = vor.u32 %v12811_v37, %v9991_v38  ;;  %v12849_v41 = vld [vmem:[#allocation8 + $0x664] sm:$0xf]  ;;  %v12844_v10 = vld [vmem:[#allocation8 + $0x634] sm:$0xf0]  ;;  %v12843_v28 = vld [vmem:[#allocation8 + $0x634] sm:$0xf] }
 0x17a   : > { %2660 = vmatpush.bf16.msra.mxu1 %v10002_v26  ;;  %2647 = vmatpush.bf16.msra.mxu0 %v9990_v33  ;;  %v10210_v45 = vor.u32 %v12849_v41, %v10207_v43  ;;  %v10150_v26 = vor.u32 %v12836_v22, %v10149_v18  ;;  %v10183_v12 = vld [vmem:[#allocation8 + $0x638] sm:$0xf0]  ;;  %v10141_v31 = vld [vmem:[#allocation8 + $0x5e0] sm:$0xf]  ;;  %v12834_v19 = vld [vmem:[#allocation8 + $0x5e4] sm:$0xf0] }
 0x17b   : > { %v12833_v34 = vld [vmem:[#allocation8 + $0x5e4] sm:$0xf]  ;;  %v10142_v37 = vor.u32 %v12834_v19, %v10141_v31  ;;  %v10143_v38 = vld [vmem:[#allocation8 + $0x5e8] sm:$0xf0]  ;;  %v10173_v33 = vld [vmem:[#allocation8 + $0x620] sm:$0xf] }
 0x17c   : > { %2468 = vmatmul.bf16.vlgmr.msrb.gmra.mxu2 %v2358_v11  ;;  %2482 = vmatmul.bf16.vlgmr.msrb.gmra.mxu3 %v2361_v6  ;;  %v12848_v11 = vld [vmem:[#allocation8 + $0x654] sm:$0xf0]  ;;  %v12847_v6 = vld [vmem:[#allocation8 + $0x654] sm:$0xf]  ;;  %v10146_v39 = vor.u32 %v12833_v34, %v10143_v38  ;;  %v12841_v41 = vld [vmem:[#allocation8 + $0x624] sm:$0xf] }
 0x17d   : > { %2761 = vmatpush.bf16.msra.mxu2 %v10054_v48  ;;  %2775 = vmatpush.bf16.msra.mxu3 %v10058_v49  ;;  %v9986_v48 = vor.u32 %v12809_v47, %v9983_v40  ;;  %v10197_v49 = vld [vmem:[#allocation8 + $0x650] sm:$0xf]  ;;  %v10202_v52 = vor.u32 %v12847_v6, %v10199_v51  ;;  %v12832_v36 = vld [vmem:[#allocation8 + $0x5d4] sm:$0xf0]  ;;  %v10135_v47 = vld [vmem:[#allocation8 + $0x5d8] sm:$0xf0] }
 0x17e   : > { %2661 = vmatpush.bf16.msra.mxu1 %v9994_v20  ;;  %2648 = vmatpush.bf16.msra.mxu0 %v9982_v46  ;;  %v10198_v27 = vor.u32 %v12848_v11, %v10197_v49  ;;  %v12842_v20 = vld [vmem:[#allocation8 + $0x624] sm:$0xf0]  ;;  %v10133_v44 = vld [vmem:[#allocation8 + $0x5d0] sm:$0xf]  ;;  %v12839_v6 = vld [vmem:[#allocation8 + $0x614] sm:$0xf] }
 0x17f   : > { %v10174_v24 = vor.u32 %v12842_v20, %v10173_v33  ;;  %v10134_v46 = vor.u32 %v12832_v36, %v10133_v44  ;;  %v10165_v40 = vld [vmem:[#allocation8 + $0x610] sm:$0xf]  ;;  %v10125_v51 = vld [vmem:[#allocation8 + $0x5c0] sm:$0xf]  ;;  %v12837_v3 = vld [vmem:[#allocation8 + $0x604] sm:$0xf] }
 0x180   : > { %v12828_v18 = vld [vmem:[#allocation8 + $0x5b4] sm:$0xf0]  ;;  %v12827_v22 = vld [vmem:[#allocation8 + $0x5b4] sm:$0xf]  ;;  %v10101_v19 = vld [vmem:[#allocation8 + $0x590] sm:$0xf] }
 0x181   : > { %2762 = vmatpush.bf16.msra.mxu2 %v10046_v53  ;;  %2776 = vmatpush.bf16.msra.mxu3 %v10050_v56  ;;  %v9973_v53 = vld [vmem:[#allocation8 + $0x510] sm:$0xf]  ;;  %v12807_v56 = vld [vmem:[#allocation8 + $0x514] sm:$0xf]  ;;  %v10103_v38 = vld [vmem:[#allocation8 + $0x598] sm:$0xf0] }
 0x182   : > { %2662 = vmatpush.bf16.msra.mxu1 %v9986_v48  ;;  %v9974_v57 = vor.u32 %v12808_v55, %v9973_v53  ;;  %v9978_v1 = vor.u32 %v12807_v56, %v9975_v62  ;;  %v12840_v48 = vld [vmem:[#allocation8 + $0x614] sm:$0xf0]  ;;  %v12830_v53 = vld [vmem:[#allocation8 + $0x5c4] sm:$0xf0]  ;;  %v12829_v55 = vld [vmem:[#allocation8 + $0x5c4] sm:$0xf] }
 0x183   : > { %v10166_v11 = vor.u32 %v12840_v48, %v10165_v40  ;;  %v10127_v56 = vld [vmem:[#allocation8 + $0x5c8] sm:$0xf0]  ;;  %v10157_v62 = vld [vmem:[#allocation8 + $0x600] sm:$0xf]  ;;  %v13495_v40 = vld [vmem:[%s13910_s27 + $0x8] sm:$0xff] }
 0x184   : > { %2649 = vmatpush.bf16.msra.mxu0 %v9974_v57  ;;  %v10126_v57 = vor.u32 %v12830_v53, %v10125_v51  ;;  %v10093_v36 = vld [vmem:[#allocation8 + $0x580] sm:$0xf] }
 0x185   : > { %2763 = vmatpush.bf16.msra.mxu2 %v10038_v14  ;;  %2777 = vmatpush.bf16.msra.mxu3 %v10042_v59  ;;  %v10194_v14 = vor.u32 %v12845_v9, %v10191_v13  ;;  %v9966_v59 = vor.u32 %v12806_v16, %v9965_v15  ;;  %v10159_v13 = vld [vmem:[#allocation8 + $0x608] sm:$0xf0] }
 0x186   : > { %2663 = vmatpush.bf16.msra.mxu1 %v9978_v1  ;;  %v12838_v1 = vld [vmem:[#allocation8 + $0x604] sm:$0xf0]  ;;  %v10162_v17 = vor.u32 %v12837_v3, %v10159_v13  ;;  %v12883_v13 = vld [vmem:[#allocation8 + $0x774] sm:$0xf] }
 0x187   : > { %v10158_v16 = vor.u32 %v12838_v1, %v10157_v62 }
 0x188   : > { %2650 = vmatpush.bf16.msra.mxu0 %v9966_v59  ;;  %v10117_v59 = vld [vmem:[#allocation8 + $0x5b0] sm:$0xf] }
 0x189   : > { %2764 = vmatpush.bf16.msra.mxu2 %v10030_v8  ;;  %2778 = vmatpush.bf16.msra.mxu3 %v10034_v29  ;;  %v10154_v8 = vor.u32 %v12835_v5, %v10151_v25  ;;  %v10182_v29 = vor.u32 %v12844_v10, %v10181_v61  ;;  %v10109_v25 = vld [vmem:[#allocation8 + $0x5a0] sm:$0xf]  ;;  %v12826_v61 = vld [vmem:[#allocation8 + $0x5a4] sm:$0xf0]  ;;  %v10111_v10 = vld [vmem:[#allocation8 + $0x5a8] sm:$0xf0] }
 0x18a   : > { %2664 = vmatpush.bf16.msra.mxu1 %v9970_v23  ;;  %v10119_v23 = vld [vmem:[#allocation8 + $0x5b8] sm:$0xf0] }
 0x18b   : > { %v10122_v5 = vor.u32 %v12827_v22, %v10119_v23  ;;  %v12882_v22 = vld [vmem:[#allocation8 + $0x764] sm:$0xf0]  ;;  %v12881_v23 = vld [vmem:[#allocation8 + $0x764] sm:$0xf] }
 0x18c   : > { %2906 = vmatpush.bf16.msrb.mxu0 %v10150_v26  ;;  %v10118_v26 = vor.u32 %v12828_v18, %v10117_v59 }
 0x18d   : > { %3043 = vmatpush.bf16.msrb.mxu2 %v10214_v30  ;;  %3057 = vmatpush.bf16.msrb.mxu3 %v10218_v21  ;;  %v10186_v30 = vor.u32 %v12843_v28, %v10183_v12  ;;  %v13494_v28 = vld [vmem:[%s13910_s27] sm:$0xff] }
 0x18e   : > { %2920 = vmatpush.bf16.msrb.mxu1 %v10154_v8  ;;  %v12825_v8 = vld [vmem:[#allocation8 + $0x5a4] sm:$0xf] }
 0x18f   : > { %v10114_v31 = vor.u32 %v12825_v8, %v10111_v10  ;;  %v10325_v8 = vld [vmem:[#allocation8 + $0x750] sm:$0xf]  ;;  %v12880_v10 = vld [vmem:[#allocation8 + $0x754] sm:$0xf0] }
 0x190   : > { %2907 = vmatpush.bf16.msrb.mxu0 %v10142_v37  ;;  %v12823_v37 = vld [vmem:[#allocation8 + $0x594] sm:$0xf] }
 0x191   : > { %3044 = vmatpush.bf16.msrb.mxu2 %v10206_v42  ;;  %3058 = vmatpush.bf16.msrb.mxu3 %v10210_v45  ;;  %v10175_v42 = vld [vmem:[#allocation8 + $0x628] sm:$0xf0]  ;;  %v12831_v45 = vld [vmem:[#allocation8 + $0x5d4] sm:$0xf]  ;;  %v10106_v44 = vor.u32 %v12823_v37, %v10103_v38  ;;  %v10317_v38 = vld [vmem:[#allocation8 + $0x740] sm:$0xf] }
 0x192   : > { %v10178_v43 = vor.u32 %v12841_v41, %v10175_v42  ;;  %2921 = vmatpush.bf16.msrb.mxu1 %v10146_v39  ;;  %v10138_v49 = vor.u32 %v12831_v45, %v10135_v47  ;;  %v12822_v45 = vld [vmem:[#allocation8 + $0x584] sm:$0xf0]  ;;  %v10095_v47 = vld [vmem:[#allocation8 + $0x588] sm:$0xf0] }
 0x194   : > { %2908 = vmatpush.bf16.msrb.mxu0 %v10134_v46  ;;  %v12821_v46 = vld [vmem:[#allocation8 + $0x584] sm:$0xf] }
 0x195   : > { %3045 = vmatpush.bf16.msrb.mxu2 %v10198_v27  ;;  %3059 = vmatpush.bf16.msrb.mxu3 %v10202_v52  ;;  %v10167_v27 = vld [vmem:[#allocation8 + $0x618] sm:$0xf0]  ;;  %v10098_v51 = vor.u32 %v12821_v46, %v10095_v47 }
 0x196   : > { %v10170_v52 = vor.u32 %v12839_v6, %v10167_v27  ;;  %2922 = vmatpush.bf16.msrb.mxu1 %v10138_v49  ;;  %v10094_v6 = vor.u32 %v12822_v45, %v10093_v36  ;;  %v10279_v36 = vld [vmem:[#allocation8 + $0x6f8] sm:$0xf0] }
 0x198   : > { %2909 = vmatpush.bf16.msrb.mxu0 %v10126_v57 }
 0x199   : > { %3046 = vmatpush.bf16.msrb.mxu2 %v10190_v60  ;;  %3060 = vmatpush.bf16.msrb.mxu3 %v10194_v14  ;;  %v10130_v60 = vor.u32 %v12829_v55, %v10127_v56 }
 0x19b   : > { %2923 = vmatpush.bf16.msrb.mxu1 %v10130_v60  ;;  %v12884_v60 = vld [vmem:[#allocation8 + $0x774] sm:$0xf0] }
 0x19c   : > { %2910 = vmatpush.bf16.msrb.mxu0 %v10118_v26  ;;  %v10335_v26 = vld [vmem:[#allocation8 + $0x768] sm:$0xf0] }
 0x19d   : > { %3047 = vmatpush.bf16.msrb.mxu2 %v10182_v29  ;;  %3061 = vmatpush.bf16.msrb.mxu3 %v10186_v30  ;;  %v10110_v30 = vor.u32 %v12826_v61, %v10109_v25  ;;  %v10338_v61 = vor.u32 %v12881_v23, %v10335_v26 }
 0x19f   : > { %2924 = vmatpush.bf16.msrb.mxu1 %v10122_v5  ;;  %v2517_v5 = vld [vmem:[#allocation2] sm:$0x8] }
 0x1a0   : > { %2911 = vmatpush.bf16.msrb.mxu0 %v10110_v30 }
 0x1a1   : > { %3048 = vmatpush.bf16.msrb.mxu2 %v10174_v24  ;;  %3062 = vmatpush.bf16.msrb.mxu3 %v10178_v43 }
 0x1a3   : > { %2925 = vmatpush.bf16.msrb.mxu1 %v10114_v31 }
 0x1a5   : > { %3049 = vmatpush.bf16.msrb.mxu2 %v10166_v11  ;;  %3063 = vmatpush.bf16.msrb.mxu3 %v10170_v52 }
 0x1a7   : > { %2926 = vmatpush.bf16.msrb.mxu1 %v10106_v44  ;;  %v12867_v44 = vld [vmem:[#allocation8 + $0x6f4] sm:$0xf] }
 0x1a9   : > { %3050 = vmatpush.bf16.msrb.mxu2 %v10158_v16  ;;  %3064 = vmatpush.bf16.msrb.mxu3 %v10162_v17 }
 0x1ab   : > { %2927 = vmatpush.bf16.msrb.mxu1 %v10098_v51 }
 0x1ef   : > { %v2095_v21 = vpop.f32.mrf.mxu2  ;;  %v2109_v35 = vpop.f32.mrf.mxu3 }
 0x1f0   : > { %v2110_v63 = vadd.f32 %v2109_v35, %v2095_v21  ;;  %v12824_v35 = vld [vmem:[#allocation8 + $0x594] sm:$0xf0] }
 0x1f1   : > { %v2296_v4 = vpop.f32.mrf.mxu0  ;;  %v2310_v9 = vpop.f32.mrf.mxu1  ;;  %v10102_v42 = vor.u32 %v12824_v35, %v10101_v19  ;;  %v10326_v35 = vor.u32 %v12880_v10, %v10325_v8  ;;  %v12873_v8 = vld [vmem:[#allocation8 + $0x724] sm:$0xf]  ;;  %v10303_v10 = vld [vmem:[#allocation8 + $0x728] sm:$0xf0] }
 0x1f2   : > { %v2114_v12 = vadd.f32 %v13494_v28, %v2110_v63  ;;  %v2311_v29 = vadd.f32 %v2310_v9, %v2296_v4  ;;  %v10341_v4 = vld [vmem:[#allocation8 + $0x770] sm:$0xf]  ;;  %v10333_v63 = vld [vmem:[#allocation8 + $0x760] sm:$0xf]  ;;  %v12879_v28 = vld [vmem:[#allocation8 + $0x754] sm:$0xf] }
 0x1f3   : > { %2912 = vmatpush.bf16.msrb.mxu0 %v10102_v42  ;;  %v10342_v17 = vor.u32 %v12884_v60, %v10341_v4  ;;  %v10334_v25 = vor.u32 %v12882_v22, %v10333_v63  ;;  %v10277_v42 = vld [vmem:[#allocation8 + $0x6f0] sm:$0xf]  ;;  %v12875_v4 = vld [vmem:[#allocation8 + $0x734] sm:$0xf]  ;;  %v12865_v63 = vld [vmem:[#allocation8 + $0x6e4] sm:$0xf] }
 0x1f4   : > { %v2315_v33 = vadd.f32 %v2311_v29, %v2114_v12  ;;  %v10327_v12 = vld [vmem:[#allocation8 + $0x758] sm:$0xf0]  ;;  %v2540_v29 = vunpack.c.l.b16 %v2517_v5  ;;  %v10301_v5 = vld [vmem:[#allocation8 + $0x720] sm:$0xf] }
 0x1f5   : > { %v10330_v37 = vor.u32 %v12879_v28, %v10327_v12 }
 0x1f7   : > { %v2097_v14 = vpop.f32.mrf.mxu2  ;;  %v2111_v15 = vpop.f32.mrf.mxu3  ;;  %2913 = vmatpush.bf16.msrb.mxu0 %v10094_v6 }
 0x1f8   : > { %v2112_v20 = vadd.f32 %v2111_v15, %v2097_v14  ;;  %v10343_v14 = vld [vmem:[#allocation8 + $0x778] sm:$0xf0] }
 0x1f9   : > { %v2298_v24 = vpop.f32.mrf.mxu0  ;;  %v2312_v41 = vpop.f32.mrf.mxu1  ;;  %v10346_v59 = vor.u32 %v12883_v13, %v10343_v14 }
 0x1fa   : > { %v2115_v48 = vadd.f32 %v13495_v40, %v2112_v20  ;;  %v2313_v49 = vadd.f32 %v2312_v41, %v2298_v24  ;;  %v12877_v20 = vld [vmem:[#allocation8 + $0x744] sm:$0xf] }
 0x1fc   : > { %v2316_v56 = vadd.f32 %v2313_v49, %v2115_v48 }
 0x1ff   : > { %v2469_v34 = vpop.f32.mrf.mxu2  ;;  %v2483_v21 = vpop.f32.mrf.mxu3 }
 0x200   : > { %v2484_v39 = vadd.f32 %v2483_v21, %v2469_v34 }
 0x202   : > { %v2488_v43 = vadd.f32 %v2484_v39, %v2315_v33  ;;  %v12878_v33 = vld [vmem:[#allocation8 + $0x744] sm:$0xf0]  ;;  %v10319_v39 = vld [vmem:[#allocation8 + $0x748] sm:$0xf0] }
 0x203   : > { %v10322_v6 = vor.u32 %v12877_v20, %v10319_v39  ;;  %v10306_v20 = vor.u32 %v12873_v8, %v10303_v10  ;;  %v10293_v39 = vld [vmem:[#allocation8 + $0x710] sm:$0xf] }
 0x204   : > { %vm2490_vm1 = vcmp.ge.f32.partialorder %v2488_v43, 0.0  ;;  %v2492_v11 = vmul.f32 0.2, %v2488_v43 }
 0x206   : > { %v14128_v27 = vsel %vm2490_vm1, %v2488_v43, %v2492_v11  ;;  %v12868_v43 = vld [vmem:[#allocation8 + $0x6f4] sm:$0xf0]  ;;  %v10318_v11 = vor.u32 %v12878_v33, %v10317_v38 }
 0x207   : > { %v2496_v52 = vpack.c.bf16 %v14128_v27, %v14128_v27  ;;  %v2471_v53 = vpop.f32.mrf.mxu2  ;;  %v2485_v55 = vpop.f32.mrf.mxu3 }
 0x208   : > { %v2486_v57 = vadd.f32 %v2485_v55, %v2471_v53 }
 0x209   : > { %2498 = vst [vmem:[#allocation2 + $0x4] sm:$0xf] %v2496_v52  ;;  %v2673_v15 = vunpack.c.l.b16 %v2496_v52 }
 0x20a   : > { %v2489_v62 = vadd.f32 %v2486_v57, %v2316_v56  ;;  %v10309_v56 = vld [vmem:[#allocation8 + $0x730] sm:$0xf]  ;;  %v10278_v57 = vor.u32 %v12868_v43, %v10277_v42  ;;  %v12871_v42 = vld [vmem:[#allocation8 + $0x714] sm:$0xf]  ;;  %v10295_v43 = vld [vmem:[#allocation8 + $0x718] sm:$0xf0] }
 0x20c   : > { %vm2491_vm14 = vcmp.ge.f32.partialorder %v2489_v62, 0.0  ;;  %v2493_v1 = vmul.f32 0.2, %v2489_v62 }
 0x20e   : > { %v14132_v3 = vsel %vm2491_vm14, %v2489_v62, %v2493_v1  ;;  %v10282_v62 = vor.u32 %v12867_v44, %v10279_v36  ;;  %v12876_v1 = vld [vmem:[#allocation8 + $0x734] sm:$0xf0]  ;;  %vm5576_vm14 = vcmask 523264  }
 0x20f   : > { %v2497_v9 = vpack.c.bf16 %v14132_v3, %v14132_v3  ;;  %v10310_v23 = vor.u32 %v12876_v1, %v10309_v56  ;;  %v12870_v56 = vld [vmem:[#allocation8 + $0x704] sm:$0xf0]  ;;  %v10473_v1 = vld [vmem:[#allocation8 + $0x870] sm:$0xf] }
 0x211   : > { %2499 = vst [vmem:[#allocation2 + $0x8] sm:$0xf] %v2497_v9  ;;  %v2674_v16 = vunpack.c.l.b16 %v2497_v9  ;;  %v10311_v9 = vld [vmem:[#allocation8 + $0x738] sm:$0xf0] }
 0x212   : > { %v10314_v26 = vor.u32 %v12875_v4, %v10311_v9 }
 0x213   : > { %v2675_v18 = vpack.c.b16 %v2674_v16, %v2673_v15 }
 0x215   : > { %2765 = vmatmul.bf16.vlgmr.msra.gmra.mxu2 %v2675_v18  ;;  %2779 = vmatmul.bf16.vlgmr.msra.gmra.mxu3 %v2675_v18  ;;  %v10271_v18 = vld [vmem:[#allocation8 + $0x6e8] sm:$0xf0] }
 0x216   : > { %3321 = vmatpush.bf16.msra.mxu2 %v10342_v17  ;;  %3335 = vmatpush.bf16.msra.mxu3 %v10346_v59  ;;  %v10269_v17 = vld [vmem:[#allocation8 + $0x6e0] sm:$0xf]  ;;  %v12866_v59 = vld [vmem:[#allocation8 + $0x6e4] sm:$0xf0] }
 0x217   : > { %v10270_v12 = vor.u32 %v12866_v59, %v10269_v17  ;;  %v10475_v17 = vld [vmem:[#allocation8 + $0x878] sm:$0xf0] }
 0x218   : > { %v14136_v30 = vld [vmem:[#allocation2 + $0x4] sm:$0xff]  }
 0x219   : > { %v2938_v31 = vld [vmem:[#allocation2 + $0x8] sm:$0x7]  ;;  %v2541_v19 = vunpack.c.l.b16 %v14136_v30  ;;  %v2542_v34 = vunpack.c.h.b16 %v14136_v30 }
 0x21a   : > { %v2957_v21 = vunpack.c.l.b16 %v2938_v31  ;;  %3322 = vmatpush.bf16.msra.mxu2 %v10334_v25  ;;  %3336 = vmatpush.bf16.msra.mxu3 %v10338_v61  ;;  %v14142_v49 = vld [vmem:[#allocation2 + $0x4] sm:$0xff]   ;;  %v2787_v25 = vld [vmem:[#allocation2 + $0xc] sm:$0x1]  ;;  %v12874_v61 = vld [vmem:[#allocation8 + $0x724] sm:$0xf0] }
 0x21b   : > { %v2543_v24 = vpack.c.b16 %v2541_v19, %v2540_v29  ;;  %v2544_v41 = vpack.c.b16 %v2542_v34, %v2542_v34  ;;  %v14145_v60 = vunpack.c.h.b16 %v14142_v49  ;;  %v10274_v29 = vor.u32 %v12865_v63, %v10271_v18  ;;  %v10261_v31 = vld [vmem:[#allocation8 + $0x6d0] sm:$0xf]  ;;  %v3212_v34 = vld [vmem:[#allocation2] sm:$0xc] }
 0x21c   : > { %v2958_v45 = vpack.c.b16 %v2957_v21, %v2957_v21  ;;  %v12864_v21 = vld [vmem:[#allocation8 + $0x6d4] sm:$0xf0]  ;;  %v2810_v38 = vunpack.c.l.b16 %v2787_v25  ;;  %v10302_v33 = vor.u32 %v12874_v61, %v10301_v5  ;;  %v2816_v44 = vshll.u32 %v14142_v49, 16  ;;  %v10245_v63 = vld [vmem:[#allocation8 + $0x6b0] sm:$0xf] }
 0x21d   : > { %v2546_v46 = vshrl.u32 %v2543_v24, 16  ;;  %v2549_v47 = vshll.u32 %v2543_v24, 16  ;;  %v2554_v40 = vshrl.u32 %v2544_v41, 16  ;;  %v2557_v48 = vshll.u32 %v2544_v41, 16  ;;  %v3213_v41 = vld [vmem:[#allocation2 + $0x8] sm:$0x3] }
 0x21e   : > { %3323 = vmatpush.bf16.msra.mxu2 %v10326_v35  ;;  %3337 = vmatpush.bf16.msra.mxu3 %v10330_v37  ;;  %v2959_v15 = vrot.slane %v2543_v24, 3  ;;  %v2960_v16 = vrot.slane %v2958_v45, 3  ;;  %v12863_v35 = vld [vmem:[#allocation8 + $0x6d4] sm:$0xf]  ;;  %v10263_v37 = vld [vmem:[#allocation8 + $0x6d8] sm:$0xf0]  ;;  %v10262_v36 = vor.u32 %v12864_v21, %v10261_v31 }
 0x21f   : > { %v2548_v51 = vrot.slane %v2546_v46, 3  ;;  %v2551_v52 = vrot.slane %v2549_v47, 4  ;;  %v2556_v53 = vrot.slane %v2554_v40, 3  ;;  %v2559_v55 = vrot.slane %v2557_v48, 4  ;;  %v12872_v24 = vld [vmem:[#allocation8 + $0x714] sm:$0xf0] }
 0x220   : > { %v2961_v28 = vsel %vm1089_vm7, %v2959_v15, %v2960_v16  ;;  %v10266_v45 = vor.u32 %v12863_v35, %v10263_v37  ;;  %v10253_v46 = vld [vmem:[#allocation8 + $0x6c0] sm:$0xf]  ;;  %v12862_v47 = vld [vmem:[#allocation8 + $0x6c4] sm:$0xf0]  ;;  %v12861_v40 = vld [vmem:[#allocation8 + $0x6c4] sm:$0xf] }
 0x221   : > { %v2552_v13 = vor.u32 %v2551_v52, %v2548_v51  ;;  %v2560_v14 = vor.u32 %v2559_v55, %v2556_v53  ;;  %v10255_v48 = vld [vmem:[#allocation8 + $0x6c8] sm:$0xf0]  ;;  %v3234_v51 = vunpack.c.l.b16 %v3213_v41  ;;  %v10294_v52 = vor.u32 %v12872_v24, %v10293_v39  ;;  %v10285_v55 = vld [vmem:[#allocation8 + $0x700] sm:$0xf]  ;;  %v12917_v15 = vld [vmem:[#allocation8 + $0x874] sm:$0xf0] }
 0x222   : > { %3324 = vmatpush.bf16.msra.mxu2 %v10318_v11  ;;  %3338 = vmatpush.bf16.msra.mxu3 %v10322_v6  ;;  %v14150_v11 = vpack.c.b16 %v2810_v38, %v2810_v38  ;;  %v3233_v6 = vunpack.c.l.b16 %v3212_v34  ;;  %v10298_v53 = vor.u32 %v12871_v42, %v10295_v43  ;;  %v2818_v4 = vrot.slane %v2816_v44, 1  ;;  %v12916_v16 = vld [vmem:[#allocation8 + $0x874] sm:$0xf]  ;;  %v12860_v5 = vld [vmem:[#allocation8 + $0x6b4] sm:$0xf0] }
 0x223   : > { %v2561_v22 = vsel %vm581_vm4, %v2552_v13, %v2560_v14  ;;  %v10254_v13 = vor.u32 %v12862_v47, %v10253_v46  ;;  %v10258_v14 = vor.u32 %v12861_v40, %v10255_v48  ;;  %v2814_v59 = vshrl.u32 %v14142_v49, 16  ;;  %v12859_v25 = vld [vmem:[#allocation8 + $0x6b4] sm:$0xf]  ;;  %v10247_v61 = vld [vmem:[#allocation8 + $0x6b8] sm:$0xf0] }
 0x224   : > { %2651 = vmatmul.bf16.vlgmr.msra.gmra.mxu0 %v2561_v22  ;;  %2665 = vmatmul.bf16.vlgmr.msra.gmra.mxu1 %v2561_v22  ;;  %v2821_v9 = vshll.u32 %v14150_v11, 16  ;;  %v3235_v18 = vpack.c.b16 %v2541_v19, %v3233_v6  ;;  %v3236_v22 = vpack.c.b16 %v3234_v51, %v3234_v51  ;;  %v10474_v8 = vor.u32 %v12917_v15, %v10473_v1  ;;  %v12915_v49 = vld [vmem:[#allocation8 + $0x864] sm:$0xf0]  ;;  %v12914_v31 = vld [vmem:[#allocation8 + $0x864] sm:$0xf] }
 0x225   : > { %3180 = vmatpush.bf16.msra.mxu0 %v10278_v57  ;;  %3194 = vmatpush.bf16.msra.mxu1 %v10282_v62  ;;  %v12869_v57 = vld [vmem:[#allocation8 + $0x704] sm:$0xf]  ;;  %v10287_v62 = vld [vmem:[#allocation8 + $0x708] sm:$0xf0]  ;;  %v10478_v10 = vor.u32 %v12916_v16, %v10475_v17  ;;  %v10246_v30 = vor.u32 %v12860_v5, %v10245_v63  ;;  %v10250_v19 = vor.u32 %v12859_v25, %v10247_v61  ;;  %v10237_v37 = vld [vmem:[#allocation8 + $0x6a0] sm:$0xf] }
 0x226   : > { %3051 = vmatmul.bf16.vlgmr.msrb.gmra.mxu2 %v2961_v28  ;;  %3065 = vmatmul.bf16.vlgmr.msrb.gmra.mxu3 %v2961_v28  ;;  %v2819_v28 = vor.u32 %v2818_v4, %v2814_v59  ;;  %v10467_v34 = vld [vmem:[#allocation8 + $0x868] sm:$0xf0]  ;;  %v3237_v21 = vrot.slane %v3235_v18, 2  ;;  %v3238_v35 = vrot.slane %v3236_v22, 2  ;;  %v12858_v38 = vld [vmem:[#allocation8 + $0x6a4] sm:$0xf0] }
 0x227   : > { %3325 = vmatpush.bf16.msra.mxu2 %v10310_v23  ;;  %3339 = vmatpush.bf16.msra.mxu3 %v10314_v26  ;;  %v10286_v23 = vor.u32 %v12870_v56, %v10285_v55  ;;  %v10290_v26 = vor.u32 %v12869_v57, %v10287_v62  ;;  %v10470_v41 = vor.u32 %v12914_v31, %v10467_v34  ;;  %v10457_v42 = vld [vmem:[#allocation8 + $0x850] sm:$0xf]  ;;  %v12913_v43 = vld [vmem:[#allocation8 + $0x854] sm:$0xf0]  ;;  %v12912_v44 = vld [vmem:[#allocation8 + $0x854] sm:$0xf] }
 0x228   : > { %v10238_v46 = vor.u32 %v12858_v38, %v10237_v37  ;;  %v10229_v40 = vld [vmem:[#allocation8 + $0x690] sm:$0xf]  ;;  %v12856_v6 = vld [vmem:[#allocation8 + $0x694] sm:$0xf0]  ;;  %v12855_v51 = vld [vmem:[#allocation8 + $0x694] sm:$0xf] }
 0x229   : > { %3181 = vmatpush.bf16.msra.mxu0 %v10270_v12  ;;  %3195 = vmatpush.bf16.msra.mxu1 %v10274_v29  ;;  %v2823_v12 = vrot.slane %v2821_v9, 1  ;;  %v10465_v29 = vld [vmem:[#allocation8 + $0x860] sm:$0xf]  ;;  %v3075_v48 = vld [vmem:[#allocation2 + $0x4] sm:$0xe]  ;;  %v10230_v9 = vor.u32 %v12856_v6, %v10229_v40  ;;  %v3097_v34 = vrot.slane %v14150_v11, 1 }
 0x22a   : > { %v10466_v24 = vor.u32 %v12915_v49, %v10465_v29  ;;  %v10449_v56 = vld [vmem:[#allocation8 + $0x840] sm:$0xf]  ;;  %v12911_v57 = vld [vmem:[#allocation8 + $0x844] sm:$0xf0]  ;;  %v12910_v62 = vld [vmem:[#allocation8 + $0x844] sm:$0xf]  ;;  %v3094_v4 = vunpack.c.l.b16 %v3075_v48 }
 0x22b   : > { %3326 = vmatpush.bf16.msra.mxu2 %v10302_v33  ;;  %3340 = vmatpush.bf16.msra.mxu3 %v10306_v20  ;;  %v12857_v33 = vld [vmem:[#allocation8 + $0x6a4] sm:$0xf]  ;;  %v10239_v20 = vld [vmem:[#allocation8 + $0x6a8] sm:$0xf0]  ;;  %v2824_v39 = vsel %vm942_vm13, %v2819_v28, %v2823_v12  ;;  %v12854_v15 = vld [vmem:[#allocation8 + $0x684] sm:$0xf0]  ;;  %v10450_v22 = vor.u32 %v12911_v57, %v10449_v56 }
 0x22c   : > { %v10242_v47 = vor.u32 %v12857_v33, %v10239_v20  ;;  %v10451_v1 = vld [vmem:[#allocation8 + $0x848] sm:$0xf0]  ;;  %v12853_v16 = vld [vmem:[#allocation8 + $0x684] sm:$0xf]  ;;  %v10405_v59 = vld [vmem:[#allocation8 + $0x7f0] sm:$0xf]  ;;  %v3095_v18 = vpack.c.b16 %v14145_v60, %v3094_v4 }
 0x22d   : > { %3182 = vmatpush.bf16.msra.mxu0 %v10262_v36  ;;  %3196 = vmatpush.bf16.msra.mxu1 %v10266_v45  ;;  %v10459_v36 = vld [vmem:[#allocation8 + $0x858] sm:$0xf0]  ;;  %v3239_v45 = vsel %vm1369_vm2, %v3237_v21, %v3238_v35  ;;  %v10223_v17 = vld [vmem:[#allocation8 + $0x688] sm:$0xf0]  ;;  %v12900_v63 = vld [vmem:[#allocation8 + $0x7f4] sm:$0xf0] }
 0x22e   : > { %v10462_v55 = vor.u32 %v12912_v44, %v10459_v36  ;;  %v10407_v5 = vld [vmem:[#allocation8 + $0x7f8] sm:$0xf0]  ;;  %v10441_v25 = vld [vmem:[#allocation8 + $0x830] sm:$0xf]  ;;  %v12909_v61 = vld [vmem:[#allocation8 + $0x834] sm:$0xf0]  ;;  %v10226_v12 = vor.u32 %v12853_v16, %v10223_v17  ;;  %v10406_v29 = vor.u32 %v12900_v63, %v10405_v59 }
 0x22f   : > { %3327 = vmatpush.bf16.msra.mxu2 %v10294_v52  ;;  %3341 = vmatpush.bf16.msra.mxu3 %v10298_v53  ;;  %v10231_v52 = vld [vmem:[#allocation8 + $0x698] sm:$0xf0]  ;;  %v10458_v53 = vor.u32 %v12913_v43, %v10457_v42  ;;  %v3096_v31 = vrot.slane %v3095_v18, 1  ;;  %v10442_v21 = vor.u32 %v12909_v61, %v10441_v25  ;;  %v12897_v37 = vld [vmem:[#allocation8 + $0x7e4] sm:$0xf] }
 0x230   : > { %v10399_v38 = vld [vmem:[#allocation8 + $0x7e8] sm:$0xf0]  ;;  %v10433_v33 = vld [vmem:[#allocation8 + $0x820] sm:$0xf]  ;;  %v12907_v20 = vld [vmem:[#allocation8 + $0x824] sm:$0xf0] }
 0x231   : > { %3183 = vmatpush.bf16.msra.mxu0 %v10254_v13  ;;  %3197 = vmatpush.bf16.msra.mxu1 %v10258_v14  ;;  %v10234_v13 = vor.u32 %v12855_v51, %v10231_v52  ;;  %v10221_v14 = vld [vmem:[#allocation8 + $0x680] sm:$0xf]  ;;  %v10402_v42 = vor.u32 %v12897_v37, %v10399_v38  ;;  %v10389_v43 = vld [vmem:[#allocation8 + $0x7d0] sm:$0xf]  ;;  %v12896_v11 = vld [vmem:[#allocation8 + $0x7d4] sm:$0xf0]  ;;  %v3098_v44 = vsel %vm1227_vm0, %v3096_v31, %v3097_v34 }
 0x232   : > { %v10222_v28 = vor.u32 %v12854_v15, %v10221_v14  ;;  %v10434_v36 = vor.u32 %v12907_v20, %v10433_v33  ;;  %v10425_v40 = vld [vmem:[#allocation8 + $0x810] sm:$0xf]  ;;  %v12905_v48 = vld [vmem:[#allocation8 + $0x814] sm:$0xf0]  ;;  %v12904_v6 = vld [vmem:[#allocation8 + $0x814] sm:$0xf]  ;;  %v10390_v52 = vor.u32 %v12896_v11, %v10389_v43 }
 0x233   : > { %3328 = vmatpush.bf16.msra.mxu2 %v10286_v23  ;;  %3342 = vmatpush.bf16.msra.mxu3 %v10290_v26  ;;  %v10454_v23 = vor.u32 %v12910_v62, %v10451_v1  ;;  %v12899_v26 = vld [vmem:[#allocation8 + $0x7f4] sm:$0xf]  ;;  %v10427_v51 = vld [vmem:[#allocation8 + $0x818] sm:$0xf0]  ;;  %v12894_v56 = vld [vmem:[#allocation8 + $0x7c4] sm:$0xf0]  ;;  %v10426_v57 = vor.u32 %v12905_v48, %v10425_v40 }
 0x234   : > { %2914 = vmatmul.bf16.vlgmr.msrb.gmra.mxu0 %v2824_v39  ;;  %2928 = vmatmul.bf16.vlgmr.msrb.gmra.mxu1 %v2824_v39  ;;  %v10410_v49 = vor.u32 %v12899_v26, %v10407_v5  ;;  %v12906_v39 = vld [vmem:[#allocation8 + $0x824] sm:$0xf]  ;;  %v10430_v62 = vor.u32 %v12904_v6, %v10427_v51  ;;  %v10383_v4 = vld [vmem:[#allocation8 + $0x7c8] sm:$0xf0]  ;;  %v10373_v59 = vld [vmem:[#allocation8 + $0x7b0] sm:$0xf] }
 0x235   : > { %3184 = vmatpush.bf16.msra.mxu0 %v10246_v30  ;;  %3198 = vmatpush.bf16.msra.mxu1 %v10250_v19  ;;  %v10397_v30 = vld [vmem:[#allocation8 + $0x7e0] sm:$0xf]  ;;  %v12898_v19 = vld [vmem:[#allocation8 + $0x7e4] sm:$0xf0]  ;;  %v12893_v1 = vld [vmem:[#allocation8 + $0x7c4] sm:$0xf] }
 0x236   : > { %3329 = vmatmul.bf16.vlgmr.msra.gmra.mxu2 %v3239_v45  ;;  %3343 = vmatmul.bf16.vlgmr.msra.gmra.mxu3 %v3239_v45  ;;  %v12902_v14 = vld [vmem:[#allocation8 + $0x804] sm:$0xf]  ;;  %v10419_v15 = vld [vmem:[#allocation8 + $0x808] sm:$0xf0]  ;;  %v10386_v17 = vor.u32 %v12893_v1, %v10383_v4  ;;  %v10375_v26 = vld [vmem:[#allocation8 + $0x7b8] sm:$0xf0] }
 0x237   : > { %3599 = vmatpush.bf16.msrb.mxu2 %v10474_v8  ;;  %3613 = vmatpush.bf16.msrb.mxu3 %v10478_v10  ;;  %v12908_v8 = vld [vmem:[#allocation8 + $0x834] sm:$0xf]  ;;  %v10443_v10 = vld [vmem:[#allocation8 + $0x838] sm:$0xf0]  ;;  %v10422_v18 = vor.u32 %v12902_v14, %v10419_v15  ;;  %v10365_v61 = vld [vmem:[#allocation8 + $0x7a0] sm:$0xf] }
 0x238   : > { %v10446_v35 = vor.u32 %v12908_v8, %v10443_v10  ;;  %v12890_v8 = vld [vmem:[#allocation8 + $0x7a4] sm:$0xf0]  ;;  %v12889_v10 = vld [vmem:[#allocation8 + $0x7a4] sm:$0xf]  ;;  %v10357_v34 = vld [vmem:[#allocation8 + $0x790] sm:$0xf] }
 0x239   : > { %3185 = vmatpush.bf16.msra.mxu0 %v10238_v46  ;;  %3199 = vmatpush.bf16.msra.mxu1 %v10242_v47  ;;  %v12895_v46 = vld [vmem:[#allocation8 + $0x7d4] sm:$0xf]  ;;  %v10391_v47 = vld [vmem:[#allocation8 + $0x7d8] sm:$0xf0]  ;;  %v10537_v43 = vld [vmem:[#allocation8 + $0x8f0] sm:$0xf] }
 0x23a   : > { %v10521_v4 = vld [vmem:[#allocation8 + $0x8d0] sm:$0xf]  ;;  %v12928_v14 = vld [vmem:[#allocation8 + $0x8d4] sm:$0xf]  ;;  %v10523_v15 = vld [vmem:[#allocation8 + $0x8d8] sm:$0xf0] }
 0x23b   : > { %3600 = vmatpush.bf16.msrb.mxu2 %v10466_v24  ;;  %3614 = vmatpush.bf16.msrb.mxu3 %v10470_v41  ;;  %v10435_v24 = vld [vmem:[#allocation8 + $0x828] sm:$0xf0]  ;;  %v10398_v41 = vor.u32 %v12898_v19, %v10397_v30  ;;  %v3353_v30 = vld [vmem:[#allocation2 + $0x4] sm:$0xc]  ;;  %v12888_v19 = vld [vmem:[#allocation8 + $0x794] sm:$0xf0] }
 0x23c   : > { %v10438_v45 = vor.u32 %v12906_v39, %v10435_v24  ;;  %v3374_v38 = vunpack.c.l.b16 %v3353_v30  ;;  %v10358_v33 = vor.u32 %v12888_v19, %v10357_v34  ;;  %v10349_v39 = vld [vmem:[#allocation8 + $0x780] sm:$0xf]  ;;  %v12886_v24 = vld [vmem:[#allocation8 + $0x784] sm:$0xf0]  ;;  %v10489_v19 = vld [vmem:[#allocation8 + $0x890] sm:$0xf] }
 0x23d   : > { %3186 = vmatpush.bf16.msra.mxu0 %v10230_v9  ;;  %3200 = vmatpush.bf16.msra.mxu1 %v10234_v13  ;;  %v10417_v9 = vld [vmem:[#allocation8 + $0x800] sm:$0xf]  ;;  %v12903_v13 = vld [vmem:[#allocation8 + $0x804] sm:$0xf0] }
 0x23e   : > { %v10418_v63 = vor.u32 %v12903_v13, %v10417_v9  ;;  %v3376_v11 = vpack.c.b16 %v14145_v60, %v3374_v38  ;;  %v12929_v13 = vld [vmem:[#allocation8 + $0x8d4] sm:$0xf0] }
 0x23f   : > { %3601 = vmatpush.bf16.msrb.mxu2 %v10458_v53  ;;  %3615 = vmatpush.bf16.msrb.mxu3 %v10462_v55  ;;  %v10394_v53 = vor.u32 %v12895_v46, %v10391_v47  ;;  %v10381_v55 = vld [vmem:[#allocation8 + $0x7c0] sm:$0xf]  ;;  %v10539_v46 = vld [vmem:[#allocation8 + $0x8f8] sm:$0xf0]  ;;  %v10350_v47 = vor.u32 %v12886_v24, %v10349_v39  ;;  %v12919_v39 = vld [vmem:[#allocation8 + $0x884] sm:$0xf0] }
 0x240   : > { %v10382_v16 = vor.u32 %v12894_v56, %v10381_v55  ;;  %v3378_v51 = vrot.slane %v3376_v11, 2  ;;  %v12931_v55 = vld [vmem:[#allocation8 + $0x8e4] sm:$0xf0]  ;;  %v12930_v56 = vld [vmem:[#allocation8 + $0x8e4] sm:$0xf] }
 0x241   : > { %3187 = vmatpush.bf16.msra.mxu0 %v10222_v28  ;;  %3201 = vmatpush.bf16.msra.mxu1 %v10226_v12  ;;  %v10367_v28 = vld [vmem:[#allocation8 + $0x7a8] sm:$0xf0]  ;;  %v3354_v12 = vld [vmem:[#allocation2 + $0xc] sm:$0x3]  ;;  %v12918_v24 = vld [vmem:[#allocation8 + $0x884] sm:$0xf] }
 0x242   : > { %v10370_v31 = vor.u32 %v12889_v10, %v10367_v28  ;;  %v3375_v37 = vunpack.c.l.b16 %v3354_v12  ;;  %v10497_v12 = vld [vmem:[#allocation8 + $0x8a0] sm:$0xf] }
 0x243   : > { %3602 = vmatpush.bf16.msrb.mxu2 %v10450_v22  ;;  %3616 = vmatpush.bf16.msrb.mxu3 %v10454_v23  ;;  %v12892_v22 = vld [vmem:[#allocation8 + $0x7b4] sm:$0xf0]  ;;  %v12891_v23 = vld [vmem:[#allocation8 + $0x7b4] sm:$0xf] }
 0x244   : > { %3188 = vmatmul.bf16.vlgmr.msra.gmra.mxu0 %v3098_v44  ;;  %3202 = vmatmul.bf16.vlgmr.msra.gmra.mxu1 %v3098_v44  ;;  %v10374_v5 = vor.u32 %v12892_v22, %v10373_v59  ;;  %v10378_v25 = vor.u32 %v12891_v23, %v10375_v26  ;;  %v3377_v44 = vpack.c.b16 %v3375_v37, %v3375_v37  ;;  %v10513_v59 = vld [vmem:[#allocation8 + $0x8c0] sm:$0xf]  ;;  %v10515_v22 = vld [vmem:[#allocation8 + $0x8c8] sm:$0xf0]  ;;  %v10491_v37 = vld [vmem:[#allocation8 + $0x898] sm:$0xf0] }
 0x245   : > { %3462 = vmatpush.bf16.msrb.mxu0 %v10406_v29  ;;  %3476 = vmatpush.bf16.msrb.mxu1 %v10410_v49  ;;  %v12901_v29 = vld [vmem:[#allocation2] sm:$0xff]  ;;  %v10366_v49 = vor.u32 %v12890_v8, %v10365_v61  ;;  %v12924_v61 = vld [vmem:[#allocation8 + $0x8b4] sm:$0xf]  ;;  %v10507_v8 = vld [vmem:[#allocation8 + $0x8b8] sm:$0xf0] }
 0x246   : > { %v10510_v28 = vor.u32 %v12924_v61, %v10507_v8 }
 0x247   : > { %3603 = vmatpush.bf16.msrb.mxu2 %v10442_v21  ;;  %3617 = vmatpush.bf16.msrb.mxu3 %v10446_v35  ;;  %v12887_v21 = vld [vmem:[#allocation8 + $0x794] sm:$0xf]  ;;  %v10359_v35 = vld [vmem:[#allocation8 + $0x798] sm:$0xf0] }
 0x248   : > { %v10362_v20 = vor.u32 %v12887_v21, %v10359_v35  ;;  %v12921_v21 = vld [vmem:[#allocation8 + $0x894] sm:$0xf0]  ;;  %v12920_v35 = vld [vmem:[#allocation8 + $0x894] sm:$0xf] }
 0x249   : > { %3463 = vmatpush.bf16.msrb.mxu0 %v10398_v41  ;;  %3477 = vmatpush.bf16.msrb.mxu1 %v10402_v42  ;;  %v12885_v41 = vld [vmem:[#allocation8 + $0x784] sm:$0xf]  ;;  %v10351_v42 = vld [vmem:[#allocation8 + $0x788] sm:$0xf0]  ;;  %v10490_v38 = vor.u32 %v12921_v21, %v10489_v19  ;;  %v12959_v19 = vld [vmem:[#allocation10 + $0x238] sm:$0xff] }
 0x24a   : > { %v10354_v40 = vor.u32 %v12885_v41, %v10351_v42  ;;  %v10483_v41 = vld [vmem:[#allocation8 + $0x888] sm:$0xf0]  ;;  %v3631_v42 = vld [vmem:[#allocation2 + $0xc] sm:$0xf] }
 0x24b   : > { %3604 = vmatpush.bf16.msrb.mxu2 %v10434_v36  ;;  %3618 = vmatpush.bf16.msrb.mxu3 %v10438_v45  ;;  %v12933_v36 = vld [vmem:[#allocation8 + $0x8f4] sm:$0xf0]  ;;  %v12932_v45 = vld [vmem:[#allocation8 + $0x8f4] sm:$0xf]  ;;  %v10486_v11 = vor.u32 %v12918_v24, %v10483_v41 }
 0x24c   : > { %v10538_v48 = vor.u32 %v12933_v36, %v10537_v43  ;;  %v10542_v6 = vor.u32 %v12932_v45, %v10539_v46 }
 0x24d   : > { %3464 = vmatpush.bf16.msrb.mxu0 %v10390_v52  ;;  %3478 = vmatpush.bf16.msrb.mxu1 %v10394_v53  ;;  %v3379_v52 = vrot.slane %v3377_v44, 2  ;;  %v10529_v53 = vld [vmem:[#allocation8 + $0x8e0] sm:$0xf]  ;;  %v3650_v44 = vunpack.c.l.b16 %v3631_v42 }
 0x24f   : > { %3605 = vmatpush.bf16.msrb.mxu2 %v10426_v57  ;;  %3619 = vmatpush.bf16.msrb.mxu3 %v10430_v62  ;;  %v10531_v57 = vld [vmem:[#allocation8 + $0x8e8] sm:$0xf0]  ;;  %v10530_v62 = vor.u32 %v12931_v55, %v10529_v53  ;;  %v3380_v9 = vsel %vm1369_vm2, %v3378_v51, %v3379_v52  ;;  %v3651_v36 = vpack.c.b16 %v3650_v44, %v14145_v60 }
 0x250   : > { %v10534_v1 = vor.u32 %v12930_v56, %v10531_v57  ;;  %v12943_v56 = vld [vmem:[#allocation10 + $0x1b8] sm:$0xff]  ;;  %v12945_v44 = vld [vmem:[#allocation10 + $0x1c8] sm:$0xff] }
 0x251   : > { %3465 = vmatpush.bf16.msrb.mxu0 %v10382_v16  ;;  %3479 = vmatpush.bf16.msrb.mxu1 %v10386_v17  ;;  %v10522_v16 = vor.u32 %v12929_v13, %v10521_v4  ;;  %v10526_v17 = vor.u32 %v12928_v14, %v10523_v15  ;;  %v12951_v57 = vld [vmem:[#allocation10 + $0x1f8] sm:$0xff]  ;;  %v12949_v13 = vld [vmem:[#allocation10 + $0x1e8] sm:$0xff] }
 0x253   : > { %3606 = vmatpush.bf16.msrb.mxu2 %v10418_v63  ;;  %3620 = vmatpush.bf16.msrb.mxu3 %v10422_v18  ;;  %v12927_v63 = vld [vmem:[#allocation8 + $0x8c4] sm:$0xf0]  ;;  %v12926_v18 = vld [vmem:[#allocation8 + $0x8c4] sm:$0xf] }
 0x254   : > { %v10514_v23 = vor.u32 %v12927_v63, %v10513_v59  ;;  %v10518_v26 = vor.u32 %v12926_v18, %v10515_v22 }
 0x255   : > { %3466 = vmatpush.bf16.msrb.mxu0 %v10374_v5  ;;  %3480 = vmatpush.bf16.msrb.mxu1 %v10378_v25  ;;  %v10505_v5 = vld [vmem:[#allocation8 + $0x8b0] sm:$0xf]  ;;  %v12925_v25 = vld [vmem:[#allocation8 + $0x8b4] sm:$0xf0] }
 0x256   : > { %3607 = vmatmul.bf16.vlgmr.msrb.gmra.mxu2 %v12901_v29  ;;  %3621 = vmatmul.bf16.vlgmr.msrb.gmra.mxu3 %v12901_v29  ;;  %v10506_v10 = vor.u32 %v12925_v25, %v10505_v5  ;;  %v12923_v29 = vld [vmem:[#allocation8 + $0x8a4] sm:$0xf0]  ;;  %v12940_v5 = vld [vmem:[#allocation10 + $0x1a0] sm:$0xff] }
 0x257   : > { %v10498_v34 = vor.u32 %v12923_v29, %v10497_v12  ;;  %3947 = vmatpush.bf16.msra.mxu2 %v12943_v56  ;;  %3961 = vmatpush.bf16.msra.mxu3 %v12951_v57  ;;  %v12948_v25 = vld [vmem:[#allocation10 + $0x1e0] sm:$0xff]  ;;  %v12939_v12 = vld [vmem:[#allocation10 + $0x198] sm:$0xff]  ;;  %v12957_v57 = vld [vmem:[#allocation10 + $0x228] sm:$0xff] }
 0x258   : > { %v12947_v29 = vld [vmem:[#allocation10 + $0x1d8] sm:$0xff] }
 0x259   : > { %3467 = vmatpush.bf16.msrb.mxu0 %v10366_v49  ;;  %3481 = vmatpush.bf16.msrb.mxu1 %v10370_v31  ;;  %v12922_v49 = vld [vmem:[#allocation8 + $0x8a4] sm:$0xf]  ;;  %v10499_v31 = vld [vmem:[#allocation8 + $0x8a8] sm:$0xf0] }
 0x25a   : > { %v10502_v30 = vor.u32 %v12922_v49, %v10499_v31 }
 0x25d   : > { %3468 = vmatpush.bf16.msrb.mxu0 %v10358_v33  ;;  %3482 = vmatpush.bf16.msrb.mxu1 %v10362_v20  ;;  %v10494_v33 = vor.u32 %v12920_v35, %v10491_v37  ;;  %v10481_v20 = vld [vmem:[#allocation8 + $0x880] sm:$0xf]  ;;  %v12967_v37 = vld [vmem:[#allocation10 + $0x278] sm:$0xff] }
 0x25e   : > { %v10482_v43 = vor.u32 %v12919_v39, %v10481_v20 }
 0x261   : > { %3469 = vmatpush.bf16.msrb.mxu0 %v10350_v47  ;;  %3483 = vmatpush.bf16.msrb.mxu1 %v10354_v40 }
 0x264   : > { %3470 = vmatmul.bf16.vlgmr.msrb.gmra.mxu0 %v3380_v9  ;;  %3484 = vmatmul.bf16.vlgmr.msrb.gmra.mxu1 %v3380_v9  ;;  %v12941_v9 = vld [vmem:[#allocation10 + $0x1a8] sm:$0xff] }
 0x265   : > { %3733 = vmatpush.bf16.msra.mxu0 %v10538_v48  ;;  %3747 = vmatpush.bf16.msra.mxu1 %v10542_v6 }
 0x269   : > { %3734 = vmatpush.bf16.msra.mxu0 %v10530_v62  ;;  %3748 = vmatpush.bf16.msra.mxu1 %v10534_v1  ;;  %v12942_v62 = vld [vmem:[#allocation10 + $0x1b0] sm:$0xff] }
 0x26a   : > { %v12950_v1 = vld [vmem:[#allocation10 + $0x1f0] sm:$0xff]  ;;  %3948 = vmatpush.bf16.msra.mxu2 %v12942_v62  ;;  %v12965_v62 = vld [vmem:[#allocation10 + $0x268] sm:$0xff] }
 0x26b   : > { %3962 = vmatpush.bf16.msra.mxu3 %v12950_v1 }
 0x26d   : > { %3735 = vmatpush.bf16.msra.mxu0 %v10522_v16  ;;  %3749 = vmatpush.bf16.msra.mxu1 %v10526_v17 }
 0x26e   : > { %3949 = vmatpush.bf16.msra.mxu2 %v12941_v9 }
 0x26f   : > { %3963 = vmatpush.bf16.msra.mxu3 %v12949_v13 }
 0x271   : > { %3736 = vmatpush.bf16.msra.mxu0 %v10514_v23  ;;  %3750 = vmatpush.bf16.msra.mxu1 %v10518_v26 }
 0x272   : > { %3950 = vmatpush.bf16.msra.mxu2 %v12940_v5 }
 0x273   : > { %3964 = vmatpush.bf16.msra.mxu3 %v12948_v25 }
 0x275   : > { %3737 = vmatpush.bf16.msra.mxu0 %v10506_v10  ;;  %3751 = vmatpush.bf16.msra.mxu1 %v10510_v28 }
 0x276   : > { %3951 = vmatpush.bf16.msra.mxu2 %v12939_v12 }
 0x277   : > { %3965 = vmatpush.bf16.msra.mxu3 %v12947_v29  ;;  %v12955_v29 = vld [vmem:[#allocation10 + $0x218] sm:$0xff] }
 0x279   : > { %3738 = vmatpush.bf16.msra.mxu0 %v10498_v34  ;;  %3752 = vmatpush.bf16.msra.mxu1 %v10502_v30  ;;  %v12938_v34 = vld [vmem:[#allocation10 + $0x190] sm:$0xff] }
 0x27a   : > { %v12946_v30 = vld [vmem:[#allocation10 + $0x1d0] sm:$0xff]  ;;  %3952 = vmatpush.bf16.msra.mxu2 %v12938_v34 }
 0x27b   : > { %3966 = vmatpush.bf16.msra.mxu3 %v12946_v30 }
 0x27d   : > { %3739 = vmatpush.bf16.msra.mxu0 %v10490_v38  ;;  %3753 = vmatpush.bf16.msra.mxu1 %v10494_v33 }
 0x27f   : > { %3967 = vmatpush.bf16.msra.mxu3 %v12945_v44 }
 0x281   : > { %3740 = vmatpush.bf16.msra.mxu0 %v10482_v43  ;;  %3754 = vmatpush.bf16.msra.mxu1 %v10486_v11  ;;  %v12937_v11 = vld [vmem:[#allocation10 + $0x188] sm:$0xff] }
 0x282   : > { %3953 = vmatpush.bf16.msra.mxu2 %v12937_v11 }
 0x284   : > { %3741 = vmatmul.bf16.vlgmr.msra.gmra.mxu0 %v3651_v36  ;;  %3755 = vmatmul.bf16.vlgmr.msra.gmra.mxu1 %v3651_v36  ;;  %v12958_v36 = vld [vmem:[#allocation10 + $0x230] sm:$0xff] }
 0x285   : > { %4148 = vmatpush.bf16.msrb.mxu0 %v12959_v19  ;;  %4162 = vmatpush.bf16.msrb.mxu1 %v12967_v37 }
 0x289   : > { %4149 = vmatpush.bf16.msrb.mxu0 %v12958_v36 }
 0x28d   : > { %4150 = vmatpush.bf16.msrb.mxu0 %v12957_v57 }
 0x298   : > { %v2766_v48 = vpop.f32.mrf.mxu2  ;;  %v2780_v6 = vpop.f32.mrf.mxu3 }
 0x2a0   : > { %v2768_v53 = vpop.f32.mrf.mxu2  ;;  %v2782_v55 = vpop.f32.mrf.mxu3 }
 0x2a1   : > { %v2652_v45 = vpop.f32.mrf.mxu0  ;;  %v2666_v46 = vpop.f32.mrf.mxu1 }
 0x2a2   : > { %v2767_v61 = vadd.f32 %v2766_v48, %v2652_v45  ;;  %v2781_v8 = vadd.f32 %v2780_v6, %v2666_v46  ;;  %v12966_v45 = vld [vmem:[#allocation10 + $0x270] sm:$0xff] }
 0x2a3   : > { %4163 = vmatpush.bf16.msrb.mxu1 %v12966_v45  ;;  %v12971_v45 = vld [vmem:[#allocation10 + $0x298] sm:$0xff] }
 0x2a7   : > { %4164 = vmatpush.bf16.msrb.mxu1 %v12965_v62  ;;  %v12970_v62 = vld [vmem:[#allocation10 + $0x290] sm:$0xff] }
 0x2a9   : > { %v2654_v47 = vpop.f32.mrf.mxu0  ;;  %v2668_v40 = vpop.f32.mrf.mxu1 }
 0x2aa   : > { %v3052_v14 = vpop.f32.mrf.mxu2  ;;  %v3066_v15 = vpop.f32.mrf.mxu3  ;;  %v2769_v38 = vadd.f32 %v2768_v53, %v2654_v47  ;;  %v2783_v33 = vadd.f32 %v2782_v55, %v2668_v40  ;;  %v12936_v47 = vld [vmem:[#allocation10 + $0x180] sm:$0xff]  ;;  %v12983_v53 = vld [vmem:[#allocation10 + $0x2f8] sm:$0xff] }
 0x2ab   : > { %v12944_v40 = vld [vmem:[#allocation10 + $0x1c0] sm:$0xff]  ;;  %3954 = vmatpush.bf16.msra.mxu2 %v12936_v47 }
 0x2ac   : > { %3968 = vmatpush.bf16.msra.mxu3 %v12944_v40  ;;  %v12953_v40 = vld [vmem:[#allocation10 + $0x208] sm:$0xff] }
 0x2b0   : > { %4335 = vmatpush.bf16.msrb.mxu3 %v12983_v53 }
 0x2b1   : > { %v2915_v51 = vpop.f32.mrf.mxu0  ;;  %v2929_v52 = vpop.f32.mrf.mxu1 }
 0x2b2   : > { %v3054_v59 = vpop.f32.mrf.mxu2  ;;  %v3068_v63 = vpop.f32.mrf.mxu3  ;;  %v2934_v49 = vadd.f32 %v2915_v51, %v2767_v61  ;;  %v2935_v31 = vadd.f32 %v2929_v52, %v2781_v8  ;;  %v12975_v52 = vld [vmem:[#allocation10 + $0x2b8] sm:$0xff]  ;;  %v12973_v8 = vld [vmem:[#allocation10 + $0x2a8] sm:$0xff] }
 0x2b3   : > { %4321 = vmatpush.bf16.msrb.mxu2 %v12975_v52 }
 0x2b4   : > { %v3071_v21 = vadd.f32 %v3052_v14, %v2934_v49  ;;  %v3072_v35 = vadd.f32 %v3066_v15, %v2935_v31  ;;  %v12974_v15 = vld [vmem:[#allocation10 + $0x2b0] sm:$0xff]  ;;  %v12963_v49 = vld [vmem:[#allocation10 + $0x258] sm:$0xff] }
 0x2b7   : > { %4322 = vmatpush.bf16.msrb.mxu2 %v12974_v15  ;;  %v12969_v15 = vld [vmem:[#allocation10 + $0x288] sm:$0xff] }
 0x2b9   : > { %v2917_v4 = vpop.f32.mrf.mxu0  ;;  %v2931_v60 = vpop.f32.mrf.mxu1 }
 0x2ba   : > { %v3330_v23 = vpop.f32.mrf.mxu2  ;;  %v3344_v26 = vpop.f32.mrf.mxu3  ;;  %v2936_v42 = vadd.f32 %v2917_v4, %v2769_v38  ;;  %v2937_v43 = vadd.f32 %v2931_v60, %v2783_v33 }
 0x2bb   : > { %4323 = vmatpush.bf16.msrb.mxu2 %v12973_v8 }
 0x2bc   : > { %v3073_v55 = vadd.f32 %v3054_v59, %v2936_v42  ;;  %v3074_v56 = vadd.f32 %v3068_v63, %v2937_v43 }
 0x2c1   : > { %v3189_v16 = vpop.f32.mrf.mxu0  ;;  %v3203_v17 = vpop.f32.mrf.mxu1 }
 0x2c2   : > { %v3332_v20 = vpop.f32.mrf.mxu2  ;;  %v3346_v39 = vpop.f32.mrf.mxu3  ;;  %v3208_v24 = vadd.f32 %v3189_v16, %v3071_v21  ;;  %v3209_v41 = vadd.f32 %v3203_v17, %v3072_v35  ;;  %v12982_v16 = vld [vmem:[#allocation10 + $0x2f0] sm:$0xff]  ;;  %v12956_v17 = vld [vmem:[#allocation10 + $0x220] sm:$0xff] }
 0x2c3   : > { %4336 = vmatpush.bf16.msrb.mxu3 %v12982_v16  ;;  %4151 = vmatpush.bf16.msrb.mxu0 %v12956_v17  ;;  %v12972_v21 = vld [vmem:[#allocation10 + $0x2a0] sm:$0xff]  ;;  %v12977_v16 = vld [vmem:[#allocation10 + $0x2c8] sm:$0xff] }
 0x2c4   : > { %v3349_v6 = vadd.f32 %v3330_v23, %v3208_v24  ;;  %v3350_v51 = vadd.f32 %v3344_v26, %v3209_v41  ;;  %v12964_v23 = vld [vmem:[#allocation10 + $0x260] sm:$0xff]  ;;  %4324 = vmatpush.bf16.msrb.mxu2 %v12972_v21 }
 0x2c5   : > { %4165 = vmatpush.bf16.msrb.mxu1 %v12964_v23  ;;  %v12980_v35 = vld [vmem:[#allocation10 + $0x2e0] sm:$0xff] }
 0x2c7   : > { %4152 = vmatpush.bf16.msrb.mxu0 %v12955_v29 }
 0x2c8   : > { %4325 = vmatpush.bf16.msrb.mxu2 %v12971_v45 }
 0x2c9   : > { %v3191_v18 = vpop.f32.mrf.mxu0  ;;  %v3205_v22 = vpop.f32.mrf.mxu1  ;;  %4166 = vmatpush.bf16.msrb.mxu1 %v12963_v49 }
 0x2ca   : > { %v3210_v60 = vadd.f32 %v3191_v18, %v3073_v55  ;;  %v3211_v9 = vadd.f32 %v3205_v22, %v3074_v56  ;;  %v3799_v55 = vld [vmem:[#allocation3] sm:$0xff] }
 0x2cc   : > { %v3351_v26 = vadd.f32 %v3332_v20, %v3210_v60  ;;  %v3352_v5 = vadd.f32 %v3346_v39, %v3211_v9  ;;  %v12954_v20 = vld [vmem:[#allocation10 + $0x210] sm:$0xff]  ;;  %v12952_v9 = vld [vmem:[#allocation10 + $0x200] sm:$0xff]  ;;  %4326 = vmatpush.bf16.msrb.mxu2 %v12970_v62 }
 0x2cd   : > { %v12962_v39 = vld [vmem:[#allocation10 + $0x250] sm:$0xff]  ;;  %4153 = vmatpush.bf16.msrb.mxu0 %v12954_v20 }
 0x2ce   : > { %4167 = vmatpush.bf16.msrb.mxu1 %v12962_v39 }
 0x2d0   : > { %4327 = vmatpush.bf16.msrb.mxu2 %v12969_v15 }
 0x2d1   : > { %4154 = vmatpush.bf16.msrb.mxu0 %v12953_v40 }
 0x2d5   : > { %4155 = vmatpush.bf16.msrb.mxu0 %v12952_v9 }
 0x2d9   : > { %v3608_v13 = vpop.f32.mrf.mxu2  ;;  %v3622_v14 = vpop.f32.mrf.mxu3 }
 0x2e1   : > { %v3471_v10 = vpop.f32.mrf.mxu0  ;;  %v3485_v28 = vpop.f32.mrf.mxu1 }
 0x2e2   : > { %v3490_v1 = vadd.f32 %v3471_v10, %v3349_v6  ;;  %v3491_v4 = vadd.f32 %v3485_v28, %v3350_v51  ;;  %v12981_v10 = vld [vmem:[#allocation10 + $0x2e8] sm:$0xff]  ;;  %v3610_v37 = vpop.f32.mrf.mxu2  ;;  %v3624_v38 = vpop.f32.mrf.mxu3 }
 0x2e3   : > { %4337 = vmatpush.bf16.msrb.mxu3 %v12981_v10  ;;  %v12961_v6 = vld [vmem:[#allocation10 + $0x248] sm:$0xff] }
 0x2e4   : > { %v3627_v59 = vadd.f32 %v3608_v13, %v3490_v1  ;;  %v3628_v63 = vadd.f32 %v3622_v14, %v3491_v4  ;;  %v12978_v1 = vld [vmem:[#allocation10 + $0x2d0] sm:$0xff]  ;;  %4168 = vmatpush.bf16.msrb.mxu1 %v12961_v6  ;;  %v12960_v13 = vld [vmem:[#allocation10 + $0x240] sm:$0xff] }
 0x2e7   : > { %4338 = vmatpush.bf16.msrb.mxu3 %v12980_v35 }
 0x2e8   : > { %4169 = vmatpush.bf16.msrb.mxu1 %v12960_v13  ;;  %v12991_v13 = vld [vmem:[%s14620_s8 + $0x38] sm:$0xff] }
 0x2e9   : > { %v3473_v46 = vpop.f32.mrf.mxu0  ;;  %v3487_v48 = vpop.f32.mrf.mxu1 }
 0x2ea   : > { %v3492_v28 = vadd.f32 %v3473_v46, %v3351_v26  ;;  %v3493_v12 = vadd.f32 %v3487_v48, %v3352_v5  ;;  %v12979_v46 = vld [vmem:[#allocation10 + $0x2d8] sm:$0xff]  ;;  %v3803_v26 = vld [vmem:[#allocation3 + $0x10] sm:$0x11]  ;;  %v12968_v5 = vld [vmem:[#allocation10 + $0x280] sm:$0xff] }
 0x2eb   : > { %4339 = vmatpush.bf16.msrb.mxu3 %v12979_v46  ;;  %4328 = vmatpush.bf16.msrb.mxu2 %v12968_v5  ;;  %v12988_v5 = vld [vmem:[%s14620_s8 + $0x20] sm:$0xff] }
 0x2ec   : > { %v3629_v24 = vadd.f32 %v3610_v37, %v3492_v28  ;;  %v3630_v41 = vadd.f32 %v3624_v38, %v3493_v12  ;;  %4443 = vmatpush.bf16.msra.mxu1 %v12991_v13  ;;  %v10804_v13 = vld [vmem:[#allocation12 + $0x98] sm:$0xf0] }
 0x2ef   : > { %4340 = vmatpush.bf16.msrb.mxu3 %v12978_v1 }
 0x2f3   : > { %4341 = vmatpush.bf16.msrb.mxu3 %v12977_v16  ;;  %v12990_v16 = vld [vmem:[%s14620_s8 + $0x30] sm:$0xff] }
 0x2f4   : > { %4444 = vmatpush.bf16.msra.mxu1 %v12990_v16  ;;  %v10844_v16 = vld [vmem:[#allocation12 + $0x20] sm:$0xf] }
 0x301   : > { %v3742_v25 = vpop.f32.mrf.mxu0  ;;  %v3756_v61 = vpop.f32.mrf.mxu1 }
 0x302   : > { %v3761_v18 = vadd.f32 %v3742_v25, %v3627_v59  ;;  %v3762_v22 = vadd.f32 %v3756_v61, %v3628_v63  ;;  %v12976_v25 = vld [vmem:[#allocation10 + $0x2c0] sm:$0xff] }
 0x303   : > { %4342 = vmatpush.bf16.msrb.mxu3 %v12976_v25 }
 0x304   : > { %vm3765_vm4 = vcmp.ge.f32.partialorder %v3761_v18, 0.0  ;;  %v3769_v31 = vmul.f32 0.2, %v3761_v18  ;;  %vm3766_vm7 = vcmp.ge.f32.partialorder %v3762_v22, 0.0  ;;  %v3770_v34 = vmul.f32 0.2, %v3762_v22 }
 0x306   : > { %v3773_v30 = vsel %vm3765_vm4, %v3761_v18, %v3769_v31  ;;  %v3774_v19 = vsel %vm3766_vm7, %v3762_v22, %v3770_v34 }
 0x307   : > { %v3777_v33 = vpack.c.bf16 %v3774_v19, %v3773_v30 }
 0x309   : > { %v3780_v42 = vshrl.u32 %v3777_v33, 16  ;;  %v3744_v43 = vpop.f32.mrf.mxu0  ;;  %v3758_v11 = vpop.f32.mrf.mxu1  ;;  %v3783_v47 = vshll.u32 %v3777_v33, 16 }
 0x30a   : > { %v3763_v44 = vadd.f32 %v3744_v43, %v3629_v24  ;;  %v3764_v36 = vadd.f32 %v3758_v11, %v3630_v41 }
 0x30b   : > { %v3782_v48 = vrot.slane %v3780_v42, 7 }
 0x30c   : > { %vm3767_vm2 = vcmp.ge.f32.partialorder %v3763_v44, 0.0  ;;  %v3771_v51 = vmul.f32 0.2, %v3763_v44  ;;  %vm3768_vm6 = vcmp.ge.f32.partialorder %v3764_v36, 0.0  ;;  %v3772_v52 = vmul.f32 0.2, %v3764_v36 }
 0x30d   : > { %v3785_v53 = vor.u32 %v3783_v47, %v3782_v48  ;;  %v3786_v54 = vrot.slane %v3782_v48, 4 }
 0x30e   : > { %v3775_v56 = vsel %vm3767_vm2, %v3763_v44, %v3771_v51  ;;  %v3776_v57 = vsel %vm3768_vm6, %v3764_v36, %v3772_v52  ;;  %vm609_vm6 = vcmask 519168  }
 0x30f   : > { %v3800_v4 = vsel %vm1938_vm5, %v3785_v53, %v3799_v55  ;;  %v3778_v60 = vpack.c.bf16 %v3776_v57, %v3775_v56  ;;  %vm4361_vm5 = vcmask 130048   ;;  %610 = vst.msk [vmem:[#allocation6] sm:$0xf] %vm609_vm6, %v13741_v0 }
 0x310   : > { %3801 = vst [vmem:[#allocation3] sm:$0xff] %v3800_v4  ;;  %v4016_v10 = vunpack.c.l.b16 %v3800_v4  ;;  %v4017_v28 = vunpack.c.h.b16 %v3800_v4 }
 0x311   : > { %v3788_v14 = vshrl.u32 %v3778_v60, 16  ;;  %v3791_v23 = vshll.u32 %v3778_v60, 16 }
 0x313   : > { %v3790_v17 = vrot.slane %v3788_v14, 7 }
 0x315   : > { %v3793_v59 = vor.u32 %v3791_v23, %v3790_v17  ;;  %v3795_v63 = vrot.slane %v3790_v17, 4 }
 0x317   : > { %v3794_v61 = vsel %vm14101_vm3, %v3786_v54, %v3793_v59  ;;  %v3804_v18 = vsel %vm13939_vm8, %v3795_v63, %v3803_v26  ;;  %v10545_v49 = vld [vmem:[#allocation3] sm:$0xf]  ;;  %v12934_v31 = vld [vmem:[#allocation3 + $0x4] sm:$0xf]  ;;  %v12989_v59 = vld [vmem:[%s14620_s8 + $0x28] sm:$0xff] }
 0x318   : > { %3802 = vst [vmem:[#allocation3 + $0x8] sm:$0xff] %v3794_v61  ;;  %v4018_v22 = vunpack.c.l.b16 %v3794_v61  ;;  %v4019_v8 = vunpack.c.h.b16 %v3794_v61  ;;  %v4178_v41 = vld [vmem:[#allocation3] sm:$0xee]  ;;  %4445 = vmatpush.bf16.msra.mxu1 %v12989_v59 }
 0x319   : > { %3805 = vst [vmem:[#allocation3 + $0x10] sm:$0x11] %v3804_v18  ;;  %v4213_v36 = vunpack.c.l.b16 %v4178_v41  ;;  %v4214_v45 = vunpack.c.h.b16 %v4178_v41  ;;  %v13003_v41 = vld [vmem:[#allocation12 + $0x54] sm:$0xf0] }
 0x31a   : > { %v4022_v12 = vpack.c.b16 %v4018_v22, %v4016_v10  ;;  %v4023_v29 = vpack.c.b16 %v4019_v8, %v4017_v28 }
 0x31b   : > { %v4215_v52 = vpack.c.b16 %v4018_v22, %v4213_v36  ;;  %v4216_v53 = vpack.c.b16 %v4019_v8, %v4214_v45  ;;  %v13015_v36 = vld [vmem:[#allocation12 + $0xb4] sm:$0xf0]  ;;  %v13014_v45 = vld [vmem:[#allocation12 + $0xb4] sm:$0xf] }
 0x31c   : > { %v4029_v19 = vshll.u32 %v4022_v12, 16  ;;  %v4041_v58 = vshll.u32 %v4023_v29, 16  ;;  %v4027_v42 = vshrl.u32 %v4022_v12, 16  ;;  %v4039_v11 = vshrl.u32 %v4023_v29, 16  ;;  %4446 = vmatpush.bf16.msra.mxu1 %v12988_v5  ;;  %v13024_v5 = vld [vmem:[#allocation12 + $0x104] sm:$0xf] }
 0x31d   : > { %v4217_v57 = vrot.slane %v4215_v52, 1  ;;  %v4220_v62 = vrot.slane %v4216_v53, 1  ;;  %v10810_v52 = vld [vmem:[#allocation12 + $0xa0] sm:$0xf]  ;;  %v13013_v53 = vld [vmem:[#allocation12 + $0xa4] sm:$0xf0] }
 0x31e   : > { %v4031_v20 = vrot.slane %v4029_v19, 1  ;;  %v4043_v24 = vrot.slane %v4041_v58, 1 }
 0x31f   : > { %v12935_v34 = vld [vmem:[#allocation3 + $0x4] sm:$0xf0]  ;;  %v10547_v30 = vld [vmem:[#allocation3 + $0x8] sm:$0xf0] }
 0x320   : > { %v10546_v21 = vor.u32 %v12935_v34, %v10545_v49  ;;  %v10550_v35 = vor.u32 %v12934_v31, %v10547_v30  ;;  %v3979_v7 = vld [vmem:[#allocation3 + $0x10] sm:$0x11]  ;;  %v4032_v46 = vor.u32 %v4031_v20, %v4027_v42  ;;  %v4044_v47 = vor.u32 %v4043_v24, %v4039_v11  ;;  %v12986_v30 = vld [vmem:[%s14620_s8 + $0x10] sm:$0xff]  ;;  %v13001_v11 = vld [vmem:[#allocation12 + $0x44] sm:$0xf0] }
 0x321   : > { %v4020_v37 = vunpack.c.l.b16 %v3979_v7  ;;  %v4021_v38 = vunpack.c.h.b16 %v3979_v7  ;;  %v12985_v7 = vld [vmem:[%s14620_s8 + $0x8] sm:$0xff]  ;;  %v4359_v20 = vld [vmem:[#allocation16] sm:$0xf]  ;;  %v10868_v24 = vld [vmem:[#allocation12 + $0x50] sm:$0xf] }
 0x322   : > { %3955 = vmatmul.bf16.vlgmr.msra.gmra.mxu2 %v10546_v21  ;;  %3969 = vmatmul.bf16.vlgmr.msra.gmra.mxu3 %v10550_v35  ;;  %v10860_v42 = vld [vmem:[#allocation12 + $0x40] sm:$0xf] }
 0x323   : > { %v4024_v33 = vpack.c.b16 %v4020_v37, %v4020_v37  ;;  %v4025_v39 = vpack.c.b16 %v4021_v38, %v4021_v38 }
 0x325   : > { %v4034_v43 = vshll.u32 %v4024_v33, 16  ;;  %v4046_v44 = vshll.u32 %v4025_v39, 16  ;;  %v4218_v55 = vrot.slane %v4024_v33, 1  ;;  %v4221_v56 = vrot.slane %v4025_v39, 1  ;;  %v12984_v39 = vld [vmem:[%s14620_s8] sm:$0xff] }
 0x327   : > { %v4036_v48 = vrot.slane %v4034_v43, 1  ;;  %v4048_v40 = vrot.slane %v4046_v44, 1  ;;  %v4219_v1 = vsel %vm1227_vm0, %v4217_v57, %v4218_v55  ;;  %v4222_v4 = vsel %vm1227_vm0, %v4220_v62, %v4221_v56  ;;  %v10818_v44 = vld [vmem:[#allocation12 + $0xb0] sm:$0xf]  ;;  %v13012_v55 = vld [vmem:[#allocation12 + $0xa4] sm:$0xf] }
 0x328   : > { %v10869_v43 = vor.u32 %v13003_v41, %v10868_v24  ;;  %v10811_v56 = vor.u32 %v13013_v53, %v10810_v52  ;;  %v10812_v57 = vld [vmem:[#allocation12 + $0xa8] sm:$0xf0]  ;;  %v13004_v41 = vld [vmem:[#allocation12 + $0x64] sm:$0xf]  ;;  %v13002_v53 = vld [vmem:[#allocation12 + $0x54] sm:$0xf] }
 0x329   : > { %v4037_v6 = vsel %vm942_vm13, %v4032_v46, %v4036_v48  ;;  %v4049_v51 = vsel %vm942_vm13, %v4044_v47, %v4048_v40  ;;  %v10861_v46 = vor.u32 %v13001_v11, %v10860_v42  ;;  %v10852_v48 = vld [vmem:[#allocation12 + $0x30] sm:$0xf]  ;;  %v12999_v47 = vld [vmem:[#allocation12 + $0x34] sm:$0xf0]  ;;  %v10819_v40 = vor.u32 %v13015_v36, %v10818_v44  ;;  %v10780_v42 = vld [vmem:[#allocation12 + $0x68] sm:$0xf0] }
 0x32a   : > { %4156 = vmatmul.bf16.vlgmr.msrb.gmra.mxu0 %v4037_v6  ;;  %4170 = vmatmul.bf16.vlgmr.msrb.gmra.mxu1 %v4049_v51  ;;  %v10820_v6 = vld [vmem:[#allocation12 + $0xb8] sm:$0xf0]  ;;  %v10815_v62 = vor.u32 %v13012_v55, %v10812_v57  ;;  %vm595_vm13 = vcmask 781312   ;;  %v10960_v11 = vld [vmem:[#allocation12 + $0x160] sm:$0xf]  ;;  %vm4558_vm0 = vcmask 785408  }
 0x32b   : > { %v10823_v51 = vor.u32 %v13014_v45, %v10820_v6  ;;  %4564 = vmatpush.bf16.msra.mxu2 %v10819_v40  ;;  %596 = vst.msk [vmem:[#allocation4] sm:$0xf] %vm595_vm13, %v13741_v0  ;;  %v13037_v44 = vld [vmem:[#allocation12 + $0x164] sm:$0xf0]  ;;  %v10783_v45 = vor.u32 %v13004_v41, %v10780_v42  ;;  %v10952_v40 = vld [vmem:[#allocation12 + $0x150] sm:$0xf] }
 0x32c   : > { %597 = vst.msk [vmem:[#allocation4 + $0x8] sm:$0xf] %vm595_vm13, %v13741_v0  ;;  %v13035_v6 = vld [vmem:[#allocation12 + $0x154] sm:$0xf0]  ;;  %v10870_v55 = vld [vmem:[#allocation12 + $0x58] sm:$0xf0] }
 0x32d   : > { %4577 = vmatpush.bf16.msra.mxu3 %v10823_v51  ;;  %v10953_v51 = vor.u32 %v13035_v6, %v10952_v40  ;;  %v10873_v57 = vor.u32 %v13002_v53, %v10870_v55  ;;  %v12994_v42 = vld [vmem:[#allocation12 + $0x14] sm:$0xf]  ;;  %v12992_v40 = vld [vmem:[#allocation12 + $0x4] sm:$0xf]  ;;  %v10830_v6 = vld [vmem:[#allocation12 + $0x8] sm:$0xf0] }
 0x32e   : > { %v13017_v53 = vld [vmem:[#allocation12 + $0xc4] sm:$0xf0]  ;;  %v10833_v55 = vor.u32 %v12992_v40, %v10830_v6 }
 0x32f   : > { %4565 = vmatpush.bf16.msra.mxu2 %v10811_v56  ;;  %v10918_v56 = vld [vmem:[#allocation12 + $0x110] sm:$0xf]  ;;  %v13054_v40 = vld [vmem:[#allocation12 + $0x1e4] sm:$0xf0] }
 0x331   : > { %4578 = vmatpush.bf16.msra.mxu3 %v10815_v62  ;;  %v13027_v62 = vld [vmem:[#allocation12 + $0x114] sm:$0xf0] }
 0x332   : > { %4329 = vmatmul.bf16.vlgmr.msrb.gmra.mxu2 %v4219_v1  ;;  %4343 = vmatmul.bf16.vlgmr.msrb.gmra.mxu3 %v4222_v4  ;;  %v10802_v1 = vld [vmem:[#allocation12 + $0x90] sm:$0xf]  ;;  %v13011_v4 = vld [vmem:[#allocation12 + $0x94] sm:$0xf0] }
 0x3a5   : > { %v3956_v60 = vpop.f32.mrf.mxu2  ;;  %v3970_v9 = vpop.f32.mrf.mxu3 }
 0x3a6   : > { %v3971_v54 = vadd.f32 %v3970_v9, %v3956_v60  ;;  %v13010_v60 = vld [vmem:[#allocation12 + $0x94] sm:$0xf]  ;;  %v10853_v9 = vor.u32 %v12999_v47, %v10852_v48  ;;  %v10961_v48 = vor.u32 %v13037_v44, %v10960_v11  ;;  %v10886_v44 = vld [vmem:[#allocation12 + $0xd0] sm:$0xf] }
 0x3a7   : > { %v4157_v14 = vpop.f32.mrf.mxu0  ;;  %v4171_v15 = vpop.f32.mrf.mxu1  ;;  %v10807_v59 = vor.u32 %v13010_v60, %v10804_v13  ;;  %v10919_v60 = vor.u32 %v13027_v62, %v10918_v56  ;;  %v10944_v13 = vld [vmem:[#allocation12 + $0x140] sm:$0xf]  ;;  %v10996_v62 = vld [vmem:[#allocation12 + $0x1a8] sm:$0xf0] }
 0x3a8   : > { %v3975_v63 = vadd.f32 %v3971_v54, %v14128_v27  ;;  %v4172_v26 = vadd.f32 %v4171_v15, %v4157_v14  ;;  %v12987_v27 = vld [vmem:[%s14620_s8 + $0x18] sm:$0xff]  ;;  %v13026_v14 = vld [vmem:[#allocation12 + $0x114] sm:$0xf]  ;;  %v10920_v15 = vld [vmem:[#allocation12 + $0x118] sm:$0xf0]  ;;  %v10803_v54 = vor.u32 %v13011_v4, %v10802_v1 }
 0x3a9   : > { %4447 = vmatpush.bf16.msra.mxu1 %v12987_v27  ;;  %v13022_v27 = vld [vmem:[#allocation12 + $0xf4] sm:$0xf]  ;;  %4579 = vmatpush.bf16.msra.mxu3 %v10807_v59  ;;  %v13020_v1 = vld [vmem:[#allocation12 + $0xe4] sm:$0xf]  ;;  %v10896_v4 = vld [vmem:[#allocation12 + $0xe8] sm:$0xf0] }
 0x3aa   : > { %v4176_v18 = vadd.f32 %v4172_v26, %v3975_v63  ;;  %v10794_v63 = vld [vmem:[#allocation12 + $0x80] sm:$0xf]  ;;  %v13009_v26 = vld [vmem:[#allocation12 + $0x84] sm:$0xf0]  ;;  %4566 = vmatpush.bf16.msra.mxu2 %v10803_v54 }
 0x3ab   : > { %v13025_v59 = vld [vmem:[#allocation12 + $0x104] sm:$0xf0] }
 0x3ad   : > { %v3958_v17 = vpop.f32.mrf.mxu2  ;;  %v3972_v23 = vpop.f32.mrf.mxu3  ;;  %4448 = vmatpush.bf16.msra.mxu1 %v12986_v30 }
 0x3ae   : > { %v3973_v22 = vadd.f32 %v3972_v23, %v3958_v17  ;;  %v12997_v17 = vld [vmem:[#allocation12 + $0x24] sm:$0xf0]  ;;  %v10923_v23 = vor.u32 %v13026_v14, %v10920_v15 }
 0x3af   : > { %v4159_v10 = vpop.f32.mrf.mxu0  ;;  %v4173_v28 = vpop.f32.mrf.mxu1  ;;  %v13033_v14 = vld [vmem:[#allocation12 + $0x144] sm:$0xf0] }
 0x3b0   : > { %v3976_v29 = vadd.f32 %v3973_v22, %v14132_v3  ;;  %v4174_v49 = vadd.f32 %v4173_v28, %v4159_v10  ;;  %v10912_v22 = vld [vmem:[#allocation12 + $0x108] sm:$0xf0]  ;;  %v12995_v10 = vld [vmem:[#allocation12 + $0x14] sm:$0xf0]  ;;  %v10945_v15 = vor.u32 %v13033_v14, %v10944_v13  ;;  %v11072_v13 = vld [vmem:[#allocation12 + $0x230] sm:$0xf] }
 0x3b1   : > { %4449 = vmatpush.bf16.msra.mxu1 %v12985_v7  ;;  %v10915_v28 = vor.u32 %v13024_v5, %v10912_v22  ;;  %v10968_v7 = vld [vmem:[#allocation12 + $0x170] sm:$0xf]  ;;  %v12998_v22 = vld [vmem:[#allocation12 + $0x34] sm:$0xf]  ;;  %v13064_v14 = vld [vmem:[#allocation12 + $0x234] sm:$0xf0] }
 0x3b2   : > { %v4177_v21 = vadd.f32 %v4174_v49, %v3976_v29  ;;  %v10904_v29 = vld [vmem:[#allocation12 + $0xf8] sm:$0xf0] }
 0x3b3   : > { %v10907_v30 = vor.u32 %v13022_v27, %v10904_v29  ;;  %v13016_v29 = vld [vmem:[#allocation12 + $0xc4] sm:$0xf] }
 0x3b5   : > { %v4330_v25 = vpop.f32.mrf.mxu2  ;;  %v4344_v61 = vpop.f32.mrf.mxu3  ;;  %4450 = vmatpush.bf16.msra.mxu1 %v12984_v39  ;;  %v13005_v39 = vld [vmem:[#allocation12 + $0x64] sm:$0xf0] }
 0x3b6   : > { %v4345_v8 = vadd.f32 %v4344_v61, %v4330_v25  ;;  %v10845_v25 = vor.u32 %v12997_v17, %v10844_v16  ;;  %v13008_v61 = vld [vmem:[#allocation12 + $0x84] sm:$0xf]  ;;  %v10862_v17 = vld [vmem:[#allocation12 + $0x48] sm:$0xf0] }
 0x3b7   : > { %v13000_v16 = vld [vmem:[#allocation12 + $0x44] sm:$0xf] }
 0x3b8   : > { %v4349_v12 = vadd.f32 %v4345_v8, %v4176_v18  ;;  %v10796_v18 = vld [vmem:[#allocation12 + $0x88] sm:$0xf0]  ;;  %v10836_v8 = vld [vmem:[#allocation12 + $0x10] sm:$0xf]  ;;  %v10865_v54 = vor.u32 %v13000_v16, %v10862_v17 }
 0x3b9   : > { %4782 = vmatpush.bf16.msrb.mxu1 %v10923_v23  ;;  %v10799_v49 = vor.u32 %v13008_v61, %v10796_v18  ;;  %v10910_v23 = vld [vmem:[#allocation12 + $0x100] sm:$0xf]  ;;  %v10936_v61 = vld [vmem:[#allocation12 + $0x130] sm:$0xf]  ;;  %v13031_v18 = vld [vmem:[#allocation12 + $0x134] sm:$0xf0] }
 0x3ba   : > { %vm4351_vm8 = vcmp.ge.f32.partialorder %v4349_v12, 0.0  ;;  %v4353_v31 = vmul.f32 0.2, %v4349_v12  ;;  %v10911_v5 = vor.u32 %v13025_v59, %v10910_v23  ;;  %v10980_v16 = vld [vmem:[#allocation12 + $0x188] sm:$0xf0]  ;;  %v11073_v23 = vor.u32 %v13064_v14, %v11072_v13 }
 0x3bb   : > { %4580 = vmatpush.bf16.msra.mxu3 %v10799_v49  ;;  %v10880_v49 = vld [vmem:[#allocation12 + $0xc8] sm:$0xf0]  ;;  %v13074_v13 = vld [vmem:[#allocation12 + $0x284] sm:$0xf] }
 0x3bc   : > { %v4355_v34 = vsel %vm4351_vm8, %v4349_v12, %v4353_v31  ;;  %v10795_v12 = vor.u32 %v13009_v26, %v10794_v63  ;;  %v10786_v31 = vld [vmem:[#allocation12 + $0x70] sm:$0xf]  ;;  %v13018_v63 = vld [vmem:[#allocation12 + $0xd4] sm:$0xf]  ;;  %v10888_v26 = vld [vmem:[#allocation12 + $0xd8] sm:$0xf0] }
 0x3bd   : > { %4357 = vst [vmem:[%s565_s26] sm:$0xff] %v4355_v34  ;;  %v4332_v19 = vpop.f32.mrf.mxu2  ;;  %v4346_v58 = vpop.f32.mrf.mxu3  ;;  %4783 = vmatpush.bf16.msrb.mxu1 %v10915_v28  ;;  %v10902_v28 = vld [vmem:[#allocation12 + $0xf0] sm:$0xf]  ;;  %v11120_v14 = vld [vmem:[#allocation12 + $0x288] sm:$0xf0]  ;;  %vm611_vm8 = vcmask 519170  }
 0x3be   : > { %v4347_v35 = vadd.f32 %v4346_v58, %v4332_v19  ;;  %v10837_v19 = vor.u32 %v12995_v10, %v10836_v8  ;;  %v13006_v58 = vld [vmem:[#allocation12 + $0x74] sm:$0xf]  ;;  %4567 = vmatpush.bf16.msra.mxu2 %v10795_v12  ;;  %v10937_v8 = vor.u32 %v13031_v18, %v10936_v61  ;;  %v10854_v10 = vld [vmem:[#allocation12 + $0x38] sm:$0xf0]  ;;  %v13023_v12 = vld [vmem:[#allocation12 + $0xf4] sm:$0xf0] }
 0x3bf   : > { %v10857_v27 = vor.u32 %v12998_v22, %v10854_v10  ;;  %v13060_v61 = vld [vmem:[#allocation12 + $0x214] sm:$0xf0]  ;;  %v4470_v18 = vld [vmem:[#allocation4] sm:$0x8]  ;;  %v14222_v22 = vld [vmem:[#allocation4 + $0x8] sm:$0x1] }
 0x3c0   : > { %v4350_v3 = vadd.f32 %v4347_v35, %v4177_v21  ;;  %v10788_v21 = vld [vmem:[#allocation12 + $0x78] sm:$0xf0]  ;;  %v10828_v35 = vld [vmem:[#allocation12] sm:$0xf]  ;;  %612 = vst.msk [vmem:[#allocation6 + $0x4] sm:$0xc] %vm611_vm8, %v13741_v0 }
 0x3c1   : > { %4784 = vmatpush.bf16.msrb.mxu1 %v10907_v30  ;;  %v10883_v30 = vor.u32 %v13016_v29, %v10880_v49  ;;  %v13058_v29 = vld [vmem:[#allocation12 + $0x204] sm:$0xf0] }
 0x3c2   : > { %vm4352_vm9 = vcmp.ge.f32.partialorder %v4350_v3, 0.0  ;;  %v4354_v37 = vmul.f32 0.2, %v4350_v3 }
 0x3c4   : > { %v4356_v38 = vsel %vm4352_vm9, %v4350_v3, %v4354_v37  ;;  %v12993_v3 = vld [vmem:[#allocation12 + $0x4] sm:$0xf0]  ;;  %v13039_v37 = vld [vmem:[#allocation12 + $0x174] sm:$0xf0]  ;;  %vm618_vm9 = vcmask 1042434  }
 0x3c5   : > { %4358 = vst [vmem:[%s565_s26 + $0x8] sm:$0xff] %v4356_v38  ;;  %v4360_v33 = vpack.c.bf16 %v4356_v38, %v4355_v34  ;;  %v13007_v34 = vld [vmem:[#allocation12 + $0x74] sm:$0xf0]  ;;  %v10829_v24 = vor.u32 %v12993_v3, %v10828_v35  ;;  %s9181_s26 = sshll.u32 %s14659_s29, 3 }
 0x3c6   : > { %v10787_v38 = vor.u32 %v13007_v34, %v10786_v31  ;;  %v13050_v31 = vld [vmem:[#allocation12 + $0x1d4] sm:$0xf]  ;;  %v10903_v34 = vor.u32 %v13023_v12, %v10902_v28  ;;  %v4487_v28 = vunpack.c.l.b16 %v4470_v18  ;;  %v4695_v12 = vunpack.c.l.b16 %v14222_v22  ;;  %v11176_v18 = vld [vmem:[#allocation12 + $0x2f0] sm:$0xf]  ;;  %s569_s27 = scalar_lea.vmem %s14624_s12, %s9181_s26  ;;  %s9182_s26 = sshll.u32 %s14659_s29, 2 }
 0x3c7   : > { %4372 = vmatpush.bf16.msra.mxu0 %v4360_v33  ;;  %v10791_v33 = vor.u32 %v13006_v58, %v10788_v21  ;;  %v10928_v58 = vld [vmem:[#allocation12 + $0x120] sm:$0xf]  ;;  %v13029_v21 = vld [vmem:[#allocation12 + $0x124] sm:$0xf0] }
 0x3c8   : > { %4568 = vmatpush.bf16.msra.mxu2 %v10787_v38  ;;  %v10929_v3 = vor.u32 %v13029_v21, %v10928_v58  ;;  %v10894_v38 = vld [vmem:[#allocation12 + $0xe0] sm:$0xf] }
 0x3c9   : > { %4581 = vmatpush.bf16.msra.mxu3 %v10791_v33  ;;  %v13021_v33 = vld [vmem:[#allocation12 + $0xe4] sm:$0xf0] }
 0x3ca   : > { %10743 = vmatmul.msk.bf16.vlgmr.msra.gmra.mxu0 %vm4361_vm5, %v4359_v20  ;;  %v10778_v20 = vld [vmem:[#allocation12 + $0x60] sm:$0xf]  ;;  %v10895_v41 = vor.u32 %v13021_v33, %v10894_v38  ;;  %v13056_v38 = vld [vmem:[#allocation12 + $0x1f4] sm:$0xf0]  ;;  %v13038_v33 = vld [vmem:[#allocation12 + $0x174] sm:$0xf] }
 0x3cb   : > { %4653 = vmatpush.bf16.msrb.mxu0 %v10869_v43  ;;  %v10969_v43 = vor.u32 %v13039_v37, %v10968_v7  ;;  %v10779_v36 = vor.u32 %v13005_v39, %v10778_v20  ;;  %v12996_v7 = vld [vmem:[#allocation12 + $0x24] sm:$0xf]  ;;  %v10846_v37 = vld [vmem:[#allocation12 + $0x28] sm:$0xf0]  ;;  %vm619_vm5 = vsmask.f32 7946 }
 0x3cc   : > { %v10849_v20 = vor.u32 %v12996_v7, %v10846_v37  ;;  %v13048_v39 = vld [vmem:[#allocation12 + $0x1c4] sm:$0xf]  ;;  %v11040_v37 = vld [vmem:[#allocation12 + $0x1f0] sm:$0xf] }
 0x3cd   : > { %4569 = vmatpush.bf16.msra.mxu2 %v10779_v36  ;;  %4582 = vmatpush.bf16.msra.mxu3 %v10783_v45  ;;  %v13019_v36 = vld [vmem:[#allocation12 + $0xd4] sm:$0xf0]  ;;  %v13046_v45 = vld [vmem:[#allocation12 + $0x1b4] sm:$0xf] }
 0x3cf   : > { %4654 = vmatpush.bf16.msrb.mxu0 %v10861_v46 }
 0x3d1   : > { %4666 = vmatpush.bf16.msrb.mxu2 %v10873_v57  ;;  %4769 = vmatpush.bf16.msrb.mxu3 %v10919_v60  ;;  %v13044_v57 = vld [vmem:[#allocation12 + $0x1a4] sm:$0xf]  ;;  %v10988_v60 = vld [vmem:[#allocation12 + $0x198] sm:$0xf0] }
 0x3d3   : > { %4655 = vmatpush.bf16.msrb.mxu0 %v10853_v9  ;;  %v10899_v9 = vor.u32 %v13020_v1, %v10896_v4  ;;  %v10999_v1 = vor.u32 %v13044_v57, %v10996_v62  ;;  %v13042_v4 = vld [vmem:[#allocation12 + $0x194] sm:$0xf]  ;;  %v10962_v57 = vld [vmem:[#allocation12 + $0x168] sm:$0xf0]  ;;  %v11010_v62 = vld [vmem:[#allocation12 + $0x1c0] sm:$0xf] }
 0x3d5   : > { %4785 = vmatpush.bf16.msrb.mxu1 %v10899_v9  ;;  %4667 = vmatpush.bf16.msrb.mxu2 %v10865_v54  ;;  %v10991_v9 = vor.u32 %v13042_v4, %v10988_v60  ;;  %v13049_v60 = vld [vmem:[#allocation12 + $0x1c4] sm:$0xf0] }
 0x3d6   : > { %4770 = vmatpush.bf16.msrb.mxu3 %v10911_v5 }
 0x3d7   : > { %4656 = vmatpush.bf16.msrb.mxu0 %v10845_v25  ;;  %v10891_v25 = vor.u32 %v13018_v63, %v10888_v26  ;;  %v11064_v63 = vld [vmem:[#allocation12 + $0x220] sm:$0xf]  ;;  %v13062_v26 = vld [vmem:[#allocation12 + $0x224] sm:$0xf0] }
 0x3d8   : > { %v11065_v5 = vor.u32 %v13062_v26, %v11064_v63  ;;  %v11002_v63 = vld [vmem:[#allocation12 + $0x1b0] sm:$0xf]  ;;  %v13047_v26 = vld [vmem:[#allocation12 + $0x1b4] sm:$0xf0] }
 0x3d9   : > { %4786 = vmatpush.bf16.msrb.mxu1 %v10891_v25  ;;  %4668 = vmatpush.bf16.msrb.mxu2 %v10857_v27  ;;  %v11056_v25 = vld [vmem:[#allocation12 + $0x210] sm:$0xf]  ;;  %v11048_v27 = vld [vmem:[#allocation12 + $0x200] sm:$0xf] }
 0x3da   : > { %4771 = vmatpush.bf16.msrb.mxu3 %v10903_v34  ;;  %v11057_v10 = vor.u32 %v13060_v61, %v11056_v25  ;;  %v11049_v21 = vor.u32 %v13058_v29, %v11048_v27  ;;  %v13072_v25 = vld [vmem:[#allocation12 + $0x274] sm:$0xf]  ;;  %v11112_v61 = vld [vmem:[#allocation12 + $0x278] sm:$0xf0] }
 0x3db   : > { %4657 = vmatpush.bf16.msrb.mxu0 %v10837_v19  ;;  %v11020_v19 = vld [vmem:[#allocation12 + $0x1d8] sm:$0xf0]  ;;  %v11028_v29 = vld [vmem:[#allocation4] sm:$0xc] }
 0x3dc   : > { %v11023_v35 = vor.u32 %v13050_v31, %v11020_v19 }
 0x3dd   : > { %4787 = vmatpush.bf16.msrb.mxu1 %v10883_v30  ;;  %4669 = vmatpush.bf16.msrb.mxu2 %v10849_v20  ;;  %v10970_v20 = vld [vmem:[#allocation12 + $0x178] sm:$0xf0] }
 0x3de   : > { %4772 = vmatpush.bf16.msrb.mxu3 %v10895_v41 }
 0x3df   : > { %4658 = vmatpush.bf16.msrb.mxu0 %v10829_v24  ;;  %v11012_v24 = vld [vmem:[#allocation12 + $0x1c8] sm:$0xf0] }
 0x3e0   : > { %v11015_v11 = vor.u32 %v13048_v39, %v11012_v24  ;;  %v11018_v39 = vld [vmem:[#allocation12 + $0x1d0] sm:$0xf] }
 0x3e3   : > { %4878 = vmatpush.bf16.msra.mxu0 %v10969_v43  ;;  %v10838_v43 = vld [vmem:[#allocation12 + $0x18] sm:$0xf0] }
 0x3e7   : > { %4879 = vmatpush.bf16.msra.mxu0 %v10961_v48  ;;  %v10841_v48 = vor.u32 %v12994_v42, %v10838_v43  ;;  %v13051_v42 = vld [vmem:[#allocation12 + $0x1d4] sm:$0xf0]  ;;  %v13076_v43 = vld [vmem:[#allocation12 + $0x294] sm:$0xf] }
 0x3e9   : > { %4670 = vmatpush.bf16.msrb.mxu2 %v10841_v48 }
 0x3eb   : > { %4880 = vmatpush.bf16.msra.mxu0 %v10953_v51 }
 0x3ed   : > { %4671 = vmatpush.bf16.msrb.mxu2 %v10833_v55  ;;  %v11019_v55 = vor.u32 %v13051_v42, %v11018_v39  ;;  %v13030_v42 = vld [vmem:[#allocation12 + $0x134] sm:$0xf] }
 0x3ef   : > { %4881 = vmatpush.bf16.msra.mxu0 %v10945_v15  ;;  %v13040_v15 = vld [vmem:[#allocation12 + $0x184] sm:$0xf] }
 0x3f0   : > { %v10983_v54 = vor.u32 %v13040_v15, %v10980_v16  ;;  %v13034_v16 = vld [vmem:[#allocation12 + $0x154] sm:$0xf] }
 0x3f3   : > { %4882 = vmatpush.bf16.msra.mxu0 %v10937_v8 }
 0x3f7   : > { %4883 = vmatpush.bf16.msra.mxu0 %v10929_v3 }
 0x447   : > { %v4374_v46 = vpop.f32.mrf.mxu0 }
 0x448   : > { %v4378_v47 = vpack.c.bf16 %v4374_v46, %v4374_v46  ;;  %v11004_v46 = vld [vmem:[#allocation12 + $0x1b8] sm:$0xf0] }
 0x449   : > { %v11007_v51 = vor.u32 %v13046_v45, %v11004_v46  ;;  %v11032_v45 = vld [vmem:[#allocation12 + $0x1e0] sm:$0xf] }
 0x44a   : > { %4451 = vmatmul.bf16.vlgmr.msra.gmra.mxu1 %v4378_v47  ;;  %v10887_v47 = vor.u32 %v13019_v36, %v10886_v44  ;;  %v11041_v44 = vor.u32 %v13056_v38, %v11040_v37  ;;  %v11128_v36 = vld [vmem:[#allocation12 + $0x298] sm:$0xf0]  ;;  %v13087_v37 = vld [vmem:[#allocation12 + $0x2e4] sm:$0xf0] }
 0x44b   : > { %5000 = vmatpush.bf16.msra.mxu1 %v11023_v35 }
 0x44c   : > { %4773 = vmatpush.bf16.msrb.mxu3 %v10887_v47 }
 0x44f   : > { %v4376_v52 = vpop.f32.mrf.mxu0  ;;  %5001 = vmatpush.bf16.msra.mxu1 %v11015_v11 }
 0x450   : > { %v10878_v52 = vld [vmem:[#allocation12 + $0xc0] sm:$0xf] }
 0x451   : > { %v10879_v56 = vor.u32 %v13017_v53, %v10878_v52  ;;  %v10973_v52 = vor.u32 %v13038_v33, %v10970_v20  ;;  %v13070_v33 = vld [vmem:[#allocation12 + $0x264] sm:$0xf]  ;;  %v11104_v20 = vld [vmem:[#allocation12 + $0x268] sm:$0xf0] }
 0x453   : > { %5002 = vmatpush.bf16.msra.mxu1 %v11007_v51  ;;  %4774 = vmatpush.bf16.msrb.mxu3 %v10879_v56  ;;  %v13036_v56 = vld [vmem:[#allocation12 + $0x164] sm:$0xf] }
 0x454   : > { %v10965_v15 = vor.u32 %v13036_v56, %v10962_v57  ;;  %v10978_v57 = vld [vmem:[#allocation12 + $0x180] sm:$0xf] }
 0x457   : > { %5003 = vmatpush.bf16.msra.mxu1 %v10999_v1  ;;  %v11131_v1 = vor.u32 %v13076_v43, %v11128_v36  ;;  %v10938_v43 = vld [vmem:[#allocation12 + $0x138] sm:$0xf0] }
 0x458   : > { %v10941_v56 = vor.u32 %v13030_v42, %v10938_v43 }
 0x45b   : > { %5004 = vmatpush.bf16.msra.mxu1 %v10991_v9  ;;  %v11033_v9 = vor.u32 %v13054_v40, %v11032_v45  ;;  %v11107_v45 = vor.u32 %v13070_v33, %v11104_v20  ;;  %v11058_v33 = vld [vmem:[#allocation12 + $0x218] sm:$0xf0] }
 0x45f   : > { %5005 = vmatpush.bf16.msra.mxu1 %v10983_v54  ;;  %v11011_v54 = vor.u32 %v13049_v60, %v11010_v62  ;;  %v13041_v62 = vld [vmem:[#allocation12 + $0x184] sm:$0xf0]  ;;  %v11074_v60 = vld [vmem:[#allocation12 + $0x238] sm:$0xf0] }
 0x4c7   : > { %v14212_v17 = vpop.f32.mrf.mxu1 }
 0x4c8   : > { %v14216_v59 = vpack.c.bf16 %v14212_v17, %v14212_v17 }
 0x4ca   : > { %4457 = vst.msk [vmem:[#allocation4 + $0x4] sm:$0xf] %vm595_vm13, %v14216_v59  ;;  %10874 = vmatmul.msk.bf16.vlgmr.msrb.gmra.mxu0 %vm4558_vm0, %v14216_v59 }
 0x4cb   : > { %5099 = vmatpush.bf16.msrb.mxu0 %v11073_v23  ;;  %v10954_v23 = vld [vmem:[#allocation12 + $0x158] sm:$0xf0] }
 0x4cc   : > { %v10957_v27 = vor.u32 %v13034_v16, %v10954_v23 }
 0x4cf   : > { %v4454_v8 = vpop.f32.mrf.mxu1  ;;  %5100 = vmatpush.bf16.msrb.mxu0 %v11065_v5  ;;  %v11123_v5 = vor.u32 %v13074_v13, %v11120_v14  ;;  %v11126_v14 = vld [vmem:[#allocation12 + $0x290] sm:$0xf] }
 0x4d0   : > { %v13089_v8 = vld [vmem:[#allocation12 + $0x2f4] sm:$0xf0] }
 0x4d1   : > { %v4795_v49 = vld [vmem:[#allocation4 + $0x4] sm:$0x7] }
 0x4d2   : > { %v4471_v31 = vld [vmem:[#allocation4 + $0x4] sm:$0xf]  ;;  %v4810_v30 = vunpack.c.l.b16 %v4795_v49 }
 0x4d3   : > { %v4677_v34 = vld [vmem:[#allocation4 + $0x4] sm:$0xf]  ;;  %v4488_v19 = vunpack.c.l.b16 %v4471_v31  ;;  %5101 = vmatpush.bf16.msrb.mxu0 %v11057_v10  ;;  %v11003_v31 = vor.u32 %v13047_v26, %v11002_v63  ;;  %v11088_v63 = vld [vmem:[#allocation12 + $0x248] sm:$0xf0]  ;;  %v13100_v26 = vld [vmem:[#allocation12 + $0x354] sm:$0xf] }
 0x4d4   : > { %v4694_v58 = vunpack.c.l.b16 %v4677_v34  ;;  %v14225_v35 = vpack.c.b16 %v4810_v30, %v4487_v28  ;;  %v4904_v10 = vld [vmem:[#allocation4 + $0x4] sm:$0xe]  ;;  %v13032_v34 = vld [vmem:[#allocation12 + $0x144] sm:$0xf]  ;;  %v10946_v30 = vld [vmem:[#allocation12 + $0x148] sm:$0xf0] }
 0x4d5   : > { %v4489_v3 = vpack.c.b16 %v4488_v19, %v4487_v28  ;;  %v11177_v28 = vor.u32 %v13089_v8, %v11176_v18  ;;  %v13052_v49 = vld [vmem:[#allocation4] sm:$0x30]  ;;  %v10994_v19 = vld [vmem:[#allocation12 + $0x1a0] sm:$0xf]  ;;  %v10979_v8 = vor.u32 %v13041_v62, %v10978_v57  ;;  %v11082_v20 = vld [vmem:[#allocation4 + $0x4] sm:$0xc] }
 0x4d6   : > { %v4696_v7 = vpack.c.b16 %v4695_v12, %v4694_v58  ;;  %v4812_v46 = vrot.slane %v14225_v35, 3  ;;  %v11115_v58 = vor.u32 %v13072_v25, %v11112_v61  ;;  %v11029_v38 = vor.u32 %v13052_v49, %v11028_v29  ;;  %v11228_v25 = vld [vmem:[#allocation12 + $0x358] sm:$0xf0]  ;;  %v11144_v61 = vld [vmem:[#allocation12 + $0x2b0] sm:$0xf] }
 0x4d7   : > { %v4491_v24 = vshrl.u32 %v4489_v3, 16  ;;  %v4494_v41 = vshll.u32 %v4489_v3, 16  ;;  %5102 = vmatpush.bf16.msrb.mxu0 %v11049_v21  ;;  %v13045_v21 = vld [vmem:[#allocation12 + $0x1a4] sm:$0xf0]  ;;  %v4919_v3 = vunpack.c.l.b16 %v4904_v10  ;;  %v13081_v18 = vld [vmem:[#allocation12 + $0x2b4] sm:$0xf0] }
 0x4d8   : > { %v4700_v11 = vshll.u32 %v4696_v7, 16  ;;  %v4698_v6 = vshrl.u32 %v4696_v7, 16  ;;  %v11168_v7 = vld [vmem:[#allocation12 + $0x2e0] sm:$0xf]  ;;  %v14243_v40 = vrot.slane %v11029_v38, 2 }
 0x4d9   : > { %v4493_v48 = vrot.slane %v4491_v24, 3  ;;  %v4496_v47 = vrot.slane %v4494_v41, 4  ;;  %v11169_v39 = vor.u32 %v13087_v37, %v11168_v7  ;;  %v10949_v24 = vor.u32 %v13032_v34, %v10946_v30  ;;  %v11118_v29 = vld [vmem:[#allocation12 + $0x280] sm:$0xf]  ;;  %v13075_v49 = vld [vmem:[#allocation12 + $0x284] sm:$0xf0] }
 0x4da   : > { %v4702_v51 = vrot.slane %v4700_v11, 1  ;;  %10974 = vmatmul.msk.bf16.vlgmr.msra.gmra.mxu0 %vm4558_vm0, %v4812_v46  ;;  %v10995_v41 = vor.u32 %v13045_v21, %v10994_v19  ;;  %v10986_v11 = vld [vmem:[#allocation12 + $0x190] sm:$0xf]  ;;  %v14241_v36 = vpack.c.b16 %v4695_v12, %v4919_v3  ;;  %v13063_v12 = vld [vmem:[#allocation12 + $0x234] sm:$0xf]  ;;  %v11145_v30 = vor.u32 %v13081_v18, %v11144_v61 }
 0x4db   : > { %v4497_v53 = vor.u32 %v4496_v47, %v4493_v48  ;;  %5103 = vmatpush.bf16.msrb.mxu0 %v11041_v44  ;;  %v13043_v44 = vld [vmem:[#allocation12 + $0x194] sm:$0xf0]  ;;  %v11160_v48 = vld [vmem:[#allocation12 + $0x2d0] sm:$0xf]  ;;  %v11077_v10 = vor.u32 %v13063_v12, %v11074_v60  ;;  %v13098_v34 = vld [vmem:[#allocation12 + $0x344] sm:$0xf]  ;;  %v11119_v37 = vor.u32 %v13075_v49, %v11118_v29 }
 0x4dc   : > { %v14233_v4 = vor.u32 %v4702_v51, %v4698_v6  ;;  %v13085_v47 = vld [vmem:[#allocation12 + $0x2d4] sm:$0xf0]  ;;  %v13028_v6 = vld [vmem:[#allocation12 + $0x124] sm:$0xf]  ;;  %v10930_v51 = vld [vmem:[#allocation12 + $0x128] sm:$0xf0]  ;;  %v10987_v22 = vor.u32 %v13043_v44, %v10986_v11 }
 0x4dd   : > { %10824 = vmatmul.msk.bf16.vlgmr.msra.gmra.mxu2 %vm4558_vm0, %v4497_v53  ;;  %10825 = vmatmul.msk.bf16.vlgmr.msra.gmra.mxu3 %vm4558_vm0, %v4497_v53  ;;  %v11096_v53 = vld [vmem:[#allocation12 + $0x258] sm:$0xf0]  ;;  %v4921_v13 = vrot.slane %v14241_v36, 1  ;;  %v11220_v19 = vld [vmem:[#allocation12 + $0x348] sm:$0xf0] }
 0x4de   : > { %10925 = vmatmul.msk.bf16.vlgmr.msrb.gmra.mxu1 %vm4558_vm0, %v14233_v4  ;;  %4891 = vmatpush.bf16.msra.mxu2 %v10973_v52  ;;  %v13068_v52 = vld [vmem:[#allocation12 + $0x254] sm:$0xf]  ;;  %v13079_v21 = vld [vmem:[#allocation12 + $0x2a4] sm:$0xf0]  ;;  %v13065_v7 = vld [vmem:[#allocation4 + $0x4] sm:$0x30] }
 0x4df   : > { %4987 = vmatpush.bf16.msra.mxu3 %v11019_v55  ;;  %5224 = vmatpush.bf16.msrb.mxu1 %v11131_v1  ;;  %v11161_v55 = vor.u32 %v13085_v47, %v11160_v48  ;;  %v11152_v1 = vld [vmem:[#allocation12 + $0x2c0] sm:$0xf]  ;;  %v11099_v16 = vor.u32 %v13068_v52, %v11096_v53  ;;  %v13059_v38 = vld [vmem:[#allocation12 + $0x214] sm:$0xf]  ;;  %v11083_v11 = vor.u32 %v13065_v7, %v11082_v20  ;;  %v13057_v44 = vld [vmem:[#allocation12 + $0x204] sm:$0xf] }
 0x4e0   : > { %5104 = vmatpush.bf16.msrb.mxu0 %v11033_v9  ;;  %v13083_v9 = vld [vmem:[#allocation12 + $0x2c4] sm:$0xf0]  ;;  %v11061_v43 = vor.u32 %v13059_v38, %v11058_v33  ;;  %v11050_v48 = vld [vmem:[#allocation12 + $0x208] sm:$0xf0]  ;;  %v13096_v47 = vld [vmem:[#allocation12 + $0x334] sm:$0xf] }
 0x4e1   : > { %v11153_v23 = vor.u32 %v13083_v9, %v11152_v1  ;;  %v13071_v52 = vld [vmem:[#allocation12 + $0x264] sm:$0xf0]  ;;  %v14255_v53 = vld [vmem:[#allocation4] sm:$0xf]  ;;  %v13094_v12 = vld [vmem:[#allocation12 + $0x324] sm:$0xf] }
 0x4e2   : > { %4892 = vmatpush.bf16.msra.mxu2 %v10965_v15  ;;  %v13077_v15 = vld [vmem:[#allocation12 + $0x294] sm:$0xf0]  ;;  %v13055_v57 = vld [vmem:[#allocation12 + $0x1f4] sm:$0xf]  ;;  %v11204_v60 = vld [vmem:[#allocation12 + $0x328] sm:$0xf0] }
 0x4e3   : > { %4988 = vmatpush.bf16.msra.mxu3 %v11011_v54  ;;  %5225 = vmatpush.bf16.msrb.mxu1 %v11123_v5  ;;  %v13066_v54 = vld [vmem:[#allocation12 + $0x244] sm:$0xf]  ;;  %v10933_v5 = vor.u32 %v13028_v6, %v10930_v51  ;;  %v11212_v6 = vld [vmem:[#allocation12 + $0x338] sm:$0xf0]  ;;  %v11102_v51 = vld [vmem:[#allocation12 + $0x260] sm:$0xf] }
 0x4e4   : > { %5316 = vmatpush.bf16.msra.mxu0 %v11177_v28  ;;  %v11127_v28 = vor.u32 %v13077_v15, %v11126_v14  ;;  %v11215_v62 = vor.u32 %v13096_v47, %v11212_v6  ;;  %v11103_v1 = vor.u32 %v13071_v52, %v11102_v51  ;;  %v11094_v9 = vld [vmem:[#allocation12 + $0x250] sm:$0xf]  ;;  %v13069_v14 = vld [vmem:[#allocation12 + $0x254] sm:$0xf0]  ;;  %v11086_v35 = vld [vmem:[#allocation12 + $0x240] sm:$0xf] }
 0x4e5   : > { %v13088_v36 = vld [vmem:[#allocation12 + $0x2f4] sm:$0xf]  ;;  %v13101_v61 = vld [vmem:[#allocation12 + $0x354] sm:$0xf0]  ;;  %v13086_v29 = vld [vmem:[#allocation12 + $0x2e4] sm:$0xf] }
 0x4e6   : > { %4893 = vmatpush.bf16.msra.mxu2 %v10957_v27  ;;  %v11066_v27 = vld [vmem:[#allocation12 + $0x228] sm:$0xf0]  ;;  %v11210_v7 = vld [vmem:[#allocation12 + $0x330] sm:$0xf]  ;;  %v5342_v38 = vld [vmem:[#allocation4 + $0x8] sm:$0xf] }
 0x4e7   : > { %4989 = vmatpush.bf16.msra.mxu3 %v11003_v31  ;;  %5226 = vmatpush.bf16.msrb.mxu1 %v11115_v58  ;;  %v11231_v31 = vor.u32 %v13100_v26, %v11228_v25  ;;  %v11136_v58 = vld [vmem:[#allocation12 + $0x2a0] sm:$0xf]  ;;  %v13092_v26 = vld [vmem:[#allocation12 + $0x314] sm:$0xf]  ;;  %v11178_v25 = vld [vmem:[#allocation12 + $0x2f8] sm:$0xf0] }
 0x4e8   : > { %5317 = vmatpush.bf16.msra.mxu0 %v11169_v39  ;;  %v11110_v39 = vld [vmem:[#allocation12 + $0x270] sm:$0xf]  ;;  %v11137_v42 = vor.u32 %v13079_v21, %v11136_v58  ;;  %v11170_v49 = vld [vmem:[#allocation12 + $0x2e8] sm:$0xf0]  ;;  %v13084_v21 = vld [vmem:[#allocation12 + $0x2d4] sm:$0xf] }
 0x4e9   : > { %v13093_v47 = vld [vmem:[#allocation12 + $0x314] sm:$0xf0]  ;;  %v13078_v51 = vld [vmem:[#allocation12 + $0x2a4] sm:$0xf]  ;;  %v11138_v52 = vld [vmem:[#allocation12 + $0x2a8] sm:$0xf0] }
 0x4ea   : > { %4894 = vmatpush.bf16.msra.mxu2 %v10949_v24  ;;  %11078 = vmatmul.msk.bf16.vlgmr.msrb.gmra.mxu0 %vm4558_vm0, %v14243_v40  ;;  %v13073_v24 = vld [vmem:[#allocation12 + $0x274] sm:$0xf0] }
 0x4eb   : > { %4990 = vmatpush.bf16.msra.mxu3 %v10995_v41  ;;  %5227 = vmatpush.bf16.msrb.mxu1 %v11107_v45  ;;  %v11223_v41 = vor.u32 %v13098_v34, %v11220_v19  ;;  %v11111_v45 = vor.u32 %v13073_v24, %v11110_v39  ;;  %v13099_v34 = vld [vmem:[#allocation12 + $0x344] sm:$0xf0]  ;;  %v11173_v19 = vor.u32 %v13086_v29, %v11170_v49  ;;  %v13082_v39 = vld [vmem:[#allocation12 + $0x2c4] sm:$0xf]  ;;  %v11154_v24 = vld [vmem:[#allocation12 + $0x2c8] sm:$0xf0] }
 0x4ec   : > { %5318 = vmatpush.bf16.msra.mxu0 %v11161_v55  ;;  %v14257_v55 = vrot.slane %v11083_v11, 2  ;;  %v13113_v49 = vld [vmem:[#allocation13 + $0x58] sm:$0xff] }
 0x4ed   : > { %10875 = vmatmul.msk.bf16.vlgmr.msrb.gmra.mxu2 %vm4558_vm0, %v14216_v59  ;;  %10924 = vmatmul.msk.bf16.vlgmr.msrb.gmra.mxu3 %vm4558_vm0, %v14233_v4  ;;  %v13061_v59 = vld [vmem:[#allocation12 + $0x224] sm:$0xf]  ;;  %v11091_v4 = vor.u32 %v13066_v54, %v11088_v63  ;;  %v11207_v54 = vor.u32 %v13094_v12, %v11204_v60  ;;  %v11095_v63 = vor.u32 %v13069_v14, %v11094_v9 }
 0x4ee   : > { %4895 = vmatpush.bf16.msra.mxu2 %v10941_v56  ;;  %11025 = vmatmul.msk.bf16.vlgmr.msra.gmra.mxu1 %vm4558_vm0, %v4921_v13  ;;  %v11069_v3 = vor.u32 %v13061_v59, %v11066_v27  ;;  %v11053_v56 = vor.u32 %v13057_v44, %v11050_v48  ;;  %v13090_v59 = vld [vmem:[#allocation12 + $0x304] sm:$0xf]  ;;  %v11188_v27 = vld [vmem:[#allocation12 + $0x308] sm:$0xf0]  ;;  %v13080_v44 = vld [vmem:[#allocation12 + $0x2b4] sm:$0xf] }
 0x4ef   : > { %4991 = vmatpush.bf16.msra.mxu3 %v10987_v22  ;;  %5228 = vmatpush.bf16.msrb.mxu1 %v11099_v16  ;;  %v11042_v22 = vld [vmem:[#allocation12 + $0x1f8] sm:$0xf0]  ;;  %v13053_v16 = vld [vmem:[#allocation12 + $0x1e4] sm:$0xf]  ;;  %v11194_v48 = vld [vmem:[#allocation12 + $0x310] sm:$0xf] }
 0x4f0   : > { %5319 = vmatpush.bf16.msra.mxu0 %v11153_v23  ;;  %v11045_v15 = vor.u32 %v13055_v57, %v11042_v22  ;;  %v11034_v23 = vld [vmem:[#allocation12 + $0x1e8] sm:$0xf0]  ;;  %v11195_v6 = vor.u32 %v13093_v47, %v11194_v48  ;;  %v11141_v57 = vor.u32 %v13078_v51, %v11138_v52  ;;  %v13132_v48 = vld [vmem:[#allocation13 + $0xf0] sm:$0xff] }
 0x4f1   : > { %v11037_v18 = vor.u32 %v13053_v16, %v11034_v23  ;;  %v13103_v47 = vld [vmem:[#allocation13 + $0x8] sm:$0xff] }
 0x4f2   : > { %4896 = vmatpush.bf16.msra.mxu2 %v10933_v5  ;;  %v13067_v5 = vld [vmem:[#allocation12 + $0x244] sm:$0xf0] }
 0x4f3   : > { %4992 = vmatpush.bf16.msra.mxu3 %v10979_v8  ;;  %5229 = vmatpush.bf16.msrb.mxu1 %v11091_v4 }
 0x4f4   : > { %5320 = vmatpush.bf16.msra.mxu0 %v11145_v30  ;;  %v11191_v30 = vor.u32 %v13090_v59, %v11188_v27 }
 0x4f6   : > { %5112 = vmatpush.bf16.msrb.mxu2 %v11077_v10  ;;  %v11087_v10 = vor.u32 %v13067_v5, %v11086_v35 }
 0x4f7   : > { %5211 = vmatpush.bf16.msrb.mxu3 %v11127_v28  ;;  %5434 = vmatpush.bf16.msra.mxu1 %v11231_v31  ;;  %v11181_v28 = vor.u32 %v13088_v36, %v11178_v25  ;;  %v11218_v31 = vld [vmem:[#allocation12 + $0x340] sm:$0xf] }
 0x4f8   : > { %5321 = vmatpush.bf16.msra.mxu0 %v11137_v42  ;;  %v11219_v58 = vor.u32 %v13099_v34, %v11218_v31  ;;  %v13095_v42 = vld [vmem:[#allocation12 + $0x324] sm:$0xf0]  ;;  %v13108_v31 = vld [vmem:[#allocation13 + $0x30] sm:$0xff] }
 0x4f9   : > { %v13112_v34 = vld [vmem:[#allocation13 + $0x50] sm:$0xff] }
 0x4fa   : > { %5113 = vmatpush.bf16.msrb.mxu2 %v11069_v3  ;;  %v11162_v3 = vld [vmem:[#allocation12 + $0x2d8] sm:$0xf0] }
 0x4fb   : > { %5212 = vmatpush.bf16.msrb.mxu3 %v11119_v37  ;;  %5435 = vmatpush.bf16.msra.mxu1 %v11223_v41  ;;  %v13097_v37 = vld [vmem:[#allocation12 + $0x334] sm:$0xf0]  ;;  %v11165_v33 = vor.u32 %v13084_v21, %v11162_v3  ;;  %v11202_v41 = vld [vmem:[#allocation12 + $0x320] sm:$0xf]  ;;  %v13111_v3 = vld [vmem:[#allocation13 + $0x48] sm:$0xff] }
 0x4fc   : > { %11182 = vmatmul.msk.bf16.vlgmr.msra.gmra.mxu0 %vm4558_vm0, %v14255_v53  ;;  %v11211_v20 = vor.u32 %v13097_v37, %v11210_v7  ;;  %v11203_v11 = vor.u32 %v13095_v42, %v11202_v41  ;;  %v13106_v7 = vld [vmem:[#allocation13 + $0x20] sm:$0xff]  ;;  %v13121_v37 = vld [vmem:[#allocation13 + $0x98] sm:$0xff]  ;;  %v13120_v42 = vld [vmem:[#allocation13 + $0x90] sm:$0xff] }
 0x4fd   : > { %10975 = vmatmul.msk.bf16.vlgmr.msra.gmra.mxu2 %vm4558_vm0, %v4812_v46  ;;  %11024 = vmatmul.msk.bf16.vlgmr.msra.gmra.mxu3 %vm4558_vm0, %v4921_v13  ;;  %v11196_v46 = vld [vmem:[#allocation12 + $0x318] sm:$0xf0]  ;;  %v11226_v13 = vld [vmem:[#allocation12 + $0x350] sm:$0xf] }
 0x4fe   : > { %5114 = vmatpush.bf16.msrb.mxu2 %v11061_v43  ;;  %11133 = vmatmul.msk.bf16.vlgmr.msrb.gmra.mxu1 %vm4558_vm0, %v14257_v55  ;;  %v11199_v8 = vor.u32 %v13092_v26, %v11196_v46  ;;  %v11227_v4 = vor.u32 %v13101_v61, %v11226_v13  ;;  %v11157_v43 = vor.u32 %v13082_v39, %v11154_v24  ;;  %v13133_v39 = vld [vmem:[#allocation13 + $0xf8] sm:$0xff] }
 0x4ff   : > { %5213 = vmatpush.bf16.msrb.mxu3 %v11111_v45  ;;  %5436 = vmatpush.bf16.msra.mxu1 %v11215_v62  ;;  %v11146_v45 = vld [vmem:[#allocation12 + $0x2b8] sm:$0xf0] }
 0x502   : > { %5115 = vmatpush.bf16.msrb.mxu2 %v11053_v56  ;;  %v11186_v56 = vld [vmem:[#allocation12 + $0x300] sm:$0xf] }
 0x503   : > { %5214 = vmatpush.bf16.msrb.mxu3 %v11103_v1  ;;  %5437 = vmatpush.bf16.msra.mxu1 %v11207_v54 }
 0x506   : > { %5116 = vmatpush.bf16.msrb.mxu2 %v11045_v15 }
 0x507   : > { %5215 = vmatpush.bf16.msrb.mxu3 %v11095_v63  ;;  %5438 = vmatpush.bf16.msra.mxu1 %v11199_v8 }
 0x50a   : > { %5117 = vmatpush.bf16.msrb.mxu2 %v11037_v18 }
 0x50b   : > { %5216 = vmatpush.bf16.msrb.mxu3 %v11087_v10  ;;  %5439 = vmatpush.bf16.msra.mxu1 %v11191_v30  ;;  %v13109_v10 = vld [vmem:[#allocation13 + $0x38] sm:$0xff] }
 0x50c   : > { %5580 = vmatpush.bf16.msrb.mxu0 %v13109_v10  ;;  %v13127_v10 = vld [vmem:[#allocation13 + $0xc8] sm:$0xff] }
 0x50d   : > { %11079 = vmatmul.msk.bf16.vlgmr.msrb.gmra.mxu2 %vm4558_vm0, %v14243_v40  ;;  %v11149_v40 = vor.u32 %v13080_v44, %v11146_v45  ;;  %v13104_v44 = vld [vmem:[#allocation13 + $0x10] sm:$0xff] }
 0x50e   : > { %5329 = vmatpush.bf16.msra.mxu2 %v11181_v28  ;;  %11132 = vmatmul.msk.bf16.vlgmr.msrb.gmra.mxu3 %vm4558_vm0, %v14257_v55  ;;  %v13091_v55 = vld [vmem:[#allocation12 + $0x304] sm:$0xf0] }
 0x50f   : > { %5421 = vmatpush.bf16.msra.mxu3 %v11227_v4  ;;  %11233 = vmatmul.msk.bf16.vlgmr.msra.gmra.mxu1 %vm4558_vm0, %v5342_v38  ;;  %v11187_v62 = vor.u32 %v13091_v55, %v11186_v56  ;;  %v13118_v56 = vld [vmem:[#allocation13 + $0x80] sm:$0xff] }
 0x510   : > { %5581 = vmatpush.bf16.msrb.mxu0 %v13108_v31  ;;  %v13126_v31 = vld [vmem:[#allocation13 + $0xc0] sm:$0xff] }
 0x512   : > { %5330 = vmatpush.bf16.msra.mxu2 %v11173_v19 }
 0x513   : > { %5422 = vmatpush.bf16.msra.mxu3 %v11219_v58  ;;  %v13107_v58 = vld [vmem:[#allocation13 + $0x28] sm:$0xff] }
 0x514   : > { %5582 = vmatpush.bf16.msrb.mxu0 %v13107_v58  ;;  %v5467_v58 = vld [vmem:[#allocation5] sm:$0xff] }
 0x516   : > { %5331 = vmatpush.bf16.msra.mxu2 %v11165_v33 }
 0x517   : > { %5423 = vmatpush.bf16.msra.mxu3 %v11211_v20  ;;  %v13105_v20 = vld [vmem:[#allocation13 + $0x18] sm:$0xff] }
 0x518   : > { %5583 = vmatpush.bf16.msrb.mxu0 %v13106_v7 }
 0x51a   : > { %5332 = vmatpush.bf16.msra.mxu2 %v11157_v43 }
 0x51b   : > { %5424 = vmatpush.bf16.msra.mxu3 %v11203_v11  ;;  %v13119_v11 = vld [vmem:[#allocation13 + $0x88] sm:$0xff] }
 0x51c   : > { %5584 = vmatpush.bf16.msrb.mxu0 %v13105_v20 }
 0x51e   : > { %5333 = vmatpush.bf16.msra.mxu2 %v11149_v40 }
 0x51f   : > { %5425 = vmatpush.bf16.msra.mxu3 %v11195_v6  ;;  %v13131_v6 = vld [vmem:[#allocation13 + $0xe8] sm:$0xff] }
 0x520   : > { %5585 = vmatpush.bf16.msrb.mxu0 %v13104_v44 }
 0x522   : > { %5334 = vmatpush.bf16.msra.mxu2 %v11141_v57  ;;  %v13102_v57 = vld [vmem:[#allocation13] sm:$0xff] }
 0x523   : > { %5426 = vmatpush.bf16.msra.mxu3 %v11187_v62 }
 0x524   : > { %5586 = vmatpush.bf16.msrb.mxu0 %v13103_v47 }
 0x525   : > { %11183 = vmatmul.msk.bf16.vlgmr.msra.gmra.mxu2 %vm4558_vm0, %v14255_v53 }
 0x526   : > { %11232 = vmatmul.msk.bf16.vlgmr.msra.gmra.mxu3 %vm4558_vm0, %v5342_v38  ;;  %5597 = vmatpush.bf16.msrb.mxu2 %v13113_v49  ;;  %v13110_v38 = vld [vmem:[#allocation13 + $0x40] sm:$0xff] }
 0x527   : > { %5732 = vmatpush.bf16.msrb.mxu3 %v13121_v37 }
 0x528   : > { %5587 = vmatpush.bf16.msrb.mxu0 %v13102_v57 }
 0x52a   : > { %5598 = vmatpush.bf16.msrb.mxu2 %v13112_v34 }
 0x52b   : > { %5733 = vmatpush.bf16.msrb.mxu3 %v13120_v42  ;;  %v13136_v42 = vld [vmem:[#allocation13 + $0x110] sm:$0xff] }
 0x52e   : > { %5599 = vmatpush.bf16.msrb.mxu2 %v13111_v3 }
 0x52f   : > { %5734 = vmatpush.bf16.msrb.mxu3 %v13119_v11 }
 0x532   : > { %5600 = vmatpush.bf16.msrb.mxu2 %v13110_v38 }
 0x533   : > { %5735 = vmatpush.bf16.msrb.mxu3 %v13118_v56  ;;  %v13134_v56 = vld [vmem:[#allocation13 + $0x100] sm:$0xff] }
 0x536   : > { %5868 = vmatpush.bf16.msra.mxu2 %v13133_v39  ;;  %v13137_v39 = vld [vmem:[#allocation13 + $0x118] sm:$0xff] }
 0x53a   : > { %5869 = vmatpush.bf16.msra.mxu2 %v13132_v48  ;;  %v13135_v48 = vld [vmem:[#allocation13 + $0x108] sm:$0xff] }
 0x53e   : > { %5870 = vmatpush.bf16.msra.mxu2 %v13131_v6 }
 0x547   : > { %v4660_v1 = vpop.f32.mrf.mxu0 }
 0x54f   : > { %v4662_v22 = vpop.f32.mrf.mxu0 }
 0x550   : > { %v13125_v22 = vld [vmem:[#allocation13 + $0xb8] sm:$0xff] }
 0x551   : > { %5749 = vmatpush.bf16.msra.mxu0 %v13125_v22 }
 0x557   : > { %v4885_v12 = vpop.f32.mrf.mxu0 }
 0x55b   : > { %v4789_v60 = vpop.f32.mrf.mxu1 }
 0x55f   : > { %v4887_v15 = vpop.f32.mrf.mxu0 }
 0x560   : > { %v4571_v9 = vpop.f32.mrf.mxu2  ;;  %v4584_v14 = vpop.f32.mrf.mxu3  ;;  %v13129_v15 = vld [vmem:[#allocation13 + $0xd8] sm:$0xff] }
 0x561   : > { %v4661_v26 = vadd.f32 %v4660_v1, %v4571_v9  ;;  %v13130_v1 = vld [vmem:[#allocation13 + $0xe0] sm:$0xff] }
 0x562   : > { %5871 = vmatpush.bf16.msra.mxu2 %v13130_v1 }
 0x563   : > { %v4791_v16 = vpop.f32.mrf.mxu1 }
 0x564   : > { %v13124_v16 = vld [vmem:[#allocation13 + $0xb0] sm:$0xff] }
 0x565   : > { %5750 = vmatpush.bf16.msra.mxu0 %v13124_v16 }
 0x566   : > { %5872 = vmatpush.bf16.msra.mxu2 %v13129_v15 }
 0x567   : > { %v14277_v63 = vpop.f32.mrf.mxu0 }
 0x568   : > { %v4573_v23 = vpop.f32.mrf.mxu2  ;;  %v4586_v54 = vpop.f32.mrf.mxu3 }
 0x569   : > { %v13116_v23 = vld [vmem:[#allocation13 + $0x70] sm:$0xff] }
 0x56b   : > { %v14279_v35 = vpop.f32.mrf.mxu1 }
 0x56f   : > { %v5108_v36 = vpop.f32.mrf.mxu0 }
 0x570   : > { %v4673_v46 = vpop.f32.mrf.mxu2  ;;  %v4776_v5 = vpop.f32.mrf.mxu3  ;;  %v13115_v36 = vld [vmem:[#allocation13 + $0x68] sm:$0xff] }
 0x571   : > { %v4793_v53 = vadd.f32 %v4776_v5, %v4661_v26  ;;  %v4674_v24 = vadd.f32 %v4673_v46, %v4584_v14 }
 0x573   : > { %v5009_v25 = vpop.f32.mrf.mxu1  ;;  %v4902_v13 = vadd.f32 %v4885_v12, %v4793_v53  ;;  %v4794_v45 = vadd.f32 %v4789_v60, %v4674_v24  ;;  %v13117_v60 = vld [vmem:[#allocation13 + $0x78] sm:$0xff] }
 0x574   : > { %5736 = vmatpush.bf16.msrb.mxu3 %v13117_v60 }
 0x578   : > { %v4675_v61 = vpop.f32.mrf.mxu2  ;;  %v4778_v18 = vpop.f32.mrf.mxu3  ;;  %5737 = vmatpush.bf16.msrb.mxu3 %v13116_v23  ;;  %v11473_v23 = vld [vmem:[#allocation12 + $0x3b0] sm:$0xf] }
 0x579   : > { %v14281_v8 = vpop.f32.mrf.mxu0  ;;  %v13123_v61 = vld [vmem:[#allocation13 + $0xa8] sm:$0xff] }
 0x57a   : > { %5751 = vmatpush.bf16.msra.mxu0 %v13123_v61  ;;  %v13160_v61 = vld [vmem:[#allocation12 + $0x414] sm:$0xf] }
 0x57b   : > { %v14283_v28 = vpop.f32.mrf.mxu1 }
 0x57c   : > { %5738 = vmatpush.bf16.msrb.mxu3 %v13115_v36  ;;  %v11423_v36 = vld [vmem:[#allocation12 + $0x410] sm:$0xf] }
 0x580   : > { %v4898_v59 = vpop.f32.mrf.mxu2  ;;  %v4994_v27 = vpop.f32.mrf.mxu3 }
 0x581   : > { %v5325_v4 = vpop.f32.mrf.mxu0  ;;  %v4903_v40 = vadd.f32 %v4898_v59, %v4794_v45  ;;  %v5011_v51 = vadd.f32 %v4994_v27, %v4902_v13 }
 0x583   : > { %v5233_v29 = vpop.f32.mrf.mxu1  ;;  %v5012_v62 = vadd.f32 %v14279_v35, %v4903_v40  ;;  %v5123_v12 = vadd.f32 %v14277_v63, %v5011_v51  ;;  %v13128_v63 = vld [vmem:[#allocation13 + $0xd0] sm:$0xff] }
 0x584   : > { %5873 = vmatpush.bf16.msra.mxu2 %v13128_v63  ;;  %v11457_v63 = vld [vmem:[#allocation12 + $0x390] sm:$0xf] }
 0x588   : > { %v4900_v30 = vpop.f32.mrf.mxu2  ;;  %v4996_v19 = vpop.f32.mrf.mxu3  ;;  %5874 = vmatpush.bf16.msra.mxu2 %v13127_v10 }
 0x58c   : > { %v5441_v21 = vpop.f32.mrf.mxu1  ;;  %5875 = vmatpush.bf16.msra.mxu2 %v13126_v31 }
 0x590   : > { %v5119_v33 = vpop.f32.mrf.mxu2 }
 0x591   : > { %v5218_v41 = vpop.f32.mrf.mxu3  ;;  %v5124_v9 = vadd.f32 %v5119_v33, %v5012_v62 }
 0x592   : > { %v5235_v14 = vadd.f32 %v5218_v41, %v5123_v12 }
 0x593   : > { %v5236_v54 = vadd.f32 %v14283_v28, %v5124_v9  ;;  %v13114_v28 = vld [vmem:[#allocation13 + $0x60] sm:$0xff] }
 0x594   : > { %v5443_v43 = vpop.f32.mrf.mxu1  ;;  %v5340_v35 = vadd.f32 %v14281_v8, %v5235_v14  ;;  %v13122_v8 = vld [vmem:[#allocation13 + $0xa0] sm:$0xff]  ;;  %5739 = vmatpush.bf16.msrb.mxu3 %v13114_v28 }
 0x595   : > { %5752 = vmatpush.bf16.msra.mxu0 %v13122_v8  ;;  %v11449_v8 = vld [vmem:[#allocation12 + $0x380] sm:$0xf] }
 0x598   : > { %v5121_v52 = vpop.f32.mrf.mxu2 }
 0x599   : > { %v5220_v55 = vpop.f32.mrf.mxu3 }
 0x5a8   : > { %v5336_v26 = vpop.f32.mrf.mxu2 }
 0x5a9   : > { %v5341_v46 = vadd.f32 %v5336_v26, %v5236_v54  ;;  %v5428_v5 = vpop.f32.mrf.mxu3  ;;  %v13149_v54 = vld [vmem:[#allocation12 + $0x3b4] sm:$0xf0]  ;;  %v11465_v26 = vld [vmem:[#allocation12 + $0x3a0] sm:$0xf] }
 0x5aa   : > { %v5445_v53 = vadd.f32 %v5428_v5, %v5340_v35  ;;  %v11474_v35 = vor.u32 %v13149_v54, %v11473_v23  ;;  %v13152_v23 = vld [vmem:[#allocation12 + $0x3d4] sm:$0xf] }
 0x5ab   : > { %v5446_v25 = vadd.f32 %v5441_v21, %v5341_v46  ;;  %v5470_v21 = vld [vmem:[#allocation5 + $0x8] sm:$0x11] }
 0x5ac   : > { %vm5447_vm3 = vcmp.ge.f32.partialorder %v5445_v53, 0.0  ;;  %v5449_v13 = vmul.f32 0.2, %v5445_v53  ;;  %v13147_v46 = vld [vmem:[#allocation12 + $0x3a4] sm:$0xf0] }
 0x5ad   : > { %vm5448_vm1 = vcmp.ge.f32.partialorder %v5446_v25, 0.0  ;;  %v5450_v18 = vmul.f32 0.2, %v5446_v25  ;;  %v11466_v5 = vor.u32 %v13147_v46, %v11465_v26  ;;  %v11499_v26 = vld [vmem:[#allocation12 + $0x440] sm:$0xf] }
 0x5ae   : > { %v5451_v59 = vsel %vm5447_vm3, %v5445_v53, %v5449_v13  ;;  %v13145_v53 = vld [vmem:[#allocation12 + $0x394] sm:$0xf0]  ;;  %v13167_v46 = vld [vmem:[#allocation12 + $0x444] sm:$0xf0]  ;;  %vm7935_vm3 = vcmask 1042432  }
 0x5af   : > { %v5452_v27 = vsel %vm5448_vm1, %v5446_v25, %v5450_v18  ;;  %v11458_v25 = vor.u32 %v13145_v53, %v11457_v63  ;;  %v13161_v13 = vld [vmem:[#allocation12 + $0x414] sm:$0xf0]  ;;  %v11425_v18 = vld [vmem:[#allocation12 + $0x418] sm:$0xf0]  ;;  %v11500_v63 = vor.u32 %v13167_v46, %v11499_v26  ;;  %v11565_v53 = vld [vmem:[#allocation12 + $0x4c0] sm:$0xf] }
 0x5b0   : > { %v5453_v4 = vpack.c.bf16 %v5452_v27, %v5451_v59  ;;  %v5338_v29 = vpop.f32.mrf.mxu2  ;;  %v11424_v10 = vor.u32 %v13161_v13, %v11423_v36  ;;  %v11428_v28 = vor.u32 %v13160_v61, %v11425_v18  ;;  %v13143_v59 = vld [vmem:[#allocation12 + $0x384] sm:$0xf0]  ;;  %v13150_v18 = vld [vmem:[#allocation12 + $0x3c4] sm:$0xf]  ;;  %vm7936_vm1 = vsmask.f32 2306 }
 0x5b1   : > { %v5430_v49 = vpop.f32.mrf.mxu3  ;;  %v11450_v27 = vor.u32 %v13143_v59, %v11449_v8  ;;  %v13159_v29 = vld [vmem:[#allocation12 + $0x404] sm:$0xf0]  ;;  %v11491_v59 = vld [vmem:[#allocation12 + $0x430] sm:$0xf]  ;;  %v13142_v46 = vld [vmem:[#allocation12 + $0x384] sm:$0xf] }
 0x5b2   : > { %v5455_v34 = vshrl.u32 %v5453_v4, 16  ;;  %v5458_v19 = vshll.u32 %v5453_v4, 16  ;;  %6006 = vmatpush.bf16.msrb.mxu1 %v11424_v10  ;;  %6019 = vmatpush.bf16.msra.mxu3 %v11428_v28  ;;  %v11415_v4 = vld [vmem:[#allocation12 + $0x400] sm:$0xf]  ;;  %v13158_v49 = vld [vmem:[#allocation12 + $0x404] sm:$0xf] }
 0x5b3   : > { %v11416_v31 = vor.u32 %v13159_v29, %v11415_v4  ;;  %v13183_v36 = vld [vmem:[#allocation12 + $0x4c4] sm:$0xf0]  ;;  %v11385_v10 = vld [vmem:[#allocation12 + $0x3c8] sm:$0xf0]  ;;  %v11557_v4 = vld [vmem:[#allocation12 + $0x4b0] sm:$0xf] }
 0x5b4   : > { %v5457_v30 = vrot.slane %v5455_v34, 7  ;;  %v11417_v34 = vld [vmem:[#allocation12 + $0x408] sm:$0xf0]  ;;  %v11566_v13 = vor.u32 %v13183_v36, %v11565_v53  ;;  %v13151_v61 = vld [vmem:[#allocation12 + $0x3c4] sm:$0xf0]  ;;  %v11388_v8 = vor.u32 %v13150_v18, %v11385_v10 }
 0x5b5   : > { %v11501_v36 = vld [vmem:[#allocation12 + $0x448] sm:$0xf0] }
 0x5b6   : > { %v5460_v3 = vor.u32 %v5458_v19, %v5457_v30  ;;  %v5461_v7 = vrot.slane %v5457_v30, 4  ;;  %v11523_v30 = vld [vmem:[#allocation12 + $0x470] sm:$0xf]  ;;  %v13173_v19 = vld [vmem:[#allocation12 + $0x474] sm:$0xf0]  ;;  %6007 = vmatpush.bf16.msrb.mxu1 %v11416_v31 }
 0x5b7   : > { %v13181_v31 = vld [vmem:[#allocation12 + $0x4b4] sm:$0xf0] }
 0x5b8   : > { %v5468_v37 = vsel %vm5466_vm12, %v5460_v3, %v5467_v58  ;;  %v5471_v38 = vsel %vm13982_vm15, %v5461_v7, %v5470_v21  ;;  %v11420_v58 = vor.u32 %v13158_v49, %v11417_v34  ;;  %v11524_v21 = vor.u32 %v13173_v19, %v11523_v30  ;;  %v11441_v3 = vld [vmem:[#allocation12 + $0x370] sm:$0xf]  ;;  %v13141_v7 = vld [vmem:[#allocation12 + $0x374] sm:$0xf0]  ;;  %v13148_v34 = vld [vmem:[#allocation12 + $0x3b4] sm:$0xf] }
 0x5b9   : > { %5469 = vst [vmem:[#allocation5] sm:$0xff] %v5468_v37  ;;  %v5499_v33 = vunpack.c.l.b16 %v5468_v37  ;;  %v5500_v20 = vunpack.c.h.b16 %v5468_v37  ;;  %v11407_v37 = vld [vmem:[#allocation12 + $0x3f0] sm:$0xf]  ;;  %v11475_v30 = vld [vmem:[#allocation12 + $0x3b8] sm:$0xf0]  ;;  %v11558_v19 = vor.u32 %v13181_v31, %v11557_v4 }
 0x5ba   : > { %5472 = vst [vmem:[#allocation5 + $0x8] sm:$0x11] %v5471_v38  ;;  %6020 = vmatpush.bf16.msra.mxu3 %v11420_v58  ;;  %v11478_v58 = vor.u32 %v13148_v34, %v11475_v30  ;;  %v13164_v4 = vld [vmem:[#allocation12 + $0x434] sm:$0xf]  ;;  %v13191_v31 = vld [vmem:[#allocation12 + $0x504] sm:$0xf0] }
 0x5bb   : > { %v5501_v24 = vpack.c.b16 %v5499_v33, %v5499_v33  ;;  %v5502_v41 = vpack.c.b16 %v5500_v20, %v5500_v20 }
 0x5bd   : > { %5588 = vmatmul.bf16.vlgmr.msrb.gmra.mxu0 %v5501_v24  ;;  %11282 = vmatmul.msk.bf16.vlgmr.msrb.gmra.mxu2 %vm5576_vm14, %v5502_v41  ;;  %v11409_v24 = vld [vmem:[#allocation12 + $0x3f8] sm:$0xf0] }
 0x5be   : > { %5885 = vmatpush.bf16.msrb.mxu0 %v13137_v39  ;;  %v13156_v39 = vld [vmem:[#allocation12 + $0x3f4] sm:$0xf]  ;;  %6211 = vmatpush.bf16.msrb.mxu2 %v11524_v21 }
 0x5bf   : > { %v13172_v21 = vld [vmem:[#allocation12 + $0x474] sm:$0xf] }
 0x5c0   : > { %v5759_v43 = vld [vmem:[#allocation5] sm:$0xee] }
 0x5c1   : > { %v5608_v11 = vld [vmem:[#allocation5 + $0x8] sm:$0x11]  ;;  %v5786_v47 = vunpack.c.l.b16 %v5759_v43  ;;  %v5787_v14 = vunpack.c.h.b16 %v5759_v43  ;;  %v11515_v43 = vld [vmem:[#allocation12 + $0x460] sm:$0xf] }
 0x5c2   : > { %v5638_v44 = vunpack.c.l.b16 %v5608_v11  ;;  %v5639_v45 = vunpack.c.h.b16 %v5608_v11  ;;  %5886 = vmatpush.bf16.msrb.mxu0 %v13136_v42  ;;  %v11412_v42 = vor.u32 %v13156_v39, %v11409_v24  ;;  %v13171_v11 = vld [vmem:[#allocation12 + $0x464] sm:$0xf0]  ;;  %v11549_v39 = vld [vmem:[#allocation12 + $0x4a0] sm:$0xf] }
 0x5c3   : > { %v13179_v24 = vld [vmem:[#allocation12 + $0x4a4] sm:$0xf0] }
 0x5c4   : > { %v5640_v40 = vpack.c.b16 %v5638_v44, %v5499_v33  ;;  %v5641_v6 = vpack.c.b16 %v5639_v45, %v5500_v20  ;;  %v5788_v55 = vpack.c.b16 %v5638_v44, %v5786_v47  ;;  %v5789_v15 = vpack.c.b16 %v5639_v45, %v5787_v14  ;;  %v13157_v20 = vld [vmem:[#allocation12 + $0x3f4] sm:$0xf0]  ;;  %v11433_v44 = vld [vmem:[#allocation12 + $0x360] sm:$0xf]  ;;  %6021 = vmatpush.bf16.msra.mxu3 %v11412_v42  ;;  %v13146_v42 = vld [vmem:[#allocation12 + $0x3a4] sm:$0xf] }
 0x5c5   : > { %v11442_v33 = vor.u32 %v13141_v7, %v11441_v3  ;;  %v11408_v41 = vor.u32 %v13157_v20, %v11407_v37  ;;  %v11516_v45 = vor.u32 %v13171_v11, %v11515_v43  ;;  %v11399_v47 = vld [vmem:[#allocation12 + $0x3e0] sm:$0xf]  ;;  %v11525_v3 = vld [vmem:[#allocation12 + $0x478] sm:$0xf0]  ;;  %v13163_v20 = vld [vmem:[#allocation12 + $0x424] sm:$0xf0] }
 0x5c6   : > { %v5645_v51 = vshll.u32 %v5640_v40, 16  ;;  %v5652_v52 = vshll.u32 %v5641_v6, 16  ;;  %5887 = vmatpush.bf16.msrb.mxu0 %v13135_v48  ;;  %v5643_v57 = vshrl.u32 %v5640_v40, 16  ;;  %v5650_v22 = vshrl.u32 %v5641_v6, 16  ;;  %v13139_v48 = vld [vmem:[#allocation12 + $0x364] sm:$0xf0] }
 0x5c7   : > { %v5790_v9 = vrot.slane %v5788_v55, 1  ;;  %v5791_v16 = vrot.slane %v5789_v15, 1  ;;  %v13155_v40 = vld [vmem:[#allocation12 + $0x3e4] sm:$0xf0]  ;;  %v11434_v6 = vor.u32 %v13139_v48, %v11433_v44  ;;  %6008 = vmatpush.bf16.msrb.mxu1 %v11408_v41  ;;  %6212 = vmatpush.bf16.msrb.mxu2 %v11516_v45  ;;  %v11391_v15 = vld [vmem:[#allocation12 + $0x3d0] sm:$0xf]  ;;  %v11550_v44 = vor.u32 %v13179_v24, %v11549_v39 }
 0x5c8   : > { %v5647_v62 = vrot.slane %v5645_v51, 1  ;;  %v5654_v1 = vrot.slane %v5652_v52, 1  ;;  %v13154_v51 = vld [vmem:[#allocation12 + $0x3e4] sm:$0xf]  ;;  %v11401_v52 = vld [vmem:[#allocation12 + $0x3e8] sm:$0xf0]  ;;  %v11400_v55 = vor.u32 %v13155_v40, %v11399_v47 }
 0x5c9   : > { %v11483_v7 = vld [vmem:[#allocation12 + $0x420] sm:$0xf]  ;;  %v11467_v43 = vld [vmem:[#allocation12 + $0x3a8] sm:$0xf0]  ;;  %v13170_v11 = vld [vmem:[#allocation12 + $0x464] sm:$0xf] }
 0x5ca   : > { %v5648_v12 = vor.u32 %v5647_v62, %v5643_v57  ;;  %5888 = vmatpush.bf16.msrb.mxu0 %v13134_v56  ;;  %v5655_v60 = vor.u32 %v5654_v1, %v5650_v22  ;;  %v11507_v56 = vld [vmem:[#allocation12 + $0x450] sm:$0xf]  ;;  %v13169_v57 = vld [vmem:[#allocation12 + $0x454] sm:$0xf0]  ;;  %v11404_v22 = vor.u32 %v13154_v51, %v11401_v52  ;;  %v11484_v41 = vor.u32 %v13163_v20, %v11483_v7  ;;  %v11517_v48 = vld [vmem:[#allocation12 + $0x468] sm:$0xf0] }
 0x5cb   : > { %v11573_v62 = vld [vmem:[#allocation12 + $0x4d0] sm:$0xf]  ;;  %v13185_v1 = vld [vmem:[#allocation12 + $0x4d4] sm:$0xf0]  ;;  %6009 = vmatpush.bf16.msrb.mxu1 %v11400_v55  ;;  %v11470_v45 = vor.u32 %v13146_v42, %v11467_v43  ;;  %v13144_v55 = vld [vmem:[#allocation12 + $0x394] sm:$0xf] }
 0x5cc   : > { %5740 = vmatmul.bf16.vlgmr.msrb.gmra.mxu3 %v5648_v12  ;;  %v11508_v12 = vor.u32 %v13169_v57, %v11507_v56  ;;  %v11623_v47 = vld [vmem:[#allocation12 + $0x530] sm:$0xf]  ;;  %v13197_v40 = vld [vmem:[#allocation12 + $0x534] sm:$0xf0]  ;;  %v11459_v57 = vld [vmem:[#allocation12 + $0x398] sm:$0xf0] }
 0x5cd   : > { %11331 = vmatmul.msk.bf16.vlgmr.msra.gmra.mxu0 %vm5576_vm14, %v5655_v60  ;;  %5876 = vmatmul.bf16.vlgmr.msra.gmra.mxu2 %v5790_v9  ;;  %v11574_v60 = vor.u32 %v13185_v1, %v11573_v62  ;;  %v11624_v51 = vor.u32 %v13197_v40, %v11623_v47  ;;  %v11541_v52 = vld [vmem:[#allocation12 + $0x490] sm:$0xf]  ;;  %v13177_v56 = vld [vmem:[#allocation12 + $0x494] sm:$0xf0]  ;;  %v13168_v62 = vld [vmem:[#allocation12 + $0x454] sm:$0xf] }
 0x5ce   : > { %6095 = vmatpush.bf16.msra.mxu0 %v11474_v35  ;;  %6022 = vmatpush.bf16.msra.mxu3 %v11404_v22  ;;  %v11393_v35 = vld [vmem:[#allocation12 + $0x3d8] sm:$0xf0]  ;;  %v11435_v7 = vld [vmem:[#allocation12 + $0x368] sm:$0xf0]  ;;  %v11591_v24 = vld [vmem:[#allocation12 + $0x4f0] sm:$0xf] }
 0x5cf   : > { %6213 = vmatpush.bf16.msrb.mxu2 %v11508_v12  ;;  %v11509_v1 = vld [vmem:[#allocation12 + $0x458] sm:$0xf0]  ;;  %v11615_v12 = vld [vmem:[#allocation12 + $0x520] sm:$0xf]  ;;  %v11485_v39 = vld [vmem:[#allocation12 + $0x428] sm:$0xf0] }
 0x5d0   : > { %v11583_v47 = vld [vmem:[#allocation12 + $0x4e0] sm:$0xf]  ;;  %v13187_v40 = vld [vmem:[#allocation12 + $0x4e4] sm:$0xf0] }
 0x5d2   : > { %6096 = vmatpush.bf16.msra.mxu0 %v11466_v5  ;;  %v11396_v5 = vor.u32 %v13152_v23, %v11393_v35  ;;  %v11533_v23 = vld [vmem:[#allocation12 + $0x480] sm:$0xf]  ;;  %v11512_v35 = vor.u32 %v13168_v62, %v11509_v1  ;;  %v13208_v1 = vld [vmem:[#allocation12 + $0x584] sm:$0xf0] }
 0x5d3   : > { %6214 = vmatpush.bf16.msrb.mxu2 %v11500_v63  ;;  %v13166_v63 = vld [vmem:[#allocation12 + $0x444] sm:$0xf]  ;;  %v11669_v62 = vld [vmem:[#allocation12 + $0x580] sm:$0xf] }
 0x5d4   : > { %6023 = vmatpush.bf16.msra.mxu3 %v11396_v5  ;;  %v11451_v5 = vld [vmem:[#allocation12 + $0x388] sm:$0xf0] }
 0x5d5   : > { %v11454_v18 = vor.u32 %v13142_v46, %v11451_v5 }
 0x5d6   : > { %6097 = vmatpush.bf16.msra.mxu0 %v11458_v25  ;;  %v11383_v25 = vld [vmem:[#allocation12 + $0x3c0] sm:$0xf] }
 0x5d7   : > { %v11384_v28 = vor.u32 %v13151_v61, %v11383_v25  ;;  %v11607_v25 = vld [vmem:[#allocation12 + $0x510] sm:$0xf] }
 0x5d8   : > { %6024 = vmatpush.bf16.msra.mxu3 %v11388_v8 }
 0x5da   : > { %6098 = vmatpush.bf16.msra.mxu0 %v11450_v27  ;;  %v13165_v27 = vld [vmem:[#allocation12 + $0x434] sm:$0xf0] }
 0x5db   : > { %v11492_v49 = vor.u32 %v13165_v27, %v11491_v59  ;;  %v13140_v59 = vld [vmem:[#allocation12 + $0x374] sm:$0xf]  ;;  %v11443_v27 = vld [vmem:[#allocation12 + $0x378] sm:$0xf0] }
 0x5dd   : > { %11380 = vmatmul.msk.bf16.vlgmr.msrb.gmra.mxu0 %vm5576_vm14, %v5791_v16  ;;  %v13153_v16 = vld [vmem:[#allocation12 + $0x3d4] sm:$0xf0]  ;;  %6215 = vmatpush.bf16.msrb.mxu2 %v11492_v49  ;;  %v11599_v49 = vld [vmem:[#allocation12 + $0x500] sm:$0xf] }
 0x5de   : > { %6099 = vmatpush.bf16.msra.mxu0 %v11442_v33  ;;  %v11392_v54 = vor.u32 %v13153_v16, %v11391_v15  ;;  %v11528_v33 = vor.u32 %v13172_v21, %v11525_v3  ;;  %v11542_v15 = vor.u32 %v13177_v56, %v11541_v52  ;;  %v11462_v16 = vor.u32 %v13144_v55, %v11459_v57  ;;  %v13138_v3 = vld [vmem:[#allocation12 + $0x364] sm:$0xf] }
 0x5df   : > { %v11438_v43 = vor.u32 %v13138_v3, %v11435_v7  ;;  %v11584_v56 = vor.u32 %v13187_v40, %v11583_v47  ;;  %v13200_v7 = vld [vmem:[#allocation12 + $0x544] sm:$0xf0]  ;;  %v11723_v47 = vld [vmem:[#allocation12 + $0x5e0] sm:$0xf] }
 0x5e0   : > { %6010 = vmatpush.bf16.msrb.mxu1 %v11392_v54  ;;  %6224 = vmatpush.bf16.msrb.mxu3 %v11528_v33  ;;  %v13175_v54 = vld [vmem:[#allocation12 + $0x484] sm:$0xf0]  ;;  %v13162_v33 = vld [vmem:[#allocation12 + $0x424] sm:$0xf] }
 0x5e1   : > { %6216 = vmatpush.bf16.msrb.mxu2 %v11484_v41  ;;  %v11534_v61 = vor.u32 %v13175_v54, %v11533_v23  ;;  %v13189_v41 = vld [vmem:[#allocation12 + $0x4f4] sm:$0xf0]  ;;  %v13221_v40 = vld [vmem:[#allocation12 + $0x5e4] sm:$0xf0] }
 0x5e2   : > { %6100 = vmatpush.bf16.msra.mxu0 %v11434_v6  ;;  %v11520_v6 = vor.u32 %v13170_v11, %v11517_v48  ;;  %v13210_v48 = vld [vmem:[#allocation12 + $0x594] sm:$0xf0] }
 0x5e4   : > { %6011 = vmatpush.bf16.msrb.mxu1 %v11384_v28  ;;  %6225 = vmatpush.bf16.msrb.mxu3 %v11520_v6  ;;  %v11504_v28 = vor.u32 %v13166_v63, %v11501_v36 }
 0x5e5   : > { %6429 = vmatpush.bf16.msra.mxu2 %v11624_v51 }
 0x5e6   : > { %6320 = vmatpush.bf16.msrb.mxu0 %v11574_v60  ;;  %v13195_v60 = vld [vmem:[#allocation12 + $0x524] sm:$0xf0] }
 0x5e7   : > { %v11616_v26 = vor.u32 %v13195_v60, %v11615_v12  ;;  %v11661_v12 = vld [vmem:[#allocation12 + $0x570] sm:$0xf]  ;;  %v13206_v60 = vld [vmem:[#allocation12 + $0x574] sm:$0xf0] }
 0x5e8   : > { %6108 = vmatpush.bf16.msra.mxu1 %v11478_v58  ;;  %6226 = vmatpush.bf16.msrb.mxu3 %v11512_v35  ;;  %v11446_v58 = vor.u32 %v13140_v59, %v11443_v27  ;;  %v11653_v35 = vld [vmem:[#allocation12 + $0x560] sm:$0xf]  ;;  %v13184_v59 = vld [vmem:[#allocation12 + $0x4d4] sm:$0xf]  ;;  %v11575_v27 = vld [vmem:[#allocation12 + $0x4d8] sm:$0xf0] }
 0x5e9   : > { %6430 = vmatpush.bf16.msra.mxu2 %v11616_v26  ;;  %v13204_v26 = vld [vmem:[#allocation12 + $0x564] sm:$0xf0] }
 0x5ea   : > { %6321 = vmatpush.bf16.msrb.mxu0 %v11566_v13  ;;  %v13193_v13 = vld [vmem:[#allocation12 + $0x514] sm:$0xf0] }
 0x5eb   : > { %v11608_v8 = vor.u32 %v13193_v13, %v11607_v25  ;;  %v11654_v13 = vor.u32 %v13204_v26, %v11653_v35  ;;  %v13219_v35 = vld [vmem:[#allocation12 + $0x5d4] sm:$0xf0]  ;;  %v11633_v26 = vld [vmem:[#allocation4] sm:$0xc] }
 0x5ec   : > { %6109 = vmatpush.bf16.msra.mxu1 %v11470_v45  ;;  %6227 = vmatpush.bf16.msrb.mxu3 %v11504_v28  ;;  %v11592_v45 = vor.u32 %v13189_v41, %v11591_v24  ;;  %v11645_v28 = vld [vmem:[#allocation12 + $0x550] sm:$0xf]  ;;  %v13235_v41 = vld [vmem:[#allocation12 + $0x654] sm:$0xf0] }
 0x5ed   : > { %6431 = vmatpush.bf16.msra.mxu2 %v11608_v8  ;;  %v13202_v8 = vld [vmem:[#allocation12 + $0x554] sm:$0xf0]  ;;  %v11781_v24 = vld [vmem:[#allocation12 + $0x650] sm:$0xf] }
 0x5ee   : > { %6322 = vmatpush.bf16.msrb.mxu0 %v11558_v19 }
 0x5f0   : > { %6110 = vmatpush.bf16.msra.mxu1 %v11462_v16  ;;  %v11662_v16 = vor.u32 %v13206_v60, %v11661_v12  ;;  %v11559_v12 = vld [vmem:[#allocation12 + $0x4b8] sm:$0xf0]  ;;  %v13192_v60 = vld [vmem:[#allocation12 + $0x514] sm:$0xf] }
 0x5f2   : > { %6323 = vmatpush.bf16.msrb.mxu0 %v11550_v44  ;;  %v11677_v44 = vld [vmem:[#allocation12 + $0x590] sm:$0xf] }
 0x5f3   : > { %v11678_v52 = vor.u32 %v13210_v48, %v11677_v44  ;;  %v13194_v44 = vld [vmem:[#allocation12 + $0x524] sm:$0xf]  ;;  %v11617_v48 = vld [vmem:[#allocation12 + $0x528] sm:$0xf0] }
 0x5f4   : > { %6111 = vmatpush.bf16.msra.mxu1 %v11454_v18 }
 0x5f6   : > { %6324 = vmatpush.bf16.msrb.mxu0 %v11542_v15  ;;  %v14319_v15 = vld [vmem:[#allocation4 + $0x8] sm:$0x1] }
 0x5f7   : > { %v6137_v54 = vunpack.c.l.b16 %v14319_v15 }
 0x5f8   : > { %6112 = vmatpush.bf16.msra.mxu1 %v11446_v58  ;;  %v11646_v58 = vor.u32 %v13202_v8, %v11645_v28  ;;  %v13190_v8 = vld [vmem:[#allocation12 + $0x504] sm:$0xf] }
 0x5fa   : > { %6325 = vmatpush.bf16.msrb.mxu0 %v11534_v61 }
 0x5fc   : > { %6113 = vmatpush.bf16.msra.mxu1 %v11438_v43  ;;  %v13182_v43 = vld [vmem:[#allocation12 + $0x4c4] sm:$0xf] }
 0x63a   : > { %v14299_v38 = vpop.f32.mrf.mxu0 }
 0x640   : > { %v14301_v9 = vpop.f32.mrf.mxu2 }
 0x641   : > { %v5603_v10 = vadd.f32 %v14301_v9, %v14299_v38  ;;  %v11600_v9 = vor.u32 %v13191_v31, %v11599_v49  ;;  %v11625_v31 = vld [vmem:[#allocation12 + $0x538] sm:$0xf0] }
 0x642   : > { %v5591_v14 = vpop.f32.mrf.mxu0 }
 0x643   : > { %v5606_v21 = vadd.f32 %v5603_v10, %v14212_v17  ;;  %6432 = vmatpush.bf16.msra.mxu2 %v11600_v9  ;;  %v11488_v17 = vor.u32 %v13162_v33, %v11485_v39  ;;  %v11578_v39 = vor.u32 %v13184_v59, %v11575_v27  ;;  %v11601_v59 = vld [vmem:[#allocation12 + $0x508] sm:$0xf0] }
 0x647   : > { %6433 = vmatpush.bf16.msra.mxu2 %v11592_v45 }
 0x648   : > { %v5604_v29 = vpop.f32.mrf.mxu2 }
 0x649   : > { %v11493_v29 = vld [vmem:[#allocation12 + $0x438] sm:$0xf0] }
 0x64a   : > { %v14303_v37 = vpop.f32.mrf.mxu0  ;;  %v11496_v38 = vor.u32 %v13164_v4, %v11493_v29  ;;  %v13196_v4 = vld [vmem:[#allocation12 + $0x534] sm:$0xf] }
 0x64b   : > { %6434 = vmatpush.bf16.msra.mxu2 %v11584_v56 }
 0x64c   : > { %6228 = vmatpush.bf16.msrb.mxu3 %v11496_v38 }
 0x64f   : > { %v5741_v22 = vpop.f32.mrf.mxu3 }
 0x650   : > { %v5877_v14 = vpop.f32.mrf.mxu2  ;;  %v5755_v34 = vadd.f32 %v14303_v37, %v5741_v22  ;;  %6229 = vmatpush.bf16.msrb.mxu3 %v11488_v17  ;;  %v11670_v22 = vor.u32 %v13208_v1, %v11669_v62  ;;  %v13233_v62 = vld [vmem:[#allocation12 + $0x644] sm:$0xf0]  ;;  %v11620_v1 = vor.u32 %v13194_v44, %v11617_v48  ;;  %v13209_v44 = vld [vmem:[#allocation12 + $0x594] sm:$0xf] }
 0x652   : > { %v5756_v53 = vpop.f32.mrf.mxu0  ;;  %v5758_v42 = vadd.f32 %v5755_v34, %v5606_v21  ;;  %v11731_v34 = vld [vmem:[#allocation12 + $0x5f0] sm:$0xf]  ;;  %v11637_v21 = vld [vmem:[#allocation12 + $0x540] sm:$0xf] }
 0x657   : > { %v5743_v30 = vpop.f32.mrf.mxu3 }
 0x658   : > { %v5879_v19 = vpop.f32.mrf.mxu2 }
 0x659   : > { %v13223_v19 = vld [vmem:[#allocation12 + $0x5f4] sm:$0xf0] }
 0x65a   : > { %v5890_v20 = vpop.f32.mrf.mxu0  ;;  %v11732_v17 = vor.u32 %v13223_v19, %v11731_v34  ;;  %v13176_v19 = vld [vmem:[#allocation12 + $0x494] sm:$0xf] }
 0x65b   : > { %v5891_v37 = vadd.f32 %v5890_v20, %v5877_v14  ;;  %v5913_v14 = vld [vmem:[#allocation4] sm:$0x8] }
 0x65c   : > { %v5930_v23 = vunpack.c.l.b16 %v5913_v14  ;;  %v11724_v14 = vor.u32 %v13221_v40, %v11723_v47 }
 0x65d   : > { %v5894_v11 = vadd.f32 %v5891_v37, %v5758_v42  ;;  %v11628_v37 = vor.u32 %v13196_v4, %v11625_v31 }
 0x65f   : > { %vm5895_vm4 = vcmp.ge.f32.partialorder %v5894_v11, 0.0  ;;  %v5896_v6 = vmul.f32 0.2, %v5894_v11 }
 0x661   : > { %v14309_v51 = vsel %vm5895_vm4, %v5894_v11, %v5896_v6  ;;  %v11567_v11 = vld [vmem:[#allocation12 + $0x4c8] sm:$0xf0]  ;;  %v11638_v6 = vor.u32 %v13200_v7, %v11637_v21  ;;  %v13188_v21 = vld [vmem:[#allocation12 + $0x4f4] sm:$0xf]  ;;  %vm14504_vm4 = vmand %vm7935_vm3, %vm7936_vm1 }
 0x662   : > { %v14313_v55 = vpack.c.bf16 %v14309_v51, %v14309_v51  ;;  %v5892_v57 = vpop.f32.mrf.mxu0  ;;  %v11570_v56 = vor.u32 %v13182_v43, %v11567_v11  ;;  %v11535_v43 = vld [vmem:[#allocation12 + $0x488] sm:$0xf0]  ;;  %v13186_v11 = vld [vmem:[#allocation12 + $0x4e4] sm:$0xf] }
 0x663   : > { %v11773_v57 = vld [vmem:[#allocation12 + $0x640] sm:$0xf] }
 0x664   : > { %5899 = vst.msk [vmem:[#allocation4 + $0x4] sm:$0xf] %vm595_vm13, %v14313_v55  ;;  %11479 = vmatmul.msk.bf16.vlgmr.msra.gmra.mxu0 %vm4558_vm0, %v14313_v55  ;;  %vm620_vm13 = vmand %vm618_vm9, %vm619_vm5 }
 0x665   : > { %6541 = vmatpush.bf16.msra.mxu0 %v11678_v52  ;;  %v11782_v52 = vor.u32 %v13235_v41, %v11781_v24  ;;  %v11699_v24 = vld [vmem:[#allocation12 + $0x5b0] sm:$0xf]  ;;  %v13215_v41 = vld [vmem:[#allocation12 + $0x5b4] sm:$0xf0] }
 0x666   : > { %v11700_v40 = vor.u32 %v13215_v41, %v11699_v24  ;;  %v14352_v24 = vld [vmem:[#allocation4] sm:$0xf] }
 0x669   : > { %6542 = vmatpush.bf16.msra.mxu0 %v11670_v22  ;;  %v13180_v22 = vld [vmem:[#allocation12 + $0x4b4] sm:$0xf] }
 0x66b   : > { %v6237_v46 = vld [vmem:[#allocation4 + $0x4] sm:$0x7] }
 0x66c   : > { %v5914_v5 = vld [vmem:[#allocation4 + $0x4] sm:$0xf]  ;;  %v6252_v53 = vunpack.c.l.b16 %v6237_v46 }
 0x66d   : > { %v6119_v63 = vld [vmem:[#allocation4 + $0x4] sm:$0xf]  ;;  %v5931_v36 = vunpack.c.l.b16 %v5914_v5  ;;  %6543 = vmatpush.bf16.msra.mxu0 %v11662_v16  ;;  %v11609_v16 = vld [vmem:[#allocation12 + $0x518] sm:$0xf0]  ;;  %v11774_v5 = vor.u32 %v13233_v62, %v11773_v57  ;;  %v13213_v57 = vld [vmem:[#allocation12 + $0x5a4] sm:$0xf0] }
 0x66e   : > { %v6136_v25 = vunpack.c.l.b16 %v6119_v63  ;;  %v14322_v61 = vpack.c.b16 %v6252_v53, %v5930_v23  ;;  %v6346_v46 = vld [vmem:[#allocation4 + $0x4] sm:$0xe]  ;;  %v11562_v63 = vor.u32 %v13180_v22, %v11559_v12  ;;  %v11831_v62 = vld [vmem:[#allocation12 + $0x6b0] sm:$0xf] }
 0x66f   : > { %v5932_v18 = vpack.c.b16 %v5931_v36, %v5930_v23  ;;  %v11715_v23 = vld [vmem:[#allocation12 + $0x5d0] sm:$0xf]  ;;  %v13198_v53 = vld [vmem:[#allocation4] sm:$0x30]  ;;  %v6361_v27 = vunpack.c.l.b16 %v6346_v46  ;;  %v11725_v46 = vld [vmem:[#allocation12 + $0x5e8] sm:$0xf0] }
 0x670   : > { %v6138_v10 = vpack.c.b16 %v6137_v54, %v6136_v25  ;;  %v6254_v38 = vrot.slane %v14322_v61, 3  ;;  %v11765_v36 = vld [vmem:[#allocation12 + $0x630] sm:$0xf]  ;;  %v13231_v25 = vld [vmem:[#allocation12 + $0x634] sm:$0xf0]  ;;  %v11716_v28 = vor.u32 %v13219_v35, %v11715_v23  ;;  %v11634_v4 = vor.u32 %v13198_v53, %v11633_v26 }
 0x671   : > { %v5934_v29 = vshrl.u32 %v5932_v18, 16  ;;  %v5937_v49 = vshll.u32 %v5932_v18, 16  ;;  %6544 = vmatpush.bf16.msra.mxu0 %v11654_v13  ;;  %v11612_v13 = vor.u32 %v13192_v60, %v11609_v16  ;;  %v13178_v18 = vld [vmem:[#allocation12 + $0x4a4] sm:$0xf]  ;;  %v11766_v31 = vor.u32 %v13231_v25, %v11765_v36  ;;  %v13247_v22 = vld [vmem:[#allocation12 + $0x6b4] sm:$0xf0] }
 0x672   : > { %v6142_v30 = vshll.u32 %v6138_v10, 16  ;;  %v6140_v33 = vshrl.u32 %v6138_v10, 16  ;;  %v11551_v10 = vld [vmem:[#allocation12 + $0x4a8] sm:$0xf0]  ;;  %v11749_v12 = vld [vmem:[#allocation12 + $0x610] sm:$0xf] }
 0x673   : > { %v5936_v9 = vrot.slane %v5934_v29, 3  ;;  %v5939_v3 = vrot.slane %v5937_v49, 4  ;;  %v11707_v29 = vld [vmem:[#allocation12 + $0x5c0] sm:$0xf]  ;;  %v13217_v49 = vld [vmem:[#allocation12 + $0x5c4] sm:$0xf0]  ;;  %v11554_v34 = vor.u32 %v13178_v18, %v11551_v10 }
 0x674   : > { %v6144_v20 = vrot.slane %v6142_v30, 1  ;;  %11579 = vmatmul.msk.bf16.vlgmr.msrb.gmra.mxu0 %vm4558_vm0, %v6254_v38  ;;  %v11604_v30 = vor.u32 %v13190_v8, %v11601_v59  ;;  %v11708_v7 = vor.u32 %v13217_v49, %v11707_v29  ;;  %v13227_v60 = vld [vmem:[#allocation12 + $0x614] sm:$0xf0]  ;;  %v11671_v35 = vld [vmem:[#allocation12 + $0x588] sm:$0xf0] }
 0x675   : > { %v5940_v42 = vor.u32 %v5939_v3, %v5936_v9  ;;  %6545 = vmatpush.bf16.msra.mxu0 %v11646_v58  ;;  %v11543_v58 = vld [vmem:[#allocation12 + $0x498] sm:$0xf0]  ;;  %v14338_v9 = vpack.c.b16 %v6137_v54, %v6361_v27  ;;  %v11585_v54 = vld [vmem:[#allocation12 + $0x4e8] sm:$0xf0]  ;;  %v13220_v26 = vld [vmem:[#allocation12 + $0x5e4] sm:$0xf]  ;;  %v11750_v53 = vor.u32 %v13227_v60, %v11749_v12 }
 0x676   : > { %v14330_v45 = vor.u32 %v6144_v20, %v6140_v33  ;;  %v11593_v3 = vld [vmem:[#allocation12 + $0x4f8] sm:$0xf0]  ;;  %v11757_v33 = vld [vmem:[#allocation12 + $0x620] sm:$0xf]  ;;  %v13229_v20 = vld [vmem:[#allocation12 + $0x624] sm:$0xf0] }
 0x677   : > { %11429 = vmatmul.msk.bf16.vlgmr.msrb.gmra.mxu1 %vm4558_vm0, %v5940_v42  ;;  %11430 = vmatmul.msk.bf16.vlgmr.msra.gmra.mxu3 %vm4558_vm0, %v5940_v42  ;;  %v11546_v42 = vor.u32 %v13176_v19, %v11543_v58  ;;  %v11596_v15 = vor.u32 %v13188_v21, %v11593_v3  ;;  %v11758_v48 = vor.u32 %v13229_v20, %v11757_v33  ;;  %v6363_v47 = vrot.slane %v14338_v9, 1  ;;  %v13245_v36 = vld [vmem:[#allocation12 + $0x6a4] sm:$0xf0]  ;;  %v11741_v25 = vld [vmem:[#allocation12 + $0x600] sm:$0xf] }
 0x678   : > { %11529 = vmatmul.msk.bf16.vlgmr.msrb.gmra.mxu2 %vm4558_vm0, %v14330_v45  ;;  %6333 = vmatpush.bf16.msrb.mxu1 %v11578_v39  ;;  %v14340_v39 = vrot.slane %v11634_v4, 2  ;;  %v13211_v10 = vld [vmem:[#allocation4 + $0x4] sm:$0x30]  ;;  %v13205_v8 = vld [vmem:[#allocation12 + $0x574] sm:$0xf] }
 0x679   : > { %6442 = vmatpush.bf16.msra.mxu3 %v11628_v37  ;;  %6653 = vmatpush.bf16.msrb.mxu2 %v11732_v17  ;;  %v13174_v37 = vld [vmem:[#allocation12 + $0x484] sm:$0xf]  ;;  %v11679_v17 = vld [vmem:[#allocation12 + $0x598] sm:$0xf0]  ;;  %v11687_v27 = vld [vmem:[#allocation4 + $0x4] sm:$0xc] }
 0x67a   : > { %6546 = vmatpush.bf16.msra.mxu0 %v11638_v6  ;;  %v13222_v6 = vld [vmem:[#allocation12 + $0x5f4] sm:$0xf]  ;;  %v11682_v16 = vor.u32 %v13209_v44, %v11679_v17  ;;  %v11663_v59 = vld [vmem:[#allocation12 + $0x578] sm:$0xf0]  ;;  %v13203_v19 = vld [vmem:[#allocation12 + $0x564] sm:$0xf] }
 0x67b   : > { %v13218_v4 = vld [vmem:[#allocation12 + $0x5d4] sm:$0xf]  ;;  %v11717_v29 = vld [vmem:[#allocation12 + $0x5d8] sm:$0xf0]  ;;  %v11655_v21 = vld [vmem:[#allocation12 + $0x568] sm:$0xf0] }
 0x67c   : > { %6334 = vmatpush.bf16.msrb.mxu1 %v11570_v56  ;;  %v11691_v56 = vld [vmem:[#allocation12 + $0x5a0] sm:$0xf]  ;;  %v11720_v58 = vor.u32 %v13218_v4, %v11717_v29  ;;  %v11815_v3 = vld [vmem:[#allocation12 + $0x690] sm:$0xf]  ;;  %v13216_v33 = vld [vmem:[#allocation12 + $0x5c4] sm:$0xf] }
 0x67d   : > { %6443 = vmatpush.bf16.msra.mxu3 %v11620_v1  ;;  %6654 = vmatpush.bf16.msrb.mxu2 %v11724_v14  ;;  %v11538_v1 = vor.u32 %v13174_v37, %v11535_v43  ;;  %v11588_v14 = vor.u32 %v13186_v11, %v11585_v54  ;;  %v11692_v23 = vor.u32 %v13213_v57, %v11691_v56  ;;  %v11709_v20 = vld [vmem:[#allocation12 + $0x5c8] sm:$0xf0]  ;;  %v13201_v43 = vld [vmem:[#allocation12 + $0x554] sm:$0xf]  ;;  %v11807_v54 = vld [vmem:[#allocation12 + $0x680] sm:$0xf] }
 0x67e   : > { %6758 = vmatpush.bf16.msrb.mxu0 %v11782_v52  ;;  %v11733_v52 = vld [vmem:[#allocation12 + $0x5f8] sm:$0xf0]  ;;  %v11712_v11 = vor.u32 %v13216_v33, %v11709_v20  ;;  %v13241_v44 = vld [vmem:[#allocation12 + $0x684] sm:$0xf0]  ;;  %v13214_v17 = vld [vmem:[#allocation12 + $0x5b4] sm:$0xf] }
 0x67f   : > { %v11639_v56 = vld [vmem:[#allocation12 + $0x548] sm:$0xf0]  ;;  %v13212_v61 = vld [vmem:[#allocation12 + $0x5a4] sm:$0xf]  ;;  %v13234_v9 = vld [vmem:[#allocation12 + $0x654] sm:$0xf] }
 0x680   : > { %6335 = vmatpush.bf16.msrb.mxu1 %v11562_v63  ;;  %v11823_v63 = vld [vmem:[#allocation12 + $0x6a0] sm:$0xf]  ;;  %v11833_v12 = vld [vmem:[#allocation12 + $0x6b8] sm:$0xf0]  ;;  %v13228_v4 = vld [vmem:[#allocation12 + $0x624] sm:$0xf] }
 0x681   : > { %6444 = vmatpush.bf16.msra.mxu3 %v11612_v13  ;;  %6655 = vmatpush.bf16.msrb.mxu2 %v11716_v28  ;;  %v13225_v13 = vld [vmem:[#allocation12 + $0x604] sm:$0xf0]  ;;  %v11728_v28 = vor.u32 %v13220_v26, %v11725_v46  ;;  %v11824_v49 = vor.u32 %v13245_v36, %v11823_v63  ;;  %v13232_v26 = vld [vmem:[#allocation12 + $0x644] sm:$0xf]  ;;  %v11775_v46 = vld [vmem:[#allocation12 + $0x648] sm:$0xf0] }
 0x682   : > { %6759 = vmatpush.bf16.msrb.mxu0 %v11774_v5  ;;  %v11832_v5 = vor.u32 %v13247_v22, %v11831_v62  ;;  %v11799_v62 = vld [vmem:[#allocation12 + $0x670] sm:$0xf]  ;;  %v11783_v22 = vld [vmem:[#allocation12 + $0x658] sm:$0xf0]  ;;  %v11825_v63 = vld [vmem:[#allocation12 + $0x6a8] sm:$0xf0]  ;;  %v11778_v36 = vor.u32 %v13232_v26, %v11775_v46 }
 0x683   : > { %v11759_v29 = vld [vmem:[#allocation12 + $0x628] sm:$0xf0]  ;;  %v13224_v33 = vld [vmem:[#allocation12 + $0x604] sm:$0xf] }
 0x684   : > { %6336 = vmatpush.bf16.msrb.mxu1 %v11554_v34  ;;  %11683 = vmatmul.msk.bf16.vlgmr.msra.gmra.mxu0 %vm4558_vm0, %v14340_v39  ;;  %v11666_v34 = vor.u32 %v13205_v8, %v11663_v59  ;;  %v6784_v8 = vld [vmem:[#allocation4 + $0x8] sm:$0xf]  ;;  %v11743_v20 = vld [vmem:[#allocation12 + $0x608] sm:$0xf0] }
 0x685   : > { %6445 = vmatpush.bf16.msra.mxu3 %v11604_v30  ;;  %6656 = vmatpush.bf16.msrb.mxu2 %v11708_v7  ;;  %v11688_v30 = vor.u32 %v13211_v10, %v11687_v27  ;;  %v13243_v7 = vld [vmem:[#allocation12 + $0x694] sm:$0xf0]  ;;  %v13242_v10 = vld [vmem:[#allocation12 + $0x694] sm:$0xf] }
 0x686   : > { %6760 = vmatpush.bf16.msrb.mxu0 %v11766_v31  ;;  %v11742_v31 = vor.u32 %v13225_v13, %v11741_v25  ;;  %v11816_v37 = vor.u32 %v13243_v7, %v11815_v3  ;;  %v13230_v13 = vld [vmem:[#allocation12 + $0x634] sm:$0xf]  ;;  %v11801_v3 = vld [vmem:[#allocation12 + $0x678] sm:$0xf0] }
 0x687   : > { %11480 = vmatmul.msk.bf16.vlgmr.msra.gmra.mxu1 %vm4558_vm0, %v14313_v55  ;;  %11530 = vmatmul.msk.bf16.vlgmr.msrb.gmra.mxu3 %vm4558_vm0, %v14330_v45  ;;  %v11736_v55 = vor.u32 %v13222_v6, %v11733_v52  ;;  %v13207_v45 = vld [vmem:[#allocation12 + $0x584] sm:$0xf]  ;;  %v14354_v41 = vrot.slane %v11688_v30, 2  ;;  %v11808_v6 = vor.u32 %v13241_v44, %v11807_v54 }
 0x688   : > { %6337 = vmatpush.bf16.msrb.mxu1 %v11546_v42  ;;  %11629 = vmatmul.msk.bf16.vlgmr.msra.gmra.mxu2 %vm4558_vm0, %v6363_v47  ;;  %v11674_v18 = vor.u32 %v13207_v45, %v11671_v35  ;;  %v11658_v42 = vor.u32 %v13203_v19, %v11655_v21  ;;  %v13199_v52 = vld [vmem:[#allocation12 + $0x544] sm:$0xf]  ;;  %v13237_v45 = vld [vmem:[#allocation12 + $0x664] sm:$0xf0]  ;;  %v13226_v19 = vld [vmem:[#allocation12 + $0x614] sm:$0xf] }
 0x689   : > { %6446 = vmatpush.bf16.msra.mxu3 %v11596_v15  ;;  %6657 = vmatpush.bf16.msrb.mxu2 %v11700_v40  ;;  %v11647_v15 = vld [vmem:[#allocation12 + $0x558] sm:$0xf0]  ;;  %v11642_v60 = vor.u32 %v13199_v52, %v11639_v56  ;;  %v13238_v21 = vld [vmem:[#allocation12 + $0x674] sm:$0xf] }
 0x68a   : > { %6761 = vmatpush.bf16.msrb.mxu0 %v11758_v48  ;;  %v11701_v48 = vld [vmem:[#allocation12 + $0x5b8] sm:$0xf0]  ;;  %v11650_v40 = vor.u32 %v13201_v43, %v11647_v15  ;;  %v11804_v7 = vor.u32 %v13238_v21, %v11801_v3 }
 0x68b   : > { %v11704_v57 = vor.u32 %v13214_v17, %v11701_v48  ;;  %v13271_v21 = vld [vmem:[#allocation13 + $0x1d8] sm:$0xff] }
 0x68c   : > { %6338 = vmatpush.bf16.msrb.mxu1 %v11538_v1  ;;  %v11693_v1 = vld [vmem:[#allocation12 + $0x5a8] sm:$0xf0] }
 0x68d   : > { %6447 = vmatpush.bf16.msra.mxu3 %v11588_v14  ;;  %6658 = vmatpush.bf16.msrb.mxu2 %v11692_v23  ;;  %v11791_v23 = vld [vmem:[#allocation12 + $0x660] sm:$0xf] }
 0x68e   : > { %6762 = vmatpush.bf16.msrb.mxu0 %v11750_v53  ;;  %v11792_v53 = vor.u32 %v13237_v45, %v11791_v23  ;;  %v13259_v23 = vld [vmem:[#allocation13 + $0x178] sm:$0xff] }
 0x690   : > { %6554 = vmatpush.bf16.msra.mxu1 %v11682_v16  ;;  %v11696_v16 = vor.u32 %v13212_v61, %v11693_v1 }
 0x691   : > { %6666 = vmatpush.bf16.msrb.mxu3 %v11736_v55  ;;  %6863 = vmatpush.bf16.msra.mxu2 %v11832_v5  ;;  %v11786_v55 = vor.u32 %v13234_v9, %v11783_v22  ;;  %v13244_v5 = vld [vmem:[#allocation12 + $0x6a4] sm:$0xf] }
 0x692   : > { %6763 = vmatpush.bf16.msrb.mxu0 %v11742_v31  ;;  %v11828_v25 = vor.u32 %v13244_v5, %v11825_v63  ;;  %v11809_v31 = vld [vmem:[#allocation12 + $0x688] sm:$0xf0]  ;;  %v13254_v5 = vld [vmem:[#allocation13 + $0x150] sm:$0xff] }
 0x693   : > { %v13258_v63 = vld [vmem:[#allocation13 + $0x170] sm:$0xff] }
 0x694   : > { %6555 = vmatpush.bf16.msra.mxu1 %v11674_v18  ;;  %v11767_v18 = vld [vmem:[#allocation12 + $0x638] sm:$0xf0] }
 0x695   : > { %6667 = vmatpush.bf16.msrb.mxu3 %v11728_v28  ;;  %6864 = vmatpush.bf16.msra.mxu2 %v11824_v49  ;;  %v11817_v28 = vld [vmem:[#allocation12 + $0x698] sm:$0xf0]  ;;  %v11770_v59 = vor.u32 %v13230_v13, %v11767_v18  ;;  %v13240_v49 = vld [vmem:[#allocation12 + $0x684] sm:$0xf]  ;;  %v13257_v18 = vld [vmem:[#allocation13 + $0x168] sm:$0xff] }
 0x696   : > { %11787 = vmatmul.msk.bf16.vlgmr.msrb.gmra.mxu0 %vm4558_vm0, %v14352_v24  ;;  %v11820_v27 = vor.u32 %v13242_v10, %v11817_v28  ;;  %v11812_v30 = vor.u32 %v13240_v49, %v11809_v31  ;;  %v13252_v10 = vld [vmem:[#allocation13 + $0x140] sm:$0xff]  ;;  %v13267_v28 = vld [vmem:[#allocation13 + $0x1b8] sm:$0xff]  ;;  %v13266_v31 = vld [vmem:[#allocation13 + $0x1b0] sm:$0xff] }
 0x697   : > { %11580 = vmatmul.msk.bf16.vlgmr.msrb.gmra.mxu1 %vm4558_vm0, %v6254_v38  ;;  %11630 = vmatmul.msk.bf16.vlgmr.msra.gmra.mxu3 %vm4558_vm0, %v6363_v47  ;;  %v13239_v38 = vld [vmem:[#allocation12 + $0x674] sm:$0xf0]  ;;  %v13246_v47 = vld [vmem:[#allocation12 + $0x6b4] sm:$0xf] }
 0x698   : > { %6556 = vmatpush.bf16.msra.mxu1 %v11666_v34  ;;  %11737 = vmatmul.msk.bf16.vlgmr.msrb.gmra.mxu2 %vm4558_vm0, %v14354_v41  ;;  %v11800_v14 = vor.u32 %v13239_v38, %v11799_v62  ;;  %v11836_v35 = vor.u32 %v13246_v47, %v11833_v12  ;;  %v11762_v34 = vor.u32 %v13228_v4, %v11759_v29 }
 0x699   : > { %6668 = vmatpush.bf16.msrb.mxu3 %v11720_v58  ;;  %6865 = vmatpush.bf16.msra.mxu2 %v11816_v37  ;;  %v11751_v58 = vld [vmem:[#allocation12 + $0x618] sm:$0xf0]  ;;  %v11746_v37 = vor.u32 %v13224_v33, %v11743_v20  ;;  %v13270_v33 = vld [vmem:[#allocation13 + $0x1d0] sm:$0xff] }
 0x69c   : > { %6557 = vmatpush.bf16.msra.mxu1 %v11658_v42  ;;  %v13236_v42 = vld [vmem:[#allocation12 + $0x664] sm:$0xf] }
 0x69d   : > { %6669 = vmatpush.bf16.msrb.mxu3 %v11712_v11  ;;  %6866 = vmatpush.bf16.msra.mxu2 %v11808_v6 }
 0x6a0   : > { %6558 = vmatpush.bf16.msra.mxu1 %v11650_v40 }
 0x6a1   : > { %6670 = vmatpush.bf16.msrb.mxu3 %v11704_v57  ;;  %6867 = vmatpush.bf16.msra.mxu2 %v11800_v14 }
 0x6a4   : > { %6559 = vmatpush.bf16.msra.mxu1 %v11642_v60 }
 0x6a5   : > { %6671 = vmatpush.bf16.msrb.mxu3 %v11696_v16  ;;  %6868 = vmatpush.bf16.msra.mxu2 %v11792_v53 }
 0x6a7   : > { %11684 = vmatmul.msk.bf16.vlgmr.msra.gmra.mxu1 %vm4558_vm0, %v14340_v39  ;;  %v11754_v39 = vor.u32 %v13226_v19, %v11751_v58  ;;  %v13265_v19 = vld [vmem:[#allocation13 + $0x1a8] sm:$0xff]  ;;  %v13278_v58 = vld [vmem:[#allocation13 + $0x210] sm:$0xff] }
 0x6a8   : > { %6771 = vmatpush.bf16.msrb.mxu1 %v11786_v55  ;;  %11738 = vmatmul.msk.bf16.vlgmr.msrb.gmra.mxu3 %vm4558_vm0, %v14354_v41  ;;  %v11793_v41 = vld [vmem:[#allocation12 + $0x668] sm:$0xf0]  ;;  %v13255_v55 = vld [vmem:[#allocation13 + $0x158] sm:$0xff] }
 0x6a9   : > { %6876 = vmatpush.bf16.msra.mxu3 %v11836_v35  ;;  %11837 = vmatmul.msk.bf16.vlgmr.msra.gmra.mxu2 %vm4558_vm0, %v6784_v8  ;;  %v11796_v43 = vor.u32 %v13236_v42, %v11793_v41  ;;  %v13264_v41 = vld [vmem:[#allocation13 + $0x1a0] sm:$0xff] }
 0x6aa   : > { %7019 = vmatpush.bf16.msra.mxu0 %v13255_v55  ;;  %7171 = vmatpush.bf16.msrb.mxu2 %v13267_v28  ;;  %v13261_v55 = vld [vmem:[#allocation13 + $0x188] sm:$0xff] }
 0x6ac   : > { %6772 = vmatpush.bf16.msrb.mxu1 %v11778_v36  ;;  %v13253_v36 = vld [vmem:[#allocation13 + $0x148] sm:$0xff] }
 0x6ad   : > { %6877 = vmatpush.bf16.msra.mxu3 %v11828_v25 }
 0x6ae   : > { %7020 = vmatpush.bf16.msra.mxu0 %v13254_v5  ;;  %7172 = vmatpush.bf16.msrb.mxu2 %v13266_v31 }
 0x6b0   : > { %6773 = vmatpush.bf16.msrb.mxu1 %v11770_v59  ;;  %v13251_v59 = vld [vmem:[#allocation13 + $0x138] sm:$0xff] }
 0x6b1   : > { %6878 = vmatpush.bf16.msra.mxu3 %v11820_v27  ;;  %v13279_v27 = vld [vmem:[#allocation13 + $0x218] sm:$0xff] }
 0x6b2   : > { %7021 = vmatpush.bf16.msra.mxu0 %v13253_v36  ;;  %7173 = vmatpush.bf16.msrb.mxu2 %v13265_v19  ;;  %v13272_v36 = vld [vmem:[#allocation13 + $0x1e0] sm:$0xff] }
 0x6b4   : > { %6774 = vmatpush.bf16.msrb.mxu1 %v11762_v34  ;;  %v13250_v34 = vld [vmem:[#allocation13 + $0x130] sm:$0xff] }
 0x6b5   : > { %6879 = vmatpush.bf16.msra.mxu3 %v11812_v30 }
 0x6b6   : > { %7022 = vmatpush.bf16.msra.mxu0 %v13252_v10  ;;  %7174 = vmatpush.bf16.msrb.mxu2 %v13264_v41 }
 0x6b8   : > { %6775 = vmatpush.bf16.msrb.mxu1 %v11754_v39  ;;  %v13249_v39 = vld [vmem:[#allocation13 + $0x128] sm:$0xff] }
 0x6b9   : > { %6880 = vmatpush.bf16.msra.mxu3 %v11804_v7  ;;  %v13277_v7 = vld [vmem:[#allocation13 + $0x208] sm:$0xff] }
 0x6ba   : > { %7023 = vmatpush.bf16.msra.mxu0 %v13251_v59  ;;  %v6906_v59 = vld [vmem:[#allocation5] sm:$0xff] }
 0x6bc   : > { %6776 = vmatpush.bf16.msrb.mxu1 %v11746_v37 }
 0x6bd   : > { %6881 = vmatpush.bf16.msra.mxu3 %v11796_v43 }
 0x6be   : > { %7024 = vmatpush.bf16.msra.mxu0 %v13250_v34 }
 0x6bf   : > { %11788 = vmatmul.msk.bf16.vlgmr.msrb.gmra.mxu1 %vm4558_vm0, %v14352_v24 }
 0x6c0   : > { %11838 = vmatmul.msk.bf16.vlgmr.msra.gmra.mxu3 %vm4558_vm0, %v6784_v8  ;;  %7036 = vmatpush.bf16.msra.mxu1 %v13259_v23  ;;  %v13256_v8 = vld [vmem:[#allocation13 + $0x160] sm:$0xff]  ;;  %v13281_v23 = vld [vmem:[#allocation13 + $0x228] sm:$0xff] }
 0x6c1   : > { %7188 = vmatpush.bf16.msrb.mxu3 %v13271_v21 }
 0x6c2   : > { %7025 = vmatpush.bf16.msra.mxu0 %v13249_v39 }
 0x6c4   : > { %7037 = vmatpush.bf16.msra.mxu1 %v13258_v63  ;;  %v13260_v63 = vld [vmem:[#allocation13 + $0x180] sm:$0xff] }
 0x6c5   : > { %7189 = vmatpush.bf16.msrb.mxu3 %v13270_v33 }
 0x6c8   : > { %7038 = vmatpush.bf16.msra.mxu1 %v13257_v18 }
 0x6cc   : > { %7039 = vmatpush.bf16.msra.mxu1 %v13256_v8 }
 0x6d0   : > { %7307 = vmatpush.bf16.msrb.mxu1 %v13279_v27  ;;  %v6909_v27 = vld [vmem:[#allocation5 + $0x8] sm:$0x11] }
 0x6d4   : > { %7308 = vmatpush.bf16.msrb.mxu1 %v13278_v58 }
 0x6d8   : > { %7309 = vmatpush.bf16.msrb.mxu1 %v13277_v7 }
 0x6e1   : > { %v6102_v11 = vpop.f32.mrf.mxu0 }
 0x6e9   : > { %v6104_v15 = vpop.f32.mrf.mxu0 }
 0x6f1   : > { %v6327_v54 = vpop.f32.mrf.mxu0 }
 0x6f4   : > { %v6013_v44 = vpop.f32.mrf.mxu1 }
 0x6f5   : > { %v6103_v17 = vadd.f32 %v6102_v11, %v6013_v44  ;;  %v13276_v44 = vld [vmem:[#allocation13 + $0x200] sm:$0xff] }
 0x6f6   : > { %7310 = vmatpush.bf16.msrb.mxu1 %v13276_v44 }
 0x6f9   : > { %v6329_v40 = vpop.f32.mrf.mxu0 }
 0x6fa   : > { %v6026_v48 = vpop.f32.mrf.mxu3 }
 0x6fb   : > { %v6218_v6 = vpop.f32.mrf.mxu2 }
 0x6fc   : > { %v6235_v52 = vadd.f32 %v6218_v6, %v6103_v17  ;;  %v6015_v56 = vpop.f32.mrf.mxu1  ;;  %v13269_v17 = vld [vmem:[#allocation13 + $0x1c8] sm:$0xff] }
 0x6fd   : > { %7190 = vmatpush.bf16.msrb.mxu3 %v13269_v17 }
 0x6fe   : > { %v6344_v57 = vadd.f32 %v6327_v54, %v6235_v52  ;;  %v13248_v54 = vld [vmem:[#allocation13 + $0x120] sm:$0xff]  ;;  %v13263_v52 = vld [vmem:[#allocation13 + $0x198] sm:$0xff] }
 0x6ff   : > { %7026 = vmatpush.bf16.msra.mxu0 %v13248_v54  ;;  %7175 = vmatpush.bf16.msrb.mxu2 %v13263_v52  ;;  %v13288_v52 = vld [vmem:[%s14622_s10 + $0x20] sm:$0xff] }
 0x701   : > { %v6548_v62 = vpop.f32.mrf.mxu0 }
 0x702   : > { %v6028_v61 = vpop.f32.mrf.mxu3 }
 0x703   : > { %v6220_v38 = vpop.f32.mrf.mxu2  ;;  %v13275_v61 = vld [vmem:[#allocation13 + $0x1f8] sm:$0xff] }
 0x704   : > { %v6115_v1 = vpop.f32.mrf.mxu1  ;;  %v13282_v38 = vld [vmem:[#allocation13 + $0x230] sm:$0xff]  ;;  %7311 = vmatpush.bf16.msrb.mxu1 %v13275_v61  ;;  %v13287_v61 = vld [vmem:[%s14622_s10 + $0x18] sm:$0xff] }
 0x705   : > { %v6116_v3 = vadd.f32 %v6115_v1, %v6026_v48  ;;  %v13283_v48 = vld [vmem:[#allocation13 + $0x238] sm:$0xff] }
 0x706   : > { %7324 = vmatpush.bf16.msrb.mxu0 %v13283_v48 }
 0x709   : > { %v6550_v22 = vpop.f32.mrf.mxu0 }
 0x70a   : > { %v6231_v9 = vpop.f32.mrf.mxu3  ;;  %v13262_v22 = vld [vmem:[#allocation13 + $0x190] sm:$0xff]  ;;  %7325 = vmatpush.bf16.msrb.mxu0 %v13282_v38 }
 0x70b   : > { %v6436_v24 = vpop.f32.mrf.mxu2  ;;  %v6236_v20 = vadd.f32 %v6231_v9, %v6116_v3  ;;  %7176 = vmatpush.bf16.msrb.mxu2 %v13262_v22  ;;  %v13285_v22 = vld [vmem:[%s14622_s10 + $0x8] sm:$0xff] }
 0x70c   : > { %v6117_v47 = vpop.f32.mrf.mxu1  ;;  %v6453_v30 = vadd.f32 %v6436_v24, %v6344_v57 }
 0x70d   : > { %v13274_v47 = vld [vmem:[#allocation13 + $0x1f0] sm:$0xff] }
 0x70e   : > { %v6565_v42 = vadd.f32 %v6548_v62, %v6453_v30  ;;  %v13268_v62 = vld [vmem:[#allocation13 + $0x1c0] sm:$0xff]  ;;  %7312 = vmatpush.bf16.msrb.mxu1 %v13274_v47  ;;  %7326 = vmatpush.bf16.msrb.mxu0 %v13281_v23 }
 0x70f   : > { %7191 = vmatpush.bf16.msrb.mxu3 %v13268_v62  ;;  %7177 = vmatpush.bf16.msrb.mxu2 %v13261_v55  ;;  %v13286_v62 = vld [vmem:[%s14622_s10 + $0x10] sm:$0xff] }
 0x712   : > { %v6233_v12 = vpop.f32.mrf.mxu3 }
 0x713   : > { %v6438_v60 = vpop.f32.mrf.mxu2  ;;  %v14374_v14 = vpop.f32.mrf.mxu0  ;;  %7178 = vmatpush.bf16.msrb.mxu2 %v13260_v63 }
 0x714   : > { %v6340_v16 = vpop.f32.mrf.mxu1 }
 0x715   : > { %v6345_v11 = vadd.f32 %v6340_v16, %v6236_v20 }
 0x71a   : > { %v6449_v45 = vpop.f32.mrf.mxu3 }
 0x71b   : > { %v6660_v35 = vpop.f32.mrf.mxu2  ;;  %v6767_v26 = vpop.f32.mrf.mxu0  ;;  %v6454_v40 = vadd.f32 %v6449_v45, %v6345_v11 }
 0x71c   : > { %v6342_v46 = vpop.f32.mrf.mxu1  ;;  %v6677_v15 = vadd.f32 %v6660_v35, %v6565_v42  ;;  %v13273_v35 = vld [vmem:[#allocation13 + $0x1e8] sm:$0xff]  ;;  %v13280_v26 = vld [vmem:[#allocation13 + $0x220] sm:$0xff] }
 0x71d   : > { %7313 = vmatpush.bf16.msrb.mxu1 %v13273_v35  ;;  %7327 = vmatpush.bf16.msrb.mxu0 %v13280_v26 }
 0x71e   : > { %v6782_v56 = vadd.f32 %v14374_v14, %v6677_v15 }
 0x721   : > { %7314 = vmatpush.bf16.msrb.mxu1 %v13272_v36  ;;  %v13284_v36 = vld [vmem:[%s14622_s10] sm:$0xff] }
 0x722   : > { %v6451_v53 = vpop.f32.mrf.mxu3 }
 0x723   : > { %v6662_v25 = vpop.f32.mrf.mxu2 }
 0x724   : > { %v6561_v13 = vpop.f32.mrf.mxu1 }
 0x725   : > { %v6566_v57 = vadd.f32 %v6561_v13, %v6454_v40 }
 0x72b   : > { %v6673_v4 = vpop.f32.mrf.mxu3 }
 0x72c   : > { %v6870_v29 = vpop.f32.mrf.mxu2  ;;  %v6563_v49 = vpop.f32.mrf.mxu1  ;;  %v6678_v1 = vadd.f32 %v6673_v4, %v6566_v57 }
 0x72d   : > { %v6887_v9 = vadd.f32 %v6870_v29, %v6782_v56 }
 0x72f   : > { %v6891_v60 = vmul.f32 0.2, %v6887_v9  ;;  %vm6889_vm7 = vcmp.ge.f32.partialorder %v6887_v9, 0.0 }
 0x731   : > { %v6893_v46 = vsel %vm6889_vm7, %v6887_v9, %v6891_v60 }
 0x733   : > { %v6675_v37 = vpop.f32.mrf.mxu3 }
 0x734   : > { %v6872_v43 = vpop.f32.mrf.mxu2 }
 0x73c   : > { %v6778_v6 = vpop.f32.mrf.mxu1 }
 0x73d   : > { %v6783_v24 = vadd.f32 %v6778_v6, %v6678_v1  ;;  %v13289_v6 = vld [vmem:[%s14622_s10 + $0x28] sm:$0xff] }
 0x73e   : > { %7415 = vmatpush.bf16.msra.mxu2 %v13289_v6 }
 0x742   : > { %7416 = vmatpush.bf16.msra.mxu2 %v13288_v52  ;;  %v13323_v52 = vld [vmem:[#allocation15 + $0x108] sm:$0xff] }
 0x743   : > { %v6883_v12 = vpop.f32.mrf.mxu3 }
 0x744   : > { %v6888_v14 = vadd.f32 %v6883_v12, %v6783_v24  ;;  %v6780_v16 = vpop.f32.mrf.mxu1 }
 0x746   : > { %vm6890_vm2 = vcmp.ge.f32.partialorder %v6888_v14, 0.0  ;;  %v6892_v45 = vmul.f32 0.2, %v6888_v14  ;;  %7417 = vmatpush.bf16.msra.mxu2 %v13287_v61 }
 0x748   : > { %v6894_v5 = vsel %vm6890_vm2, %v6888_v14, %v6892_v45 }
 0x749   : > { %v6895_v53 = vpack.c.bf16 %v6894_v5, %v6893_v46 }
 0x74a   : > { %7418 = vmatpush.bf16.msra.mxu2 %v13286_v62 }
 0x74b   : > { %v6897_v25 = vshrl.u32 %v6895_v53, 16  ;;  %v6885_v13 = vpop.f32.mrf.mxu3  ;;  %v6900_v10 = vshll.u32 %v6895_v53, 16  ;;  %v7338_v53 = vld [vmem:[#allocation18] sm:$0x3] }
 0x74c   : > { %v13292_v13 = vld [vmem:[#allocation15 + $0x10] sm:$0xff] }
 0x74d   : > { %v6899_v18 = vrot.slane %v6897_v25, 7  ;;  %v13293_v25 = vld [vmem:[#allocation15 + $0x18] sm:$0xff] }
 0x74e   : > { %7419 = vmatpush.bf16.msra.mxu2 %v13285_v22 }
 0x74f   : > { %v6902_v28 = vor.u32 %v6900_v10, %v6899_v18  ;;  %v6903_v8 = vrot.slane %v6899_v18, 4 }
 0x751   : > { %v6907_v4 = vsel %vm5466_vm12, %v6902_v28, %v6906_v59  ;;  %v6910_v29 = vsel %vm13982_vm15, %v6903_v8, %v6909_v27  ;;  %vm613_vm12 = vcmask 517120   ;;  %v13291_v8 = vld [vmem:[#allocation15 + $0x8] sm:$0xff]  ;;  %v13297_v59 = vld [vmem:[#allocation15 + $0x38] sm:$0xff] }
 0x752   : > { %6908 = vst [vmem:[#allocation5] sm:$0xff] %v6907_v4  ;;  %v6939_v49 = vunpack.c.l.b16 %v6907_v4  ;;  %v6940_v31 = vunpack.c.h.b16 %v6907_v4  ;;  %7420 = vmatpush.bf16.msra.mxu2 %v13284_v36  ;;  %v13309_v27 = vld [vmem:[#allocation15 + $0x98] sm:$0xff] }
 0x753   : > { %6911 = vst [vmem:[#allocation5 + $0x8] sm:$0x11] %v6910_v29  ;;  %v13301_v4 = vld [vmem:[#allocation15 + $0x58] sm:$0xff]  ;;  %v13290_v29 = vld [vmem:[#allocation15] sm:$0xff] }
 0x754   : > { %v6941_v34 = vpack.c.b16 %v6939_v49, %v6939_v49  ;;  %v6942_v30 = vpack.c.b16 %v6940_v31, %v6940_v31  ;;  %614 = vst.msk [vmem:[#allocation6 + $0x8] sm:$0x3] %vm613_vm12, %v13741_v0  ;;  %v13303_v0 = vld [vmem:[#allocation15 + $0x68] sm:$0xff] }
 0x756   : > { %7027 = vmatmul.bf16.vlgmr.msra.gmra.mxu0 %v6941_v34  ;;  %11887 = vmatmul.msk.bf16.vlgmr.msra.gmra.mxu1 %vm5576_vm14, %v6942_v30  ;;  %v13300_v34 = vld [vmem:[#allocation15 + $0x50] sm:$0xff]  ;;  %v13295_v30 = vld [vmem:[#allocation15 + $0x28] sm:$0xff] }
 0x757   : > { %7491 = vmatpush.bf16.msra.mxu0 %v13297_v59  ;;  %7591 = vmatpush.bf16.msra.mxu1 %v13301_v4  ;;  %v13318_v4 = vld [vmem:[#allocation15 + $0xe0] sm:$0xff] }
 0x759   : > { %v7198_v19 = vld [vmem:[#allocation5] sm:$0xee] }
 0x75a   : > { %v7047_v58 = vld [vmem:[#allocation5 + $0x8] sm:$0x11]  ;;  %v7225_v3 = vunpack.c.l.b16 %v7198_v19  ;;  %v7226_v50 = vunpack.c.h.b16 %v7198_v19 }
 0x75b   : > { %v7077_v21 = vunpack.c.l.b16 %v7047_v58  ;;  %v7078_v2 = vunpack.c.h.b16 %v7047_v58  ;;  %7592 = vmatpush.bf16.msra.mxu1 %v13300_v34  ;;  %v13307_v19 = vld [vmem:[#allocation15 + $0x88] sm:$0xff]  ;;  %v7821_v34 = vld [vmem:[#allocation6] sm:$0x3] }
 0x75c   : > { %v13299_v58 = vld [vmem:[#allocation15 + $0x48] sm:$0xff] }
 0x75d   : > { %v7079_v39 = vpack.c.b16 %v7077_v21, %v6939_v49  ;;  %v7080_v7 = vpack.c.b16 %v7078_v2, %v6940_v31  ;;  %v7227_v20 = vpack.c.b16 %v7077_v21, %v7225_v3  ;;  %v7228_v42 = vpack.c.b16 %v7078_v2, %v7226_v50  ;;  %v13296_v49 = vld [vmem:[#allocation15 + $0x30] sm:$0xff]  ;;  %v13313_v21 = vld [vmem:[#allocation15 + $0xb8] sm:$0xff]  ;;  %v13294_v2 = vld [vmem:[#allocation15 + $0x20] sm:$0xff] }
 0x75e   : > { %v13308_v31 = vld [vmem:[#allocation15 + $0x90] sm:$0xff]  ;;  %7492 = vmatpush.bf16.msra.mxu0 %v13296_v49  ;;  %v13306_v3 = vld [vmem:[#allocation15 + $0x80] sm:$0xff] }
 0x75f   : > { %v7084_v33 = vshll.u32 %v7079_v39, 16  ;;  %v7091_v32 = vshll.u32 %v7080_v7, 16  ;;  %v7082_v41 = vshrl.u32 %v7079_v39, 16  ;;  %v7089_v43 = vshrl.u32 %v7080_v7, 16  ;;  %7593 = vmatpush.bf16.msra.mxu1 %v13299_v58  ;;  %v13298_v50 = vld [vmem:[#allocation15 + $0x40] sm:$0xff]  ;;  %v13305_v39 = vld [vmem:[#allocation15 + $0x78] sm:$0xff] }
 0x760   : > { %v7229_v44 = vrot.slane %v7227_v20, 1  ;;  %v7230_v17 = vrot.slane %v7228_v42, 1  ;;  %v13312_v7 = vld [vmem:[#allocation15 + $0xb0] sm:$0xff]  ;;  %v13311_v20 = vld [vmem:[#allocation15 + $0xa8] sm:$0xff]  ;;  %v13325_v42 = vld [vmem:[#allocation15 + $0x118] sm:$0xff] }
 0x761   : > { %v7086_v37 = vrot.slane %v7084_v33, 1  ;;  %v7093_v11 = vrot.slane %v7091_v32, 1  ;;  %v13304_v33 = vld [vmem:[#allocation15 + $0x70] sm:$0xff]  ;;  %v13317_v32 = vld [vmem:[#allocation15 + $0xd8] sm:$0xff] }
 0x762   : > { %7493 = vmatpush.bf16.msra.mxu0 %v13295_v30  ;;  %v13332_v58 = vld [vmem:[%s14618_s6 + $0x30] sm:$0xff] }
 0x763   : > { %v7087_v15 = vor.u32 %v7086_v37, %v7082_v41  ;;  %v7094_v54 = vor.u32 %v7093_v11, %v7089_v43  ;;  %7594 = vmatpush.bf16.msra.mxu1 %v13298_v50  ;;  %v13316_v41 = vld [vmem:[#allocation15 + $0xd0] sm:$0xff]  ;;  %v13310_v37 = vld [vmem:[#allocation15 + $0xa0] sm:$0xff]  ;;  %v13315_v43 = vld [vmem:[#allocation15 + $0xc8] sm:$0xff] }
 0x764   : > { %v13302_v11 = vld [vmem:[#allocation15 + $0x60] sm:$0xff] }
 0x765   : > { %7179 = vmatmul.bf16.vlgmr.msrb.gmra.mxu2 %v7087_v15  ;;  %11936 = vmatmul.msk.bf16.vlgmr.msrb.gmra.mxu3 %vm5576_vm14, %v7094_v54  ;;  %v13349_v50 = vld [vmem:[%s14618_s6 + $0xb8] sm:$0xff] }
 0x766   : > { %7315 = vmatmul.bf16.vlgmr.msrb.gmra.mxu1 %v7229_v44  ;;  %11985 = vmatmul.msk.bf16.vlgmr.msrb.gmra.mxu0 %vm5576_vm14, %v7230_v17  ;;  %v7711_v44 = vld [vmem:[#allocation6] sm:$0xc] }
 0x767   : > { %7701 = vmatpush.bf16.msrb.mxu2 %v13309_v27  ;;  %7494 = vmatpush.bf16.msra.mxu0 %v13294_v2  ;;  %v13324_v17 = vld [vmem:[#allocation15 + $0x110] sm:$0xff]  ;;  %v7722_v6 = vunpack.c.l.b16 %v7711_v44  ;;  %v7872_v27 = vld [vmem:[#allocation6 + $0x8] sm:$0x3] }
 0x768   : > { %7811 = vmatpush.bf16.msrb.mxu1 %v13317_v32  ;;  %v13330_v44 = vld [vmem:[%s14618_s6 + $0x20] sm:$0xff] }
 0x76b   : > { %7702 = vmatpush.bf16.msrb.mxu2 %v13308_v31  ;;  %7646 = vmatpush.bf16.msrb.mxu0 %v13305_v39  ;;  %v621_v39 = vld [vmem:[#allocation7] sm:$0x4] }
 0x76c   : > { %7812 = vmatpush.bf16.msrb.mxu1 %v13316_v41 }
 0x76f   : > { %7703 = vmatpush.bf16.msrb.mxu2 %v13307_v19  ;;  %7647 = vmatpush.bf16.msrb.mxu0 %v13304_v33  ;;  %v13333_v19 = vld [vmem:[%s14618_s6 + $0x38] sm:$0xff]  ;;  %v622_v33 = vsel %vm620_vm13, 0, %v621_v39 }
 0x770   : > { %7813 = vmatpush.bf16.msrb.mxu1 %v13315_v43  ;;  %623 = vst [vmem:[#allocation7] sm:$0x4] %v622_v33  ;;  %v13348_v43 = vld [vmem:[%s14618_s6 + $0xb0] sm:$0xff] }
 0x773   : > { %7704 = vmatpush.bf16.msrb.mxu2 %v13306_v3  ;;  %7648 = vmatpush.bf16.msrb.mxu0 %v13303_v0  ;;  %v13331_v0 = vld [vmem:[%s14618_s6 + $0x28] sm:$0xff] }
 0x777   : > { %7649 = vmatpush.bf16.msrb.mxu0 %v13302_v11 }
 0x7d3   : > { %v7028_v48 = vpop.f32.mrf.mxu0  ;;  %v7041_v40 = vpop.f32.mrf.mxu1 }
 0x7d4   : > { %v7042_v9 = vadd.f32 %v7041_v40, %v7028_v48  ;;  %v13314_v48 = vld [vmem:[#allocation15 + $0xc0] sm:$0xff]  ;;  %v7436_v40 = vld [vmem:[#allocation6] sm:$0x8] }
 0x7d5   : > { %7814 = vmatpush.bf16.msrb.mxu1 %v13314_v48  ;;  %v13340_v48 = vld [vmem:[%s14618_s6 + $0x70] sm:$0xff] }
 0x7d6   : > { %v7045_v12 = vadd.f32 %v7042_v9, %v14309_v51 }
 0x7db   : > { %v7030_v56 = vpop.f32.mrf.mxu0  ;;  %v7043_v57 = vpop.f32.mrf.mxu1 }
 0x7dc   : > { %v7449_v57 = vunpack.c.l.b16 %v7436_v40  ;;  %v13347_v40 = vld [vmem:[%s14618_s6 + $0xa8] sm:$0xff] }
 0x7e3   : > { %v7316_v38 = vpop.f32.mrf.mxu1  ;;  %v7329_v1 = vpop.f32.mrf.mxu0 }
 0x7e4   : > { %v7330_v16 = vadd.f32 %v7329_v1, %v7316_v38 }
 0x7e8   : > { %v7180_v24 = vpop.f32.mrf.mxu2  ;;  %v7193_v47 = vpop.f32.mrf.mxu3 }
 0x7e9   : > { %v7194_v60 = vadd.f32 %v7193_v47, %v7180_v24  ;;  %v7723_v24 = vpack.c.b16 %v7722_v6, %v7722_v6  ;;  %v13322_v47 = vld [vmem:[#allocation15 + $0x100] sm:$0xff] }
 0x7eb   : > { %v7197_v14 = vadd.f32 %v7194_v60, %v7045_v12  ;;  %v7318_v55 = vpop.f32.mrf.mxu1  ;;  %v7331_v23 = vpop.f32.mrf.mxu0 }
 0x7ed   : > { %v7333_v45 = vadd.f32 %v7330_v16, %v7197_v14 }
 0x7ef   : > { %vm7334_vm15 = vcmp.ge.f32.partialorder %v7333_v45, 0.0  ;;  %v7335_v35 = vmul.f32 0.2, %v7333_v45 }
 0x7f0   : > { %v7182_v26 = vpop.f32.mrf.mxu2  ;;  %v7195_v46 = vpop.f32.mrf.mxu3 }
 0x7f1   : > { %v7336_v5 = vsel %vm7334_vm15, %v7333_v45, %v7335_v35  ;;  %v7724_v45 = vrot.slane %v7723_v24, 2 }
 0x7f2   : > { %7337 = vst.msk [vmem:[%s569_s27] sm:$0xff] %vm4558_vm0, %v7336_v5  ;;  %v7339_v51 = vpack.c.bf16 %v7336_v5, %v7336_v5  ;;  %s573_s27 = scalar_lea.vmem %s14625_s13, %s9182_s26 }
 0x7f4   : > { %v7346_v63 = vsel %vm14655_vm10, %v7339_v51, 0 }
 0x7f5   : > { %7355 = vmatpush.bf16.msra.mxu3 %v7346_v63  ;;  %v13321_v63 = vld [vmem:[#allocation15 + $0xf8] sm:$0xff] }
 0x7f8   : > { %11986 = vmatmul.msk.bf16.vlgmr.msra.gmra.mxu3 %vm7340_vm11, %v7338_v53 }
 0x7f9   : > { %7531 = vmatpush.bf16.msrb.mxu3 %v13293_v25  ;;  %v13320_v25 = vld [vmem:[#allocation15 + $0xf0] sm:$0xff] }
 0x7fd   : > { %7532 = vmatpush.bf16.msrb.mxu3 %v13292_v13  ;;  %v7766_v13 = vld [vmem:[#allocation6 + $0x4] sm:$0xc] }
 0x801   : > { %7533 = vmatpush.bf16.msrb.mxu3 %v13291_v8 }
 0x805   : > { %7534 = vmatpush.bf16.msrb.mxu3 %v13290_v29 }
 0x809   : > { %7756 = vmatpush.bf16.msra.mxu3 %v13313_v21 }
 0x80d   : > { %7757 = vmatpush.bf16.msra.mxu3 %v13312_v7 }
 0x811   : > { %7758 = vmatpush.bf16.msra.mxu3 %v13311_v20 }
 0x815   : > { %7759 = vmatpush.bf16.msra.mxu3 %v13310_v37  ;;  %v13341_v37 = vld [vmem:[%s14618_s6 + $0x78] sm:$0xff] }
 0x87b   : > { %v7357_v18 = vpop.f32.mrf.mxu3 }
 0x87c   : > { %v7361_v10 = vpack.c.bf16 %v7357_v18, %v7357_v18 }
 0x87e   : > { %12011 = vmatmul.msk.bf16.vlgmr.msra.gmra.mxu2 %vm4558_vm0, %v7361_v10  ;;  %v7777_v10 = vunpack.c.l.b16 %v7766_v13  ;;  %v13334_v13 = vld [vmem:[%s14618_s6 + $0x40] sm:$0xff] }
 0x87f   : > { %7913 = vmatpush.bf16.msra.mxu2 %v13325_v42 }
 0x880   : > { %v7778_v59 = vpack.c.b16 %v7777_v10, %v7777_v10 }
 0x882   : > { %v7779_v49 = vrot.slane %v7778_v59, 2 }
 0x883   : > { %v7359_v28 = vpop.f32.mrf.mxu3  ;;  %7914 = vmatpush.bf16.msra.mxu2 %v13324_v17 }
 0x884   : > { %v13319_v28 = vld [vmem:[#allocation15 + $0xe8] sm:$0xff] }
 0x887   : > { %7915 = vmatpush.bf16.msra.mxu2 %v13323_v52 }
 0x88b   : > { %7916 = vmatpush.bf16.msra.mxu2 %v13322_v47 }
 0x901   : > { %v14418_v15 = vpop.f32.mrf.mxu2 }
 0x902   : > { %v7426_v54 = vpack.c.bf16 %v14418_v15, %v14418_v15 }
 0x904   : > { %7427 = vst.msk [vmem:[#allocation6 + $0x4] sm:$0x3] %vm613_vm12, %v7426_v54  ;;  %12045 = vmatmul.msk.bf16.vlgmr.msrb.gmra.mxu3 %vm5576_vm14, %v7426_v54 }
 0x905   : > { %8006 = vmatpush.bf16.msrb.mxu3 %v13333_v19 }
 0x909   : > { %v7424_v56 = vpop.f32.mrf.mxu2  ;;  %8007 = vmatpush.bf16.msrb.mxu3 %v13332_v58 }
 0x90a   : > { %v13329_v56 = vld [vmem:[%s14618_s6 + $0x18] sm:$0xff] }
 0x90b   : > { %v7437_v61 = vld [vmem:[#allocation6 + $0x4] sm:$0x3] }
 0x90c   : > { %v7656_v62 = vld [vmem:[#allocation6 + $0x4] sm:$0x6]  ;;  %v7450_v1 = vunpack.c.l.b16 %v7437_v61  ;;  %v7601_v18 = vld [vmem:[#allocation6 + $0x4] sm:$0x1] }
 0x90d   : > { %v7540_v38 = vld [vmem:[#allocation6 + $0x4] sm:$0x7]  ;;  %v7667_v9 = vunpack.c.l.b16 %v7656_v62  ;;  %v7612_v8 = vunpack.c.l.b16 %v7601_v18  ;;  %8008 = vmatpush.bf16.msrb.mxu3 %v13331_v0  ;;  %v13346_v62 = vld [vmem:[%s14618_s6 + $0xa0] sm:$0xff]  ;;  %v13361_v0 = vld [vmem:[#allocation15 + $0x178] sm:$0xff] }
 0x90e   : > { %v7551_v22 = vunpack.c.l.b16 %v7540_v38  ;;  %v7451_v12 = vpack.c.b16 %v7450_v1, %v7449_v57  ;;  %v13339_v61 = vld [vmem:[%s14618_s6 + $0x68] sm:$0xff]  ;;  %v13328_v1 = vld [vmem:[%s14618_s6 + $0x10] sm:$0xff] }
 0x90f   : > { %v7668_v60 = vpack.c.b16 %v7667_v9, %v7667_v9  ;;  %v7613_v29 = vpack.c.b16 %v7612_v8, %v7449_v57  ;;  %v13338_v9 = vld [vmem:[%s14618_s6 + $0x60] sm:$0xff] }
 0x910   : > { %v7552_v14 = vpack.c.b16 %v7551_v22, %v7551_v22  ;;  %v7453_v16 = vshrl.u32 %v7451_v12, 16  ;;  %v7456_v55 = vshll.u32 %v7451_v12, 16  ;;  %v13345_v22 = vld [vmem:[%s14618_s6 + $0x98] sm:$0xff]  ;;  %v13327_v12 = vld [vmem:[%s14618_s6 + $0x8] sm:$0xff] }
 0x911   : > { %v7669_v23 = vrot.slane %v7668_v60, 1  ;;  %v7614_v31 = vrot.slane %v7613_v29, 3  ;;  %8009 = vmatpush.bf16.msrb.mxu3 %v13330_v44  ;;  %v7938_v29 = vld [vmem:[#allocation7] sm:$0x7]  ;;  %v13363_v44 = vld [vmem:[#allocation15 + $0x188] sm:$0xff] }
 0x912   : > { %v7556_v35 = vshll.u32 %v7552_v14, 16  ;;  %v7455_v26 = vrot.slane %v7453_v16, 3  ;;  %v7458_v46 = vrot.slane %v7456_v55, 4  ;;  %v7554_v5 = vshrl.u32 %v7552_v14, 16  ;;  %v13337_v16 = vld [vmem:[%s14618_s6 + $0x58] sm:$0xff]  ;;  %v13344_v55 = vld [vmem:[%s14618_s6 + $0x90] sm:$0xff] }
 0x913   : > { %12096 = vmatmul.msk.bf16.vlgmr.msrb.gmra.mxu2 %vm5576_vm14, %v7669_v23 }
 0x914   : > { %v7558_v51 = vrot.slane %v7556_v35, 1  ;;  %v7459_v53 = vor.u32 %v7458_v46, %v7455_v26  ;;  %12113 = vmatmul.msk.bf16.vlgmr.msra.gmra.mxu3 %vm5576_vm14, %v7724_v45  ;;  %v13326_v45 = vld [vmem:[%s14618_s6] sm:$0xff]  ;;  %v13336_v35 = vld [vmem:[%s14618_s6 + $0x50] sm:$0xff]  ;;  %v13343_v26 = vld [vmem:[%s14618_s6 + $0x88] sm:$0xff] }
 0x915   : > { %8010 = vmatpush.bf16.msrb.mxu3 %v13329_v56  ;;  %v13354_v56 = vld [vmem:[#allocation15 + $0x140] sm:$0xff] }
 0x916   : > { %v7559_v36 = vor.u32 %v7558_v51, %v7554_v5  ;;  %12028 = vmatmul.msk.bf16.vlgmr.msra.gmra.mxu0 %vm5576_vm14, %v7459_v53  ;;  %v13342_v53 = vld [vmem:[%s14618_s6 + $0x80] sm:$0xff] }
 0x917   : > { %7862 = vmatpush.bf16.msra.mxu0 %v13321_v63  ;;  %v13335_v63 = vld [vmem:[%s14618_s6 + $0x48] sm:$0xff] }
 0x918   : > { %12062 = vmatmul.msk.bf16.vlgmr.msra.gmra.mxu1 %vm5576_vm14, %v7559_v36 }
 0x919   : > { %8097 = vmatpush.bf16.msra.mxu1 %v13341_v37  ;;  %8011 = vmatpush.bf16.msrb.mxu3 %v13328_v1  ;;  %v13364_v37 = vld [vmem:[#allocation15 + $0x190] sm:$0xff] }
 0x91b   : > { %7863 = vmatpush.bf16.msra.mxu0 %v13320_v25 }
 0x91d   : > { %8098 = vmatpush.bf16.msra.mxu1 %v13340_v48  ;;  %8012 = vmatpush.bf16.msrb.mxu3 %v13327_v12  ;;  %v13355_v48 = vld [vmem:[#allocation15 + $0x148] sm:$0xff] }
 0x91e   : > { %v13351_v12 = vld [vmem:[#allocation15 + $0x128] sm:$0xff] }
 0x91f   : > { %7864 = vmatpush.bf16.msra.mxu0 %v13319_v28 }
 0x921   : > { %8099 = vmatpush.bf16.msra.mxu1 %v13339_v61  ;;  %8013 = vmatpush.bf16.msrb.mxu3 %v13326_v45 }
 0x923   : > { %12164 = vmatmul.msk.bf16.vlgmr.msra.gmra.mxu2 %vm5576_vm14, %v7872_v27  ;;  %7865 = vmatpush.bf16.msra.mxu0 %v13318_v4 }
 0x925   : > { %8100 = vmatpush.bf16.msra.mxu1 %v13338_v9  ;;  %8365 = vmatpush.bf16.msra.mxu3 %v13361_v0  ;;  %v13352_v9 = vld [vmem:[#allocation15 + $0x130] sm:$0xff]  ;;  %v13379_v0 = vld [vmem:[#allocation15 + $0x208] sm:$0xff] }
 0x926   : > { %12079 = vmatmul.msk.bf16.vlgmr.msrb.gmra.mxu0 %vm5576_vm14, %v7614_v31 }
 0x927   : > { %8182 = vmatpush.bf16.msrb.mxu0 %v13349_v50 }
 0x928   : > { %12130 = vmatmul.msk.bf16.vlgmr.msrb.gmra.mxu1 %vm5576_vm14, %v7779_v49 }
 0x929   : > { %8101 = vmatpush.bf16.msra.mxu1 %v13337_v16 }
 0x92b   : > { %8183 = vmatpush.bf16.msrb.mxu0 %v13348_v43  ;;  %v13368_v43 = vld [vmem:[#allocation15 + $0x1b0] sm:$0xff] }
 0x92d   : > { %8102 = vmatpush.bf16.msra.mxu1 %v13336_v35  ;;  %v13377_v35 = vld [vmem:[#allocation15 + $0x1f8] sm:$0xff] }
 0x92f   : > { %8184 = vmatpush.bf16.msrb.mxu0 %v13347_v40  ;;  %v13359_v40 = vld [vmem:[#allocation15 + $0x168] sm:$0xff] }
 0x931   : > { %8103 = vmatpush.bf16.msra.mxu1 %v13335_v63 }
 0x933   : > { %8185 = vmatpush.bf16.msrb.mxu0 %v13346_v62 }
 0x935   : > { %8104 = vmatpush.bf16.msra.mxu1 %v13334_v13 }
 0x936   : > { %12147 = vmatmul.msk.bf16.vlgmr.msra.gmra.mxu0 %vm5576_vm14, %v7821_v34 }
 0x937   : > { %8186 = vmatpush.bf16.msrb.mxu0 %v13345_v22 }
 0x93b   : > { %8187 = vmatpush.bf16.msrb.mxu0 %v13344_v55 }
 0x93f   : > { %8188 = vmatpush.bf16.msrb.mxu0 %v13343_v26  ;;  %v8210_v26 = vld [vmem:[#allocation6] sm:$0x8] }
 0x940   : > { %v8223_v63 = vunpack.c.l.b16 %v8210_v26 }
 0x943   : > { %8189 = vmatpush.bf16.msrb.mxu0 %v13342_v53  ;;  %v13380_v53 = vld [vmem:[#allocation15 + $0x210] sm:$0xff] }
 0x987   : > { %v7536_v30 = vpop.f32.mrf.mxu3 }
 0x98f   : > { %v7538_v21 = vpop.f32.mrf.mxu3 }
 0x993   : > { %v7496_v2 = vpop.f32.mrf.mxu0 }
 0x994   : > { %v7537_v54 = vadd.f32 %v7536_v30, %v7496_v2 }
 0x995   : > { %v7596_v3 = vpop.f32.mrf.mxu1 }
 0x996   : > { %v7706_v7 = vpop.f32.mrf.mxu2  ;;  %v7600_v6 = vadd.f32 %v7596_v3, %v7537_v54  ;;  %v13360_v54 = vld [vmem:[#allocation15 + $0x170] sm:$0xff] }
 0x997   : > { %v7761_v32 = vpop.f32.mrf.mxu3  ;;  %8366 = vmatpush.bf16.msra.mxu3 %v13360_v54  ;;  %v13378_v54 = vld [vmem:[#allocation15 + $0x200] sm:$0xff] }
 0x99b   : > { %v7498_v20 = vpop.f32.mrf.mxu0  ;;  %8367 = vmatpush.bf16.msra.mxu3 %v13359_v40  ;;  %v13370_v40 = vld [vmem:[#allocation15 + $0x1c0] sm:$0xff] }
 0x99c   : > { %v13365_v20 = vld [vmem:[#allocation15 + $0x198] sm:$0xff] }
 0x99d   : > { %v7598_v42 = vpop.f32.mrf.mxu1  ;;  %8420 = vmatpush.bf16.msrb.mxu1 %v13365_v20 }
 0x99e   : > { %v7708_v41 = vpop.f32.mrf.mxu2  ;;  %v13369_v42 = vld [vmem:[#allocation15 + $0x1b8] sm:$0xff] }
 0x99f   : > { %v7763_v11 = vpop.f32.mrf.mxu3  ;;  %v13357_v41 = vld [vmem:[#allocation15 + $0x158] sm:$0xff]  ;;  %8475 = vmatpush.bf16.msra.mxu0 %v13369_v42 }
 0x9a0   : > { %8265 = vmatpush.bf16.msrb.mxu2 %v13357_v41  ;;  %v13356_v11 = vld [vmem:[#allocation15 + $0x150] sm:$0xff] }
 0x9a1   : > { %8421 = vmatpush.bf16.msrb.mxu1 %v13364_v37  ;;  %v13384_v41 = vld [vmem:[#allocation15 + $0x230] sm:$0xff] }
 0x9a2   : > { %v13372_v37 = vld [vmem:[#allocation15 + $0x1d0] sm:$0xff] }
 0x9a3   : > { %v7651_v17 = vpop.f32.mrf.mxu0  ;;  %8476 = vmatpush.bf16.msra.mxu0 %v13368_v43  ;;  %v8540_v43 = vld [vmem:[#allocation6 + $0x4] sm:$0xc] }
 0x9a4   : > { %v7655_v38 = vadd.f32 %v7651_v17, %v7600_v6  ;;  %v13367_v17 = vld [vmem:[#allocation15 + $0x1a8] sm:$0xff]  ;;  %8266 = vmatpush.bf16.msrb.mxu2 %v13356_v11  ;;  %v13362_v6 = vld [vmem:[#allocation15 + $0x180] sm:$0xff] }
 0x9a5   : > { %v7816_v52 = vpop.f32.mrf.mxu1  ;;  %8422 = vmatpush.bf16.msrb.mxu1 %v13363_v44  ;;  %v13383_v11 = vld [vmem:[#allocation15 + $0x228] sm:$0xff] }
 0x9a6   : > { %v7918_v57 = vpop.f32.mrf.mxu2  ;;  %v7710_v24 = vadd.f32 %v7706_v7, %v7655_v38  ;;  %v13353_v38 = vld [vmem:[#allocation15 + $0x138] sm:$0xff]  ;;  %v13371_v44 = vld [vmem:[#allocation15 + $0x1c8] sm:$0xff] }
 0x9a7   : > { %8477 = vmatpush.bf16.msra.mxu0 %v13367_v17  ;;  %v8551_v17 = vunpack.c.l.b16 %v8540_v43 }
 0x9a8   : > { %v7765_v23 = vadd.f32 %v7761_v32, %v7710_v24  ;;  %8267 = vmatpush.bf16.msrb.mxu2 %v13355_v48  ;;  %v13382_v48 = vld [vmem:[#allocation15 + $0x220] sm:$0xff] }
 0x9a9   : > { %8423 = vmatpush.bf16.msrb.mxu1 %v13362_v6  ;;  %v8552_v6 = vpack.c.b16 %v8551_v17, %v8551_v17 }
 0x9aa   : > { %v7820_v46 = vadd.f32 %v7816_v52, %v7765_v23  ;;  %v13366_v52 = vld [vmem:[#allocation15 + $0x1a0] sm:$0xff] }
 0x9ab   : > { %v7653_v47 = vpop.f32.mrf.mxu0  ;;  %8478 = vmatpush.bf16.msra.mxu0 %v13366_v52  ;;  %v13350_v23 = vld [vmem:[#allocation15 + $0x120] sm:$0xff]  ;;  %v8595_v52 = vld [vmem:[#allocation6] sm:$0x3] }
 0x9ac   : > { %8268 = vmatpush.bf16.msrb.mxu2 %v13354_v56  ;;  %v8646_v56 = vld [vmem:[#allocation6 + $0x8] sm:$0x3] }
 0x9ad   : > { %v7818_v60 = vpop.f32.mrf.mxu1 }
 0x9ae   : > { %v7920_v14 = vpop.f32.mrf.mxu2 }
 0x9b0   : > { %8305 = vmatpush.bf16.msra.mxu2 %v13353_v38 }
 0x9b3   : > { %v7867_v5 = vpop.f32.mrf.mxu0 }
 0x9b4   : > { %v7871_v51 = vadd.f32 %v7867_v5, %v7820_v46  ;;  %8306 = vmatpush.bf16.msra.mxu2 %v13352_v9  ;;  %v13376_v46 = vld [vmem:[#allocation15 + $0x1f0] sm:$0xff]  ;;  %v13381_v5 = vld [vmem:[#allocation15 + $0x218] sm:$0xff] }
 0x9b6   : > { %v7922_v36 = vadd.f32 %v7918_v57, %v7871_v51  ;;  %v13358_v57 = vld [vmem:[#allocation15 + $0x160] sm:$0xff]  ;;  %v13385_v51 = vld [vmem:[#allocation15 + $0x238] sm:$0xff] }
 0x9b7   : > { %8368 = vmatpush.bf16.msra.mxu3 %v13358_v57  ;;  %v8553_v57 = vrot.slane %v8552_v6, 2 }
 0x9b8   : > { %vm7923_vm0 = vcmp.ge.f32.partialorder %v7922_v36, 0.0  ;;  %v7924_v25 = vmul.f32 0.2, %v7922_v36  ;;  %8307 = vmatpush.bf16.msra.mxu2 %v13351_v12 }
 0x9ba   : > { %v7925_v18 = vsel %vm7923_vm0, %v7922_v36, %v7924_v25 }
 0x9bb   : > { %v7926_v10 = vpack.c.bf16 %v7925_v18, %v7925_v18  ;;  %v7869_v28 = vpop.f32.mrf.mxu0 }
 0x9bc   : > { %8308 = vmatpush.bf16.msra.mxu2 %v13350_v23  ;;  %v13409_v23 = vld [vmem:[%s14618_s6 + $0x178] sm:$0xff] }
 0x9bd   : > { %v7928_v8 = vshrl.u32 %v7926_v10, 16  ;;  %v7931_v27 = vshll.u32 %v7926_v10, 16 }
 0x9bf   : > { %v7930_v59 = vrot.slane %v7928_v8, 7 }
 0x9c1   : > { %v7933_v49 = vor.u32 %v7931_v27, %v7930_v59  ;;  %v13375_v59 = vld [vmem:[#allocation15 + $0x1e8] sm:$0xff] }
 0x9c3   : > { %v7939_v31 = vsel %vm14504_vm4, %v7933_v49, %v7938_v29 }
 0x9c4   : > { %7940 = vst [vmem:[#allocation7] sm:$0x7] %v7939_v31 }
 0x9cb   : > { %v7941_v34 = vld [vmem:[#allocation7] sm:$0x3] }
 0x9cc   : > { %v8111_v30 = vld [vmem:[#allocation7] sm:$0x6]  ;;  %8014 = vmatmul.bf16.vlgmr.msrb.gmra.mxu3 %v7941_v34 }
 0x9cd   : > { %v8020_v19 = vld [vmem:[#allocation7] sm:$0x7]  ;;  %v8130_v58 = vunpack.c.l.b16 %v8111_v30  ;;  %8585 = vmatpush.bf16.msrb.mxu3 %v13377_v35 }
 0x9ce   : > { %v8039_v21 = vunpack.c.l.b16 %v8020_v19 }
 0x9cf   : > { %v8131_v2 = vpack.c.b16 %v8130_v58, %v8130_v58 }
 0x9d0   : > { %v8040_v3 = vpack.c.b16 %v8039_v21, %v8039_v21 }
 0x9d1   : > { %v8132_v50 = vrot.slane %v8131_v2, 1  ;;  %8586 = vmatpush.bf16.msrb.mxu3 %v13376_v46  ;;  %v13374_v2 = vld [vmem:[#allocation15 + $0x1e0] sm:$0xff]  ;;  %v13391_v46 = vld [vmem:[%s14618_s6 + $0xe8] sm:$0xff] }
 0x9d2   : > { %v8044_v39 = vshll.u32 %v8040_v3, 16  ;;  %v8042_v7 = vshrl.u32 %v8040_v3, 16 }
 0x9d3   : > { %8190 = vmatmul.bf16.vlgmr.msrb.gmra.mxu0 %v8132_v50 }
 0x9d4   : > { %v8046_v33 = vrot.slane %v8044_v39, 1  ;;  %8687 = vmatpush.bf16.msrb.mxu0 %v13385_v51 }
 0x9d5   : > { %8587 = vmatpush.bf16.msrb.mxu3 %v13375_v59  ;;  %v13399_v59 = vld [vmem:[%s14618_s6 + $0x128] sm:$0xff] }
 0x9d6   : > { %v8047_v32 = vor.u32 %v8046_v33, %v8042_v7 }
 0x9d8   : > { %8105 = vmatmul.bf16.vlgmr.msra.gmra.mxu1 %v8047_v32  ;;  %v13373_v32 = vld [vmem:[#allocation15 + $0x1d8] sm:$0xff]  ;;  %8688 = vmatpush.bf16.msrb.mxu0 %v13384_v41 }
 0x9d9   : > { %8636 = vmatpush.bf16.msra.mxu1 %v13381_v5  ;;  %8588 = vmatpush.bf16.msrb.mxu3 %v13374_v2  ;;  %v13397_v2 = vld [vmem:[%s14618_s6 + $0x118] sm:$0xff] }
 0x9dc   : > { %8689 = vmatpush.bf16.msrb.mxu0 %v13383_v11 }
 0x9dd   : > { %8637 = vmatpush.bf16.msra.mxu1 %v13380_v53  ;;  %v13401_v53 = vld [vmem:[%s14618_s6 + $0x138] sm:$0xff] }
 0x9e0   : > { %8690 = vmatpush.bf16.msrb.mxu0 %v13382_v48 }
 0x9e1   : > { %8638 = vmatpush.bf16.msra.mxu1 %v13379_v0  ;;  %v13395_v0 = vld [vmem:[%s14618_s6 + $0x108] sm:$0xff] }
 0x9e5   : > { %8639 = vmatpush.bf16.msra.mxu1 %v13378_v54 }
 0xa4f   : > { %v8015_v61 = vpop.f32.mrf.mxu3 }
 0xa50   : > { %v8191_v62 = vpop.f32.mrf.mxu0  ;;  %v8019_v1 = vadd.f32 %v8015_v61, %v14418_v15  ;;  %v8485_v61 = vld [vmem:[#allocation6] sm:$0xc] }
 0xa55   : > { %v8106_v22 = vpop.f32.mrf.mxu1 }
 0xa56   : > { %v8110_v24 = vadd.f32 %v8106_v22, %v8019_v1 }
 0xa57   : > { %v8017_v60 = vpop.f32.mrf.mxu3 }
 0xa58   : > { %v8195_v47 = vadd.f32 %v8191_v62, %v8110_v24  ;;  %v8193_v14 = vpop.f32.mrf.mxu0  ;;  %v8496_v62 = vunpack.c.l.b16 %v8485_v61  ;;  %v13393_v24 = vld [vmem:[%s14618_s6 + $0xf8] sm:$0xff] }
 0xa5a   : > { %vm8196_vm7 = vcmp.ge.f32.partialorder %v8195_v47, 0.0  ;;  %v8197_v16 = vmul.f32 0.2, %v8195_v47  ;;  %v8497_v38 = vpack.c.b16 %v8496_v62, %v8496_v62 }
 0xa5c   : > { %v14511_v55 = vsel %vm8196_vm7, %v8195_v47, %v8197_v16  ;;  %v8498_v1 = vrot.slane %v8497_v38, 2  ;;  %v13392_v16 = vld [vmem:[%s14618_s6 + $0xf0] sm:$0xff] }
 0xa5d   : > { %v14515_v45 = vpack.c.bf16 %v14511_v55, %v14511_v55  ;;  %v8108_v15 = vpop.f32.mrf.mxu1 }
 0xa5f   : > { %8200 = vst.msk [vmem:[#allocation6 + $0x4] sm:$0x3] %vm613_vm12, %v14515_v45 }
 0xa66   : > { %v8375_v36 = vld [vmem:[#allocation6 + $0x4] sm:$0x1]  ;;  %v8430_v25 = vld [vmem:[#allocation6 + $0x4] sm:$0x6] }
 0xa67   : > { %v8211_v13 = vld [vmem:[#allocation6 + $0x4] sm:$0x3]  ;;  %v8386_v18 = vunpack.c.l.b16 %v8375_v36  ;;  %v8441_v10 = vunpack.c.l.b16 %v8430_v25  ;;  %v13408_v36 = vld [vmem:[%s14618_s6 + $0x170] sm:$0xff] }
 0xa68   : > { %v8224_v28 = vunpack.c.l.b16 %v8211_v13  ;;  %v8314_v8 = vld [vmem:[#allocation6 + $0x4] sm:$0x7]  ;;  %v13390_v13 = vld [vmem:[%s14618_s6 + $0xe0] sm:$0xff] }
 0xa69   : > { %v8325_v27 = vunpack.c.l.b16 %v8314_v8  ;;  %v8387_v29 = vpack.c.b16 %v8386_v18, %v8223_v63  ;;  %v8442_v49 = vpack.c.b16 %v8441_v10, %v8441_v10  ;;  %v13400_v10 = vld [vmem:[%s14618_s6 + $0x130] sm:$0xff]  ;;  %v13389_v8 = vld [vmem:[%s14618_s6 + $0xd8] sm:$0xff] }
 0xa6a   : > { %v8225_v31 = vpack.c.b16 %v8224_v28, %v8223_v63  ;;  %v13407_v28 = vld [vmem:[%s14618_s6 + $0x168] sm:$0xff] }
 0xa6b   : > { %v8326_v34 = vpack.c.b16 %v8325_v27, %v8325_v27  ;;  %v8388_v30 = vrot.slane %v8387_v29, 3  ;;  %v8443_v19 = vrot.slane %v8442_v49, 1  ;;  %v13406_v27 = vld [vmem:[%s14618_s6 + $0x160] sm:$0xff] }
 0xa6c   : > { %v8227_v58 = vshrl.u32 %v8225_v31, 16  ;;  %v8230_v21 = vshll.u32 %v8225_v31, 16  ;;  %v13388_v31 = vld [vmem:[%s14618_s6 + $0xd0] sm:$0xff] }
 0xa6d   : > { %v8330_v3 = vshll.u32 %v8326_v34, 16  ;;  %12360 = vmatmul.msk.bf16.vlgmr.msrb.gmra.mxu1 %vm5576_vm14, %v8388_v30  ;;  %12377 = vmatmul.msk.bf16.vlgmr.msra.gmra.mxu0 %vm5576_vm14, %v8443_v19  ;;  %v8328_v7 = vshrl.u32 %v8326_v34, 16  ;;  %v13398_v30 = vld [vmem:[%s14618_s6 + $0x120] sm:$0xff]  ;;  %v13405_v19 = vld [vmem:[%s14618_s6 + $0x158] sm:$0xff] }
 0xa6e   : > { %v8229_v50 = vrot.slane %v8227_v58, 3  ;;  %v8232_v39 = vrot.slane %v8230_v21, 4  ;;  %8954 = vmatpush.bf16.msrb.mxu1 %v13409_v23  ;;  %v13387_v21 = vld [vmem:[%s14618_s6 + $0xc8] sm:$0xff] }
 0xa6f   : > { %v8332_v33 = vrot.slane %v8330_v3, 1  ;;  %v13404_v3 = vld [vmem:[%s14618_s6 + $0x150] sm:$0xff] }
 0xa70   : > { %v8233_v20 = vor.u32 %v8232_v39, %v8229_v50 }
 0xa71   : > { %v8333_v42 = vor.u32 %v8332_v33, %v8328_v7  ;;  %v13386_v7 = vld [vmem:[%s14618_s6 + $0xc0] sm:$0xff] }
 0xa72   : > { %12309 = vmatmul.msk.bf16.vlgmr.msrb.gmra.mxu2 %vm5576_vm14, %v8233_v20  ;;  %8955 = vmatpush.bf16.msrb.mxu1 %v13408_v36  ;;  %v13403_v20 = vld [vmem:[%s14618_s6 + $0x148] sm:$0xff] }
 0xa73   : > { %12343 = vmatmul.msk.bf16.vlgmr.msra.gmra.mxu3 %vm5576_vm14, %v8333_v42  ;;  %8530 = vmatpush.bf16.msrb.mxu2 %v13373_v32  ;;  %v13396_v32 = vld [vmem:[%s14618_s6 + $0x110] sm:$0xff] }
 0xa74   : > { %8869 = vmatpush.bf16.msra.mxu3 %v13401_v53 }
 0xa76   : > { %8956 = vmatpush.bf16.msrb.mxu1 %v13407_v28 }
 0xa77   : > { %8531 = vmatpush.bf16.msrb.mxu2 %v13372_v37  ;;  %v13402_v37 = vld [vmem:[%s14618_s6 + $0x140] sm:$0xff] }
 0xa78   : > { %8870 = vmatpush.bf16.msra.mxu3 %v13400_v10 }
 0xa7a   : > { %8957 = vmatpush.bf16.msrb.mxu1 %v13406_v27 }
 0xa7b   : > { %8532 = vmatpush.bf16.msrb.mxu2 %v13371_v44  ;;  %v13394_v44 = vld [vmem:[%s14618_s6 + $0x100] sm:$0xff] }
 0xa7c   : > { %8871 = vmatpush.bf16.msra.mxu3 %v13399_v59 }
 0xa7d   : > { %12428 = vmatmul.msk.bf16.vlgmr.msra.gmra.mxu1 %vm5576_vm14, %v8595_v52  ;;  %12445 = vmatmul.msk.bf16.vlgmr.msrb.gmra.mxu0 %vm5576_vm14, %v8646_v56 }
 0xa7e   : > { %8958 = vmatpush.bf16.msrb.mxu1 %v13405_v19 }
 0xa7f   : > { %8533 = vmatpush.bf16.msrb.mxu2 %v13370_v40 }
 0xa80   : > { %8872 = vmatpush.bf16.msra.mxu3 %v13398_v30 }
 0xa82   : > { %12326 = vmatmul.msk.bf16.vlgmr.msra.gmra.mxu2 %vm5576_vm14, %v14515_v45  ;;  %8959 = vmatpush.bf16.msrb.mxu1 %v13404_v3 }
 0xa83   : > { %12411 = vmatmul.msk.bf16.vlgmr.msrb.gmra.mxu3 %vm5576_vm14, %v8553_v57  ;;  %8778 = vmatpush.bf16.msra.mxu2 %v13393_v24  ;;  %v8709_v57 = vld [vmem:[#allocation7] sm:$0x7] }
 0xa84   : > { %8873 = vmatpush.bf16.msra.mxu3 %v13397_v2 }
 0xa86   : > { %8960 = vmatpush.bf16.msrb.mxu1 %v13403_v20 }
 0xa87   : > { %8779 = vmatpush.bf16.msra.mxu2 %v13392_v16 }
 0xa88   : > { %8874 = vmatpush.bf16.msra.mxu3 %v13396_v32 }
 0xa8a   : > { %8961 = vmatpush.bf16.msrb.mxu1 %v13402_v37 }
 0xa8b   : > { %8780 = vmatpush.bf16.msra.mxu2 %v13391_v46 }
 0xa8c   : > { %8875 = vmatpush.bf16.msra.mxu3 %v13395_v0 }
 0xa8f   : > { %8781 = vmatpush.bf16.msra.mxu2 %v13390_v13 }
 0xa90   : > { %8876 = vmatpush.bf16.msra.mxu3 %v13394_v44 }
 0xa92   : > { %12394 = vmatmul.msk.bf16.vlgmr.msrb.gmra.mxu2 %vm5576_vm14, %v8498_v1 }
 0xa93   : > { %8782 = vmatpush.bf16.msra.mxu2 %v13389_v8 }
 0xa97   : > { %8783 = vmatpush.bf16.msra.mxu2 %v13388_v31 }
 0xa9b   : > { %8784 = vmatpush.bf16.msra.mxu2 %v13387_v21 }
 0xa9f   : > { %8785 = vmatpush.bf16.msra.mxu2 %v13386_v7 }
 0xaea   : > { %v8425_v9 = vpop.f32.mrf.mxu1  ;;  %v8480_v22 = vpop.f32.mrf.mxu0 }
 0xaf2   : > { %v8427_v47 = vpop.f32.mrf.mxu1  ;;  %v8482_v12 = vpop.f32.mrf.mxu0 }
 0xaf5   : > { %v8270_v60 = vpop.f32.mrf.mxu2 }
 0xaf6   : > { %v8370_v14 = vpop.f32.mrf.mxu3 }
 0xafa   : > { %v8641_v45 = vpop.f32.mrf.mxu1  ;;  %v8692_v15 = vpop.f32.mrf.mxu0 }
 0xafd   : > { %v8272_v35 = vpop.f32.mrf.mxu2 }
 0xafe   : > { %v8372_v26 = vpop.f32.mrf.mxu3 }
 0xb02   : > { %v8643_v5 = vpop.f32.mrf.mxu1  ;;  %v8694_v51 = vpop.f32.mrf.mxu0 }
 0xb05   : > { %v8310_v63 = vpop.f32.mrf.mxu2 }
 0xb06   : > { %v8590_v25 = vpop.f32.mrf.mxu3  ;;  %v8311_v18 = vadd.f32 %v8310_v63, %v8270_v60 }
 0xb08   : > { %v8374_v29 = vadd.f32 %v8370_v14, %v8311_v18 }
 0xb0a   : > { %v8429_v58 = vadd.f32 %v8425_v9, %v8374_v29 }
 0xb0c   : > { %v8484_v50 = vadd.f32 %v8480_v22, %v8429_v58 }
 0xb0d   : > { %v8312_v49 = vpop.f32.mrf.mxu2 }
 0xb0e   : > { %v8592_v34 = vpop.f32.mrf.mxu3 }
 0xb15   : > { %v8535_v39 = vpop.f32.mrf.mxu2 }
 0xb16   : > { %v8539_v33 = vadd.f32 %v8535_v39, %v8484_v50 }
 0xb18   : > { %v8594_v42 = vadd.f32 %v8590_v25, %v8539_v33 }
 0xb1a   : > { %v8645_v41 = vadd.f32 %v8641_v45, %v8594_v42 }
 0xb1c   : > { %v8696_v43 = vadd.f32 %v8692_v15, %v8645_v41 }
 0xb1d   : > { %v8537_v11 = vpop.f32.mrf.mxu2 }
 0xb1e   : > { %vm8697_vm14 = vcmp.ge.f32.partialorder %v8696_v43, 0.0  ;;  %v8698_v54 = vmul.f32 0.2, %v8696_v43 }
 0xb20   : > { %v8699_v17 = vsel %vm8697_vm14, %v8696_v43, %v8698_v54 }
 0xb21   : > { %v8700_v48 = vpack.c.bf16 %v8699_v17, %v8699_v17 }
 0xb23   : > { %v8702_v40 = vshrl.u32 %v8700_v48, 16  ;;  %v8705_v52 = vshll.u32 %v8700_v48, 16 }
 0xb25   : > { %v8704_v6 = vrot.slane %v8702_v40, 7 }
 0xb27   : > { %v8707_v56 = vor.u32 %v8705_v52, %v8704_v6 }
 0xb29   : > { %v8710_v61 = vsel %vm14504_vm4, %v8707_v56, %v8709_v57 }
 0xb2a   : > { %8711 = vst [vmem:[#allocation7] sm:$0x7] %v8710_v61 }
 0xb31   : > { %v8712_v62 = vld [vmem:[#allocation7] sm:$0x3] }
 0xb32   : > { %v8883_v38 = vld [vmem:[#allocation7] sm:$0x6]  ;;  %8786 = vmatmul.bf16.vlgmr.msra.gmra.mxu2 %v8712_v62 }
 0xb33   : > { %v8792_v1 = vld [vmem:[#allocation7] sm:$0x7]  ;;  %v8902_v9 = vunpack.c.l.b16 %v8883_v38 }
 0xb34   : > { %v8811_v22 = vunpack.c.l.b16 %v8792_v1 }
 0xb35   : > { %v8903_v24 = vpack.c.b16 %v8902_v9, %v8902_v9 }
 0xb36   : > { %v8812_v47 = vpack.c.b16 %v8811_v22, %v8811_v22 }
 0xb37   : > { %v8904_v12 = vrot.slane %v8903_v24, 1 }
 0xb38   : > { %v8816_v60 = vshll.u32 %v8812_v47, 16  ;;  %v8814_v14 = vshrl.u32 %v8812_v47, 16 }
 0xb39   : > { %8962 = vmatmul.bf16.vlgmr.msrb.gmra.mxu1 %v8904_v12 }
 0xb3a   : > { %v8818_v16 = vrot.slane %v8816_v60, 1 }
 0xb3c   : > { %v8819_v23 = vor.u32 %v8818_v16, %v8814_v14 }
 0xb3e   : > { %8877 = vmatmul.bf16.vlgmr.msra.gmra.mxu3 %v8819_v23 }
 0xbb5   : > { %v8787_v45 = vpop.f32.mrf.mxu2 }
 0xbb6   : > { %v8963_v4 = vpop.f32.mrf.mxu1  ;;  %v8791_v26 = vadd.f32 %v8787_v45, %v14511_v55 }
 0xbbd   : > { %v8789_v15 = vpop.f32.mrf.mxu2 }
 0xbbe   : > { %v8965_v35 = vpop.f32.mrf.mxu1 }
 0xbc1   : > { %v8878_v46 = vpop.f32.mrf.mxu3 }
 0xbc2   : > { %v8882_v5 = vadd.f32 %v8878_v46, %v8791_v26 }
 0xbc4   : > { %v8967_v51 = vadd.f32 %v8963_v4, %v8882_v5 }
 0xbc6   : > { %vm8968_vm2 = vcmp.ge.f32.partialorder %v8967_v51, 0.0  ;;  %v8969_v63 = vmul.f32 0.2, %v8967_v51 }
 0xbc8   : > { %v8970_v53 = vsel %vm8968_vm2, %v8967_v51, %v8969_v63 }
 0xbc9   : > { %8971 = vst.msk [vmem:[%s573_s27] sm:$0xf] %vm609_vm6, %v8970_v53  ;;  %v8880_v36 = vpop.f32.mrf.mxu3 }
 0xbca PF: > { %s28_s25 = sadd.s32 1, %s13728_s25  }
 0xbcb   : > { %p25_p7 = scmp.ge.s32.totalorder %s28_s25, 4  }
 0xbcd   :  { %27 = sbr.rel (!%p25_p7) target bundleno = 7 (0x7), region = 213 }
 0xbd2   :  { %9021 = vsyncpa [#allocation9], 1 }
 0xbd3   :  { %9023 = vsyncpa [#allocation9 + $0x1], 1 }
 0xbd4   :  { %9024 = vsyncpa [#allocation11], 1 }
 0xbd5   :  { %9025 = vsyncpa [#allocation14], 1 }
 0xbd6   :  { %9026 = vsyncpa [#allocation17], 1 }

</bundles_post_ra>
